<compile_context>
chip_gen: v6e
topology: v6e:2x2x1
jax: 0.10.0
libtpu: 0.0.40
codegen_flags: <defaults>
</compile_context>

<pallas_src>
import functools

import jax
import jax.numpy as jnp
from jax.experimental import pallas as pl
from jax.experimental.pallas import tpu as pltpu


def _sep_maxpool_axis(src, dst, axis, r):
    """dst = stride-1 'same' max pool of src along `axis` (0=H, 1=W), radius r.

    src/dst are (H, W, C) f32 VMEM scratch refs.  Clamped windows at the edges are
    mathematically identical to MaxPool2d's implicit -inf padding.
    """
    n = src.shape[axis]

    def rd(lo, hi):
        return src[lo:hi, :, :] if axis == 0 else src[:, lo:hi, :]

    def wr(lo, hi, val):
        if axis == 0:
            dst[lo:hi, :, :] = val
        else:
            dst[:, lo:hi, :] = val

    # Interior: every tap is in range -> one fused (2r+1)-tap max, single store.
    if n > 2 * r:
        taps = [rd(d, n - 2 * r + d) for d in range(2 * r + 1)]
        wr(r, n - r, functools.reduce(jnp.maximum, taps))

    # Boundaries (2r rows/cols, negligible work): clamped window per index.
    for i in list(range(0, min(r, n))) + list(range(max(r, n - r), n)):
        lo, hi = max(0, i - r), min(n, i + r + 1)
        taps = [rd(j, j + 1) for j in range(lo, hi)]
        wr(i, i + 1, functools.reduce(jnp.maximum, taps))


def _spp_kernel(x_ref, w1_ref, b1_ref, w2_ref, b2_ref, o_ref, a_ref, m_ref,
                *, windows):
    """One batch element per grid step, fully fused.

    x_ref : (1, H*W, C1)          bf16 input (NHWC, space flattened)
    w1_ref: (C1, C_)              bf16 cv1 weight (BN1 scale folded in)
    b1_ref: (1, C_)               f32  BN1 bias
    w2_ref: (1+len(k), C_, C2)    bf16 cv2 weight chunks (BN2 scale folded in);
                                  chunk j multiplies pyramid level j (0 = un-pooled)
    b2_ref: (1, C2)               f32  BN2 bias
    o_ref : (1, H*W, C2)          f32  output
    a_ref, m_ref : (H, W, C_) f32 scratch for the separable pooling cascade
    """
    H, W, C_ = a_ref.shape
    HW = H * W

    # ---- cv1: 1x1 conv == channel matmul (MXU, bf16 in / f32 acc) + bias + SiLU ----
    t = jnp.dot(x_ref[0], w1_ref[...], preferred_element_type=jnp.float32)
    t = t + b1_ref[...]
    t = t * jax.nn.sigmoid(t)                       # SiLU in f32 (EUP exp + VPU mul)

    # ---- cv2 accumulated over pyramid levels (no channel concat) -------------------
    acc = jnp.dot(t.astype(w2_ref.dtype), w2_ref[0],
                  preferred_element_type=jnp.float32)

    a_ref[...] = t.reshape(H, W, C_)                # pyramid level 0 (f32)
    for j, win in enumerate(windows):
        r = win // 2
        _sep_maxpool_axis(a_ref, m_ref, 0, r)       # pool along H:  a -> m
        _sep_maxpool_axis(m_ref, a_ref, 1, r)       # pool along W:  m -> a
        p = a_ref[...].reshape(HW, C_).astype(w2_ref.dtype)
        acc = acc + jnp.dot(p, w2_ref[j + 1],
                            preferred_element_type=jnp.float32)

    y = acc + b2_ref[...]
    y = y * jax.nn.sigmoid(y)                       # SiLU
    o_ref[0] = y.astype(o_ref.dtype)


def spp_pallas(x_nchw, params, k=(5, 9, 13)):
    """SPP forward.  x_nchw: (N, C1, H, W) float32 -> (N, C2, H, W) float32."""
    w1, w2 = params["w1"], params["w2"]             # (C_,C1,1,1), (C2,(1+len(k))*C_,1,1)
    s1, b1 = params["bn1_scale"], params["bn1_bias"]
    s2, b2 = params["bn2_scale"], params["bn2_bias"]

    N, C1, H, W = x_nchw.shape
    C_ = w1.shape[0]
    C2 = w2.shape[0]
    L = 1 + len(k)
    assert w2.shape[1] == L * C_

    # Pooling an already kp-pooled map with window w gives effective window kp+w-1
    # (stride 1, -inf padding), so 5/9/13 become three cascaded 5x5 pools.
    windows, prev = [], 1
    for kk in k:
        assert kk % 2 == 1 and kk > prev, "k must be increasing odd ints"
        windows.append(kk - prev + 1)
        prev = kk

    # ---- glue (plain JAX): layout, BN-scale folding, bf16 weight/input cast -------
    x_flat = jnp.transpose(x_nchw, (0, 2, 3, 1)).reshape(N, H * W, C1)
    x_flat = x_flat.astype(jnp.bfloat16)
    w1f = (w1.reshape(C_, C1) * s1[:, None]).T.astype(jnp.bfloat16)       # (C1, C_)
    w2f = (w2.reshape(C2, L * C_) * s2[:, None]).T                         # (L*C_, C2)
    w2f = w2f.reshape(L, C_, C2).astype(jnp.bfloat16)
    b1r = b1.reshape(1, C_).astype(jnp.float32)
    b2r = b2.reshape(1, C2).astype(jnp.float32)

    kernel = functools.partial(_spp_kernel, windows=tuple(windows))
    y_flat = pl.pallas_call(
        kernel,
        out_shape=jax.ShapeDtypeStruct((N, H * W, C2), jnp.float32),
        grid=(N,),
        in_specs=[
            pl.BlockSpec((1, H * W, C1), lambda n: (n, 0, 0)),
            pl.BlockSpec((C1, C_), lambda n: (0, 0)),
            pl.BlockSpec((1, C_), lambda n: (0, 0)),
            pl.BlockSpec((L, C_, C2), lambda n: (0, 0, 0)),
            pl.BlockSpec((1, C2), lambda n: (0, 0)),
        ],
        out_specs=pl.BlockSpec((1, H * W, C2), lambda n: (n, 0, 0)),
        scratch_shapes=[pltpu.VMEM((H, W, C_), jnp.float32),
                        pltpu.VMEM((H, W, C_), jnp.float32)],
        compiler_params=pltpu.CompilerParams(
            dimension_semantics=("parallel",)),
    )(x_flat, w1f, b1r, w2f, b2r)

    # TODO(synk): accept/emit NHWC at the call boundary to drop these layout passes
    # when the surrounding graph is NHWC; grouped conv (g>1) unsupported (SPP uses g=1).
    return jnp.transpose(y_flat.reshape(N, H, W, C2), (0, 3, 1, 2))


def _reference(x_nchw, params, k=(5, 9, 13)):
    """Independent pure-JAX f32 reference (NCHW, direct 5/9/13 pools, unfolded BN)."""
    w1, w2 = params["w1"], params["w2"]
    s1, b1 = params["bn1_scale"], params["bn1_bias"]
    s2, b2 = params["bn2_scale"], params["bn2_bias"]
    dn = ("NCHW", "OIHW", "NCHW")
    silu = lambda v: v * jax.nn.sigmoid(v)
    t = jax.lax.conv_general_dilated(x_nchw, w1, (1, 1), "VALID",
                                     dimension_numbers=dn)
    t = silu(t * s1[None, :, None, None] + b1[None, :, None, None])
    pools = [t]
    for kk in k:
        p = kk // 2
        pools.append(jax.lax.reduce_window(
            t, -jnp.inf, jax.lax.max, (1, 1, kk, kk), (1, 1, 1, 1),
            ((0, 0), (0, 0), (p, p), (p, p))))
    cat = jnp.concatenate(pools, axis=1)
    y = jax.lax.conv_general_dilated(cat, w2, (1, 1), "VALID",
                                     dimension_numbers=dn)
    return silu(y * s2[None, :, None, None] + b2[None, :, None, None])


def make_params(key, c1, c2, n_levels=4):
    """Deterministic synthetic params: conv weights + inference-mode BN folded to
    per-channel scale/bias (scale = gamma/sqrt(var+eps), bias = beta - mean*scale)."""
    c_ = c1 // 2
    cin2 = c_ * n_levels
    eps = 1e-5  # PyTorch BatchNorm2d default
    ks = jax.random.split(key, 10)
    w1 = jax.random.normal(ks[0], (c_, c1, 1, 1), jnp.float32) * 0.2
    w2 = jax.random.normal(ks[1], (c2, cin2, 1, 1), jnp.float32) * 0.2
    g1 = jax.random.uniform(ks[2], (c_,), jnp.float32, 0.5, 1.5)
    be1 = jax.random.normal(ks[3], (c_,), jnp.float32) * 0.1
    m1 = jax.random.normal(ks[4], (c_,), jnp.float32) * 0.1
    v1 = jax.random.uniform(ks[5], (c_,), jnp.float32, 0.5, 1.5)
    g2 = jax.random.uniform(ks[6], (c2,), jnp.float32, 0.5, 1.5)
    be2 = jax.random.normal(ks[7], (c2,), jnp.float32) * 0.1
    m2 = jax.random.normal(ks[8], (c2,), jnp.float32) * 0.1
    v2 = jax.random.uniform(ks[9], (c2,), jnp.float32, 0.5, 1.5)
    s1 = g1 / jnp.sqrt(v1 + eps)
    s2 = g2 / jnp.sqrt(v2 + eps)
    return {"w1": w1, "w2": w2,
            "bn1_scale": s1, "bn1_bias": be1 - m1 * s1,
            "bn2_scale": s2, "bn2_bias": be2 - m2 * s2}


if __name__ == "__main__":
    # Small shapes consistent with SPP: batch=2, c1=4 (so c_ = 2), c2=8, spatial=16.
    key = jax.random.PRNGKey(0)
    kx, kp = jax.random.split(key)
    N, c1, c2, H, W = 2, 4, 8, 16, 16
    x = jax.random.normal(kx, (N, c1, H, W), jnp.float32)
    params = make_params(kp, c1, c2)

    y = spp_pallas(x, params)
    y = jax.block_until_ready(y)

    y_ref = _reference(x, params)
    assert y.shape == (N, c2, H, W), y.shape
    # Tolerance sized for bfloat16 matmul operands (accumulation stays float32).
    assert jnp.allclose(y, y_ref, atol=5e-2, rtol=5e-2), \
        float(jnp.max(jnp.abs(y - y_ref)))
    print("KERNEL_OK")
</pallas_src>

<mosaic_0001>
module attributes {stable_mosaic.version = 11 : i64} {
  func.func @_spp_kernel(%arg0: i32, %arg1: memref<1x256x4xbf16, #tpu.memory_space<vmem>>, %arg2: memref<4x2xbf16, #tpu.memory_space<vmem>>, %arg3: memref<1x2xf32, #tpu.memory_space<vmem>>, %arg4: memref<4x2x8xbf16, #tpu.memory_space<vmem>>, %arg5: memref<1x8xf32, #tpu.memory_space<vmem>>, %arg6: memref<1x256x8xf32, #tpu.memory_space<vmem>>, %arg7: memref<16x16x2xf32, #tpu.memory_space<vmem>>, %arg8: memref<16x16x2xf32, #tpu.memory_space<vmem>>) attributes {dimension_semantics = [#tpu.dimension_semantics<parallel>], iteration_bounds = array<i64: 2>, scalar_prefetch = 0 : i64, scratch_operands = 2 : i64, tpu.core_type = #tpu.core_type<tc>, window_params = [{transform_indices = @transform_0, window_bounds = array<i64: 1, 256, 4>}, {pipeline_mode = #tpu.pipeline_mode<synchronous>, transform_indices = @transform_1, window_bounds = array<i64: 4, 2>}, {pipeline_mode = #tpu.pipeline_mode<synchronous>, transform_indices = @transform_2, window_bounds = array<i64: 1, 2>}, {pipeline_mode = #tpu.pipeline_mode<synchronous>, transform_indices = @transform_3, window_bounds = array<i64: 4, 2, 8>}, {pipeline_mode = #tpu.pipeline_mode<synchronous>, transform_indices = @transform_4, window_bounds = array<i64: 1, 8>}, {transform_indices = @transform_5, window_bounds = array<i64: 1, 256, 8>}]} {
    %c0 = arith.constant 0 : index
    %c0_0 = arith.constant 0 : index
    %c0_1 = arith.constant 0 : index
    %0 = vector.load %arg1[%c0, %c0_0, %c0_1] : memref<1x256x4xbf16, #tpu.memory_space<vmem>>, vector<1x256x4xbf16>
    %1 = vector.shape_cast %0 : vector<1x256x4xbf16> to vector<256x4xbf16>
    %c0_2 = arith.constant 0 : index
    %c0_3 = arith.constant 0 : index
    %2 = vector.load %arg2[%c0_2, %c0_3] : memref<4x2xbf16, #tpu.memory_space<vmem>>, vector<4x2xbf16>
    %cst = arith.constant dense<0.000000e+00> : vector<256x2xf32>
    %3 = tpu.matmul %1, %2, %cst {dimension_numbers = #tpu.dot_dimension_numbers<[1], [0], [0], [1], [0, 0, 1, 1], [], []>} : vector<256x4xbf16>, vector<4x2xbf16>, vector<256x2xf32> -> vector<256x2xf32>
    %c0_4 = arith.constant 0 : index
    %c0_5 = arith.constant 0 : index
    %4 = vector.load %arg3[%c0_4, %c0_5] : memref<1x2xf32, #tpu.memory_space<vmem>>, vector<1x2xf32>
    %5 = vector.broadcast %4 : vector<1x2xf32> to vector<256x2xf32>
    %6 = arith.addf %3, %5 : vector<256x2xf32>
    %7 = arith.negf %6 : vector<256x2xf32>
    %8 = math.exp %7 : vector<256x2xf32>
    %cst_6 = arith.constant 1.000000e+00 : f32
    %9 = vector.broadcast %cst_6 : f32 to vector<256x2xf32>
    %10 = arith.addf %9, %8 : vector<256x2xf32>
    %11 = arith.divf %9, %10 : vector<256x2xf32>
    %12 = arith.mulf %6, %11 : vector<256x2xf32>
    %13 = arith.truncf %12 : vector<256x2xf32> to vector<256x2xbf16>
    %c0_7 = arith.constant 0 : index
    %c0_8 = arith.constant 0 : index
    %c0_9 = arith.constant 0 : index
    %14 = vector.load %arg4[%c0_7, %c0_8, %c0_9] : memref<4x2x8xbf16, #tpu.memory_space<vmem>>, vector<1x2x8xbf16>
    %15 = vector.shape_cast %14 : vector<1x2x8xbf16> to vector<2x8xbf16>
    %cst_10 = arith.constant dense<0.000000e+00> : vector<256x8xf32>
    %16 = tpu.matmul %13, %15, %cst_10 {dimension_numbers = #tpu.dot_dimension_numbers<[1], [0], [0], [1], [0, 0, 1, 1], [], []>} : vector<256x2xbf16>, vector<2x8xbf16>, vector<256x8xf32> -> vector<256x8xf32>
    %17 = vector.shape_cast %12 : vector<256x2xf32> to vector<16x16x2xf32>
    %c0_11 = arith.constant 0 : index
    %c0_12 = arith.constant 0 : index
    %c0_13 = arith.constant 0 : index
    %18 = vector.load %arg7[%c0_11, %c0_12, %c0_13] : memref<16x16x2xf32, #tpu.memory_space<vmem>>, vector<16x16x2xf32>
    tpu.vector_store %arg7[%c0_11, %c0_12, %c0_13], %17 {strides = array<i32>} : memref<16x16x2xf32, #tpu.memory_space<vmem>>, vector<16x16x2xf32>,
    %c0_14 = arith.constant 0 : index
    %c0_15 = arith.constant 0 : index
    %c0_16 = arith.constant 0 : index
    %19 = vector.load %arg7[%c0_14, %c0_15, %c0_16] : memref<16x16x2xf32, #tpu.memory_space<vmem>>, vector<12x16x2xf32>
    %c1 = arith.constant 1 : index
    %c0_17 = arith.constant 0 : index
    %c0_18 = arith.constant 0 : index
    %20 = vector.load %arg7[%c1, %c0_17, %c0_18] : memref<16x16x2xf32, #tpu.memory_space<vmem>>, vector<12x16x2xf32>
    %c2 = arith.constant 2 : index
    %c0_19 = arith.constant 0 : index
    %c0_20 = arith.constant 0 : index
    %21 = vector.load %arg7[%c2, %c0_19, %c0_20] : memref<16x16x2xf32, #tpu.memory_space<vmem>>, vector<12x16x2xf32>
    %c3 = arith.constant 3 : index
    %c0_21 = arith.constant 0 : index
    %c0_22 = arith.constant 0 : index
    %22 = vector.load %arg7[%c3, %c0_21, %c0_22] : memref<16x16x2xf32, #tpu.memory_space<vmem>>, vector<12x16x2xf32>
    %c4 = arith.constant 4 : index
    %c0_23 = arith.constant 0 : index
    %c0_24 = arith.constant 0 : index
    %23 = vector.load %arg7[%c4, %c0_23, %c0_24] : memref<16x16x2xf32, #tpu.memory_space<vmem>>, vector<12x16x2xf32>
    %24 = arith.maximumf %19, %20 : vector<12x16x2xf32>
    %25 = arith.maximumf %24, %21 : vector<12x16x2xf32>
    %26 = arith.maximumf %25, %22 : vector<12x16x2xf32>
    %27 = arith.maximumf %26, %23 : vector<12x16x2xf32>
    %c2_25 = arith.constant 2 : index
    %c0_26 = arith.constant 0 : index
    %c0_27 = arith.constant 0 : index
    %28 = vector.load %arg8[%c2_25, %c0_26, %c0_27] : memref<16x16x2xf32, #tpu.memory_space<vmem>>, vector<12x16x2xf32>
    tpu.vector_store %arg8[%c2_25, %c0_26, %c0_27], %27 {strides = array<i32>} : memref<16x16x2xf32, #tpu.memory_space<vmem>>, vector<12x16x2xf32>,
    %c0_28 = arith.constant 0 : index
    %c0_29 = arith.constant 0 : index
    %c0_30 = arith.constant 0 : index
    %29 = vector.load %arg7[%c0_28, %c0_29, %c0_30] : memref<16x16x2xf32, #tpu.memory_space<vmem>>, vector<1x16x2xf32>
    %c1_31 = arith.constant 1 : index
    %c0_32 = arith.constant 0 : index
    %c0_33 = arith.constant 0 : index
    %30 = vector.load %arg7[%c1_31, %c0_32, %c0_33] : memref<16x16x2xf32, #tpu.memory_space<vmem>>, vector<1x16x2xf32>
    %c2_34 = arith.constant 2 : index
    %c0_35 = arith.constant 0 : index
    %c0_36 = arith.constant 0 : index
    %31 = vector.load %arg7[%c2_34, %c0_35, %c0_36] : memref<16x16x2xf32, #tpu.memory_space<vmem>>, vector<1x16x2xf32>
    %32 = arith.maximumf %29, %30 : vector<1x16x2xf32>
    %33 = arith.maximumf %32, %31 : vector<1x16x2xf32>
    %c0_37 = arith.constant 0 : index
    %c0_38 = arith.constant 0 : index
    %c0_39 = arith.constant 0 : index
    %34 = vector.load %arg8[%c0_37, %c0_38, %c0_39] : memref<16x16x2xf32, #tpu.memory_space<vmem>>, vector<1x16x2xf32>
    tpu.vector_store %arg8[%c0_37, %c0_38, %c0_39], %33 {strides = array<i32>} : memref<16x16x2xf32, #tpu.memory_space<vmem>>, vector<1x16x2xf32>,
    %c0_40 = arith.constant 0 : index
    %c0_41 = arith.constant 0 : index
    %c0_42 = arith.constant 0 : index
    %35 = vector.load %arg7[%c0_40, %c0_41, %c0_42] : memref<16x16x2xf32, #tpu.memory_space<vmem>>, vector<1x16x2xf32>
    %c1_43 = arith.constant 1 : index
    %c0_44 = arith.constant 0 : index
    %c0_45 = arith.constant 0 : index
    %36 = vector.load %arg7[%c1_43, %c0_44, %c0_45] : memref<16x16x2xf32, #tpu.memory_space<vmem>>, vector<1x16x2xf32>
    %c2_46 = arith.constant 2 : index
    %c0_47 = arith.constant 0 : index
    %c0_48 = arith.constant 0 : index
    %37 = vector.load %arg7[%c2_46, %c0_47, %c0_48] : memref<16x16x2xf32, #tpu.memory_space<vmem>>, vector<1x16x2xf32>
    %c3_49 = arith.constant 3 : index
    %c0_50 = arith.constant 0 : index
    %c0_51 = arith.constant 0 : index
    %38 = vector.load %arg7[%c3_49, %c0_50, %c0_51] : memref<16x16x2xf32, #tpu.memory_space<vmem>>, vector<1x16x2xf32>
    %39 = arith.maximumf %35, %36 : vector<1x16x2xf32>
    %40 = arith.maximumf %39, %37 : vector<1x16x2xf32>
    %41 = arith.maximumf %40, %38 : vector<1x16x2xf32>
    %c1_52 = arith.constant 1 : index
    %c0_53 = arith.constant 0 : index
    %c0_54 = arith.constant 0 : index
    %42 = vector.load %arg8[%c1_52, %c0_53, %c0_54] : memref<16x16x2xf32, #tpu.memory_space<vmem>>, vector<1x16x2xf32>
    tpu.vector_store %arg8[%c1_52, %c0_53, %c0_54], %41 {strides = array<i32>} : memref<16x16x2xf32, #tpu.memory_space<vmem>>, vector<1x16x2xf32>,
    %c12 = arith.constant 12 : index
    %c0_55 = arith.constant 0 : index
    %c0_56 = arith.constant 0 : index
    %43 = vector.load %arg7[%c12, %c0_55, %c0_56] : memref<16x16x2xf32, #tpu.memory_space<vmem>>, vector<1x16x2xf32>
    %c13 = arith.constant 13 : index
    %c0_57 = arith.constant 0 : index
    %c0_58 = arith.constant 0 : index
    %44 = vector.load %arg7[%c13, %c0_57, %c0_58] : memref<16x16x2xf32, #tpu.memory_space<vmem>>, vector<1x16x2xf32>
    %c14 = arith.constant 14 : index
    %c0_59 = arith.constant 0 : index
    %c0_60 = arith.constant 0 : index
    %45 = vector.load %arg7[%c14, %c0_59, %c0_60] : memref<16x16x2xf32, #tpu.memory_space<vmem>>, vector<1x16x2xf32>
    %c15 = arith.constant 15 : index
    %c0_61 = arith.constant 0 : index
    %c0_62 = arith.constant 0 : index
    %46 = vector.load %arg7[%c15, %c0_61, %c0_62] : memref<16x16x2xf32, #tpu.memory_space<vmem>>, vector<1x16x2xf32>
    %47 = arith.maximumf %43, %44 : vector<1x16x2xf32>
    %48 = arith.maximumf %47, %45 : vector<1x16x2xf32>
    %49 = arith.maximumf %48, %46 : vector<1x16x2xf32>
    %c14_63 = arith.constant 14 : index
    %c0_64 = arith.constant 0 : index
    %c0_65 = arith.constant 0 : index
    %50 = vector.load %arg8[%c14_63, %c0_64, %c0_65] : memref<16x16x2xf32, #tpu.memory_space<vmem>>, vector<1x16x2xf32>
    tpu.vector_store %arg8[%c14_63, %c0_64, %c0_65], %49 {strides = array<i32>} : memref<16x16x2xf32, #tpu.memory_space<vmem>>, vector<1x16x2xf32>,
    %c13_66 = arith.constant 13 : index
    %c0_67 = arith.constant 0 : index
    %c0_68 = arith.constant 0 : index
    %51 = vector.load %arg7[%c13_66, %c0_67, %c0_68] : memref<16x16x2xf32, #tpu.memory_space<vmem>>, vector<1x16x2xf32>
    %c14_69 = arith.constant 14 : index
    %c0_70 = arith.constant 0 : index
    %c0_71 = arith.constant 0 : index
    %52 = vector.load %arg7[%c14_69, %c0_70, %c0_71] : memref<16x16x2xf32, #tpu.memory_space<vmem>>, vector<1x16x2xf32>
    %c15_72 = arith.constant 15 : index
    %c0_73 = arith.constant 0 : index
    %c0_74 = arith.constant 0 : index
    %53 = vector.load %arg7[%c15_72, %c0_73, %c0_74] : memref<16x16x2xf32, #tpu.memory_space<vmem>>, vector<1x16x2xf32>
    %54 = arith.maximumf %51, %52 : vector<1x16x2xf32>
    %55 = arith.maximumf %54, %53 : vector<1x16x2xf32>
    %c15_75 = arith.constant 15 : index
    %c0_76 = arith.constant 0 : index
    %c0_77 = arith.constant 0 : index
    %56 = vector.load %arg8[%c15_75, %c0_76, %c0_77] : memref<16x16x2xf32, #tpu.memory_space<vmem>>, vector<1x16x2xf32>
    tpu.vector_store %arg8[%c15_75, %c0_76, %c0_77], %55 {strides = array<i32>} : memref<16x16x2xf32, #tpu.memory_space<vmem>>, vector<1x16x2xf32>,
    %c0_78 = arith.constant 0 : index
    %c0_79 = arith.constant 0 : index
    %c0_80 = arith.constant 0 : index
    %57 = vector.load %arg8[%c0_78, %c0_79, %c0_80] : memref<16x16x2xf32, #tpu.memory_space<vmem>>, vector<16x12x2xf32>
    %c0_81 = arith.constant 0 : index
    %c1_82 = arith.constant 1 : index
    %c0_83 = arith.constant 0 : index
    %58 = vector.load %arg8[%c0_81, %c1_82, %c0_83] : memref<16x16x2xf32, #tpu.memory_space<vmem>>, vector<16x12x2xf32>
    %c0_84 = arith.constant 0 : index
    %c2_85 = arith.constant 2 : index
    %c0_86 = arith.constant 0 : index
    %59 = vector.load %arg8[%c0_84, %c2_85, %c0_86] : memref<16x16x2xf32, #tpu.memory_space<vmem>>, vector<16x12x2xf32>
    %c0_87 = arith.constant 0 : index
    %c3_88 = arith.constant 3 : index
    %c0_89 = arith.constant 0 : index
    %60 = vector.load %arg8[%c0_87, %c3_88, %c0_89] : memref<16x16x2xf32, #tpu.memory_space<vmem>>, vector<16x12x2xf32>
    %c0_90 = arith.constant 0 : index
    %c4_91 = arith.constant 4 : index
    %c0_92 = arith.constant 0 : index
    %61 = vector.load %arg8[%c0_90, %c4_91, %c0_92] : memref<16x16x2xf32, #tpu.memory_space<vmem>>, vector<16x12x2xf32>
    %62 = arith.maximumf %57, %58 : vector<16x12x2xf32>
    %63 = arith.maximumf %62, %59 : vector<16x12x2xf32>
    %64 = arith.maximumf %63, %60 : vector<16x12x2xf32>
    %65 = arith.maximumf %64, %61 : vector<16x12x2xf32>
    %c0_93 = arith.constant 0 : index
    %c2_94 = arith.constant 2 : index
    %c0_95 = arith.constant 0 : index
    %66 = vector.load %arg7[%c0_93, %c2_94, %c0_95] : memref<16x16x2xf32, #tpu.memory_space<vmem>>, vector<16x12x2xf32>
    tpu.vector_store %arg7[%c0_93, %c2_94, %c0_95], %65 {strides = array<i32>} : memref<16x16x2xf32, #tpu.memory_space<vmem>>, vector<16x12x2xf32>,
    %c0_96 = arith.constant 0 : index
    %c0_97 = arith.constant 0 : index
    %c0_98 = arith.constant 0 : index
    %67 = vector.load %arg8[%c0_96, %c0_97, %c0_98] : memref<16x16x2xf32, #tpu.memory_space<vmem>>, vector<16x1x2xf32>
    %c0_99 = arith.constant 0 : index
    %c1_100 = arith.constant 1 : index
    %c0_101 = arith.constant 0 : index
    %68 = vector.load %arg8[%c0_99, %c1_100, %c0_101] : memref<16x16x2xf32, #tpu.memory_space<vmem>>, vector<16x1x2xf32>
    %c0_102 = arith.constant 0 : index
    %c2_103 = arith.constant 2 : index
    %c0_104 = arith.constant 0 : index
    %69 = vector.load %arg8[%c0_102, %c2_103, %c0_104] : memref<16x16x2xf32, #tpu.memory_space<vmem>>, vector<16x1x2xf32>
    %70 = arith.maximumf %67, %68 : vector<16x1x2xf32>
    %71 = arith.maximumf %70, %69 : vector<16x1x2xf32>
    %c0_105 = arith.constant 0 : index
    %c0_106 = arith.constant 0 : index
    %c0_107 = arith.constant 0 : index
    %72 = vector.load %arg7[%c0_105, %c0_106, %c0_107] : memref<16x16x2xf32, #tpu.memory_space<vmem>>, vector<16x1x2xf32>
    tpu.vector_store %arg7[%c0_105, %c0_106, %c0_107], %71 {strides = array<i32>} : memref<16x16x2xf32, #tpu.memory_space<vmem>>, vector<16x1x2xf32>,
    %c0_108 = arith.constant 0 : index
    %c0_109 = arith.constant 0 : index
    %c0_110 = arith.constant 0 : index
    %73 = vector.load %arg8[%c0_108, %c0_109, %c0_110] : memref<16x16x2xf32, #tpu.memory_space<vmem>>, vector<16x1x2xf32>
    %c0_111 = arith.constant 0 : index
    %c1_112 = arith.constant 1 : index
    %c0_113 = arith.constant 0 : index
    %74 = vector.load %arg8[%c0_111, %c1_112, %c0_113] : memref<16x16x2xf32, #tpu.memory_space<vmem>>, vector<16x1x2xf32>
    %c0_114 = arith.constant 0 : index
    %c2_115 = arith.constant 2 : index
    %c0_116 = arith.constant 0 : index
    %75 = vector.load %arg8[%c0_114, %c2_115, %c0_116] : memref<16x16x2xf32, #tpu.memory_space<vmem>>, vector<16x1x2xf32>
    %c0_117 = arith.constant 0 : index
    %c3_118 = arith.constant 3 : index
    %c0_119 = arith.constant 0 : index
    %76 = vector.load %arg8[%c0_117, %c3_118, %c0_119] : memref<16x16x2xf32, #tpu.memory_space<vmem>>, vector<16x1x2xf32>
    %77 = arith.maximumf %73, %74 : vector<16x1x2xf32>
    %78 = arith.maximumf %77, %75 : vector<16x1x2xf32>
    %79 = arith.maximumf %78, %76 : vector<16x1x2xf32>
    %c0_120 = arith.constant 0 : index
    %c1_121 = arith.constant 1 : index
    %c0_122 = arith.constant 0 : index
    %80 = vector.load %arg7[%c0_120, %c1_121, %c0_122] : memref<16x16x2xf32, #tpu.memory_space<vmem>>, vector<16x1x2xf32>
    tpu.vector_store %arg7[%c0_120, %c1_121, %c0_122], %79 {strides = array<i32>} : memref<16x16x2xf32, #tpu.memory_space<vmem>>, vector<16x1x2xf32>,
    %c0_123 = arith.constant 0 : index
    %c12_124 = arith.constant 12 : index
    %c0_125 = arith.constant 0 : index
    %81 = vector.load %arg8[%c0_123, %c12_124, %c0_125] : memref<16x16x2xf32, #tpu.memory_space<vmem>>, vector<16x1x2xf32>
    %c0_126 = arith.constant 0 : index
    %c13_127 = arith.constant 13 : index
    %c0_128 = arith.constant 0 : index
    %82 = vector.load %arg8[%c0_126, %c13_127, %c0_128] : memref<16x16x2xf32, #tpu.memory_space<vmem>>, vector<16x1x2xf32>
    %c0_129 = arith.constant 0 : index
    %c14_130 = arith.constant 14 : index
    %c0_131 = arith.constant 0 : index
    %83 = vector.load %arg8[%c0_129, %c14_130, %c0_131] : memref<16x16x2xf32, #tpu.memory_space<vmem>>, vector<16x1x2xf32>
    %c0_132 = arith.constant 0 : index
    %c15_133 = arith.constant 15 : index
    %c0_134 = arith.constant 0 : index
    %84 = vector.load %arg8[%c0_132, %c15_133, %c0_134] : memref<16x16x2xf32, #tpu.memory_space<vmem>>, vector<16x1x2xf32>
    %85 = arith.maximumf %81, %82 : vector<16x1x2xf32>
    %86 = arith.maximumf %85, %83 : vector<16x1x2xf32>
    %87 = arith.maximumf %86, %84 : vector<16x1x2xf32>
    %c0_135 = arith.constant 0 : index
    %c14_136 = arith.constant 14 : index
    %c0_137 = arith.constant 0 : index
    %88 = vector.load %arg7[%c0_135, %c14_136, %c0_137] : memref<16x16x2xf32, #tpu.memory_space<vmem>>, vector<16x1x2xf32>
    tpu.vector_store %arg7[%c0_135, %c14_136, %c0_137], %87 {strides = array<i32>} : memref<16x16x2xf32, #tpu.memory_space<vmem>>, vector<16x1x2xf32>,
    %c0_138 = arith.constant 0 : index
    %c13_139 = arith.constant 13 : index
    %c0_140 = arith.constant 0 : index
    %89 = vector.load %arg8[%c0_138, %c13_139, %c0_140] : memref<16x16x2xf32, #tpu.memory_space<vmem>>, vector<16x1x2xf32>
    %c0_141 = arith.constant 0 : index
    %c14_142 = arith.constant 14 : index
    %c0_143 = arith.constant 0 : index
    %90 = vector.load %arg8[%c0_141, %c14_142, %c0_143] : memref<16x16x2xf32, #tpu.memory_space<vmem>>, vector<16x1x2xf32>
    %c0_144 = arith.constant 0 : index
    %c15_145 = arith.constant 15 : index
    %c0_146 = arith.constant 0 : index
    %91 = vector.load %arg8[%c0_144, %c15_145, %c0_146] : memref<16x16x2xf32, #tpu.memory_space<vmem>>, vector<16x1x2xf32>
    %92 = arith.maximumf %89, %90 : vector<16x1x2xf32>
    %93 = arith.maximumf %92, %91 : vector<16x1x2xf32>
    %c0_147 = arith.constant 0 : index
    %c15_148 = arith.constant 15 : index
    %c0_149 = arith.constant 0 : index
    %94 = vector.load %arg7[%c0_147, %c15_148, %c0_149] : memref<16x16x2xf32, #tpu.memory_space<vmem>>, vector<16x1x2xf32>
    tpu.vector_store %arg7[%c0_147, %c15_148, %c0_149], %93 {strides = array<i32>} : memref<16x16x2xf32, #tpu.memory_space<vmem>>, vector<16x1x2xf32>,
    %c0_150 = arith.constant 0 : index
    %c0_151 = arith.constant 0 : index
    %c0_152 = arith.constant 0 : index
    %95 = vector.load %arg7[%c0_150, %c0_151, %c0_152] : memref<16x16x2xf32, #tpu.memory_space<vmem>>, vector<16x16x2xf32>
    %96 = vector.shape_cast %95 : vector<16x16x2xf32> to vector<256x2xf32>
    %97 = arith.truncf %96 : vector<256x2xf32> to vector<256x2xbf16>
    %c1_153 = arith.constant 1 : index
    %c0_154 = arith.constant 0 : index
    %c0_155 = arith.constant 0 : index
    %98 = vector.load %arg4[%c1_153, %c0_154, %c0_155] : memref<4x2x8xbf16, #tpu.memory_space<vmem>>, vector<1x2x8xbf16>
    %99 = vector.shape_cast %98 : vector<1x2x8xbf16> to vector<2x8xbf16>
    %cst_156 = arith.constant dense<0.000000e+00> : vector<256x8xf32>
    %100 = tpu.matmul %97, %99, %cst_156 {dimension_numbers = #tpu.dot_dimension_numbers<[1], [0], [0], [1], [0, 0, 1, 1], [], []>} : vector<256x2xbf16>, vector<2x8xbf16>, vector<256x8xf32> -> vector<256x8xf32>
    %101 = arith.addf %16, %100 : vector<256x8xf32>
    %c0_157 = arith.constant 0 : index
    %c0_158 = arith.constant 0 : index
    %c0_159 = arith.constant 0 : index
    %102 = vector.load %arg7[%c0_157, %c0_158, %c0_159] : memref<16x16x2xf32, #tpu.memory_space<vmem>>, vector<12x16x2xf32>
    %c1_160 = arith.constant 1 : index
    %c0_161 = arith.constant 0 : index
    %c0_162 = arith.constant 0 : index
    %103 = vector.load %arg7[%c1_160, %c0_161, %c0_162] : memref<16x16x2xf32, #tpu.memory_space<vmem>>, vector<12x16x2xf32>
    %c2_163 = arith.constant 2 : index
    %c0_164 = arith.constant 0 : index
    %c0_165 = arith.constant 0 : index
    %104 = vector.load %arg7[%c2_163, %c0_164, %c0_165] : memref<16x16x2xf32, #tpu.memory_space<vmem>>, vector<12x16x2xf32>
    %c3_166 = arith.constant 3 : index
    %c0_167 = arith.constant 0 : index
    %c0_168 = arith.constant 0 : index
    %105 = vector.load %arg7[%c3_166, %c0_167, %c0_168] : memref<16x16x2xf32, #tpu.memory_space<vmem>>, vector<12x16x2xf32>
    %c4_169 = arith.constant 4 : index
    %c0_170 = arith.constant 0 : index
    %c0_171 = arith.constant 0 : index
    %106 = vector.load %arg7[%c4_169, %c0_170, %c0_171] : memref<16x16x2xf32, #tpu.memory_space<vmem>>, vector<12x16x2xf32>
    %107 = arith.maximumf %102, %103 : vector<12x16x2xf32>
    %108 = arith.maximumf %107, %104 : vector<12x16x2xf32>
    %109 = arith.maximumf %108, %105 : vector<12x16x2xf32>
    %110 = arith.maximumf %109, %106 : vector<12x16x2xf32>
    %c2_172 = arith.constant 2 : index
    %c0_173 = arith.constant 0 : index
    %c0_174 = arith.constant 0 : index
    %111 = vector.load %arg8[%c2_172, %c0_173, %c0_174] : memref<16x16x2xf32, #tpu.memory_space<vmem>>, vector<12x16x2xf32>
    tpu.vector_store %arg8[%c2_172, %c0_173, %c0_174], %110 {strides = array<i32>} : memref<16x16x2xf32, #tpu.memory_space<vmem>>, vector<12x16x2xf32>,
    %c0_175 = arith.constant 0 : index
    %c0_176 = arith.constant 0 : index
    %c0_177 = arith.constant 0 : index
    %112 = vector.load %arg7[%c0_175, %c0_176, %c0_177] : memref<16x16x2xf32, #tpu.memory_space<vmem>>, vector<1x16x2xf32>
    %c1_178 = arith.constant 1 : index
    %c0_179 = arith.constant 0 : index
    %c0_180 = arith.constant 0 : index
    %113 = vector.load %arg7[%c1_178, %c0_179, %c0_180] : memref<16x16x2xf32, #tpu.memory_space<vmem>>, vector<1x16x2xf32>
    %c2_181 = arith.constant 2 : index
    %c0_182 = arith.constant 0 : index
    %c0_183 = arith.constant 0 : index
    %114 = vector.load %arg7[%c2_181, %c0_182, %c0_183] : memref<16x16x2xf32, #tpu.memory_space<vmem>>, vector<1x16x2xf32>
    %115 = arith.maximumf %112, %113 : vector<1x16x2xf32>
    %116 = arith.maximumf %115, %114 : vector<1x16x2xf32>
    %c0_184 = arith.constant 0 : index
    %c0_185 = arith.constant 0 : index
    %c0_186 = arith.constant 0 : index
    %117 = vector.load %arg8[%c0_184, %c0_185, %c0_186] : memref<16x16x2xf32, #tpu.memory_space<vmem>>, vector<1x16x2xf32>
    tpu.vector_store %arg8[%c0_184, %c0_185, %c0_186], %116 {strides = array<i32>} : memref<16x16x2xf32, #tpu.memory_space<vmem>>, vector<1x16x2xf32>,
    %c0_187 = arith.constant 0 : index
    %c0_188 = arith.constant 0 : index
    %c0_189 = arith.constant 0 : index
    %118 = vector.load %arg7[%c0_187, %c0_188, %c0_189] : memref<16x16x2xf32, #tpu.memory_space<vmem>>, vector<1x16x2xf32>
    %c1_190 = arith.constant 1 : index
    %c0_191 = arith.constant 0 : index
    %c0_192 = arith.constant 0 : index
    %119 = vector.load %arg7[%c1_190, %c0_191, %c0_192] : memref<16x16x2xf32, #tpu.memory_space<vmem>>, vector<1x16x2xf32>
    %c2_193 = arith.constant 2 : index
    %c0_194 = arith.constant 0 : index
    %c0_195 = arith.constant 0 : index
    %120 = vector.load %arg7[%c2_193, %c0_194, %c0_195] : memref<16x16x2xf32, #tpu.memory_space<vmem>>, vector<1x16x2xf32>
    %c3_196 = arith.constant 3 : index
    %c0_197 = arith.constant 0 : index
    %c0_198 = arith.constant 0 : index
    %121 = vector.load %arg7[%c3_196, %c0_197, %c0_198] : memref<16x16x2xf32, #tpu.memory_space<vmem>>, vector<1x16x2xf32>
    %122 = arith.maximumf %118, %119 : vector<1x16x2xf32>
    %123 = arith.maximumf %122, %120 : vector<1x16x2xf32>
    %124 = arith.maximumf %123, %121 : vector<1x16x2xf32>
    %c1_199 = arith.constant 1 : index
    %c0_200 = arith.constant 0 : index
    %c0_201 = arith.constant 0 : index
    %125 = vector.load %arg8[%c1_199, %c0_200, %c0_201] : memref<16x16x2xf32, #tpu.memory_space<vmem>>, vector<1x16x2xf32>
    tpu.vector_store %arg8[%c1_199, %c0_200, %c0_201], %124 {strides = array<i32>} : memref<16x16x2xf32, #tpu.memory_space<vmem>>, vector<1x16x2xf32>,
    %c12_202 = arith.constant 12 : index
    %c0_203 = arith.constant 0 : index
    %c0_204 = arith.constant 0 : index
    %126 = vector.load %arg7[%c12_202, %c0_203, %c0_204] : memref<16x16x2xf32, #tpu.memory_space<vmem>>, vector<1x16x2xf32>
    %c13_205 = arith.constant 13 : index
    %c0_206 = arith.constant 0 : index
    %c0_207 = arith.constant 0 : index
    %127 = vector.load %arg7[%c13_205, %c0_206, %c0_207] : memref<16x16x2xf32, #tpu.memory_space<vmem>>, vector<1x16x2xf32>
    %c14_208 = arith.constant 14 : index
    %c0_209 = arith.constant 0 : index
    %c0_210 = arith.constant 0 : index
    %128 = vector.load %arg7[%c14_208, %c0_209, %c0_210] : memref<16x16x2xf32, #tpu.memory_space<vmem>>, vector<1x16x2xf32>
    %c15_211 = arith.constant 15 : index
    %c0_212 = arith.constant 0 : index
    %c0_213 = arith.constant 0 : index
    %129 = vector.load %arg7[%c15_211, %c0_212, %c0_213] : memref<16x16x2xf32, #tpu.memory_space<vmem>>, vector<1x16x2xf32>
    %130 = arith.maximumf %126, %127 : vector<1x16x2xf32>
    %131 = arith.maximumf %130, %128 : vector<1x16x2xf32>
    %132 = arith.maximumf %131, %129 : vector<1x16x2xf32>
    %c14_214 = arith.constant 14 : index
    %c0_215 = arith.constant 0 : index
    %c0_216 = arith.constant 0 : index
    %133 = vector.load %arg8[%c14_214, %c0_215, %c0_216] : memref<16x16x2xf32, #tpu.memory_space<vmem>>, vector<1x16x2xf32>
    tpu.vector_store %arg8[%c14_214, %c0_215, %c0_216], %132 {strides = array<i32>} : memref<16x16x2xf32, #tpu.memory_space<vmem>>, vector<1x16x2xf32>,
    %c13_217 = arith.constant 13 : index
    %c0_218 = arith.constant 0 : index
    %c0_219 = arith.constant 0 : index
    %134 = vector.load %arg7[%c13_217, %c0_218, %c0_219] : memref<16x16x2xf32, #tpu.memory_space<vmem>>, vector<1x16x2xf32>
    %c14_220 = arith.constant 14 : index
    %c0_221 = arith.constant 0 : index
    %c0_222 = arith.constant 0 : index
    %135 = vector.load %arg7[%c14_220, %c0_221, %c0_222] : memref<16x16x2xf32, #tpu.memory_space<vmem>>, vector<1x16x2xf32>
    %c15_223 = arith.constant 15 : index
    %c0_224 = arith.constant 0 : index
    %c0_225 = arith.constant 0 : index
    %136 = vector.load %arg7[%c15_223, %c0_224, %c0_225] : memref<16x16x2xf32, #tpu.memory_space<vmem>>, vector<1x16x2xf32>
    %137 = arith.maximumf %134, %135 : vector<1x16x2xf32>
    %138 = arith.maximumf %137, %136 : vector<1x16x2xf32>
    %c15_226 = arith.constant 15 : index
    %c0_227 = arith.constant 0 : index
    %c0_228 = arith.constant 0 : index
    %139 = vector.load %arg8[%c15_226, %c0_227, %c0_228] : memref<16x16x2xf32, #tpu.memory_space<vmem>>, vector<1x16x2xf32>
    tpu.vector_store %arg8[%c15_226, %c0_227, %c0_228], %138 {strides = array<i32>} : memref<16x16x2xf32, #tpu.memory_space<vmem>>, vector<1x16x2xf32>,
    %c0_229 = arith.constant 0 : index
    %c0_230 = arith.constant 0 : index
    %c0_231 = arith.constant 0 : index
    %140 = vector.load %arg8[%c0_229, %c0_230, %c0_231] : memref<16x16x2xf32, #tpu.memory_space<vmem>>, vector<16x12x2xf32>
    %c0_232 = arith.constant 0 : index
    %c1_233 = arith.constant 1 : index
    %c0_234 = arith.constant 0 : index
    %141 = vector.load %arg8[%c0_232, %c1_233, %c0_234] : memref<16x16x2xf32, #tpu.memory_space<vmem>>, vector<16x12x2xf32>
    %c0_235 = arith.constant 0 : index
    %c2_236 = arith.constant 2 : index
    %c0_237 = arith.constant 0 : index
    %142 = vector.load %arg8[%c0_235, %c2_236, %c0_237] : memref<16x16x2xf32, #tpu.memory_space<vmem>>, vector<16x12x2xf32>
    %c0_238 = arith.constant 0 : index
    %c3_239 = arith.constant 3 : index
    %c0_240 = arith.constant 0 : index
    %143 = vector.load %arg8[%c0_238, %c3_239, %c0_240] : memref<16x16x2xf32, #tpu.memory_space<vmem>>, vector<16x12x2xf32>
    %c0_241 = arith.constant 0 : index
    %c4_242 = arith.constant 4 : index
    %c0_243 = arith.constant 0 : index
    %144 = vector.load %arg8[%c0_241, %c4_242, %c0_243] : memref<16x16x2xf32, #tpu.memory_space<vmem>>, vector<16x12x2xf32>
    %145 = arith.maximumf %140, %141 : vector<16x12x2xf32>
    %146 = arith.maximumf %145, %142 : vector<16x12x2xf32>
    %147 = arith.maximumf %146, %143 : vector<16x12x2xf32>
    %148 = arith.maximumf %147, %144 : vector<16x12x2xf32>
    %c0_244 = arith.constant 0 : index
    %c2_245 = arith.constant 2 : index
    %c0_246 = arith.constant 0 : index
    %149 = vector.load %arg7[%c0_244, %c2_245, %c0_246] : memref<16x16x2xf32, #tpu.memory_space<vmem>>, vector<16x12x2xf32>
    tpu.vector_store %arg7[%c0_244, %c2_245, %c0_246], %148 {strides = array<i32>} : memref<16x16x2xf32, #tpu.memory_space<vmem>>, vector<16x12x2xf32>,
    %c0_247 = arith.constant 0 : index
    %c0_248 = arith.constant 0 : index
    %c0_249 = arith.constant 0 : index
    %150 = vector.load %arg8[%c0_247, %c0_248, %c0_249] : memref<16x16x2xf32, #tpu.memory_space<vmem>>, vector<16x1x2xf32>
    %c0_250 = arith.constant 0 : index
    %c1_251 = arith.constant 1 : index
    %c0_252 = arith.constant 0 : index
    %151 = vector.load %arg8[%c0_250, %c1_251, %c0_252] : memref<16x16x2xf32, #tpu.memory_space<vmem>>, vector<16x1x2xf32>
    %c0_253 = arith.constant 0 : index
    %c2_254 = arith.constant 2 : index
    %c0_255 = arith.constant 0 : index
    %152 = vector.load %arg8[%c0_253, %c2_254, %c0_255] : memref<16x16x2xf32, #tpu.memory_space<vmem>>, vector<16x1x2xf32>
    %153 = arith.maximumf %150, %151 : vector<16x1x2xf32>
    %154 = arith.maximumf %153, %152 : vector<16x1x2xf32>
    %c0_256 = arith.constant 0 : index
    %c0_257 = arith.constant 0 : index
    %c0_258 = arith.constant 0 : index
    %155 = vector.load %arg7[%c0_256, %c0_257, %c0_258] : memref<16x16x2xf32, #tpu.memory_space<vmem>>, vector<16x1x2xf32>
    tpu.vector_store %arg7[%c0_256, %c0_257, %c0_258], %154 {strides = array<i32>} : memref<16x16x2xf32, #tpu.memory_space<vmem>>, vector<16x1x2xf32>,
    %c0_259 = arith.constant 0 : index
    %c0_260 = arith.constant 0 : index
    %c0_261 = arith.constant 0 : index
    %156 = vector.load %arg8[%c0_259, %c0_260, %c0_261] : memref<16x16x2xf32, #tpu.memory_space<vmem>>, vector<16x1x2xf32>
    %c0_262 = arith.constant 0 : index
    %c1_263 = arith.constant 1 : index
    %c0_264 = arith.constant 0 : index
    %157 = vector.load %arg8[%c0_262, %c1_263, %c0_264] : memref<16x16x2xf32, #tpu.memory_space<vmem>>, vector<16x1x2xf32>
    %c0_265 = arith.constant 0 : index
    %c2_266 = arith.constant 2 : index
    %c0_267 = arith.constant 0 : index
    %158 = vector.load %arg8[%c0_265, %c2_266, %c0_267] : memref<16x16x2xf32, #tpu.memory_space<vmem>>, vector<16x1x2xf32>
    %c0_268 = arith.constant 0 : index
    %c3_269 = arith.constant 3 : index
    %c0_270 = arith.constant 0 : index
    %159 = vector.load %arg8[%c0_268, %c3_269, %c0_270] : memref<16x16x2xf32, #tpu.memory_space<vmem>>, vector<16x1x2xf32>
    %160 = arith.maximumf %156, %157 : vector<16x1x2xf32>
    %161 = arith.maximumf %160, %158 : vector<16x1x2xf32>
    %162 = arith.maximumf %161, %159 : vector<16x1x2xf32>
    %c0_271 = arith.constant 0 : index
    %c1_272 = arith.constant 1 : index
    %c0_273 = arith.constant 0 : index
    %163 = vector.load %arg7[%c0_271, %c1_272, %c0_273] : memref<16x16x2xf32, #tpu.memory_space<vmem>>, vector<16x1x2xf32>
    tpu.vector_store %arg7[%c0_271, %c1_272, %c0_273], %162 {strides = array<i32>} : memref<16x16x2xf32, #tpu.memory_space<vmem>>, vector<16x1x2xf32>,
    %c0_274 = arith.constant 0 : index
    %c12_275 = arith.constant 12 : index
    %c0_276 = arith.constant 0 : index
    %164 = vector.load %arg8[%c0_274, %c12_275, %c0_276] : memref<16x16x2xf32, #tpu.memory_space<vmem>>, vector<16x1x2xf32>
    %c0_277 = arith.constant 0 : index
    %c13_278 = arith.constant 13 : index
    %c0_279 = arith.constant 0 : index
    %165 = vector.load %arg8[%c0_277, %c13_278, %c0_279] : memref<16x16x2xf32, #tpu.memory_space<vmem>>, vector<16x1x2xf32>
    %c0_280 = arith.constant 0 : index
    %c14_281 = arith.constant 14 : index
    %c0_282 = arith.constant 0 : index
    %166 = vector.load %arg8[%c0_280, %c14_281, %c0_282] : memref<16x16x2xf32, #tpu.memory_space<vmem>>, vector<16x1x2xf32>
    %c0_283 = arith.constant 0 : index
    %c15_284 = arith.constant 15 : index
    %c0_285 = arith.constant 0 : index
    %167 = vector.load %arg8[%c0_283, %c15_284, %c0_285] : memref<16x16x2xf32, #tpu.memory_space<vmem>>, vector<16x1x2xf32>
    %168 = arith.maximumf %164, %165 : vector<16x1x2xf32>
    %169 = arith.maximumf %168, %166 : vector<16x1x2xf32>
    %170 = arith.maximumf %169, %167 : vector<16x1x2xf32>
    %c0_286 = arith.constant 0 : index
    %c14_287 = arith.constant 14 : index
    %c0_288 = arith.constant 0 : index
    %171 = vector.load %arg7[%c0_286, %c14_287, %c0_288] : memref<16x16x2xf32, #tpu.memory_space<vmem>>, vector<16x1x2xf32>
    tpu.vector_store %arg7[%c0_286, %c14_287, %c0_288], %170 {strides = array<i32>} : memref<16x16x2xf32, #tpu.memory_space<vmem>>, vector<16x1x2xf32>,
    %c0_289 = arith.constant 0 : index
    %c13_290 = arith.constant 13 : index
    %c0_291 = arith.constant 0 : index
    %172 = vector.load %arg8[%c0_289, %c13_290, %c0_291] : memref<16x16x2xf32, #tpu.memory_space<vmem>>, vector<16x1x2xf32>
    %c0_292 = arith.constant 0 : index
    %c14_293 = arith.constant 14 : index
    %c0_294 = arith.constant 0 : index
    %173 = vector.load %arg8[%c0_292, %c14_293, %c0_294] : memref<16x16x2xf32, #tpu.memory_space<vmem>>, vector<16x1x2xf32>
    %c0_295 = arith.constant 0 : index
    %c15_296 = arith.constant 15 : index
    %c0_297 = arith.constant 0 : index
    %174 = vector.load %arg8[%c0_295, %c15_296, %c0_297] : memref<16x16x2xf32, #tpu.memory_space<vmem>>, vector<16x1x2xf32>
    %175 = arith.maximumf %172, %173 : vector<16x1x2xf32>
    %176 = arith.maximumf %175, %174 : vector<16x1x2xf32>
    %c0_298 = arith.constant 0 : index
    %c15_299 = arith.constant 15 : index
    %c0_300 = arith.constant 0 : index
    %177 = vector.load %arg7[%c0_298, %c15_299, %c0_300] : memref<16x16x2xf32, #tpu.memory_space<vmem>>, vector<16x1x2xf32>
    tpu.vector_store %arg7[%c0_298, %c15_299, %c0_300], %176 {strides = array<i32>} : memref<16x16x2xf32, #tpu.memory_space<vmem>>, vector<16x1x2xf32>,
    %c0_301 = arith.constant 0 : index
    %c0_302 = arith.constant 0 : index
    %c0_303 = arith.constant 0 : index
    %178 = vector.load %arg7[%c0_301, %c0_302, %c0_303] : memref<16x16x2xf32, #tpu.memory_space<vmem>>, vector<16x16x2xf32>
    %179 = vector.shape_cast %178 : vector<16x16x2xf32> to vector<256x2xf32>
    %180 = arith.truncf %179 : vector<256x2xf32> to vector<256x2xbf16>
    %c2_304 = arith.constant 2 : index
    %c0_305 = arith.constant 0 : index
    %c0_306 = arith.constant 0 : index
    %181 = vector.load %arg4[%c2_304, %c0_305, %c0_306] : memref<4x2x8xbf16, #tpu.memory_space<vmem>>, vector<1x2x8xbf16>
    %182 = vector.shape_cast %181 : vector<1x2x8xbf16> to vector<2x8xbf16>
    %cst_307 = arith.constant dense<0.000000e+00> : vector<256x8xf32>
    %183 = tpu.matmul %180, %182, %cst_307 {dimension_numbers = #tpu.dot_dimension_numbers<[1], [0], [0], [1], [0, 0, 1, 1], [], []>} : vector<256x2xbf16>, vector<2x8xbf16>, vector<256x8xf32> -> vector<256x8xf32>
    %184 = arith.addf %101, %183 : vector<256x8xf32>
    %c0_308 = arith.constant 0 : index
    %c0_309 = arith.constant 0 : index
    %c0_310 = arith.constant 0 : index
    %185 = vector.load %arg7[%c0_308, %c0_309, %c0_310] : memref<16x16x2xf32, #tpu.memory_space<vmem>>, vector<12x16x2xf32>
    %c1_311 = arith.constant 1 : index
    %c0_312 = arith.constant 0 : index
    %c0_313 = arith.constant 0 : index
    %186 = vector.load %arg7[%c1_311, %c0_312, %c0_313] : memref<16x16x2xf32, #tpu.memory_space<vmem>>, vector<12x16x2xf32>
    %c2_314 = arith.constant 2 : index
    %c0_315 = arith.constant 0 : index
    %c0_316 = arith.constant 0 : index
    %187 = vector.load %arg7[%c2_314, %c0_315, %c0_316] : memref<16x16x2xf32, #tpu.memory_space<vmem>>, vector<12x16x2xf32>
    %c3_317 = arith.constant 3 : index
    %c0_318 = arith.constant 0 : index
    %c0_319 = arith.constant 0 : index
    %188 = vector.load %arg7[%c3_317, %c0_318, %c0_319] : memref<16x16x2xf32, #tpu.memory_space<vmem>>, vector<12x16x2xf32>
    %c4_320 = arith.constant 4 : index
    %c0_321 = arith.constant 0 : index
    %c0_322 = arith.constant 0 : index
    %189 = vector.load %arg7[%c4_320, %c0_321, %c0_322] : memref<16x16x2xf32, #tpu.memory_space<vmem>>, vector<12x16x2xf32>
    %190 = arith.maximumf %185, %186 : vector<12x16x2xf32>
    %191 = arith.maximumf %190, %187 : vector<12x16x2xf32>
    %192 = arith.maximumf %191, %188 : vector<12x16x2xf32>
    %193 = arith.maximumf %192, %189 : vector<12x16x2xf32>
    %c2_323 = arith.constant 2 : index
    %c0_324 = arith.constant 0 : index
    %c0_325 = arith.constant 0 : index
    %194 = vector.load %arg8[%c2_323, %c0_324, %c0_325] : memref<16x16x2xf32, #tpu.memory_space<vmem>>, vector<12x16x2xf32>
    tpu.vector_store %arg8[%c2_323, %c0_324, %c0_325], %193 {strides = array<i32>} : memref<16x16x2xf32, #tpu.memory_space<vmem>>, vector<12x16x2xf32>,
    %c0_326 = arith.constant 0 : index
    %c0_327 = arith.constant 0 : index
    %c0_328 = arith.constant 0 : index
    %195 = vector.load %arg7[%c0_326, %c0_327, %c0_328] : memref<16x16x2xf32, #tpu.memory_space<vmem>>, vector<1x16x2xf32>
    %c1_329 = arith.constant 1 : index
    %c0_330 = arith.constant 0 : index
    %c0_331 = arith.constant 0 : index
    %196 = vector.load %arg7[%c1_329, %c0_330, %c0_331] : memref<16x16x2xf32, #tpu.memory_space<vmem>>, vector<1x16x2xf32>
    %c2_332 = arith.constant 2 : index
    %c0_333 = arith.constant 0 : index
    %c0_334 = arith.constant 0 : index
    %197 = vector.load %arg7[%c2_332, %c0_333, %c0_334] : memref<16x16x2xf32, #tpu.memory_space<vmem>>, vector<1x16x2xf32>
    %198 = arith.maximumf %195, %196 : vector<1x16x2xf32>
    %199 = arith.maximumf %198, %197 : vector<1x16x2xf32>
    %c0_335 = arith.constant 0 : index
    %c0_336 = arith.constant 0 : index
    %c0_337 = arith.constant 0 : index
    %200 = vector.load %arg8[%c0_335, %c0_336, %c0_337] : memref<16x16x2xf32, #tpu.memory_space<vmem>>, vector<1x16x2xf32>
    tpu.vector_store %arg8[%c0_335, %c0_336, %c0_337], %199 {strides = array<i32>} : memref<16x16x2xf32, #tpu.memory_space<vmem>>, vector<1x16x2xf32>,
    %c0_338 = arith.constant 0 : index
    %c0_339 = arith.constant 0 : index
    %c0_340 = arith.constant 0 : index
    %201 = vector.load %arg7[%c0_338, %c0_339, %c0_340] : memref<16x16x2xf32, #tpu.memory_space<vmem>>, vector<1x16x2xf32>
    %c1_341 = arith.constant 1 : index
    %c0_342 = arith.constant 0 : index
    %c0_343 = arith.constant 0 : index
    %202 = vector.load %arg7[%c1_341, %c0_342, %c0_343] : memref<16x16x2xf32, #tpu.memory_space<vmem>>, vector<1x16x2xf32>
    %c2_344 = arith.constant 2 : index
    %c0_345 = arith.constant 0 : index
    %c0_346 = arith.constant 0 : index
    %203 = vector.load %arg7[%c2_344, %c0_345, %c0_346] : memref<16x16x2xf32, #tpu.memory_space<vmem>>, vector<1x16x2xf32>
    %c3_347 = arith.constant 3 : index
    %c0_348 = arith.constant 0 : index
    %c0_349 = arith.constant 0 : index
    %204 = vector.load %arg7[%c3_347, %c0_348, %c0_349] : memref<16x16x2xf32, #tpu.memory_space<vmem>>, vector<1x16x2xf32>
    %205 = arith.maximumf %201, %202 : vector<1x16x2xf32>
    %206 = arith.maximumf %205, %203 : vector<1x16x2xf32>
    %207 = arith.maximumf %206, %204 : vector<1x16x2xf32>
    %c1_350 = arith.constant 1 : index
    %c0_351 = arith.constant 0 : index
    %c0_352 = arith.constant 0 : index
    %208 = vector.load %arg8[%c1_350, %c0_351, %c0_352] : memref<16x16x2xf32, #tpu.memory_space<vmem>>, vector<1x16x2xf32>
    tpu.vector_store %arg8[%c1_350, %c0_351, %c0_352], %207 {strides = array<i32>} : memref<16x16x2xf32, #tpu.memory_space<vmem>>, vector<1x16x2xf32>,
    %c12_353 = arith.constant 12 : index
    %c0_354 = arith.constant 0 : index
    %c0_355 = arith.constant 0 : index
    %209 = vector.load %arg7[%c12_353, %c0_354, %c0_355] : memref<16x16x2xf32, #tpu.memory_space<vmem>>, vector<1x16x2xf32>
    %c13_356 = arith.constant 13 : index
    %c0_357 = arith.constant 0 : index
    %c0_358 = arith.constant 0 : index
    %210 = vector.load %arg7[%c13_356, %c0_357, %c0_358] : memref<16x16x2xf32, #tpu.memory_space<vmem>>, vector<1x16x2xf32>
    %c14_359 = arith.constant 14 : index
    %c0_360 = arith.constant 0 : index
    %c0_361 = arith.constant 0 : index
    %211 = vector.load %arg7[%c14_359, %c0_360, %c0_361] : memref<16x16x2xf32, #tpu.memory_space<vmem>>, vector<1x16x2xf32>
    %c15_362 = arith.constant 15 : index
    %c0_363 = arith.constant 0 : index
    %c0_364 = arith.constant 0 : index
    %212 = vector.load %arg7[%c15_362, %c0_363, %c0_364] : memref<16x16x2xf32, #tpu.memory_space<vmem>>, vector<1x16x2xf32>
    %213 = arith.maximumf %209, %210 : vector<1x16x2xf32>
    %214 = arith.maximumf %213, %211 : vector<1x16x2xf32>
    %215 = arith.maximumf %214, %212 : vector<1x16x2xf32>
    %c14_365 = arith.constant 14 : index
    %c0_366 = arith.constant 0 : index
    %c0_367 = arith.constant 0 : index
    %216 = vector.load %arg8[%c14_365, %c0_366, %c0_367] : memref<16x16x2xf32, #tpu.memory_space<vmem>>, vector<1x16x2xf32>
    tpu.vector_store %arg8[%c14_365, %c0_366, %c0_367], %215 {strides = array<i32>} : memref<16x16x2xf32, #tpu.memory_space<vmem>>, vector<1x16x2xf32>,
    %c13_368 = arith.constant 13 : index
    %c0_369 = arith.constant 0 : index
    %c0_370 = arith.constant 0 : index
    %217 = vector.load %arg7[%c13_368, %c0_369, %c0_370] : memref<16x16x2xf32, #tpu.memory_space<vmem>>, vector<1x16x2xf32>
    %c14_371 = arith.constant 14 : index
    %c0_372 = arith.constant 0 : index
    %c0_373 = arith.constant 0 : index
    %218 = vector.load %arg7[%c14_371, %c0_372, %c0_373] : memref<16x16x2xf32, #tpu.memory_space<vmem>>, vector<1x16x2xf32>
    %c15_374 = arith.constant 15 : index
    %c0_375 = arith.constant 0 : index
    %c0_376 = arith.constant 0 : index
    %219 = vector.load %arg7[%c15_374, %c0_375, %c0_376] : memref<16x16x2xf32, #tpu.memory_space<vmem>>, vector<1x16x2xf32>
    %220 = arith.maximumf %217, %218 : vector<1x16x2xf32>
    %221 = arith.maximumf %220, %219 : vector<1x16x2xf32>
    %c15_377 = arith.constant 15 : index
    %c0_378 = arith.constant 0 : index
    %c0_379 = arith.constant 0 : index
    %222 = vector.load %arg8[%c15_377, %c0_378, %c0_379] : memref<16x16x2xf32, #tpu.memory_space<vmem>>, vector<1x16x2xf32>
    tpu.vector_store %arg8[%c15_377, %c0_378, %c0_379], %221 {strides = array<i32>} : memref<16x16x2xf32, #tpu.memory_space<vmem>>, vector<1x16x2xf32>,
    %c0_380 = arith.constant 0 : index
    %c0_381 = arith.constant 0 : index
    %c0_382 = arith.constant 0 : index
    %223 = vector.load %arg8[%c0_380, %c0_381, %c0_382] : memref<16x16x2xf32, #tpu.memory_space<vmem>>, vector<16x12x2xf32>
    %c0_383 = arith.constant 0 : index
    %c1_384 = arith.constant 1 : index
    %c0_385 = arith.constant 0 : index
    %224 = vector.load %arg8[%c0_383, %c1_384, %c0_385] : memref<16x16x2xf32, #tpu.memory_space<vmem>>, vector<16x12x2xf32>
    %c0_386 = arith.constant 0 : index
    %c2_387 = arith.constant 2 : index
    %c0_388 = arith.constant 0 : index
    %225 = vector.load %arg8[%c0_386, %c2_387, %c0_388] : memref<16x16x2xf32, #tpu.memory_space<vmem>>, vector<16x12x2xf32>
    %c0_389 = arith.constant 0 : index
    %c3_390 = arith.constant 3 : index
    %c0_391 = arith.constant 0 : index
    %226 = vector.load %arg8[%c0_389, %c3_390, %c0_391] : memref<16x16x2xf32, #tpu.memory_space<vmem>>, vector<16x12x2xf32>
    %c0_392 = arith.constant 0 : index
    %c4_393 = arith.constant 4 : index
    %c0_394 = arith.constant 0 : index
    %227 = vector.load %arg8[%c0_392, %c4_393, %c0_394] : memref<16x16x2xf32, #tpu.memory_space<vmem>>, vector<16x12x2xf32>
    %228 = arith.maximumf %223, %224 : vector<16x12x2xf32>
    %229 = arith.maximumf %228, %225 : vector<16x12x2xf32>
    %230 = arith.maximumf %229, %226 : vector<16x12x2xf32>
    %231 = arith.maximumf %230, %227 : vector<16x12x2xf32>
    %c0_395 = arith.constant 0 : index
    %c2_396 = arith.constant 2 : index
    %c0_397 = arith.constant 0 : index
    %232 = vector.load %arg7[%c0_395, %c2_396, %c0_397] : memref<16x16x2xf32, #tpu.memory_space<vmem>>, vector<16x12x2xf32>
    tpu.vector_store %arg7[%c0_395, %c2_396, %c0_397], %231 {strides = array<i32>} : memref<16x16x2xf32, #tpu.memory_space<vmem>>, vector<16x12x2xf32>,
    %c0_398 = arith.constant 0 : index
    %c0_399 = arith.constant 0 : index
    %c0_400 = arith.constant 0 : index
    %233 = vector.load %arg8[%c0_398, %c0_399, %c0_400] : memref<16x16x2xf32, #tpu.memory_space<vmem>>, vector<16x1x2xf32>
    %c0_401 = arith.constant 0 : index
    %c1_402 = arith.constant 1 : index
    %c0_403 = arith.constant 0 : index
    %234 = vector.load %arg8[%c0_401, %c1_402, %c0_403] : memref<16x16x2xf32, #tpu.memory_space<vmem>>, vector<16x1x2xf32>
    %c0_404 = arith.constant 0 : index
    %c2_405 = arith.constant 2 : index
    %c0_406 = arith.constant 0 : index
    %235 = vector.load %arg8[%c0_404, %c2_405, %c0_406] : memref<16x16x2xf32, #tpu.memory_space<vmem>>, vector<16x1x2xf32>
    %236 = arith.maximumf %233, %234 : vector<16x1x2xf32>
    %237 = arith.maximumf %236, %235 : vector<16x1x2xf32>
    %c0_407 = arith.constant 0 : index
    %c0_408 = arith.constant 0 : index
    %c0_409 = arith.constant 0 : index
    %238 = vector.load %arg7[%c0_407, %c0_408, %c0_409] : memref<16x16x2xf32, #tpu.memory_space<vmem>>, vector<16x1x2xf32>
    tpu.vector_store %arg7[%c0_407, %c0_408, %c0_409], %237 {strides = array<i32>} : memref<16x16x2xf32, #tpu.memory_space<vmem>>, vector<16x1x2xf32>,
    %c0_410 = arith.constant 0 : index
    %c0_411 = arith.constant 0 : index
    %c0_412 = arith.constant 0 : index
    %239 = vector.load %arg8[%c0_410, %c0_411, %c0_412] : memref<16x16x2xf32, #tpu.memory_space<vmem>>, vector<16x1x2xf32>
    %c0_413 = arith.constant 0 : index
    %c1_414 = arith.constant 1 : index
    %c0_415 = arith.constant 0 : index
    %240 = vector.load %arg8[%c0_413, %c1_414, %c0_415] : memref<16x16x2xf32, #tpu.memory_space<vmem>>, vector<16x1x2xf32>
    %c0_416 = arith.constant 0 : index
    %c2_417 = arith.constant 2 : index
    %c0_418 = arith.constant 0 : index
    %241 = vector.load %arg8[%c0_416, %c2_417, %c0_418] : memref<16x16x2xf32, #tpu.memory_space<vmem>>, vector<16x1x2xf32>
    %c0_419 = arith.constant 0 : index
    %c3_420 = arith.constant 3 : index
    %c0_421 = arith.constant 0 : index
    %242 = vector.load %arg8[%c0_419, %c3_420, %c0_421] : memref<16x16x2xf32, #tpu.memory_space<vmem>>, vector<16x1x2xf32>
    %243 = arith.maximumf %239, %240 : vector<16x1x2xf32>
    %244 = arith.maximumf %243, %241 : vector<16x1x2xf32>
    %245 = arith.maximumf %244, %242 : vector<16x1x2xf32>
    %c0_422 = arith.constant 0 : index
    %c1_423 = arith.constant 1 : index
    %c0_424 = arith.constant 0 : index
    %246 = vector.load %arg7[%c0_422, %c1_423, %c0_424] : memref<16x16x2xf32, #tpu.memory_space<vmem>>, vector<16x1x2xf32>
    tpu.vector_store %arg7[%c0_422, %c1_423, %c0_424], %245 {strides = array<i32>} : memref<16x16x2xf32, #tpu.memory_space<vmem>>, vector<16x1x2xf32>,
    %c0_425 = arith.constant 0 : index
    %c12_426 = arith.constant 12 : index
    %c0_427 = arith.constant 0 : index
    %247 = vector.load %arg8[%c0_425, %c12_426, %c0_427] : memref<16x16x2xf32, #tpu.memory_space<vmem>>, vector<16x1x2xf32>
    %c0_428 = arith.constant 0 : index
    %c13_429 = arith.constant 13 : index
    %c0_430 = arith.constant 0 : index
    %248 = vector.load %arg8[%c0_428, %c13_429, %c0_430] : memref<16x16x2xf32, #tpu.memory_space<vmem>>, vector<16x1x2xf32>
    %c0_431 = arith.constant 0 : index
    %c14_432 = arith.constant 14 : index
    %c0_433 = arith.constant 0 : index
    %249 = vector.load %arg8[%c0_431, %c14_432, %c0_433] : memref<16x16x2xf32, #tpu.memory_space<vmem>>, vector<16x1x2xf32>
    %c0_434 = arith.constant 0 : index
    %c15_435 = arith.constant 15 : index
    %c0_436 = arith.constant 0 : index
    %250 = vector.load %arg8[%c0_434, %c15_435, %c0_436] : memref<16x16x2xf32, #tpu.memory_space<vmem>>, vector<16x1x2xf32>
    %251 = arith.maximumf %247, %248 : vector<16x1x2xf32>
    %252 = arith.maximumf %251, %249 : vector<16x1x2xf32>
    %253 = arith.maximumf %252, %250 : vector<16x1x2xf32>
    %c0_437 = arith.constant 0 : index
    %c14_438 = arith.constant 14 : index
    %c0_439 = arith.constant 0 : index
    %254 = vector.load %arg7[%c0_437, %c14_438, %c0_439] : memref<16x16x2xf32, #tpu.memory_space<vmem>>, vector<16x1x2xf32>
    tpu.vector_store %arg7[%c0_437, %c14_438, %c0_439], %253 {strides = array<i32>} : memref<16x16x2xf32, #tpu.memory_space<vmem>>, vector<16x1x2xf32>,
    %c0_440 = arith.constant 0 : index
    %c13_441 = arith.constant 13 : index
    %c0_442 = arith.constant 0 : index
    %255 = vector.load %arg8[%c0_440, %c13_441, %c0_442] : memref<16x16x2xf32, #tpu.memory_space<vmem>>, vector<16x1x2xf32>
    %c0_443 = arith.constant 0 : index
    %c14_444 = arith.constant 14 : index
    %c0_445 = arith.constant 0 : index
    %256 = vector.load %arg8[%c0_443, %c14_444, %c0_445] : memref<16x16x2xf32, #tpu.memory_space<vmem>>, vector<16x1x2xf32>
    %c0_446 = arith.constant 0 : index
    %c15_447 = arith.constant 15 : index
    %c0_448 = arith.constant 0 : index
    %257 = vector.load %arg8[%c0_446, %c15_447, %c0_448] : memref<16x16x2xf32, #tpu.memory_space<vmem>>, vector<16x1x2xf32>
    %258 = arith.maximumf %255, %256 : vector<16x1x2xf32>
    %259 = arith.maximumf %258, %257 : vector<16x1x2xf32>
    %c0_449 = arith.constant 0 : index
    %c15_450 = arith.constant 15 : index
    %c0_451 = arith.constant 0 : index
    %260 = vector.load %arg7[%c0_449, %c15_450, %c0_451] : memref<16x16x2xf32, #tpu.memory_space<vmem>>, vector<16x1x2xf32>
    tpu.vector_store %arg7[%c0_449, %c15_450, %c0_451], %259 {strides = array<i32>} : memref<16x16x2xf32, #tpu.memory_space<vmem>>, vector<16x1x2xf32>,
    %c0_452 = arith.constant 0 : index
    %c0_453 = arith.constant 0 : index
    %c0_454 = arith.constant 0 : index
    %261 = vector.load %arg7[%c0_452, %c0_453, %c0_454] : memref<16x16x2xf32, #tpu.memory_space<vmem>>, vector<16x16x2xf32>
    %262 = vector.shape_cast %261 : vector<16x16x2xf32> to vector<256x2xf32>
    %263 = arith.truncf %262 : vector<256x2xf32> to vector<256x2xbf16>
    %c3_455 = arith.constant 3 : index
    %c0_456 = arith.constant 0 : index
    %c0_457 = arith.constant 0 : index
    %264 = vector.load %arg4[%c3_455, %c0_456, %c0_457] : memref<4x2x8xbf16, #tpu.memory_space<vmem>>, vector<1x2x8xbf16>
    %265 = vector.shape_cast %264 : vector<1x2x8xbf16> to vector<2x8xbf16>
    %cst_458 = arith.constant dense<0.000000e+00> : vector<256x8xf32>
    %266 = tpu.matmul %263, %265, %cst_458 {dimension_numbers = #tpu.dot_dimension_numbers<[1], [0], [0], [1], [0, 0, 1, 1], [], []>} : vector<256x2xbf16>, vector<2x8xbf16>, vector<256x8xf32> -> vector<256x8xf32>
    %267 = arith.addf %184, %266 : vector<256x8xf32>
    %c0_459 = arith.constant 0 : index
    %c0_460 = arith.constant 0 : index
    %268 = vector.load %arg5[%c0_459, %c0_460] : memref<1x8xf32, #tpu.memory_space<vmem>>, vector<1x8xf32>
    %269 = vector.broadcast %268 : vector<1x8xf32> to vector<256x8xf32>
    %270 = arith.addf %267, %269 : vector<256x8xf32>
    %271 = arith.negf %270 : vector<256x8xf32>
    %272 = math.exp %271 : vector<256x8xf32>
    %cst_461 = arith.constant 1.000000e+00 : f32
    %273 = vector.broadcast %cst_461 : f32 to vector<256x8xf32>
    %274 = arith.addf %273, %272 : vector<256x8xf32>
    %275 = arith.divf %273, %274 : vector<256x8xf32>
    %276 = arith.mulf %270, %275 : vector<256x8xf32>
    %c0_462 = arith.constant 0 : index
    %c0_463 = arith.constant 0 : index
    %c0_464 = arith.constant 0 : index
    %277 = vector.load %arg6[%c0_462, %c0_463, %c0_464] : memref<1x256x8xf32, #tpu.memory_space<vmem>>, vector<1x256x8xf32>
    %278 = vector.shape_cast %277 : vector<1x256x8xf32> to vector<256x8xf32>
    %279 = vector.shape_cast %276 : vector<256x8xf32> to vector<1x256x8xf32>
    tpu.vector_store %arg6[%c0_462, %c0_463, %c0_464], %279 {strides = array<i32>} : memref<1x256x8xf32, #tpu.memory_space<vmem>>, vector<1x256x8xf32>,
    return
  }
  func.func @transform_0(%arg0: i32) -> (i32, i32, i32) {
    %c0_i32 = arith.constant 0 : i32
    %c0_i32_0 = arith.constant 0 : i32
    %c0_i32_1 = arith.constant 0 : i32
    return %arg0, %c0_i32, %c0_i32_0 : i32, i32, i32
  }
  func.func @transform_1(%arg0: i32) -> (i32, i32) {
    %c0_i32 = arith.constant 0 : i32
    %c0_i32_0 = arith.constant 0 : i32
    %c0_i32_1 = arith.constant 0 : i32
    return %c0_i32, %c0_i32_0 : i32, i32
  }
  func.func @transform_2(%arg0: i32) -> (i32, i32) {
    %c0_i32 = arith.constant 0 : i32
    %c0_i32_0 = arith.constant 0 : i32
    %c0_i32_1 = arith.constant 0 : i32
    return %c0_i32, %c0_i32_0 : i32, i32
  }
  func.func @transform_3(%arg0: i32) -> (i32, i32, i32) {
    %c0_i32 = arith.constant 0 : i32
    %c0_i32_0 = arith.constant 0 : i32
    %c0_i32_1 = arith.constant 0 : i32
    %c0_i32_2 = arith.constant 0 : i32
    return %c0_i32, %c0_i32_0, %c0_i32_1 : i32, i32, i32
  }
  func.func @transform_4(%arg0: i32) -> (i32, i32) {
    %c0_i32 = arith.constant 0 : i32
    %c0_i32_0 = arith.constant 0 : i32
    %c0_i32_1 = arith.constant 0 : i32
    return %c0_i32, %c0_i32_0 : i32, i32
  }
  func.func @transform_5(%arg0: i32) -> (i32, i32, i32) {
    %c0_i32 = arith.constant 0 : i32
    %c0_i32_0 = arith.constant 0 : i32
    %c0_i32_1 = arith.constant 0 : i32
    return %arg0, %c0_i32, %c0_i32_0 : i32, i32, i32
  }
}

</mosaic_0001>

<bundles_post_ra>
// kernel: tpu_custom_call.1
= control target key start
LH: loop header
LB: loop body
LE: loop exit
PB: predicated region body
PF: predicated region fallthrough
CT: control target
= control target key end

     0   :  { %s6218_s18 = smov 0   ;;  %s8403_s0 = inlined_call_operand.vmem [shape: bf16[2,256,4], index: 0, kind: input, shape index: {}]   ;;  %s8404_s1 = inlined_call_operand.vmem [shape: bf16[4,2], index: 1, kind: input, shape index: {}]   ;;  %s8405_s2 = inlined_call_operand.vmem [shape: f32[1,2], index: 2, kind: input, shape index: {}]   ;;  %s8406_s3 = inlined_call_operand.vmem [shape: bf16[4,2,8], index: 3, kind: input, shape index: {}]   ;;  %s8407_s4 = inlined_call_operand.vmem [shape: f32[1,8], index: 4, kind: input, shape index: {}]   ;;  %s8408_s5 = inlined_call_operand.vmem [shape: f32[2,256,8], index: 5, kind: output, shape index: {}]  }
   0x1 LB: > { %s5454_s19 = sadd.s32 4294967295, %s6186_s18   ;;  %p5458_p0 = scmp.ge.s32.totalorder %s6186_s18, 1  ;;  %s6186_s18 = sphi %s6218_s18, %s15_s18  }
   0x2   : > { %p187_p1 = scmp.lt.s32.totalorder %s6186_s18, 3 }
   0x4   : > { %p188_p2 = pnand %p5458_p0, %p187_p1 }
   0x6   : > { %191 = sbr.rel (%p188_p2) target bundleno = 1072 (0x430), region = 40 }
   0xb   : > { %v258_v0 = vld [vmem:[%s8404_s1] sm:$0x3]  ;;  %vm395_vm0 = vcmask 1041408   ;;  %p215_p3 = scmp.lt.s32.totalorder %s5454_s19, 1  ;;  %vm346_vm1 = vcmask 31744   ;;  %vm801_vm2 = vcmask 15360  }
   0xc   : > { %5889 = vmatprep.subr.msk.bf16.mxu0 %vm395_vm0, %v258_v0  ;;  %5890 = vmatprep.subr.msk.bf16.mxu1 %vm395_vm0, %v258_v0  ;;  %v397_v1 = vsel %vm395_vm0, %v258_v0, 0  ;;  %v6272_v18 = vld [vmem:[%s8405_s2] ss:$0 sm:$0xff]  ;;  %vm1543_vm3 = vcmask 8192   ;;  %vm1431_vm4 = vcmask 11264   ;;  %vm2010_vm5 = vcmask 1040384  }
   0xd   : > { %5718 = vmatpush3.bf16.msra.mxu0 %v397_v1  ;;  %5888 = vmatpush3.bf16.msra.mxu1 %v397_v1  ;;  %s8547_s19 = smov (!%p215_p3, %s5454_s19), 1  ;;  %vm5366_vm6 = vcmask 64512  }
   0xe   : > { %s5630_s22 = sshll.u32 %s8547_s19, 7  ;;  %s5631_s13 = sshll.u32 %s8547_s19, 8 }
   0xf   : > { %s6235_s25 = scalar_lea.vmem %s8403_s0, %s5630_s22  ;;  %s8209_s16 = scalar_lea.vmem %s8408_s5, %s5631_s13 }
  0x10   : > { %v5903_v2 = vld [vmem:[%s6235_s25] sm:$0xff]   ;;  %v5905_v4 = vld [vmem:[%s6235_s25 + $0x8] sm:$0xff]   ;;  %v5907_v6 = vld [vmem:[%s6235_s25 + $0x10] sm:$0xff]  }
  0x11   : > { %v5904_v3 = vld [vmem:[%s6235_s25 + $0x40] sm:$0xff]   ;;  %5719 = vmatprep.mubr.msk.bf16.mxu0 %vm346_vm1, %v5903_v2  ;;  %v5906_v5 = vld [vmem:[%s6235_s25 + $0x48] sm:$0xff]   ;;  %v5908_v7 = vld [vmem:[%s6235_s25 + $0x50] sm:$0xff]  }
  0x12   : > { %5735 = vmatprep.mubr.msk.bf16.mxu1 %vm346_vm1, %v5904_v3  ;;  %5720 = vmatmul.mubr.msk.bf16.vlgmr.msra.gmra.mxu0 %vm346_vm1, %v5905_v4  ;;  %v5909_v8 = vld [vmem:[%s6235_s25 + $0x18] sm:$0xff]   ;;  %v5911_v10 = vld [vmem:[%s6235_s25 + $0x20] sm:$0xff]   ;;  %v5913_v12 = vld [vmem:[%s6235_s25 + $0x28] sm:$0xff]  }
  0x13   : > { %5736 = vmatmul.mubr.msk.bf16.vlgmr.msra.gmra.mxu1 %vm346_vm1, %v5906_v5  ;;  %5723 = vmatprep.mubr.msk.bf16.mxu0 %vm346_vm1, %v5907_v6  ;;  %v5910_v9 = vld [vmem:[%s6235_s25 + $0x58] sm:$0xff]   ;;  %v5912_v11 = vld [vmem:[%s6235_s25 + $0x60] sm:$0xff]   ;;  %v5914_v13 = vld [vmem:[%s6235_s25 + $0x68] sm:$0xff]  }
  0x14   : > { %5739 = vmatprep.mubr.msk.bf16.mxu1 %vm346_vm1, %v5908_v7  ;;  %v5915_v14 = vld [vmem:[%s6235_s25 + $0x30] sm:$0xff]   ;;  %v5917_v16 = vld [vmem:[%s6235_s25 + $0x38] sm:$0xff]  }
  0x15   : > { %v5916_v15 = vld [vmem:[%s6235_s25 + $0x70] sm:$0xff]   ;;  %v5918_v17 = vld [vmem:[%s6235_s25 + $0x78] sm:$0xff]  }
  0x1a   : > { %5724 = vmatmul.mubr.msk.bf16.gmra.mxu0 %vm346_vm1, %v5909_v8 }
  0x1b   : > { %5740 = vmatmul.mubr.msk.bf16.gmra.mxu1 %vm346_vm1, %v5910_v9  ;;  %5727 = vmatprep.mubr.msk.bf16.mxu0 %vm346_vm1, %v5911_v10 }
  0x1c   : > { %5743 = vmatprep.mubr.msk.bf16.mxu1 %vm346_vm1, %v5912_v11 }
  0x22   : > { %5728 = vmatmul.mubr.msk.bf16.gmra.mxu0 %vm346_vm1, %v5913_v12 }
  0x23   : > { %5744 = vmatmul.mubr.msk.bf16.gmra.mxu1 %vm346_vm1, %v5914_v13  ;;  %5731 = vmatprep.mubr.msk.bf16.mxu0 %vm346_vm1, %v5915_v14 }
  0x24   : > { %5747 = vmatprep.mubr.msk.bf16.mxu1 %vm346_vm1, %v5916_v15 }
  0x2a   : > { %5732 = vmatmul.mubr.msk.bf16.gmra.mxu0 %vm346_vm1, %v5917_v16 }
  0x2b   : > { %5748 = vmatmul.mubr.msk.bf16.gmra.mxu1 %vm346_vm1, %v5918_v17 }
  0xd2   : > { %v5721_v19 = vpop.f32.mrf.mxu0 }
  0xd3   : > { %v6275_v20 = vadd.f32 %v5721_v19, %v6272_v18  ;;  %v5737_v21 = vpop.f32.mrf.mxu1 }
  0xd4   : > { %v6278_v22 = vadd.f32 %v5737_v21, %v6272_v18  ;;  %v433_v23 = vpop.f32.mrf.mxu0 }
  0xd5   : > { %v5498_v24 = vmul.f32 -1.442695, %v6275_v20  ;;  %v6282_v25 = vadd.f32 %v6272_v18, %v433_v23  ;;  %v497_v26 = vpop.f32.mrf.mxu1 }
  0xd6   : > { %v5514_v27 = vmul.f32 -1.442695, %v6278_v22  ;;  %v6286_v28 = vadd.f32 %v6272_v18, %v497_v26  ;;  %v5722_v29 = vpop.f32.mrf.mxu0 }
  0xd7   : > { %5919 = vpow2.f32 %v5498_v24  ;;  %v5496_v30 = vmul.f32 -1.442695, %v6282_v25  ;;  %v6290_v31 = vadd.f32 %v5722_v29, %v6272_v18  ;;  %v5738_v32 = vpop.f32.mrf.mxu1 }
  0xd8   : > { %5921 = vpow2.f32 %v5514_v27  ;;  %v5512_v33 = vmul.f32 -1.442695, %v6286_v28  ;;  %v6294_v34 = vadd.f32 %v5738_v32, %v6272_v18  ;;  %v436_v35 = vpop.f32.mrf.mxu0 }
  0xd9   : > { %5923 = vpow2.f32 %v5496_v30  ;;  %v5499_v36 = vmul.f32 -1.442695, %v6290_v31  ;;  %v6298_v37 = vadd.f32 %v6272_v18, %v436_v35  ;;  %v500_v38 = vpop.f32.mrf.mxu1 }
  0xda   : > { %5925 = vpow2.f32 %v5512_v33  ;;  %v5515_v39 = vmul.f32 -1.442695, %v6294_v34  ;;  %v6302_v40 = vadd.f32 %v6272_v18, %v500_v38  ;;  %v5725_v41 = vpop.f32.mrf.mxu0 }
  0xdb   : > { %5927 = vpow2.f32 %v5499_v36  ;;  %v5497_v42 = vmul.f32 -1.442695, %v6298_v37  ;;  %v6306_v43 = vadd.f32 %v5725_v41, %v6272_v18  ;;  %v5741_v44 = vpop.f32.mrf.mxu1 }
  0xdc   : > { %5929 = vpow2.f32 %v5515_v39  ;;  %v5513_v45 = vmul.f32 -1.442695, %v6302_v40  ;;  %v6310_v46 = vadd.f32 %v5741_v44, %v6272_v18  ;;  %v449_v47 = vpop.f32.mrf.mxu0 }
  0xdd   : > { %5931 = vpow2.f32 %v5497_v42  ;;  %v5502_v48 = vmul.f32 -1.442695, %v6306_v43  ;;  %v6314_v49 = vadd.f32 %v6272_v18, %v449_v47  ;;  %v513_v50 = vpop.f32.mrf.mxu1 }
  0xde   : > { %5933 = vpow2.f32 %v5513_v45  ;;  %v5518_v51 = vmul.f32 -1.442695, %v6310_v46  ;;  %v6318_v52 = vadd.f32 %v6272_v18, %v513_v50  ;;  %v5726_v53 = vpop.f32.mrf.mxu0 }
  0xdf   : > { %5935 = vpow2.f32 %v5502_v48  ;;  %v5500_v54 = vmul.f32 -1.442695, %v6314_v49  ;;  %v6322_v55 = vadd.f32 %v5726_v53, %v6272_v18  ;;  %v5742_v56 = vpop.f32.mrf.mxu1 }
  0xe0   : > { %5937 = vpow2.f32 %v5518_v51  ;;  %v5516_v57 = vmul.f32 -1.442695, %v6318_v52  ;;  %v6326_v58 = vadd.f32 %v5742_v56, %v6272_v18  ;;  %v452_v59 = vpop.f32.mrf.mxu0 }
  0xe1   : > { %5939 = vpow2.f32 %v5500_v54  ;;  %v5503_v60 = vmul.f32 -1.442695, %v6322_v55  ;;  %v6330_v61 = vadd.f32 %v6272_v18, %v452_v59  ;;  %v516_v62 = vpop.f32.mrf.mxu1 }
  0xe2   : > { %5941 = vpow2.f32 %v5516_v57  ;;  %v5519_v63 = vmul.f32 -1.442695, %v6326_v58  ;;  %v6334_v0 = vadd.f32 %v6272_v18, %v516_v62  ;;  %v5729_v1 = vpop.f32.mrf.mxu0 }
  0xe3   : > { %5943 = vpow2.f32 %v5503_v60  ;;  %v5501_v2 = vmul.f32 -1.442695, %v6330_v61  ;;  %v5745_v3 = vpop.f32.mrf.mxu1  ;;  %v6339_v36 = vadd.f32 %v5729_v1, %v6272_v18 }
  0xe4   : > { %v5920_v4 = vpop.eup %5919  ;;  %5945 = vpow2.f32 %v5519_v63  ;;  %v5517_v5 = vmul.f32 -1.442695, %v6334_v0  ;;  %v465_v6 = vpop.f32.mrf.mxu0  ;;  %v6342_v38 = vadd.f32 %v5745_v3, %v6272_v18 }
  0xe5   : > { %v5922_v7 = vpop.eup %5921  ;;  %v658_v8 = vadd.f32 1.0, %v5920_v4  ;;  %5947 = vpow2.f32 %v5501_v2  ;;  %v529_v9 = vpop.f32.mrf.mxu1  ;;  %v6345_v44 = vadd.f32 %v6272_v18, %v465_v6  ;;  %v5506_v56 = vmul.f32 -1.442695, %v6339_v36 }
  0xe6   : > { %v5924_v10 = vpop.eup %5923  ;;  %v674_v11 = vadd.f32 1.0, %v5922_v7  ;;  %5949 = vpow2.f32 %v5517_v5  ;;  %v5730_v12 = vpop.f32.mrf.mxu0  ;;  %v5522_v57 = vmul.f32 -1.442695, %v6342_v38  ;;  %v6351_v1 = vadd.f32 %v6272_v18, %v529_v9 }
  0xe7   : > { %v5926_v13 = vpop.eup %5925  ;;  %5951 = vrcp.f32 %v658_v8  ;;  %v656_v14 = vadd.f32 1.0, %v5924_v10  ;;  %v5746_v21 = vpop.f32.mrf.mxu1  ;;  %v5504_v63 = vmul.f32 -1.442695, %v6345_v44  ;;  %v6354_v5 = vadd.f32 %v5730_v12, %v6272_v18 }
  0xe8   : > { %v5928_v15 = vpop.eup %5927  ;;  %5953 = vrcp.f32 %v674_v11  ;;  %v672_v16 = vadd.f32 1.0, %v5926_v13  ;;  %v468_v26 = vpop.f32.mrf.mxu0  ;;  %v6357_v6 = vadd.f32 %v5746_v21, %v6272_v18 }
  0xe9   : > { %v5930_v17 = vpop.eup %5929  ;;  %5955 = vrcp.f32 %v656_v14  ;;  %v659_v19 = vadd.f32 1.0, %v5928_v15  ;;  %v532_v39 = vpop.f32.mrf.mxu1  ;;  %v6360_v10 = vadd.f32 %v6272_v18, %v468_v26  ;;  %v5507_v26 = vmul.f32 -1.442695, %v6354_v5 }
  0xea   : > { %v5932_v23 = vpop.eup %5931  ;;  %5957 = vrcp.f32 %v672_v16  ;;  %v675_v24 = vadd.f32 1.0, %v5930_v17  ;;  %v5733_v45 = vpop.f32.mrf.mxu0  ;;  %v6363_v11 = vadd.f32 %v6272_v18, %v532_v39 }
  0xeb   : > { %v5934_v27 = vpop.eup %5933  ;;  %5959 = vrcp.f32 %v659_v19  ;;  %v657_v29 = vadd.f32 1.0, %v5932_v23  ;;  %v5749_v59 = vpop.f32.mrf.mxu1  ;;  %v6369_v12 = vadd.f32 %v5733_v45, %v6272_v18  ;;  %v5520_v19 = vmul.f32 -1.442695, %v6351_v1 }
  0xec   : > { %v5936_v30 = vpop.eup %5935  ;;  %5961 = vrcp.f32 %v675_v24  ;;  %v673_v32 = vadd.f32 1.0, %v5934_v27  ;;  %v481_v2 = vpop.f32.mrf.mxu0  ;;  %v6372_v14 = vadd.f32 %v5749_v59, %v6272_v18  ;;  %v5523_v27 = vmul.f32 -1.442695, %v6357_v6 }
  0xed   : > { %v5938_v33 = vpop.eup %5937  ;;  %5963 = vrcp.f32 %v657_v29  ;;  %v662_v35 = vadd.f32 1.0, %v5936_v30  ;;  %v545_v15 = vpop.f32.mrf.mxu1  ;;  %v6379_v21 = vadd.f32 %v6272_v18, %v481_v2  ;;  %v5505_v30 = vmul.f32 -1.442695, %v6360_v10 }
  0xee   : > { %v5940_v41 = vpop.eup %5939  ;;  %5965 = vrcp.f32 %v673_v32  ;;  %v678_v42 = vadd.f32 1.0, %v5938_v33  ;;  %v5521_v32 = vmul.f32 -1.442695, %v6363_v11  ;;  %v5526_v39 = vmul.f32 -1.442695, %v6372_v14 }
  0xef   : > { %v5942_v47 = vpop.eup %5941  ;;  %5967 = vrcp.f32 %v662_v35  ;;  %v660_v48 = vadd.f32 1.0, %v5940_v41  ;;  %v5510_v35 = vmul.f32 -1.442695, %v6369_v12  ;;  %v5750_v41 = vpop.f32.mrf.mxu1  ;;  %v5508_v45 = vmul.f32 -1.442695, %v6379_v21 }
  0xf0   : > { %v5944_v50 = vpop.eup %5943  ;;  %5969 = vrcp.f32 %v678_v42  ;;  %v676_v51 = vadd.f32 1.0, %v5942_v47  ;;  %v6406_v47 = vadd.f32 %v6272_v18, %v545_v15 }
  0xf1   : > { %v5946_v53 = vpop.eup %5945  ;;  %5971 = vrcp.f32 %v660_v48  ;;  %v663_v54 = vadd.f32 1.0, %v5944_v50 }
  0xf2   : > { %v5948_v60 = vpop.eup %5947  ;;  %5973 = vrcp.f32 %v676_v51  ;;  %v679_v62 = vadd.f32 1.0, %v5946_v53 }
  0xf3   : > { %v5950_v3 = vpop.eup %5949  ;;  %5975 = vrcp.f32 %v663_v54  ;;  %v661_v4 = vadd.f32 1.0, %v5948_v60 }
  0xf4   : > { %v5952_v7 = vpop.eup %5951  ;;  %5977 = vrcp.f32 %v679_v62  ;;  %v677_v8 = vadd.f32 1.0, %v5950_v3  ;;  %v5524_v3 = vmul.f32 -1.442695, %v6406_v47 }
  0xf5   : > { %v5954_v9 = vpop.eup %5953  ;;  %v6366_v13 = vmul.f32 %v5952_v7, %v6275_v20  ;;  %5979 = vrcp.f32 %v661_v4  ;;  %v5734_v20 = vpop.f32.mrf.mxu0 }
  0xf6   : > { %v5956_v16 = vpop.eup %5955  ;;  %v6375_v17 = vmul.f32 %v5954_v9, %v6278_v22  ;;  %5981 = vrcp.f32 %v677_v8 }
  0xf7   : > { %v5958_v23 = vpop.eup %5957  ;;  %804 = vst.msk [vmem:[#allocation2 + $0x10] sm:$0xff] %vm801_vm2, %v6366_v13  ;;  %v752_v24 = vmul.f32 %v5956_v16, %v6282_v25  ;;  %5983 = vpow2.f32 %v5506_v56 }
  0xf8   : > { %8445 = vst [vmem:[#allocation4_spill] sm:$0xff] %v6375_v17  ;;  %v5960_v22 = vpop.eup %5959  ;;  %820 = vst.msk [vmem:[#allocation2 + $0x90] sm:$0xff] %vm801_vm2, %v6375_v17  ;;  %v6389_v29 = vmul.f32 %v5958_v23, %v6286_v28  ;;  %5985 = vpow2.f32 %v5522_v57  ;;  %v6424_v57 = vadd.f32 %v5750_v41, %v6272_v18 }
  0xf9   : > { %v5962_v33 = vpop.eup %5961  ;;  %802 = vst.msk [vmem:[#allocation2] sm:$0xff] %vm801_vm2, %v752_v24  ;;  %v6395_v25 = vmul.f32 %v5960_v22, %v6290_v31  ;;  %5987 = vpow2.f32 %v5504_v63  ;;  %v484_v31 = vpop.f32.mrf.mxu0 }
  0xfa   : > { %8446 = vst [vmem:[#allocation5_spill] sm:$0xff] %v6389_v29  ;;  %v5964_v42 = vpop.eup %5963  ;;  %818 = vst.msk [vmem:[#allocation2 + $0x80] sm:$0xff] %vm801_vm2, %v6389_v29  ;;  %v6402_v28 = vmul.f32 %v5962_v33, %v6294_v34  ;;  %5989 = vpow2.f32 %v5520_v19  ;;  %v6414_v34 = vadd.f32 %v5734_v20, %v6272_v18  ;;  %v6431_v62 = vadd.f32 %v6272_v18, %v484_v31 }
  0xfb   : > { %v5966_v48 = vpop.eup %5965  ;;  %805 = vst.msk [vmem:[#allocation2 + $0x18] sm:$0xff] %vm801_vm2, %v6395_v25  ;;  %v753_v51 = vmul.f32 %v5964_v42, %v6298_v37  ;;  %5991 = vpow2.f32 %v5507_v26  ;;  %v5527_v9 = vmul.f32 -1.442695, %v6424_v57 }
  0xfc   : > { %8447 = vst [vmem:[#allocation6_spill] sm:$0xff] %v6402_v28  ;;  %v5968_v53 = vpop.eup %5967  ;;  %821 = vst.msk [vmem:[#allocation2 + $0x98] sm:$0xff] %vm801_vm2, %v6402_v28  ;;  %v6421_v56 = vmul.f32 %v5966_v48, %v6302_v40  ;;  %5993 = vpow2.f32 %v5523_v27  ;;  %v5511_v7 = vmul.f32 -1.442695, %v6414_v34  ;;  %v5509_v16 = vmul.f32 -1.442695, %v6431_v62 }
  0xfd   : > { %v5970_v59 = vpop.eup %5969  ;;  %v784_v37 = vpack.c.bf16 %v753_v51, %v752_v24  ;;  %803 = vst.msk [vmem:[#allocation2 + $0x8] sm:$0xff] %vm801_vm2, %v753_v51  ;;  %v6428_v60 = vmul.f32 %v5968_v53, %v6306_v43  ;;  %5995 = vpow2.f32 %v5505_v30 }
  0xfe   : > { %8448 = vst [vmem:[#allocation7_spill] sm:$0xff] %v6421_v56  ;;  %v5972_v63 = vpop.eup %5971  ;;  %819 = vst.msk [vmem:[#allocation2 + $0x88] sm:$0xff] %vm801_vm2, %v6421_v56  ;;  %v6438_v2 = vmul.f32 %v5970_v59, %v6310_v46  ;;  %5997 = vpow2.f32 %v5521_v32  ;;  %v6483_v33 = vld [vmem:[#allocation2 + $0x10] sm:$0xff] }
  0xff   : > { %8449 = vst [vmem:[#allocation8_spill] sm:$0xff] %v6428_v60  ;;  %v5974_v4 = vpop.eup %5973  ;;  %808 = vst.msk [vmem:[#allocation2 + $0x30] sm:$0xff] %vm801_vm2, %v6428_v60  ;;  %v6444_v43 = vmul.f32 %v5972_v63, %v6314_v49  ;;  %5999 = vpow2.f32 %v5510_v35  ;;  %5787 = vmatprep.mubr.msk.bf16.mxu0 %vm801_vm2, %v784_v37 }
 0x100   : > { %8450 = vst [vmem:[#allocation9_spill] sm:$0xff] %v6438_v2  ;;  %v5976_v8 = vpop.eup %5975  ;;  %824 = vst.msk [vmem:[#allocation2 + $0xb0] sm:$0xff] %vm801_vm2, %v6438_v2  ;;  %v6451_v46 = vmul.f32 %v5974_v4, %v6318_v52  ;;  %6001 = vpow2.f32 %v5526_v39  ;;  %v834_v26 = vld [vmem:[#allocation2] sm:$0xff] }
 0x101   : > { %v5978_v15 = vpop.eup %5977  ;;  %806 = vst.msk [vmem:[#allocation2 + $0x20] sm:$0xff] %vm801_vm2, %v6444_v43  ;;  %v6457_v49 = vmul.f32 %v5976_v8, %v6322_v55  ;;  %6003 = vpow2.f32 %v5508_v45  ;;  %v958_v41 = vmax.f32 %v834_v26, %v6483_v33 }
 0x102   : > { %8451 = vst [vmem:[#allocation10_spill] sm:$0xff] %v6451_v46  ;;  %v5980_v19 = vpop.eup %5979  ;;  %822 = vst.msk [vmem:[#allocation2 + $0xa0] sm:$0xff] %vm801_vm2, %v6451_v46  ;;  %v6463_v52 = vmul.f32 %v5978_v15, %v6326_v58  ;;  %6005 = vpow2.f32 %v5524_v3  ;;  %v6493_v63 = vld [vmem:[#allocation2 + $0x18] sm:$0xff] }
 0x103   : > { %8452 = vst [vmem:[#allocation11_spill] sm:$0xff] %v6457_v49  ;;  %v5982_v20 = vpop.eup %5981  ;;  %809 = vst.msk [vmem:[#allocation2 + $0x38] sm:$0xff] %vm801_vm2, %v6457_v49  ;;  %v6470_v55 = vmul.f32 %v5980_v19, %v6330_v61  ;;  %6007 = vpow2.f32 %v5511_v7 }
 0x104   : > { %8453 = vst [vmem:[#allocation12_spill] sm:$0xff] %v6463_v52  ;;  %v5984_v24 = vpop.eup %5983  ;;  %825 = vst.msk [vmem:[#allocation2 + $0xb8] sm:$0xff] %vm801_vm2, %v6463_v52  ;;  %v6477_v58 = vmul.f32 %v5982_v20, %v6334_v0  ;;  %6009 = vpow2.f32 %v5527_v9  ;;  %v835_v31 = vld [vmem:[#allocation2 + $0x8] sm:$0xff] }
 0x105   : > { %v5986_v22 = vpop.eup %5985  ;;  %807 = vst.msk [vmem:[#allocation2 + $0x28] sm:$0xff] %vm801_vm2, %v6470_v55  ;;  %v666_v61 = vadd.f32 1.0, %v5984_v24  ;;  %6011 = vpow2.f32 %v5509_v16  ;;  %v959_v7 = vmax.f32 %v835_v31, %v6493_v63 }
 0x106   : > { %8454 = vst [vmem:[#allocation13_spill] sm:$0xff] %v6477_v58  ;;  %v5988_v32 = vpop.eup %5987  ;;  %823 = vst.msk [vmem:[#allocation2 + $0xa8] sm:$0xff] %vm801_vm2, %v6477_v58  ;;  %v682_v0 = vadd.f32 1.0, %v5986_v22  ;;  %v6495_v3 = vld [vmem:[#allocation2 + $0x30] sm:$0xff]  ;;  %v6504_v22 = vld [vmem:[#allocation2 + $0x80] sm:$0xff] }
 0x107   : > { %v5990_v39 = vpop.eup %5989  ;;  %6013 = vrcp.f32 %v666_v61  ;;  %v664_v42 = vadd.f32 1.0, %v5988_v32  ;;  %v6533_v54 = vld [vmem:[#allocation2 + $0xb0] sm:$0xff] }
 0x108   : > { %v5992_v45 = vpop.eup %5991  ;;  %v6490_v48 = vld [vmem:[#allocation2 + $0x20] sm:$0xff]  ;;  %6015 = vrcp.f32 %v682_v0  ;;  %v680_v51 = vadd.f32 1.0, %v5990_v39 }
 0x109   : > { %v5994_v53 = vpop.eup %5993  ;;  %v982_v59 = vmax.f32 %v958_v41, %v6490_v48  ;;  %6017 = vrcp.f32 %v664_v42  ;;  %v667_v9 = vadd.f32 1.0, %v5992_v45  ;;  %v6511_v41 = vld [vmem:[#allocation2 + $0x90] sm:$0xff]  ;;  %v6513_v42 = vld [vmem:[#allocation2 + $0x88] sm:$0xff]  ;;  %v6515_v45 = vld [vmem:[#allocation2 + $0xa0] sm:$0xff] }
 0x10a   : > { %v5996_v37 = vpop.eup %5995  ;;  %6019 = vrcp.f32 %v680_v51  ;;  %v683_v15 = vadd.f32 1.0, %v5994_v53  ;;  %v6509_v0 = vld [vmem:[#allocation2 + $0x38] sm:$0xff]  ;;  %v976_v35 = vmax.f32 %v6511_v41, %v6515_v45 }
 0x10b   : > { %v5998_v4 = vpop.eup %5997  ;;  %1089 = vst.msk [vmem:[#allocation3] sm:$0xff] %vm801_vm2, %v982_v59  ;;  %v6500_v8 = vmax.f32 %v982_v59, %v6495_v3  ;;  %v665_v20 = vadd.f32 1.0, %v5996_v37  ;;  %6021 = vrcp.f32 %v667_v9  ;;  %v974_v59 = vmax.f32 %v6504_v22, %v6511_v41  ;;  %v6525_v9 = vld [vmem:[#allocation2 + $0x98] sm:$0xff] }
 0x10c   : > { %v6000_v16 = vpop.eup %5999  ;;  %v6502_v19 = vld [vmem:[#allocation2 + $0x28] sm:$0xff]  ;;  %v681_v24 = vadd.f32 1.0, %v5998_v4  ;;  %6023 = vrcp.f32 %v683_v15  ;;  %v960_v37 = vmax.f32 %v6483_v33, %v6490_v48  ;;  %v6556_v52 = vmax.f32 %v976_v35, %v6533_v54 }
 0x10d   : > { %v6002_v26 = vpop.eup %6001  ;;  %1106 = vst.msk [vmem:[#allocation3 + $0x10] sm:$0xff] %vm801_vm2, %v6500_v8  ;;  %v983_v61 = vmax.f32 %v959_v7, %v6502_v19  ;;  %6025 = vrcp.f32 %v665_v20  ;;  %v670_v51 = vadd.f32 1.0, %v6000_v16  ;;  %v6540_v23 = vmax.f32 %v974_v59, %v6515_v45  ;;  %v6545_v40 = vld [vmem:[#allocation2 + $0xa8] sm:$0xff]  ;;  %v548_v59 = vpop.f32.mrf.mxu1 }
 0x10e   : > { %v6004_v32 = vpop.eup %6003  ;;  %6027 = vrcp.f32 %v681_v24  ;;  %v686_v4 = vadd.f32 1.0, %v6002_v26 }
 0x10f   : > { %v6006_v39 = vpop.eup %6005  ;;  %1090 = vst.msk [vmem:[#allocation3 + $0x8] sm:$0xff] %vm801_vm2, %v983_v61  ;;  %v6519_v31 = vmax.f32 %v983_v61, %v6509_v0  ;;  %6029 = vrcp.f32 %v670_v51  ;;  %v668_v15 = vadd.f32 1.0, %v6004_v32 }
 0x110   : > { %v6008_v53 = vpop.eup %6007  ;;  %v684_v20 = vadd.f32 1.0, %v6006_v39  ;;  %6031 = vrcp.f32 %v686_v4  ;;  %v6543_v4 = vmax.f32 %v960_v37, %v6495_v3  ;;  %v961_v37 = vmax.f32 %v6493_v63, %v6502_v19 }
 0x111   : > { %v6010_v7 = vpop.eup %6009  ;;  %1107 = vst.msk [vmem:[#allocation3 + $0x18] sm:$0xff] %vm801_vm2, %v6519_v31  ;;  %v671_v16 = vadd.f32 1.0, %v6008_v53  ;;  %6033 = vrcp.f32 %v668_v15 }
 0x112   : > { %v6012_v61 = vpop.eup %6011  ;;  %v687_v33 = vadd.f32 1.0, %v6010_v7  ;;  %v1463_v24 = vld [vmem:[#allocation3] sm:$0x1]  ;;  %v1479_v26 = vld [vmem:[#allocation3 + $0x1] sm:$0x1]  ;;  %6035 = vrcp.f32 %v684_v20 }
 0x113   : > { %v669_v32 = vadd.f32 1.0, %v6012_v61  ;;  %v1511_v39 = vmax.f32 %v1463_v24, %v1479_v26  ;;  %v1495_v50 = vld [vmem:[#allocation3 + $0x2] sm:$0x1]  ;;  %6037 = vrcp.f32 %v671_v16 }
 0x114   : > { %v6014_v51 = vpop.eup %6013  ;;  %v1464_v7 = vld [vmem:[#allocation3 + $0x10] sm:$0x1]  ;;  %v1480_v30 = vld [vmem:[#allocation3 + $0x11] sm:$0x1]  ;;  %v1142_v2 = vld [vmem:[#allocation3] sm:$0xff]  ;;  %6039 = vrcp.f32 %v687_v33 }
 0x115   : > { %v6016_v27 = vpop.eup %6015  ;;  %v6548_v15 = vmul.f32 %v6014_v51, %v6339_v36  ;;  %v1512_v61 = vmax.f32 %v1464_v7, %v1480_v30  ;;  %v1527_v24 = vmax.f32 %v1511_v39, %v1495_v50  ;;  %v1144_v16 = vld [vmem:[#allocation3 + $0x10] sm:$0xff]  ;;  %6041 = vrcp.f32 %v669_v32 }
 0x116   : > { %v6018_v26 = vpop.eup %6017  ;;  %v1174_v20 = vld [vmem:[#allocation3 + $0x1] sm:$0xff]  ;;  %v6553_v53 = vmul.f32 %v6016_v27, %v6342_v38  ;;  %v1175_v36 = vld [vmem:[#allocation3 + $0x9] sm:$0xf]  ;;  %v1496_v39 = vld [vmem:[#allocation3 + $0x12] sm:$0x1] }
 0x117   : > { %8455 = vst [vmem:[#allocation14_spill] sm:$0xff] %v6548_v15  ;;  %v1143_v46 = vld [vmem:[#allocation3 + $0x8] sm:$0xf]  ;;  %v6020_v51 = vpop.eup %6019  ;;  %812 = vst.msk [vmem:[#allocation2 + $0x50] sm:$0xff] %vm801_vm2, %v6548_v15  ;;  %v6561_v50 = vmul.f32 %v6018_v26, %v6345_v44  ;;  %v1302_v30 = vmax.f32 %v1142_v2, %v1174_v20  ;;  %v6564_v38 = vld [vmem:[#allocation3] sm:$0x1]  ;;  %v1528_v32 = vmax.f32 %v1512_v61, %v1496_v39 }
 0x118   : > { %8456 = vst [vmem:[#allocation15_spill] sm:$0xff] %v6553_v53  ;;  %v1303_v63 = vmax.f32 %v1143_v46, %v1175_v36  ;;  %1544 = vst.msk [vmem:[#allocation2] sm:$0x1] %vm1543_vm3, %v1527_v24  ;;  %v1176_v27 = vld [vmem:[#allocation3 + $0x11] sm:$0xff]  ;;  %v6569_v35 = vmul.f32 %v6020_v51, %v6351_v1  ;;  %v1206_v44 = vld [vmem:[#allocation3 + $0x2] sm:$0xff]  ;;  %v6574_v2 = vadd.f32 %v6272_v18, %v548_v59  ;;  %v6022_v33 = vpop.eup %6021 }
 0x119   : > { %8457 = vst [vmem:[#allocation16_spill] sm:$0xff] %v6561_v50  ;;  %828 = vst.msk [vmem:[#allocation2 + $0xd0] sm:$0xff] %vm801_vm2, %v6553_v53  ;;  %v1207_v7 = vld [vmem:[#allocation3 + $0xa] sm:$0xf]  ;;  %v1304_v24 = vmax.f32 %v1144_v16, %v1176_v27  ;;  %v1145_v26 = vld [vmem:[#allocation3 + $0x18] sm:$0xf]  ;;  %v1334_v1 = vmax.f32 %v1302_v30, %v1206_v44  ;;  %v977_v61 = vmax.f32 %v6525_v9, %v6545_v40  ;;  %v6024_v27 = vpop.eup %6023 }
 0x11a   : > { %8458 = vst [vmem:[#allocation17_spill] sm:$0xff] %v6569_v35  ;;  %810 = vst.msk [vmem:[#allocation2 + $0x40] sm:$0xff] %vm801_vm2, %v6561_v50  ;;  %v1177_v20 = vld [vmem:[#allocation3 + $0x19] sm:$0xf]  ;;  %v1335_v36 = vmax.f32 %v1303_v63, %v1207_v7  ;;  %v6580_v51 = vld [vmem:[#allocation3 + $0x1] sm:$0x1]  ;;  %v8459_v18 = vmax.f32 %v6513_v42, %v6525_v9  ;;  %v6593_v16 = vmax.f32 %v961_v37, %v6509_v0  ;;  %v6026_v28 = vpop.eup %6025 }
 0x11b   : > { %v1208_v58 = vld [vmem:[#allocation3 + $0x12] sm:$0xff]  ;;  %826 = vst.msk [vmem:[#allocation2 + $0xc0] sm:$0xff] %vm801_vm2, %v6569_v35  ;;  %v1238_v30 = vld [vmem:[#allocation3 + $0x3] sm:$0xff]  ;;  %v1239_v63 = vld [vmem:[#allocation3 + $0xb] sm:$0xf]  ;;  %v1305_v39 = vmax.f32 %v1145_v26, %v1177_v20  ;;  %v6597_v7 = vmul.f32 %v6022_v33, %v6354_v5  ;;  %v6600_v56 = vmul.f32 %v6024_v27, %v6357_v6  ;;  %v1624_v26 = vmax.f32 %v6564_v38, %v6580_v51  ;;  %v6028_v20 = vpop.eup %6027 }
 0x11c   : > { %v6588_v59 = vmax.f32 %v8459_v18, %v6545_v40  ;;  %1545 = vst.msk [vmem:[#allocation2 + $0x10] sm:$0x1] %vm1543_vm3, %v1528_v32  ;;  %v1336_v44 = vmax.f32 %v1304_v24, %v1208_v58  ;;  %v1209_v46 = vld [vmem:[#allocation3 + $0x1a] sm:$0xf]  ;;  %v1366_v17 = vmax.f32 %v1334_v1, %v1238_v30  ;;  %v1367_v18 = vmax.f32 %v1335_v36, %v1239_v63  ;;  %v1270_v37 = vld [vmem:[#allocation3 + $0x4] sm:$0xff] }
 0x11d   : > { %8460 = vst [vmem:[#allocation18_spill] sm:$0xff] %v6597_v7  ;;  %v1240_v29 = vld [vmem:[#allocation3 + $0x13] sm:$0xff]  ;;  %8461 = vst [vmem:[#allocation19_spill] sm:$0xff] %v6600_v56  ;;  %v1337_v60 = vmax.f32 %v1305_v39, %v1209_v46  ;;  %v5525_v32 = vmul.f32 -1.442695, %v6574_v2  ;;  %v6610_v33 = vmul.f32 %v6026_v28, %v6360_v10  ;;  %v6030_v46 = vpop.eup %6029 }
 0x11e   : > { %v1368_v58 = vmax.f32 %v1336_v44, %v1240_v29  ;;  %813 = vst.msk [vmem:[#allocation2 + $0x58] sm:$0xff] %vm801_vm2, %v6597_v7  ;;  %v1241_v6 = vld [vmem:[#allocation3 + $0x1b] sm:$0xf]  ;;  %v1271_v24 = vld [vmem:[#allocation3 + $0xc] sm:$0xf]  ;;  %v1398_v1 = vmax.f32 %v1366_v17, %v1270_v37  ;;  %829 = vst.msk [vmem:[#allocation2 + $0xd8] sm:$0xff] %vm801_vm2, %v6600_v56  ;;  %v6619_v29 = vmul.f32 %v6028_v20, %v6363_v11  ;;  %v6032_v10 = vpop.eup %6031 }
 0x11f   : > { %8462 = vst [vmem:[#allocation20_spill] sm:$0xff] %v6610_v33  ;;  %v6612_v36 = vld [vmem:[#allocation2 + $0xb8] sm:$0xff]  ;;  %v1369_v30 = vmax.f32 %v1337_v60, %v1241_v6  ;;  %v1399_v63 = vmax.f32 %v1367_v18, %v1271_v24  ;;  %811 = vst.msk [vmem:[#allocation2 + $0x48] sm:$0xff] %vm801_vm2, %v6610_v33  ;;  %v6629_v27 = vmul.f32 %v6030_v46, %v6369_v12  ;;  %v6632_v11 = vld [vmem:[#allocation3 + $0x10] sm:$0x1]  ;;  %v6034_v60 = vpop.eup %6033  ;;  %6043 = vpow2.f32 %v5525_v32 }
 0x120   : > { %v1272_v38 = vld [vmem:[#allocation3 + $0x14] sm:$0xff]  ;;  %8463 = vst [vmem:[#allocation21_spill] sm:$0xff] %v6619_v29  ;;  %v6626_v39 = vmax.f32 %v977_v61, %v6612_v36  ;;  %v1273_v44 = vld [vmem:[#allocation3 + $0x1c] sm:$0xf]  ;;  %1430 = vst.msk [vmem:[#allocation2 + $0x2] sm:$0xff] %vm801_vm2, %v1398_v1  ;;  %v1023_v61 = vmax.f32 %v6588_v59, %v6612_v36  ;;  %v6643_v12 = vmul.f32 %v6032_v10, %v6372_v14  ;;  %v6036_v24 = vpop.eup %6035 }
 0x121   : > { %v1400_v28 = vmax.f32 %v1368_v58, %v1272_v38  ;;  %8464 = vst [vmem:[#allocation22_spill] sm:$0xff] %v6629_v27  ;;  %v6634_v18 = vld [vmem:[#allocation2 + $0x40] sm:$0xff]  ;;  %827 = vst.msk [vmem:[#allocation2 + $0xc8] sm:$0xff] %vm801_vm2, %v6619_v29  ;;  %v1401_v20 = vmax.f32 %v1369_v30, %v1273_v44  ;;  %v1577_v58 = vld [vmem:[#allocation3 + $0x11] sm:$0x1]  ;;  %v6038_v30 = vpop.eup %6037  ;;  %v8466_v10 = vmax.f32 %v6490_v48, %v6495_v3 }
 0x122   : > { %8465 = vst [vmem:[#allocation23_spill] sm:$0xff] %v6643_v12  ;;  %1432 = vst.msk [vmem:[#allocation2 + $0xa] sm:$0xf] %vm1431_vm4, %v1399_v63  ;;  %v1592_v6 = vld [vmem:[#allocation3 + $0x2] sm:$0x1]  ;;  %v964_v1 = vmax.f32 %v6495_v3, %v6634_v18  ;;  %v1008_v46 = vmax.f32 %v6543_v4, %v6634_v18  ;;  %v6655_v63 = vld [vmem:[#allocation2 + $0x50] sm:$0xff]  ;;  %v1030_v44 = vmax.f32 %v6500_v8, %v6634_v18 }
 0x123   : > { %1433 = vst.msk [vmem:[#allocation2 + $0x12] sm:$0xff] %vm801_vm2, %v1400_v28  ;;  %v6651_v38 = vld [vmem:[#allocation2 + $0xc0] sm:$0xff]  ;;  %816 = vst.msk [vmem:[#allocation2 + $0x70] sm:$0xff] %vm801_vm2, %v6629_v27  ;;  %v1640_v14 = vmax.f32 %v1624_v26, %v1592_v6  ;;  %v6661_v28 = vmax.f32 %v8466_v10, %v6634_v18  ;;  %v6040_v26 = vpop.eup %6039  ;;  %v6672_v32 = vld [vmem:[#allocation2 + $0xd0] sm:$0xff]  ;;  %v8467_v3 = vmax.f32 %v6540_v23, %v6533_v54 }
 0x124   : > { %v980_v4 = vmax.f32 %v6533_v54, %v6651_v38  ;;  %v1024_v51 = vmax.f32 %v6556_v52, %v6651_v38  ;;  %832 = vst.msk [vmem:[#allocation2 + $0xf0] sm:$0xff] %vm801_vm2, %v6643_v12  ;;  %v1032_v48 = vmax.f32 %v1008_v46, %v6655_v63  ;;  %v6680_v6 = vmul.f32 %v6034_v60, %v6379_v21  ;;  %v6042_v10 = vpop.eup %6041  ;;  %v6762_v5 = vld [vmem:[#allocation3 + $0xd] sm:$0x1]  ;;  %v6764_v17 = vld [vmem:[#allocation3 + $0xe] sm:$0x1] }
 0x125   : > { %1434 = vst.msk [vmem:[#allocation2 + $0x1a] sm:$0xf] %vm1431_vm4, %v1401_v20  ;;  %v1046_v8 = vmax.f32 %v8467_v3, %v6651_v38  ;;  %v1625_v52 = vmax.f32 %v6632_v11, %v1577_v58  ;;  %v966_v37 = vmax.f32 %v6634_v18, %v6655_v63  ;;  %v8469_v20 = vmax.f32 %v6515_v45, %v6533_v54  ;;  %v1688_v58 = vld [vmem:[#allocation3 + $0xc] sm:$0x1] }
 0x126   : > { %8468 = vst [vmem:[#allocation24_spill] sm:$0xff] %v6680_v6  ;;  %1055 = vst.msk [vmem:[#allocation3 + $0x20] sm:$0xff] %vm801_vm2, %v1030_v44  ;;  %v1048_v23 = vmax.f32 %v1024_v51, %v6672_v32  ;;  %v6694_v3 = vmul.f32 %v6036_v24, %v6406_v47  ;;  %v6703_v11 = vmax.f32 %v964_v1, %v6655_v63  ;;  %v1608_v47 = vld [vmem:[#allocation3 + $0x3] sm:$0x1]  ;;  %v1704_v24 = vld [vmem:[#allocation3 + $0xd] sm:$0x1] }
 0x127   : > { %v6690_v46 = vmax.f32 %v8469_v20, %v6651_v38  ;;  %1057 = vst.msk [vmem:[#allocation3 + $0x30] sm:$0xff] %vm801_vm2, %v1032_v48  ;;  %1071 = vst.msk [vmem:[#allocation3 + $0xa0] sm:$0xff] %vm801_vm2, %v1046_v8  ;;  %v6706_v60 = vmul.f32 %v6038_v30, %v6414_v34  ;;  %v6709_v51 = vmul.f32 %v6040_v26, %v6424_v57  ;;  %v6712_v44 = vld [vmem:[#allocation2 + $0x48] sm:$0xff]  ;;  %v1593_v57 = vld [vmem:[#allocation3 + $0x12] sm:$0x1] }
 0x128   : > { %8470 = vst [vmem:[#allocation25_spill] sm:$0xff] %v6694_v3  ;;  %814 = vst.msk [vmem:[#allocation2 + $0x60] sm:$0xff] %vm801_vm2, %v6680_v6  ;;  %v1010_v48 = vmax.f32 %v6661_v28, %v6655_v63  ;;  %v6719_v1 = vmax.f32 %v980_v4, %v6672_v32  ;;  %v6722_v34 = vmul.f32 %v6042_v10, %v6431_v62  ;;  %v6740_v4 = vld [vmem:[#allocation2 + $0x58] sm:$0xff] }
 0x129   : > { %8471 = vst [vmem:[#allocation26_spill] sm:$0xff] %v6706_v60  ;;  %8472 = vst [vmem:[#allocation27_spill] sm:$0xff] %v6709_v51  ;;  %v1656_v30 = vmax.f32 %v1640_v14, %v1608_v47  ;;  %v965_v26 = vmax.f32 %v6509_v0, %v6712_v44  ;;  %v8474_v8 = vmax.f32 %v6502_v19, %v6509_v0  ;;  %v6738_v14 = vld [vmem:[#allocation3 + $0x1c] sm:$0x1] }
 0x12a   : > { %1073 = vst.msk [vmem:[#allocation3 + $0xb0] sm:$0xff] %vm801_vm2, %v1048_v23  ;;  %830 = vst.msk [vmem:[#allocation2 + $0xe0] sm:$0xff] %vm801_vm2, %v6694_v3  ;;  %v1009_v28 = vmax.f32 %v6593_v16, %v6712_v44  ;;  %v882_v23 = vld [vmem:[#allocation2 + $0xc8] sm:$0xff]  ;;  %v1641_v62 = vmax.f32 %v1625_v52, %v1593_v57  ;;  %v1031_v19 = vmax.f32 %v6519_v31, %v6712_v44  ;;  %v6745_v10 = vld [vmem:[#allocation2 + $0x70] sm:$0xff] }
 0x12b   : > { %8473 = vst [vmem:[#allocation28_spill] sm:$0xff] %v6722_v34  ;;  %v6730_v20 = vmax.f32 %v8474_v8, %v6712_v44  ;;  %817 = vst.msk [vmem:[#allocation2 + $0x78] sm:$0xff] %vm801_vm2, %v6706_v60  ;;  %v1025_v0 = vmax.f32 %v6626_v39, %v882_v23  ;;  %v1026_v16 = vmax.f32 %v6690_v46, %v6672_v32  ;;  %v6752_v52 = vld [vmem:[#allocation3 + $0x1d] sm:$0x1]  ;;  %v956_v12 = vld [vmem:[#allocation2 + $0xf0] sm:$0xff] }
 0x12c   : > { %833 = vst.msk [vmem:[#allocation2 + $0xf8] sm:$0xff] %vm801_vm2, %v6709_v51  ;;  %815 = vst.msk [vmem:[#allocation2 + $0x68] sm:$0xff] %vm801_vm2, %v6722_v34  ;;  %v1752_v47 = vmax.f32 %v1688_v58, %v1704_v24  ;;  %v907_v57 = vld [vmem:[#allocation2 + $0xd8] sm:$0xff]  ;;  %v1033_v31 = vmax.f32 %v1009_v28, %v6740_v4  ;;  %v1047_v39 = vmax.f32 %v1023_v61, %v882_v23  ;;  %v1609_v61 = vld [vmem:[#allocation3 + $0x13] sm:$0x1] }
 0x12d   : > { %1672 = vst.msk [vmem:[#allocation2 + $0x1] sm:$0x1] %vm1543_vm3, %v1656_v30  ;;  %v972_v46 = vmax.f32 %v6745_v10, %v6504_v22  ;;  %v1049_v58 = vmax.f32 %v1025_v0, %v907_v57  ;;  %v6777_v23 = vmax.f32 %v965_v26, %v6740_v4  ;;  %v6781_v0 = vld [vmem:[#allocation3 + $0x20] sm:$0x1]  ;;  %v6783_v57 = vld [vmem:[#allocation3 + $0x21] sm:$0x1]  ;;  %v1657_v30 = vmax.f32 %v1641_v62, %v1609_v61 }
 0x12e   : > { %1056 = vst.msk [vmem:[#allocation3 + $0x28] sm:$0xff] %vm801_vm2, %v1031_v19  ;;  %1058 = vst.msk [vmem:[#allocation3 + $0x38] sm:$0xff] %vm801_vm2, %v1033_v31  ;;  %v1720_v24 = vld [vmem:[#allocation3 + $0xe] sm:$0x1]  ;;  %v6801_v31 = vpop.eup %6043 }
 0x12f   : > { %1072 = vst.msk [vmem:[#allocation3 + $0xa8] sm:$0xff] %vm801_vm2, %v1047_v39  ;;  %v996_v28 = vmax.f32 %v972_v46, %v6511_v41  ;;  %1074 = vst.msk [vmem:[#allocation3 + $0xb8] sm:$0xff] %vm801_vm2, %v1049_v58  ;;  %v846_v59 = vld [vmem:[#allocation2 + $0x60] sm:$0xff]  ;;  %v6790_v26 = vmax.f32 %v1752_v47, %v1720_v24 }
 0x130   : > { %v968_v8 = vmax.f32 %v6655_v63, %v846_v59  ;;  %v970_v62 = vmax.f32 %v846_v59, %v6745_v10  ;;  %v990_v58 = vmax.f32 %v966_v37, %v846_v59  ;;  %1673 = vst.msk [vmem:[#allocation2 + $0x11] sm:$0x1] %vm1543_vm3, %v1657_v30  ;;  %v1012_v47 = vmax.f32 %v6703_v11, %v846_v59 }
 0x131   : > { %v1020_v19 = vmax.f32 %v996_v28, %v6515_v45  ;;  %v931_v61 = vld [vmem:[#allocation2 + $0xe0] sm:$0xff]  ;;  %v1034_v24 = vmax.f32 %v1010_v48, %v846_v59  ;;  %v8475_v48 = vmax.f32 %v6651_v38, %v6672_v32 }
 0x132   : > { %v1028_v46 = vmax.f32 %v6719_v1, %v931_v61  ;;  %v1050_v39 = vmax.f32 %v1026_v16, %v931_v61  ;;  %v6805_v28 = vld [vmem:[#allocation2 + $0x78] sm:$0xff]  ;;  %v992_v51 = vmax.f32 %v968_v8, %v6745_v10  ;;  %v994_v18 = vmax.f32 %v970_v62, %v6504_v22  ;;  %v1146_v16 = vld [vmem:[#allocation3 + $0x20] sm:$0xff] }
 0x133   : > { %v1044_v21 = vmax.f32 %v1020_v19, %v6533_v54  ;;  %v1014_v37 = vmax.f32 %v990_v58, %v6745_v10  ;;  %v6811_v63 = vld [vmem:[#allocation2 + $0x68] sm:$0xff]  ;;  %v1036_v30 = vmax.f32 %v1012_v47, %v6745_v10  ;;  %1059 = vst.msk [vmem:[#allocation3 + $0x40] sm:$0xff] %vm801_vm2, %v1034_v24  ;;  %v1122_v54 = vmax.f32 %v8475_v48, %v931_v61 }
 0x134   : > { %v1052_v11 = vmax.f32 %v1028_v46, %v956_v12  ;;  %1075 = vst.msk [vmem:[#allocation3 + $0xc0] sm:$0xff] %vm801_vm2, %v1050_v39  ;;  %v1135_v1 = vmax.f32 %v6672_v32, %v931_v61  ;;  %v1016_v59 = vmax.f32 %v992_v51, %v6504_v22  ;;  %v1018_v19 = vmax.f32 %v994_v18, %v6511_v41  ;;  %v1148_v39 = vld [vmem:[#allocation3 + $0x30] sm:$0xff]  ;;  %v1162_v51 = vld [vmem:[#allocation3 + $0xa0] sm:$0xff] }
 0x135   : > { %v1178_v8 = vld [vmem:[#allocation3 + $0x21] sm:$0xff]  ;;  %1069 = vst.msk [vmem:[#allocation3 + $0x90] sm:$0xff] %vm801_vm2, %v1044_v21  ;;  %v1038_v10 = vmax.f32 %v1014_v37, %v6504_v22  ;;  %v973_v46 = vmax.f32 %v6805_v28, %v6513_v42  ;;  %v1180_v62 = vld [vmem:[#allocation3 + $0x31] sm:$0xff]  ;;  %1061 = vst.msk [vmem:[#allocation3 + $0x50] sm:$0xff] %vm801_vm2, %v1036_v30  ;;  %v1124_v38 = vmax.f32 %v1122_v54, %v956_v12 }
 0x136   : > { %v1306_v58 = vmax.f32 %v1146_v16, %v1178_v8  ;;  %1077 = vst.msk [vmem:[#allocation3 + $0xd0] sm:$0xff] %vm801_vm2, %v1052_v11  ;;  %v1137_v32 = vmax.f32 %v1135_v1, %v956_v12  ;;  %v969_v21 = vmax.f32 %v6740_v4, %v6811_v63  ;;  %v1210_v61 = vld [vmem:[#allocation3 + $0x22] sm:$0xff]  ;;  %v1308_v47 = vmax.f32 %v1148_v39, %v1180_v62  ;;  %v1164_v30 = vld [vmem:[#allocation3 + $0xb0] sm:$0xff] }
 0x137   : > { %v1194_v24 = vld [vmem:[#allocation3 + $0xa1] sm:$0xff]  ;;  %v1040_v22 = vmax.f32 %v1016_v59, %v6511_v41  ;;  %v1042_v18 = vmax.f32 %v1018_v19, %v6515_v45  ;;  %1063 = vst.msk [vmem:[#allocation3 + $0x60] sm:$0xff] %vm801_vm2, %v1038_v10  ;;  %v997_v37 = vmax.f32 %v973_v46, %v6525_v9  ;;  %v1212_v48 = vld [vmem:[#allocation3 + $0x32] sm:$0xff]  ;;  %1127 = vst.msk [vmem:[#allocation3 + $0xe0] sm:$0xff] %vm801_vm2, %v1124_v38 }
 0x138   : > { %v1338_v11 = vmax.f32 %v1306_v58, %v1210_v61  ;;  %v1196_v54 = vld [vmem:[#allocation3 + $0xb1] sm:$0xff]  ;;  %v1322_v12 = vmax.f32 %v1162_v51, %v1194_v24  ;;  %1140 = vst.msk [vmem:[#allocation3 + $0xf0] sm:$0xff] %vm801_vm2, %v1137_v32  ;;  %v971_v1 = vmax.f32 %v6811_v63, %v6805_v28  ;;  %v8476_v41 = vmax.f32 %v6712_v44, %v6740_v4  ;;  %v1242_v16 = vld [vmem:[#allocation3 + $0x23] sm:$0xff] }
 0x139   : > { %v1340_v8 = vmax.f32 %v1308_v47, %v1212_v48  ;;  %v1226_v59 = vld [vmem:[#allocation3 + $0xa2] sm:$0xff]  ;;  %v1324_v19 = vmax.f32 %v1164_v30, %v1196_v54  ;;  %1065 = vst.msk [vmem:[#allocation3 + $0x70] sm:$0xff] %vm801_vm2, %v1040_v22  ;;  %1067 = vst.msk [vmem:[#allocation3 + $0x80] sm:$0xff] %vm801_vm2, %v1042_v18  ;;  %v1021_v10 = vmax.f32 %v997_v37, %v6545_v40  ;;  %v1244_v39 = vld [vmem:[#allocation3 + $0x33] sm:$0xff] }
 0x13a   : > { %v991_v45 = vmax.f32 %v8476_v41, %v6811_v63  ;;  %v993_v46 = vmax.f32 %v969_v21, %v6805_v28  ;;  %v1370_v62 = vmax.f32 %v1338_v11, %v1242_v16  ;;  %v1228_v58 = vld [vmem:[#allocation3 + $0xb2] sm:$0xff]  ;;  %v1354_v38 = vmax.f32 %v1322_v12, %v1226_v59  ;;  %v1274_v51 = vld [vmem:[#allocation3 + $0x24] sm:$0xff] }
 0x13b   : > { %v995_v32 = vmax.f32 %v971_v1, %v6513_v42  ;;  %v1013_v44 = vmax.f32 %v6777_v23, %v6811_v63  ;;  %v1372_v61 = vmax.f32 %v1340_v8, %v1244_v39  ;;  %v1258_v47 = vld [vmem:[#allocation3 + $0xa3] sm:$0xff]  ;;  %v1356_v24 = vmax.f32 %v1324_v19, %v1228_v58  ;;  %v1276_v37 = vld [vmem:[#allocation3 + $0x34] sm:$0xff]  ;;  %v1817_v8 = vld [vmem:[#allocation3 + $0x1d] sm:$0x1] }
 0x13c   : > { %v1045_v22 = vmax.f32 %v1021_v10, %v6612_v36  ;;  %v1015_v18 = vmax.f32 %v991_v45, %v6805_v28  ;;  %v1402_v30 = vmax.f32 %v1370_v62, %v1274_v51  ;;  %v1260_v21 = vld [vmem:[#allocation3 + $0xb3] sm:$0xff]  ;;  %v1386_v48 = vmax.f32 %v1354_v38, %v1258_v47  ;;  %v1290_v1 = vld [vmem:[#allocation3 + $0xa4] sm:$0xff]  ;;  %v1721_v38 = vld [vmem:[#allocation3 + $0x1e] sm:$0x1] }
 0x13d   : > { %v1017_v11 = vmax.f32 %v993_v46, %v6513_v42  ;;  %v1019_v54 = vmax.f32 %v995_v32, %v6525_v9  ;;  %v1404_v12 = vmax.f32 %v1372_v61, %v1276_v37  ;;  %v1388_v41 = vmax.f32 %v1356_v24, %v1260_v21  ;;  %v1292_v59 = vld [vmem:[#allocation3 + $0xb4] sm:$0xff]  ;;  %v1833_v32 = vld [vmem:[#allocation3 + $0x1e] sm:$0x1]  ;;  %v1736_v51 = vld [vmem:[#allocation3 + $0xf] sm:$0x1] }
 0x13e   : > { %1070 = vst.msk [vmem:[#allocation3 + $0x98] sm:$0xff] %vm801_vm2, %v1045_v22  ;;  %v8477_v23 = vmax.f32 %v6730_v20, %v6740_v4  ;;  %v1037_v45 = vmax.f32 %v1013_v44, %v6805_v28  ;;  %1435 = vst.msk [vmem:[#allocation2 + $0x22] sm:$0xff] %vm801_vm2, %v1402_v30  ;;  %v1418_v19 = vmax.f32 %v1386_v48, %v1290_v1  ;;  %v1469_v10 = vld [vmem:[#allocation3 + $0x60] sm:$0x1]  ;;  %v1485_v46 = vld [vmem:[#allocation3 + $0x61] sm:$0x1] }
 0x13f   : > { %v1039_v39 = vmax.f32 %v1015_v18, %v6513_v42  ;;  %v1041_v62 = vmax.f32 %v1017_v11, %v6525_v9  ;;  %v1043_v58 = vmax.f32 %v1019_v54, %v6545_v40  ;;  %1437 = vst.msk [vmem:[#allocation2 + $0x32] sm:$0xff] %vm801_vm2, %v1404_v12  ;;  %v1420_v20 = vmax.f32 %v1388_v41, %v1292_v59  ;;  %v1582_v28 = vld [vmem:[#allocation3 + $0x61] sm:$0x1]  ;;  %v1501_v44 = vld [vmem:[#allocation3 + $0x62] sm:$0x1] }
 0x140   : > { %v1035_v16 = vmax.f32 %v8477_v23, %v6811_v63  ;;  %v1517_v4 = vmax.f32 %v1469_v10, %v1485_v46  ;;  %v1566_v63 = vld [vmem:[#allocation3 + $0x60] sm:$0x1]  ;;  %1062 = vst.msk [vmem:[#allocation3 + $0x58] sm:$0xff] %vm801_vm2, %v1037_v45  ;;  %1451 = vst.msk [vmem:[#allocation2 + $0xa2] sm:$0xff] %vm801_vm2, %v1418_v19  ;;  %v1497_v9 = vld [vmem:[#allocation3 + $0x22] sm:$0x1]  ;;  %v8478_v24 = vmax.f32 %v6781_v0, %v6783_v57 }
 0x141   : > { %v1630_v42 = vmax.f32 %v1566_v63, %v1582_v28  ;;  %1064 = vst.msk [vmem:[#allocation3 + $0x68] sm:$0xff] %vm801_vm2, %v1039_v39  ;;  %1066 = vst.msk [vmem:[#allocation3 + $0x78] sm:$0xff] %vm801_vm2, %v1041_v62  ;;  %v1598_v47 = vld [vmem:[#allocation3 + $0x62] sm:$0x1]  ;;  %v1737_v18 = vld [vmem:[#allocation3 + $0x1f] sm:$0x1]  ;;  %v8479_v37 = vmax.f32 %v6738_v14, %v6752_v52  ;;  %v1784_v21 = vmax.f32 %v6790_v26, %v1736_v51 }
 0x142   : > { %1060 = vst.msk [vmem:[#allocation3 + $0x48] sm:$0xff] %vm801_vm2, %v1035_v16  ;;  %1068 = vst.msk [vmem:[#allocation3 + $0x88] sm:$0xff] %vm801_vm2, %v1043_v58  ;;  %v1533_v61 = vmax.f32 %v1517_v4, %v1501_v44  ;;  %v1529_v22 = vmax.f32 %v8478_v24, %v1497_v9  ;;  %v1848_v48 = vld [vmem:[#allocation3 + $0xf] sm:$0x1]  ;;  %v1477_v54 = vld [vmem:[#allocation3 + $0xe0] sm:$0x1]  ;;  %v1865_v41 = vmax.f32 %v1817_v8, %v1833_v32 }
 0x143   : > { %1453 = vst.msk [vmem:[#allocation2 + $0xb2] sm:$0xff] %vm801_vm2, %v1420_v20  ;;  %v1769_v30 = vmax.f32 %v8479_v37, %v1721_v38  ;;  %v1646_v11 = vmax.f32 %v1630_v42, %v1598_v47  ;;  %v1493_v12 = vld [vmem:[#allocation3 + $0xe1] sm:$0x1]  ;;  %v1849_v1 = vld [vmem:[#allocation3 + $0x1f] sm:$0x1]  ;;  %v8480_v23 = vmax.f32 %v6762_v5, %v6764_v17  ;;  %v1160_v52 = vld [vmem:[#allocation3 + $0x90] sm:$0xff] }
 0x144   : > { %1550 = vst.msk [vmem:[#allocation2 + $0x60] sm:$0x1] %vm1543_vm3, %v1533_v61  ;;  %v1614_v0 = vld [vmem:[#allocation3 + $0x63] sm:$0x1]  ;;  %v1525_v57 = vmax.f32 %v1477_v54, %v1493_v12  ;;  %v1574_v45 = vld [vmem:[#allocation3 + $0xe0] sm:$0x1]  ;;  %v1881_v46 = vmax.f32 %v1865_v41, %v1849_v1 }
 0x145   : > { %v1880_v16 = vmax.f32 %v8480_v23, %v1848_v48  ;;  %v1590_v59 = vld [vmem:[#allocation3 + $0xe1] sm:$0x1]  ;;  %1546 = vst.msk [vmem:[#allocation2 + $0x20] sm:$0x1] %vm1543_vm3, %v1529_v22  ;;  %v1785_v14 = vmax.f32 %v1769_v30, %v1737_v18  ;;  %1800 = vst.msk [vmem:[#allocation2 + $0xe] sm:$0x1] %vm1543_vm3, %v1784_v21  ;;  %v1662_v26 = vmax.f32 %v1646_v11, %v1614_v0 }
 0x146   : > { %v1509_v19 = vld [vmem:[#allocation3 + $0xe2] sm:$0x1]  ;;  %v1638_v10 = vmax.f32 %v1574_v45, %v1590_v59  ;;  %v1192_v8 = vld [vmem:[#allocation3 + $0x91] sm:$0xff]  ;;  %v685_v5 = vadd.f32 1.0, %v6801_v31  ;;  %v6886_v58 = vld [vmem:[#allocation3 + $0x28] sm:$0xf] }
 0x147   : > { %1896 = vst.msk [vmem:[#allocation2 + $0xf] sm:$0x1] %vm1543_vm3, %v1880_v16  ;;  %v1541_v17 = vmax.f32 %v1525_v57, %v1509_v19  ;;  %v1606_v39 = vld [vmem:[#allocation3 + $0xe2] sm:$0x1]  ;;  %v1320_v62 = vmax.f32 %v1160_v52, %v1192_v8  ;;  %v6888_v38 = vld [vmem:[#allocation3 + $0x29] sm:$0xf] }
 0x148   : > { %1801 = vst.msk [vmem:[#allocation2 + $0x1e] sm:$0x1] %vm1543_vm3, %v1785_v14  ;;  %1678 = vst.msk [vmem:[#allocation2 + $0x61] sm:$0x1] %vm1543_vm3, %v1662_v26  ;;  %v1622_v20 = vld [vmem:[#allocation3 + $0xe3] sm:$0x1]  ;;  %v1654_v4 = vmax.f32 %v1638_v10, %v1606_v39  ;;  %6045 = vrcp.f32 %v685_v5  ;;  %v1307_v19 = vmax.f32 %v6886_v58, %v6888_v38 }
 0x149   : > { %v1224_v63 = vld [vmem:[#allocation3 + $0x92] sm:$0xff]  ;;  %1897 = vst.msk [vmem:[#allocation2 + $0x1f] sm:$0x1] %vm1543_vm3, %v1881_v46  ;;  %1558 = vst.msk [vmem:[#allocation2 + $0xe0] sm:$0x1] %vm1543_vm3, %v1541_v17  ;;  %v1182_v51 = vld [vmem:[#allocation3 + $0x41] sm:$0xff] }
 0x14a   : > { %v1256_v28 = vld [vmem:[#allocation3 + $0x93] sm:$0xff]  ;;  %v1352_v31 = vmax.f32 %v1320_v62, %v1224_v63  ;;  %v6898_v42 = vld [vmem:[#allocation3 + $0x48] sm:$0xf]  ;;  %v1150_v61 = vld [vmem:[#allocation3 + $0x40] sm:$0xff]  ;;  %v1670_v47 = vmax.f32 %v1654_v4, %v1622_v20 }
 0x14b   : > { %v6892_v32 = vld [vmem:[#allocation3 + $0x38] sm:$0xf]  ;;  %v6902_v22 = vld [vmem:[#allocation3 + $0x68] sm:$0xf]  ;;  %v1152_v48 = vld [vmem:[#allocation3 + $0x50] sm:$0xff]  ;;  %v1310_v39 = vmax.f32 %v1150_v61, %v1182_v51 }
 0x14c   : > { %v6894_v44 = vld [vmem:[#allocation3 + $0x39] sm:$0xf]  ;;  %v1183_v37 = vld [vmem:[#allocation3 + $0x49] sm:$0xf]  ;;  %v1184_v30 = vld [vmem:[#allocation3 + $0x51] sm:$0xff]  ;;  %v1384_v54 = vmax.f32 %v1352_v31, %v1256_v28 }
 0x14d   : > { %v6900_v9 = vld [vmem:[#allocation3 + $0x58] sm:$0xf]  ;;  %v1154_v11 = vld [vmem:[#allocation3 + $0x60] sm:$0xff]  ;;  %v6906_v12 = vld [vmem:[#allocation3 + $0x88] sm:$0xf]  ;;  %v1309_v17 = vmax.f32 %v6892_v32, %v6894_v44  ;;  %v1311_v62 = vmax.f32 %v6898_v42, %v1183_v37  ;;  %v1312_v28 = vmax.f32 %v1152_v48, %v1184_v30 }
 0x14e   : > { %v1288_v24 = vld [vmem:[#allocation3 + $0x94] sm:$0xff]  ;;  %v6910_v41 = vld [vmem:[#allocation3 + $0xa8] sm:$0xf]  ;;  %v1158_v59 = vld [vmem:[#allocation3 + $0x80] sm:$0xff]  ;;  %1686 = vst.msk [vmem:[#allocation2 + $0xe1] sm:$0x1] %vm1543_vm3, %v1670_v47 }
 0x14f   : > { %v6904_v18 = vld [vmem:[#allocation3 + $0x78] sm:$0xf]  ;;  %v1186_v16 = vld [vmem:[#allocation3 + $0x61] sm:$0xff]  ;;  %v1187_v0 = vld [vmem:[#allocation3 + $0x69] sm:$0xf]  ;;  %v1416_v10 = vmax.f32 %v1384_v54, %v1288_v24 }
 0x150   : > { %v1185_v21 = vld [vmem:[#allocation3 + $0x59] sm:$0xf]  ;;  %v1188_v57 = vld [vmem:[#allocation3 + $0x71] sm:$0xff]  ;;  %v1190_v52 = vld [vmem:[#allocation3 + $0x81] sm:$0xff]  ;;  %v1314_v47 = vmax.f32 %v1154_v11, %v1186_v16  ;;  %v1315_v54 = vmax.f32 %v6902_v22, %v1187_v0 }
 0x151   : > { %v6908_v1 = vld [vmem:[#allocation3 + $0x98] sm:$0xf]  ;;  %v1156_v45 = vld [vmem:[#allocation3 + $0x70] sm:$0xff]  ;;  %v1191_v26 = vld [vmem:[#allocation3 + $0x89] sm:$0xf]  ;;  %v1313_v31 = vmax.f32 %v6900_v9, %v1185_v21  ;;  %1449 = vst.msk [vmem:[#allocation2 + $0x92] sm:$0xff] %vm801_vm2, %v1416_v10  ;;  %v1318_v44 = vmax.f32 %v1158_v59, %v1190_v52 }
 0x152   : > { %v6912_v23 = vld [vmem:[#allocation3 + $0xb8] sm:$0xf]  ;;  %v1195_v46 = vld [vmem:[#allocation3 + $0xa9] sm:$0xf]  ;;  %v1316_v53 = vmax.f32 %v1156_v45, %v1188_v57  ;;  %v1319_v37 = vmax.f32 %v6906_v12, %v1191_v26 }
 0x153   : > { %v1189_v14 = vld [vmem:[#allocation3 + $0x79] sm:$0xf]  ;;  %v1211_v20 = vld [vmem:[#allocation3 + $0x2a] sm:$0xf]  ;;  %v1214_v63 = vld [vmem:[#allocation3 + $0x42] sm:$0xff]  ;;  %v1323_v9 = vmax.f32 %v6910_v41, %v1195_v46 }
 0x154   : > { %v1193_v8 = vld [vmem:[#allocation3 + $0x99] sm:$0xf]  ;;  %v1215_v58 = vld [vmem:[#allocation3 + $0x4a] sm:$0xf]  ;;  %v1317_v32 = vmax.f32 %v6904_v18, %v1189_v14  ;;  %v1218_v51 = vld [vmem:[#allocation3 + $0x62] sm:$0xff]  ;;  %v1339_v10 = vmax.f32 %v1307_v19, %v1211_v20  ;;  %v1342_v0 = vmax.f32 %v1310_v39, %v1214_v63 }
 0x155   : > { %v1197_v5 = vld [vmem:[#allocation3 + $0xb9] sm:$0xf]  ;;  %v1219_v42 = vld [vmem:[#allocation3 + $0x6a] sm:$0xf]  ;;  %v1321_v30 = vmax.f32 %v6908_v1, %v1193_v8  ;;  %v1222_v11 = vld [vmem:[#allocation3 + $0x82] sm:$0xff]  ;;  %v6928_v57 = vmax.f32 %v1311_v62, %v1215_v58  ;;  %v6930_v12 = vmax.f32 %v1314_v47, %v1218_v51 }
 0x156   : > { %v1213_v4 = vld [vmem:[#allocation3 + $0x3a] sm:$0xf]  ;;  %v1216_v38 = vld [vmem:[#allocation3 + $0x52] sm:$0xff]  ;;  %v1325_v21 = vmax.f32 %v6912_v23, %v1197_v5  ;;  %v1223_v16 = vld [vmem:[#allocation3 + $0x8a] sm:$0xf]  ;;  %v6932_v8 = vmax.f32 %v1315_v54, %v1219_v42  ;;  %v6938_v19 = vmax.f32 %v1318_v44, %v1222_v11 }
 0x157   : > { %v1217_v24 = vld [vmem:[#allocation3 + $0x5a] sm:$0xf]  ;;  %v1220_v61 = vld [vmem:[#allocation3 + $0x72] sm:$0xff]  ;;  %v1341_v22 = vmax.f32 %v1309_v17, %v1213_v4  ;;  %v1227_v45 = vld [vmem:[#allocation3 + $0xaa] sm:$0xf]  ;;  %v1344_v14 = vmax.f32 %v1312_v28, %v1216_v38  ;;  %v6940_v62 = vmax.f32 %v1319_v37, %v1223_v16  ;;  %v6046_v28 = vpop.eup %6045 }
 0x158   : > { %v1221_v48 = vld [vmem:[#allocation3 + $0x7a] sm:$0xf]  ;;  %v1345_v52 = vmax.f32 %v1313_v31, %v1217_v24  ;;  %v1243_v1 = vld [vmem:[#allocation3 + $0x2b] sm:$0xf]  ;;  %v1246_v41 = vld [vmem:[#allocation3 + $0x43] sm:$0xff]  ;;  %v6934_v23 = vmax.f32 %v1316_v53, %v1220_v61  ;;  %v6944_v4 = vmax.f32 %v1323_v9, %v1227_v45 }
 0x159   : > { %v1225_v18 = vld [vmem:[#allocation3 + $0x9a] sm:$0xf]  ;;  %v6936_v46 = vmax.f32 %v1317_v32, %v1221_v48  ;;  %v1247_v5 = vld [vmem:[#allocation3 + $0x4b] sm:$0xf]  ;;  %v1250_v31 = vld [vmem:[#allocation3 + $0x63] sm:$0xff]  ;;  %v1371_v58 = vmax.f32 %v1339_v10, %v1243_v1  ;;  %v1374_v24 = vmax.f32 %v1342_v0, %v1246_v41 }
 0x15a   : > { %v1229_v59 = vld [vmem:[#allocation3 + $0xba] sm:$0xf]  ;;  %v6942_v20 = vmax.f32 %v1321_v30, %v1225_v18  ;;  %v1251_v47 = vld [vmem:[#allocation3 + $0x6b] sm:$0xf]  ;;  %v1375_v54 = vmax.f32 %v6928_v57, %v1247_v5  ;;  %v1254_v44 = vld [vmem:[#allocation3 + $0x83] sm:$0xff]  ;;  %v1378_v37 = vmax.f32 %v6930_v12, %v1250_v31  ;;  %v6951_v30 = vmul.f32 %v6046_v28, %v6574_v2 }
 0x15b   : > { %v1245_v26 = vld [vmem:[#allocation3 + $0x3b] sm:$0xf]  ;;  %v1248_v17 = vld [vmem:[#allocation3 + $0x53] sm:$0xff]  ;;  %v6946_v63 = vmax.f32 %v1325_v21, %v1229_v59  ;;  %v1255_v51 = vld [vmem:[#allocation3 + $0x8b] sm:$0xf]  ;;  %v1379_v11 = vmax.f32 %v6932_v8, %v1251_v47 }
 0x15c   : > { %v1249_v39 = vld [vmem:[#allocation3 + $0x5b] sm:$0xf]  ;;  %v1252_v53 = vld [vmem:[#allocation3 + $0x73] sm:$0xff]  ;;  %v1373_v38 = vmax.f32 %v1341_v22, %v1245_v26  ;;  %v1376_v42 = vmax.f32 %v1344_v14, %v1248_v17  ;;  %8481 = vst [vmem:[#allocation29_spill] sm:$0xff] %v6951_v30  ;;  %v1259_v21 = vld [vmem:[#allocation3 + $0xab] sm:$0xf]  ;;  %v1382_v22 = vmax.f32 %v6938_v19, %v1254_v44  ;;  %v1383_v45 = vmax.f32 %v6940_v62, %v1255_v51 }
 0x15d   : > { %v1253_v32 = vld [vmem:[#allocation3 + $0x7b] sm:$0xf]  ;;  %v1377_v61 = vmax.f32 %v1345_v52, %v1249_v39  ;;  %v1380_v16 = vmax.f32 %v6934_v23, %v1252_v53  ;;  %v1275_v0 = vld [vmem:[#allocation3 + $0x2c] sm:$0xf]  ;;  %v1278_v18 = vld [vmem:[#allocation3 + $0x44] sm:$0xff]  ;;  %v1387_v2 = vmax.f32 %v6944_v4, %v1259_v21  ;;  %831 = vst.msk [vmem:[#allocation2 + $0xe8] sm:$0xff] %vm801_vm2, %v6951_v30 }
 0x15e   : > { %v1257_v9 = vld [vmem:[#allocation3 + $0x9b] sm:$0xf]  ;;  %v1381_v10 = vmax.f32 %v6936_v46, %v1253_v32  ;;  %v6960_v14 = vld [vmem:[#allocation3 + $0x30] sm:$0x1]  ;;  %v6962_v52 = vld [vmem:[#allocation3 + $0x31] sm:$0x1]  ;;  %v1403_v23 = vmax.f32 %v1371_v58, %v1275_v0  ;;  %v1406_v19 = vmax.f32 %v1374_v24, %v1278_v18 }
 0x15f   : > { %v1261_v48 = vld [vmem:[#allocation3 + $0xbb] sm:$0xf]  ;;  %v1385_v59 = vmax.f32 %v6942_v20, %v1257_v9  ;;  %v1279_v1 = vld [vmem:[#allocation3 + $0x4c] sm:$0xf]  ;;  %v1282_v5 = vld [vmem:[#allocation3 + $0x64] sm:$0xff] }
 0x160   : > { %v1277_v57 = vld [vmem:[#allocation3 + $0x3c] sm:$0xf]  ;;  %v1280_v26 = vld [vmem:[#allocation3 + $0x54] sm:$0xff]  ;;  %v1389_v8 = vmax.f32 %v6946_v63, %v1261_v48  ;;  %v1283_v17 = vld [vmem:[#allocation3 + $0x6c] sm:$0xf]  ;;  %v1407_v62 = vmax.f32 %v1375_v54, %v1279_v1  ;;  %v1410_v58 = vmax.f32 %v1378_v37, %v1282_v5  ;;  %1439 = vst.msk [vmem:[#allocation2 + $0x42] sm:$0xff] %vm801_vm2, %v1406_v19 }
 0x161   : > { %v1281_v41 = vld [vmem:[#allocation3 + $0x5c] sm:$0xf]  ;;  %v1405_v46 = vmax.f32 %v1373_v38, %v1277_v57  ;;  %v1284_v39 = vld [vmem:[#allocation3 + $0x74] sm:$0xff]  ;;  %v1408_v20 = vmax.f32 %v1376_v42, %v1280_v26  ;;  %v6969_v28 = vld [vmem:[#allocation3 + $0xa0] sm:$0x1]  ;;  %v1411_v38 = vmax.f32 %v1379_v11, %v1283_v17 }
 0x162   : > { %v1409_v4 = vmax.f32 %v1377_v61, %v1281_v41  ;;  %v6971_v31 = vld [vmem:[#allocation3 + $0xb0] sm:$0x1]  ;;  %v6973_v47 = vld [vmem:[#allocation3 + $0xa1] sm:$0x1]  ;;  %v6975_v53 = vld [vmem:[#allocation3 + $0xb1] sm:$0x1]  ;;  %v1412_v24 = vmax.f32 %v1380_v16, %v1284_v39 }
 0x163   : > { %v1285_v32 = vld [vmem:[#allocation3 + $0x7c] sm:$0xf]  ;;  %v1286_v44 = vld [vmem:[#allocation3 + $0x84] sm:$0xff]  ;;  %v1287_v63 = vld [vmem:[#allocation3 + $0x8c] sm:$0xf]  ;;  %1441 = vst.msk [vmem:[#allocation2 + $0x52] sm:$0xff] %vm801_vm2, %v1408_v20 }
 0x164   : > { %1436 = vst.msk [vmem:[#allocation2 + $0x2a] sm:$0xf] %vm1431_vm4, %v1403_v23  ;;  %1438 = vst.msk [vmem:[#allocation2 + $0x3a] sm:$0xf] %vm1431_vm4, %v1405_v46  ;;  %v1289_v54 = vld [vmem:[#allocation3 + $0x9c] sm:$0xf]  ;;  %v1413_v61 = vmax.f32 %v1381_v10, %v1285_v32  ;;  %v1414_v9 = vmax.f32 %v1382_v22, %v1286_v44  ;;  %v1415_v21 = vmax.f32 %v1383_v45, %v1287_v63 }
 0x165   : > { %v1291_v51 = vld [vmem:[#allocation3 + $0xac] sm:$0xf]  ;;  %v1293_v42 = vld [vmem:[#allocation3 + $0xbc] sm:$0xf]  ;;  %1440 = vst.msk [vmem:[#allocation2 + $0x4a] sm:$0xf] %vm1431_vm4, %v1407_v62  ;;  %v1417_v37 = vmax.f32 %v1385_v59, %v1289_v54  ;;  %v1514_v22 = vmax.f32 %v6960_v14, %v6962_v52  ;;  %v1521_v14 = vmax.f32 %v6969_v28, %v6973_v47  ;;  %v1522_v52 = vmax.f32 %v6971_v31, %v6975_v53 }
 0x166   : > { %1442 = vst.msk [vmem:[#allocation2 + $0x5a] sm:$0xf] %vm1431_vm4, %v1409_v4  ;;  %v1419_v48 = vmax.f32 %v1387_v2, %v1291_v51  ;;  %v1421_v11 = vmax.f32 %v1389_v8, %v1293_v42  ;;  %1444 = vst.msk [vmem:[#allocation2 + $0x6a] sm:$0xf] %vm1431_vm4, %v1411_v38  ;;  %v1467_v16 = vld [vmem:[#allocation3 + $0x40] sm:$0x1] }
 0x167   : > { %1443 = vst.msk [vmem:[#allocation2 + $0x62] sm:$0xff] %vm801_vm2, %v1410_v58  ;;  %1445 = vst.msk [vmem:[#allocation2 + $0x72] sm:$0xff] %vm801_vm2, %v1412_v24  ;;  %v1468_v0 = vld [vmem:[#allocation3 + $0x50] sm:$0x1]  ;;  %v1471_v57 = vld [vmem:[#allocation3 + $0x80] sm:$0x1] }
 0x168   : > { %v1470_v10 = vld [vmem:[#allocation3 + $0x70] sm:$0x1]  ;;  %1446 = vst.msk [vmem:[#allocation2 + $0x7a] sm:$0xf] %vm1431_vm4, %v1413_v61  ;;  %1448 = vst.msk [vmem:[#allocation2 + $0x8a] sm:$0xf] %vm1431_vm4, %v1415_v21 }
 0x169   : > { %1447 = vst.msk [vmem:[#allocation2 + $0x82] sm:$0xff] %vm801_vm2, %v1414_v9  ;;  %v1472_v18 = vld [vmem:[#allocation3 + $0x90] sm:$0x1]  ;;  %v1483_v45 = vld [vmem:[#allocation3 + $0x41] sm:$0x1]  ;;  %v7175_v34 = vld [vmem:[#allocation2 + $0xe8] sm:$0xff] }
 0x16a   : > { %1450 = vst.msk [vmem:[#allocation2 + $0x9a] sm:$0xf] %vm1431_vm4, %v1417_v37  ;;  %1452 = vst.msk [vmem:[#allocation2 + $0xaa] sm:$0xf] %vm1431_vm4, %v1419_v48  ;;  %v1484_v59 = vld [vmem:[#allocation3 + $0x51] sm:$0x1]  ;;  %v1515_v26 = vmax.f32 %v1467_v16, %v1483_v45 }
 0x16b   : > { %1454 = vst.msk [vmem:[#allocation2 + $0xba] sm:$0xf] %vm1431_vm4, %v1421_v11  ;;  %v1486_v2 = vld [vmem:[#allocation3 + $0x71] sm:$0x1]  ;;  %v1487_v1 = vld [vmem:[#allocation3 + $0x81] sm:$0x1]  ;;  %v1516_v46 = vmax.f32 %v1468_v0, %v1484_v59 }
 0x16c   : > { %v1488_v41 = vld [vmem:[#allocation3 + $0x91] sm:$0x1]  ;;  %v1498_v8 = vld [vmem:[#allocation3 + $0x32] sm:$0x1]  ;;  %v1499_v23 = vld [vmem:[#allocation3 + $0x42] sm:$0x1]  ;;  %v1518_v19 = vmax.f32 %v1470_v10, %v1486_v2  ;;  %v1519_v5 = vmax.f32 %v1471_v57, %v1487_v1 }
 0x16d   : > { %v1500_v17 = vld [vmem:[#allocation3 + $0x52] sm:$0x1]  ;;  %v1503_v62 = vld [vmem:[#allocation3 + $0x82] sm:$0x1]  ;;  %v1520_v20 = vmax.f32 %v1472_v18, %v1488_v41  ;;  %v1530_v4 = vmax.f32 %v1514_v22, %v1498_v8  ;;  %v1531_v32 = vmax.f32 %v1515_v26, %v1499_v23  ;;  %v1562_v54 = vld [vmem:[#allocation3 + $0x20] sm:$0x1] }
 0x16e   : > { %v1502_v39 = vld [vmem:[#allocation3 + $0x72] sm:$0x1]  ;;  %v1505_v63 = vld [vmem:[#allocation3 + $0xa2] sm:$0x1]  ;;  %v1532_v38 = vmax.f32 %v1516_v46, %v1500_v17  ;;  %v1535_v47 = vmax.f32 %v1519_v5, %v1503_v62  ;;  %v1563_v51 = vld [vmem:[#allocation3 + $0x30] sm:$0x1] }
 0x16f   : > { %v1504_v44 = vld [vmem:[#allocation3 + $0x92] sm:$0x1]  ;;  %v1534_v28 = vmax.f32 %v1518_v19, %v1502_v39  ;;  %v1537_v31 = vmax.f32 %v1521_v14, %v1505_v63  ;;  %1547 = vst.msk [vmem:[#allocation2 + $0x30] sm:$0x1] %vm1543_vm3, %v1530_v4  ;;  %1548 = vst.msk [vmem:[#allocation2 + $0x40] sm:$0x1] %vm1543_vm3, %v1531_v32 }
 0x170   : > { %v1506_v58 = vld [vmem:[#allocation3 + $0xb2] sm:$0x1]  ;;  %v1536_v24 = vmax.f32 %v1520_v20, %v1504_v44  ;;  %v1564_v42 = vld [vmem:[#allocation3 + $0x40] sm:$0x1]  ;;  %1549 = vst.msk [vmem:[#allocation2 + $0x50] sm:$0x1] %vm1543_vm3, %v1532_v38 }
 0x171   : > { %v1538_v53 = vmax.f32 %v1522_v52, %v1506_v58  ;;  %1551 = vst.msk [vmem:[#allocation2 + $0x70] sm:$0x1] %vm1543_vm3, %v1534_v28  ;;  %1552 = vst.msk [vmem:[#allocation2 + $0x80] sm:$0x1] %vm1543_vm3, %v1535_v47  ;;  %v1565_v61 = vld [vmem:[#allocation3 + $0x50] sm:$0x1] }
 0x172   : > { %v1567_v9 = vld [vmem:[#allocation3 + $0x70] sm:$0x1]  ;;  %v1568_v21 = vld [vmem:[#allocation3 + $0x80] sm:$0x1]  ;;  %1553 = vst.msk [vmem:[#allocation2 + $0x90] sm:$0x1] %vm1543_vm3, %v1536_v24 }
 0x173   : > { %1554 = vst.msk [vmem:[#allocation2 + $0xa0] sm:$0x1] %vm1543_vm3, %v1537_v31  ;;  %1555 = vst.msk [vmem:[#allocation2 + $0xb0] sm:$0x1] %vm1543_vm3, %v1538_v53  ;;  %v1569_v37 = vld [vmem:[#allocation3 + $0x90] sm:$0x1] }
 0x174   : > { %v1570_v48 = vld [vmem:[#allocation3 + $0xa0] sm:$0x1]  ;;  %v1571_v11 = vld [vmem:[#allocation3 + $0xb0] sm:$0x1]  ;;  %v1578_v16 = vld [vmem:[#allocation3 + $0x21] sm:$0x1] }
 0x175   : > { %v1579_v0 = vld [vmem:[#allocation3 + $0x31] sm:$0x1]  ;;  %v1580_v10 = vld [vmem:[#allocation3 + $0x41] sm:$0x1]  ;;  %v1626_v45 = vmax.f32 %v1562_v54, %v1578_v16  ;;  %v1594_v23 = vld [vmem:[#allocation3 + $0x22] sm:$0x1] }
 0x176   : > { %v1581_v22 = vld [vmem:[#allocation3 + $0x51] sm:$0x1]  ;;  %v1584_v18 = vld [vmem:[#allocation3 + $0x81] sm:$0x1]  ;;  %v1627_v59 = vmax.f32 %v1563_v51, %v1579_v0  ;;  %v1628_v2 = vmax.f32 %v1564_v42, %v1580_v10  ;;  %v1595_v46 = vld [vmem:[#allocation3 + $0x32] sm:$0x1] }
 0x177   : > { %v1583_v57 = vld [vmem:[#allocation3 + $0x71] sm:$0x1]  ;;  %v1586_v26 = vld [vmem:[#allocation3 + $0xa1] sm:$0x1]  ;;  %v1629_v52 = vmax.f32 %v1565_v61, %v1581_v22  ;;  %v1632_v8 = vmax.f32 %v1568_v21, %v1584_v18  ;;  %v1596_v19 = vld [vmem:[#allocation3 + $0x42] sm:$0x1]  ;;  %v1642_v32 = vmax.f32 %v1626_v45, %v1594_v23 }
 0x178   : > { %v1585_v1 = vld [vmem:[#allocation3 + $0x91] sm:$0x1]  ;;  %v1631_v41 = vmax.f32 %v1567_v9, %v1583_v57  ;;  %v1634_v17 = vmax.f32 %v1570_v48, %v1586_v26  ;;  %v1597_v62 = vld [vmem:[#allocation3 + $0x52] sm:$0x1]  ;;  %v1600_v4 = vld [vmem:[#allocation3 + $0x82] sm:$0x1]  ;;  %v1643_v44 = vmax.f32 %v1627_v59, %v1595_v46  ;;  %v1644_v63 = vmax.f32 %v1628_v2, %v1596_v19 }
 0x179   : > { %v1587_v14 = vld [vmem:[#allocation3 + $0xb1] sm:$0x1]  ;;  %v1633_v5 = vmax.f32 %v1569_v37, %v1585_v1  ;;  %v1599_v20 = vld [vmem:[#allocation3 + $0x72] sm:$0x1]  ;;  %v1602_v38 = vld [vmem:[#allocation3 + $0xa2] sm:$0x1]  ;;  %v1645_v47 = vmax.f32 %v1629_v52, %v1597_v62  ;;  %v1648_v31 = vmax.f32 %v1632_v8, %v1600_v4 }
 0x17a   : > { %v1635_v39 = vmax.f32 %v1571_v11, %v1587_v14  ;;  %v1601_v58 = vld [vmem:[#allocation3 + $0x92] sm:$0x1]  ;;  %v1647_v24 = vmax.f32 %v1631_v41, %v1599_v20  ;;  %v1610_v53 = vld [vmem:[#allocation3 + $0x23] sm:$0x1]  ;;  %v1611_v54 = vld [vmem:[#allocation3 + $0x33] sm:$0x1]  ;;  %v1650_v61 = vmax.f32 %v1634_v17, %v1602_v38 }
 0x17b   : > { %v1603_v28 = vld [vmem:[#allocation3 + $0xb2] sm:$0x1]  ;;  %v1612_v51 = vld [vmem:[#allocation3 + $0x43] sm:$0x1]  ;;  %v1649_v42 = vmax.f32 %v1633_v5, %v1601_v58  ;;  %v1613_v21 = vld [vmem:[#allocation3 + $0x53] sm:$0x1]  ;;  %v1658_v11 = vmax.f32 %v1642_v32, %v1610_v53  ;;  %v1659_v16 = vmax.f32 %v1643_v44, %v1611_v54 }
 0x17c   : > { %v1651_v9 = vmax.f32 %v1635_v39, %v1603_v28  ;;  %v1615_v37 = vld [vmem:[#allocation3 + $0x73] sm:$0x1]  ;;  %v1616_v48 = vld [vmem:[#allocation3 + $0x83] sm:$0x1]  ;;  %v1660_v0 = vmax.f32 %v1644_v63, %v1612_v51  ;;  %v1661_v18 = vmax.f32 %v1645_v47, %v1613_v21  ;;  %v1690_v14 = vld [vmem:[#allocation3 + $0x2c] sm:$0x1] }
 0x17d   : > { %v1617_v10 = vld [vmem:[#allocation3 + $0x93] sm:$0x1]  ;;  %v1618_v22 = vld [vmem:[#allocation3 + $0xa3] sm:$0x1]  ;;  %v1663_v45 = vmax.f32 %v1647_v24, %v1615_v37  ;;  %v1664_v59 = vmax.f32 %v1648_v31, %v1616_v48  ;;  %1674 = vst.msk [vmem:[#allocation2 + $0x21] sm:$0x1] %vm1543_vm3, %v1658_v11 }
 0x17e   : > { %v1619_v57 = vld [vmem:[#allocation3 + $0xb3] sm:$0x1]  ;;  %v1665_v2 = vmax.f32 %v1649_v42, %v1617_v10  ;;  %v1666_v1 = vmax.f32 %v1650_v61, %v1618_v22  ;;  %1675 = vst.msk [vmem:[#allocation2 + $0x31] sm:$0x1] %vm1543_vm3, %v1659_v16  ;;  %1676 = vst.msk [vmem:[#allocation2 + $0x41] sm:$0x1] %vm1543_vm3, %v1660_v0 }
 0x17f   : > { %v1667_v26 = vmax.f32 %v1651_v9, %v1619_v57  ;;  %v1691_v52 = vld [vmem:[#allocation3 + $0x3c] sm:$0x1]  ;;  %v1692_v41 = vld [vmem:[#allocation3 + $0x4c] sm:$0x1]  ;;  %1677 = vst.msk [vmem:[#allocation2 + $0x51] sm:$0x1] %vm1543_vm3, %v1661_v18 }
 0x180   : > { %1679 = vst.msk [vmem:[#allocation2 + $0x71] sm:$0x1] %vm1543_vm3, %v1663_v45  ;;  %1680 = vst.msk [vmem:[#allocation2 + $0x81] sm:$0x1] %vm1543_vm3, %v1664_v59  ;;  %v1693_v8 = vld [vmem:[#allocation3 + $0x5c] sm:$0x1] }
 0x181   : > { %v1694_v23 = vld [vmem:[#allocation3 + $0x6c] sm:$0x1]  ;;  %v1695_v46 = vld [vmem:[#allocation3 + $0x7c] sm:$0x1]  ;;  %1681 = vst.msk [vmem:[#allocation2 + $0x91] sm:$0x1] %vm1543_vm3, %v1665_v2 }
 0x182   : > { %1682 = vst.msk [vmem:[#allocation2 + $0xa1] sm:$0x1] %vm1543_vm3, %v1666_v1  ;;  %1683 = vst.msk [vmem:[#allocation2 + $0xb1] sm:$0x1] %vm1543_vm3, %v1667_v26  ;;  %v1696_v19 = vld [vmem:[#allocation3 + $0x8c] sm:$0x1] }
 0x183   : > { %v1697_v5 = vld [vmem:[#allocation3 + $0x9c] sm:$0x1]  ;;  %v1698_v17 = vld [vmem:[#allocation3 + $0xac] sm:$0x1]  ;;  %v1706_v62 = vld [vmem:[#allocation3 + $0x2d] sm:$0x1] }
 0x184   : > { %v1699_v39 = vld [vmem:[#allocation3 + $0xbc] sm:$0x1]  ;;  %v1707_v20 = vld [vmem:[#allocation3 + $0x3d] sm:$0x1]  ;;  %v1708_v4 = vld [vmem:[#allocation3 + $0x4d] sm:$0x1]  ;;  %v1754_v63 = vmax.f32 %v1690_v14, %v1706_v62 }
 0x185   : > { %v1709_v32 = vld [vmem:[#allocation3 + $0x5d] sm:$0x1]  ;;  %v1710_v44 = vld [vmem:[#allocation3 + $0x6d] sm:$0x1]  ;;  %v1755_v58 = vmax.f32 %v1691_v52, %v1707_v20  ;;  %v1756_v24 = vmax.f32 %v1692_v41, %v1708_v4  ;;  %v1722_v42 = vld [vmem:[#allocation3 + $0x2e] sm:$0x1] }
 0x186   : > { %v1711_v38 = vld [vmem:[#allocation3 + $0x7d] sm:$0x1]  ;;  %v1712_v28 = vld [vmem:[#allocation3 + $0x8d] sm:$0x1]  ;;  %v1757_v31 = vmax.f32 %v1693_v8, %v1709_v32  ;;  %v1758_v53 = vmax.f32 %v1694_v23, %v1710_v44  ;;  %v1723_v37 = vld [vmem:[#allocation3 + $0x3e] sm:$0x1]  ;;  %v1770_v10 = vmax.f32 %v1754_v63, %v1722_v42 }
 0x187   : > { %v1713_v47 = vld [vmem:[#allocation3 + $0x9d] sm:$0x1]  ;;  %v1714_v54 = vld [vmem:[#allocation3 + $0xad] sm:$0x1]  ;;  %v1759_v61 = vmax.f32 %v1695_v46, %v1711_v38  ;;  %v1760_v9 = vmax.f32 %v1696_v19, %v1712_v28  ;;  %v1724_v48 = vld [vmem:[#allocation3 + $0x4e] sm:$0x1]  ;;  %v1771_v45 = vmax.f32 %v1755_v58, %v1723_v37 }
 0x188   : > { %v1715_v51 = vld [vmem:[#allocation3 + $0xbd] sm:$0x1]  ;;  %v1761_v21 = vmax.f32 %v1697_v5, %v1713_v47  ;;  %v1725_v11 = vld [vmem:[#allocation3 + $0x5e] sm:$0x1]  ;;  %v1762_v16 = vmax.f32 %v1698_v17, %v1714_v54  ;;  %v1726_v22 = vld [vmem:[#allocation3 + $0x6e] sm:$0x1]  ;;  %v1772_v59 = vmax.f32 %v1756_v24, %v1724_v48 }
 0x189   : > { %v1763_v0 = vmax.f32 %v1699_v39, %v1715_v51  ;;  %v1727_v57 = vld [vmem:[#allocation3 + $0x7e] sm:$0x1]  ;;  %v1728_v18 = vld [vmem:[#allocation3 + $0x8e] sm:$0x1]  ;;  %v1773_v2 = vmax.f32 %v1757_v31, %v1725_v11  ;;  %v1774_v52 = vmax.f32 %v1758_v53, %v1726_v22  ;;  %v1738_v23 = vld [vmem:[#allocation3 + $0x2f] sm:$0x1] }
 0x18a   : > { %v1729_v1 = vld [vmem:[#allocation3 + $0x9e] sm:$0x1]  ;;  %v1730_v26 = vld [vmem:[#allocation3 + $0xae] sm:$0x1]  ;;  %v1775_v41 = vmax.f32 %v1759_v61, %v1727_v57  ;;  %v1776_v8 = vmax.f32 %v1760_v9, %v1728_v18  ;;  %v1739_v46 = vld [vmem:[#allocation3 + $0x3f] sm:$0x1]  ;;  %v1786_v32 = vmax.f32 %v1770_v10, %v1738_v23 }
 0x18b   : > { %v1731_v14 = vld [vmem:[#allocation3 + $0xbe] sm:$0x1]  ;;  %v1740_v19 = vld [vmem:[#allocation3 + $0x4f] sm:$0x1]  ;;  %v1777_v5 = vmax.f32 %v1761_v21, %v1729_v1  ;;  %v1778_v62 = vmax.f32 %v1762_v16, %v1730_v26  ;;  %v1741_v39 = vld [vmem:[#allocation3 + $0x5f] sm:$0x1]  ;;  %v1787_v44 = vmax.f32 %v1771_v45, %v1739_v46  ;;  %v979_v46 = vmax.f32 %v6545_v40, %v6612_v36 }
 0x18c   : > { %v1779_v17 = vmax.f32 %v1763_v0, %v1731_v14  ;;  %v1742_v20 = vld [vmem:[#allocation3 + $0x6f] sm:$0x1]  ;;  %v1743_v4 = vld [vmem:[#allocation3 + $0x7f] sm:$0x1]  ;;  %v1788_v63 = vmax.f32 %v1772_v59, %v1740_v19  ;;  %v1789_v47 = vmax.f32 %v1773_v2, %v1741_v39  ;;  %1802 = vst.msk [vmem:[#allocation2 + $0x2e] sm:$0x1] %vm1543_vm3, %v1786_v32 }
 0x18d   : > { %v1744_v58 = vld [vmem:[#allocation3 + $0x8f] sm:$0x1]  ;;  %v1745_v38 = vld [vmem:[#allocation3 + $0x9f] sm:$0x1]  ;;  %v1790_v24 = vmax.f32 %v1774_v52, %v1742_v20  ;;  %v1791_v31 = vmax.f32 %v1775_v41, %v1743_v4  ;;  %1803 = vst.msk [vmem:[#allocation2 + $0x3e] sm:$0x1] %vm1543_vm3, %v1787_v44 }
 0x18e   : > { %v1746_v28 = vld [vmem:[#allocation3 + $0xaf] sm:$0x1]  ;;  %v1747_v53 = vld [vmem:[#allocation3 + $0xbf] sm:$0x1]  ;;  %v1792_v54 = vmax.f32 %v1776_v8, %v1744_v58  ;;  %v1793_v51 = vmax.f32 %v1777_v5, %v1745_v38  ;;  %1804 = vst.msk [vmem:[#allocation2 + $0x4e] sm:$0x1] %vm1543_vm3, %v1788_v63 }
 0x18f   : > { %v1794_v42 = vmax.f32 %v1778_v62, %v1746_v28  ;;  %v1818_v61 = vld [vmem:[#allocation3 + $0x2d] sm:$0x1]  ;;  %v1819_v9 = vld [vmem:[#allocation3 + $0x3d] sm:$0x1]  ;;  %v1795_v21 = vmax.f32 %v1779_v17, %v1747_v53  ;;  %1805 = vst.msk [vmem:[#allocation2 + $0x5e] sm:$0x1] %vm1543_vm3, %v1789_v47 }
 0x190   : > { %1806 = vst.msk [vmem:[#allocation2 + $0x6e] sm:$0x1] %vm1543_vm3, %v1790_v24  ;;  %1807 = vst.msk [vmem:[#allocation2 + $0x7e] sm:$0x1] %vm1543_vm3, %v1791_v31  ;;  %v1820_v37 = vld [vmem:[#allocation3 + $0x4d] sm:$0x1] }
 0x191   : > { %v1821_v48 = vld [vmem:[#allocation3 + $0x5d] sm:$0x1]  ;;  %v1822_v11 = vld [vmem:[#allocation3 + $0x6d] sm:$0x1]  ;;  %1808 = vst.msk [vmem:[#allocation2 + $0x8e] sm:$0x1] %vm1543_vm3, %v1792_v54 }
 0x192   : > { %1809 = vst.msk [vmem:[#allocation2 + $0x9e] sm:$0x1] %vm1543_vm3, %v1793_v51  ;;  %1810 = vst.msk [vmem:[#allocation2 + $0xae] sm:$0x1] %vm1543_vm3, %v1794_v42  ;;  %v1823_v16 = vld [vmem:[#allocation3 + $0x7d] sm:$0x1] }
 0x193   : > { %v1824_v0 = vld [vmem:[#allocation3 + $0x8d] sm:$0x1]  ;;  %v1825_v10 = vld [vmem:[#allocation3 + $0x9d] sm:$0x1]  ;;  %1811 = vst.msk [vmem:[#allocation2 + $0xbe] sm:$0x1] %vm1543_vm3, %v1795_v21 }
 0x194   : > { %v1826_v22 = vld [vmem:[#allocation3 + $0xad] sm:$0x1]  ;;  %v1827_v57 = vld [vmem:[#allocation3 + $0xbd] sm:$0x1]  ;;  %v1834_v18 = vld [vmem:[#allocation3 + $0x2e] sm:$0x1] }
 0x195   : > { %v1835_v45 = vld [vmem:[#allocation3 + $0x3e] sm:$0x1]  ;;  %v1836_v59 = vld [vmem:[#allocation3 + $0x4e] sm:$0x1]  ;;  %v1866_v1 = vmax.f32 %v1818_v61, %v1834_v18  ;;  %v1850_v44 = vld [vmem:[#allocation3 + $0x2f] sm:$0x1] }
 0x196   : > { %v1837_v2 = vld [vmem:[#allocation3 + $0x5e] sm:$0x1]  ;;  %v1838_v26 = vld [vmem:[#allocation3 + $0x6e] sm:$0x1]  ;;  %v1867_v41 = vmax.f32 %v1819_v9, %v1835_v45  ;;  %v1868_v8 = vmax.f32 %v1820_v37, %v1836_v59  ;;  %v1851_v63 = vld [vmem:[#allocation3 + $0x3f] sm:$0x1] }
 0x197   : > { %v1839_v14 = vld [vmem:[#allocation3 + $0x7e] sm:$0x1]  ;;  %v1840_v52 = vld [vmem:[#allocation3 + $0x8e] sm:$0x1]  ;;  %v1869_v23 = vmax.f32 %v1821_v48, %v1837_v2  ;;  %v1870_v17 = vmax.f32 %v1822_v11, %v1838_v26  ;;  %v1852_v58 = vld [vmem:[#allocation3 + $0x4f] sm:$0x1]  ;;  %v1882_v54 = vmax.f32 %v1866_v1, %v1850_v44 }
 0x198   : > { %v1841_v19 = vld [vmem:[#allocation3 + $0x9e] sm:$0x1]  ;;  %v1842_v5 = vld [vmem:[#allocation3 + $0xae] sm:$0x1]  ;;  %v1871_v39 = vmax.f32 %v1823_v16, %v1839_v14  ;;  %v1872_v20 = vmax.f32 %v1824_v0, %v1840_v52  ;;  %v1853_v40 = vld [vmem:[#allocation3 + $0x5f] sm:$0x1]  ;;  %v1883_v51 = vmax.f32 %v1867_v41, %v1851_v63  ;;  %v1884_v42 = vmax.f32 %v1868_v8, %v1852_v58 }
 0x199   : > { %v1843_v62 = vld [vmem:[#allocation3 + $0xbe] sm:$0x1]  ;;  %v7027_v4 = vld [vmem:[#allocation2 + $0xc8] sm:$0xff]  ;;  %v1873_v38 = vmax.f32 %v1825_v10, %v1841_v19  ;;  %v1874_v28 = vmax.f32 %v1826_v22, %v1842_v5  ;;  %v1855_v53 = vld [vmem:[#allocation3 + $0x7f] sm:$0x1]  ;;  %v1885_v37 = vmax.f32 %v1869_v23, %v1853_v40 }
 0x19a   : > { %v981_v32 = vmax.f32 %v6612_v36, %v7027_v4  ;;  %v1875_v47 = vmax.f32 %v1827_v57, %v1843_v62  ;;  %v7032_v24 = vmax.f32 %v979_v46, %v7027_v4  ;;  %v1854_v31 = vld [vmem:[#allocation3 + $0x6f] sm:$0x1]  ;;  %v1857_v9 = vld [vmem:[#allocation3 + $0x9f] sm:$0x1]  ;;  %v1887_v48 = vmax.f32 %v1871_v39, %v1855_v53  ;;  %1898 = vst.msk [vmem:[#allocation2 + $0x2f] sm:$0x1] %vm1543_vm3, %v1882_v54 }
 0x19b   : > { %v1856_v61 = vld [vmem:[#allocation3 + $0x8f] sm:$0x1]  ;;  %v1886_v36 = vmax.f32 %v1870_v17, %v1854_v31  ;;  %v1859_v11 = vld [vmem:[#allocation3 + $0xbf] sm:$0x1]  ;;  %v1889_v0 = vmax.f32 %v1873_v38, %v1857_v9  ;;  %1899 = vst.msk [vmem:[#allocation2 + $0x3f] sm:$0x1] %vm1543_vm3, %v1883_v51 }
 0x19c   : > { %v1858_v21 = vld [vmem:[#allocation3 + $0xaf] sm:$0x1]  ;;  %v1888_v16 = vmax.f32 %v1872_v20, %v1856_v61  ;;  %1900 = vst.msk [vmem:[#allocation2 + $0x4f] sm:$0x1] %vm1543_vm3, %v1884_v42  ;;  %v7037_v22 = vld [vmem:[#allocation2] sm:$0xff]  ;;  %v1891_v18 = vmax.f32 %v1875_v47, %v1859_v11  ;;  %v7044_v45 = vld [vmem:[#allocation2 + $0x10] sm:$0xff] }
 0x19d   : > { %v1890_v10 = vmax.f32 %v1874_v28, %v1858_v21  ;;  %v7039_v57 = vld [vmem:[#allocation2 + $0x8] sm:$0xff]  ;;  %1901 = vst.msk [vmem:[#allocation2 + $0x5f] sm:$0x1] %vm1543_vm3, %v1885_v37  ;;  %1902 = vst.msk [vmem:[#allocation2 + $0x6f] sm:$0x1] %vm1543_vm3, %v1886_v36  ;;  %v7046_v59 = vld [vmem:[#allocation2 + $0x18] sm:$0xff]  ;;  %v2507_v52 = vmax.f32 %v7037_v22, %v7044_v45 }
 0x19e   : > { %1903 = vst.msk [vmem:[#allocation2 + $0x7f] sm:$0x1] %vm1543_vm3, %v1887_v48  ;;  %v7048_v2 = vld [vmem:[#allocation2 + $0x20] sm:$0xff]  ;;  %1904 = vst.msk [vmem:[#allocation2 + $0x8f] sm:$0x1] %vm1543_vm3, %v1888_v16  ;;  %v7053_v1 = vld [vmem:[#allocation2 + $0x30] sm:$0xff]  ;;  %v2508_v17 = vmax.f32 %v7039_v57, %v7046_v59 }
 0x19f   : > { %1905 = vst.msk [vmem:[#allocation2 + $0x9f] sm:$0x1] %vm1543_vm3, %v1889_v0  ;;  %1906 = vst.msk [vmem:[#allocation2 + $0xaf] sm:$0x1] %vm1543_vm3, %v1890_v10  ;;  %v7055_v26 = vld [vmem:[#allocation2 + $0x40] sm:$0xff]  ;;  %v7057_v14 = vld [vmem:[#allocation2 + $0x50] sm:$0xff]  ;;  %v2509_v41 = vmax.f32 %v7044_v45, %v7048_v2  ;;  %v2511_v39 = vmax.f32 %v7048_v2, %v7053_v1  ;;  %v2531_v38 = vmax.f32 %v2507_v52, %v7048_v2 }
 0x1a0   : > { %8482 = vst [vmem:[#allocation30_spill] sm:$0xff] %v7055_v26  ;;  %8483 = vst [vmem:[#allocation31_spill] sm:$0xff] %v7057_v14  ;;  %v7063_v8 = vld [vmem:[#allocation2 + $0xd8] sm:$0xff]  ;;  %v7071_v19 = vld [vmem:[#allocation2 + $0x60] sm:$0xff]  ;;  %v2513_v20 = vmax.f32 %v7053_v1, %v7055_v26 }
 0x1a1   : > { %v7066_v23 = vmax.f32 %v981_v32, %v7063_v8  ;;  %1907 = vst.msk [vmem:[#allocation2 + $0xbf] sm:$0x1] %vm1543_vm3, %v1891_v18  ;;  %8484 = vst [vmem:[#allocation32_spill] sm:$0xff] %v7071_v19  ;;  %v7073_v5 = vld [vmem:[#allocation2 + $0x70] sm:$0xff]  ;;  %v7075_v62 = vld [vmem:[#allocation2 + $0x80] sm:$0xff]  ;;  %v2515_v32 = vmax.f32 %v7055_v26, %v7057_v14  ;;  %v2517_v44 = vmax.f32 %v7057_v14, %v7071_v19 }
 0x1a2   : > { %8485 = vst [vmem:[#allocation33_spill] sm:$0xff] %v7073_v5  ;;  %v2519_v63 = vmax.f32 %v7071_v19, %v7073_v5  ;;  %v2521_v58 = vmax.f32 %v7073_v5, %v7075_v62  ;;  %v7092_v28 = vld [vmem:[#allocation2 + $0x90] sm:$0xff]  ;;  %v2533_v47 = vmax.f32 %v2509_v41, %v7053_v1  ;;  %v2535_v40 = vmax.f32 %v2511_v39, %v7055_v26  ;;  %v7111_v9 = vld [vmem:[#allocation2 + $0x28] sm:$0xff]  ;;  %v7113_v21 = vld [vmem:[#allocation2 + $0x38] sm:$0xff] }
 0x1a3   : > { %v2537_v31 = vmax.f32 %v2513_v20, %v7057_v14  ;;  %v7098_v53 = vmax.f32 %v2515_v32, %v7071_v19  ;;  %v7101_v54 = vmax.f32 %v2517_v44, %v7073_v5  ;;  %v2555_v61 = vmax.f32 %v2531_v38, %v7053_v1  ;;  %2637 = vst.msk [vmem:[#allocation3] sm:$0xff] %vm801_vm2, %v2531_v38  ;;  %v7115_v37 = vld [vmem:[#allocation2 + $0x48] sm:$0xff]  ;;  %v2473_v56 = vld [vmem:[#allocation2 + $0xa0] sm:$0xff] }
 0x1a4   : > { %v7104_v51 = vmax.f32 %v2519_v63, %v7075_v62  ;;  %v7107_v42 = vmax.f32 %v2521_v58, %v7092_v28  ;;  %8486 = vst [vmem:[#allocation34_spill] sm:$0xff] %v7113_v21  ;;  %8487 = vst [vmem:[#allocation35_spill] sm:$0xff] %v7115_v37  ;;  %v2557_v36 = vmax.f32 %v2533_v47, %v7055_v26  ;;  %v7122_v0 = vld [vmem:[#allocation2 + $0x58] sm:$0xff]  ;;  %v7124_v10 = vld [vmem:[#allocation2 + $0x68] sm:$0xff] }
 0x1a5   : > { %v2559_v48 = vmax.f32 %v2535_v40, %v7057_v14  ;;  %v2561_v11 = vmax.f32 %v2537_v31, %v7071_v19  ;;  %v2563_v16 = vmax.f32 %v7098_v53, %v7073_v5  ;;  %8488 = vst [vmem:[#allocation36_spill] sm:$0xff] %v7122_v0  ;;  %8489 = vst [vmem:[#allocation37_spill] sm:$0xff] %v7124_v10  ;;  %v7126_v18 = vld [vmem:[#allocation2 + $0x78] sm:$0xff]  ;;  %v7136_v32 = vld [vmem:[#allocation2 + $0x88] sm:$0xff] }
 0x1a6   : > { %8490 = vst [vmem:[#allocation38_spill] sm:$0xff] %v7126_v18  ;;  %v2510_v52 = vmax.f32 %v7046_v59, %v7111_v9  ;;  %v2512_v41 = vmax.f32 %v7111_v9, %v7113_v21  ;;  %v2514_v39 = vmax.f32 %v7113_v21, %v7115_v37  ;;  %v2532_v20 = vmax.f32 %v2508_v17, %v7111_v9  ;;  %v7152_v53 = vld [vmem:[#allocation2 + $0x98] sm:$0xff]  ;;  %v2474_v35 = vld [vmem:[#allocation2 + $0xa8] sm:$0xff] }
 0x1a7   : > { %2653 = vst.msk [vmem:[#allocation3 + $0x10] sm:$0xff] %vm801_vm2, %v2555_v61  ;;  %v2516_v44 = vmax.f32 %v7115_v37, %v7122_v0  ;;  %v2518_v63 = vmax.f32 %v7122_v0, %v7124_v10  ;;  %v2520_v58 = vmax.f32 %v7124_v10, %v7126_v18  ;;  %v2565_v38 = vmax.f32 %v7101_v54, %v7075_v62 }
 0x1a8   : > { %v2522_v47 = vmax.f32 %v7126_v18, %v7136_v32  ;;  %v2534_v17 = vmax.f32 %v2510_v52, %v7113_v21  ;;  %v2536_v40 = vmax.f32 %v2512_v41, %v7115_v37  ;;  %v2538_v31 = vmax.f32 %v2514_v39, %v7122_v0  ;;  %2638 = vst.msk [vmem:[#allocation3 + $0x8] sm:$0xff] %vm801_vm2, %v2532_v20  ;;  %v2498_v27 = vld [vmem:[#allocation2 + $0xb8] sm:$0xff] }
 0x1a9   : > { %v2540_v12 = vmax.f32 %v2516_v44, %v7124_v10  ;;  %v2542_v46 = vmax.f32 %v2518_v63, %v7126_v18  ;;  %v2544_v3 = vmax.f32 %v2520_v58, %v7136_v32  ;;  %v2556_v54 = vmax.f32 %v2532_v20, %v7113_v21 }
 0x1aa   : > { %v2546_v30 = vmax.f32 %v2522_v47, %v7152_v53  ;;  %v2558_v52 = vmax.f32 %v2534_v17, %v7115_v37  ;;  %v2560_v41 = vmax.f32 %v2536_v40, %v7122_v0  ;;  %v2562_v39 = vmax.f32 %v2538_v31, %v7124_v10  ;;  %v2497_v31 = vld [vmem:[#allocation2 + $0xb0] sm:$0xff]  ;;  %v3003_v6 = vld [vmem:[#allocation3] sm:$0x1] }
 0x1ab   : > { %v2564_v29 = vmax.f32 %v2540_v12, %v7126_v18  ;;  %v2566_v44 = vmax.f32 %v2542_v46, %v7136_v32  ;;  %v2567_v63 = vmax.f32 %v7104_v51, %v7092_v28  ;;  %v2568_v58 = vmax.f32 %v2544_v3, %v7152_v53  ;;  %2654 = vst.msk [vmem:[#allocation3 + $0x18] sm:$0xff] %vm801_vm2, %v2556_v54  ;;  %v2683_v3 = vld [vmem:[#allocation3] sm:$0xff] }
 0x1ac   : > { %v2569_v20 = vmax.f32 %v7107_v42, %v2473_v56  ;;  %v2570_v47 = vmax.f32 %v2546_v30, %v2474_v35  ;;  %v2579_v17 = vmax.f32 %v2555_v61, %v7055_v26  ;;  %v2580_v40 = vmax.f32 %v2556_v54, %v7115_v37 }
 0x1ad   : > { %v2581_v12 = vmax.f32 %v2557_v36, %v7057_v14  ;;  %v2582_v46 = vmax.f32 %v2558_v52, %v7122_v0  ;;  %v2583_v60 = vmax.f32 %v2559_v48, %v7071_v19  ;;  %v2584_v51 = vmax.f32 %v2560_v41, %v7124_v10  ;;  %v3019_v48 = vld [vmem:[#allocation3 + $0x1] sm:$0x1] }
 0x1ae   : > { %v2585_v30 = vmax.f32 %v2561_v11, %v7073_v5  ;;  %v2586_v42 = vmax.f32 %v2562_v39, %v7126_v18  ;;  %v2587_v61 = vmax.f32 %v2563_v16, %v7075_v62  ;;  %v2588_v54 = vmax.f32 %v2564_v29, %v7136_v32  ;;  %2603 = vst.msk [vmem:[#allocation3 + $0x20] sm:$0xff] %vm801_vm2, %v2579_v17  ;;  %v3004_v36 = vld [vmem:[#allocation3 + $0x10] sm:$0x1]  ;;  %v3020_v52 = vld [vmem:[#allocation3 + $0x11] sm:$0x1] }
 0x1af   : > { %2604 = vst.msk [vmem:[#allocation3 + $0x28] sm:$0xff] %vm801_vm2, %v2580_v40  ;;  %v2589_v41 = vmax.f32 %v2565_v38, %v7092_v28  ;;  %v2590_v15 = vmax.f32 %v2566_v44, %v7152_v53  ;;  %v2591_v7 = vmax.f32 %v2567_v63, %v2473_v56  ;;  %v2592_v10 = vmax.f32 %v2568_v58, %v2474_v35  ;;  %v2684_v29 = vld [vmem:[#allocation3 + $0x8] sm:$0xf]  ;;  %v2685_v56 = vld [vmem:[#allocation3 + $0x10] sm:$0xff]  ;;  %v3035_v44 = vld [vmem:[#allocation3 + $0x2] sm:$0x1] }
 0x1b0   : > { %2605 = vst.msk [vmem:[#allocation3 + $0x30] sm:$0xff] %vm801_vm2, %v2581_v12  ;;  %2606 = vst.msk [vmem:[#allocation3 + $0x38] sm:$0xff] %vm801_vm2, %v2582_v46  ;;  %v2715_v11 = vld [vmem:[#allocation3 + $0x1] sm:$0xff]  ;;  %v2716_v16 = vld [vmem:[#allocation3 + $0x9] sm:$0xf]  ;;  %v2593_v39 = vmax.f32 %v2569_v20, %v2497_v31  ;;  %v2594_v17 = vmax.f32 %v2570_v47, %v2498_v27  ;;  %v1121_v58 = vmax.f32 %v7027_v4, %v7063_v8 }
 0x1b1   : > { %2607 = vst.msk [vmem:[#allocation3 + $0x40] sm:$0xff] %vm801_vm2, %v2583_v60  ;;  %2608 = vst.msk [vmem:[#allocation3 + $0x48] sm:$0xff] %vm801_vm2, %v2584_v51  ;;  %v2843_v35 = vmax.f32 %v2683_v3, %v2715_v11  ;;  %v2844_v38 = vmax.f32 %v2684_v29, %v2716_v16  ;;  %v7193_v60 = vld [vmem:[#allocation3 + $0xc0] sm:$0x1]  ;;  %v7195_v63 = vld [vmem:[#allocation3 + $0xc1] sm:$0x1]  ;;  %v3051_v31 = vmax.f32 %v3003_v6, %v3019_v48 }
 0x1b2   : > { %2609 = vst.msk [vmem:[#allocation3 + $0x50] sm:$0xff] %vm801_vm2, %v2585_v30  ;;  %2610 = vst.msk [vmem:[#allocation3 + $0x58] sm:$0xff] %vm801_vm2, %v2586_v42  ;;  %v957_v27 = vld [vmem:[#allocation2 + $0xf8] sm:$0xff]  ;;  %v2747_v20 = vld [vmem:[#allocation3 + $0x2] sm:$0xff]  ;;  %v3052_v12 = vmax.f32 %v3004_v36, %v3020_v52 }
 0x1b3   : > { %2611 = vst.msk [vmem:[#allocation3 + $0x60] sm:$0xff] %vm801_vm2, %v2587_v61  ;;  %2612 = vst.msk [vmem:[#allocation3 + $0x68] sm:$0xff] %vm801_vm2, %v2588_v54  ;;  %v2748_v47 = vld [vmem:[#allocation3 + $0xa] sm:$0xf]  ;;  %v3036_v40 = vld [vmem:[#allocation3 + $0x12] sm:$0x1]  ;;  %v2875_v3 = vmax.f32 %v2843_v35, %v2747_v20  ;;  %v3067_v48 = vmax.f32 %v3051_v31, %v3035_v44 }
 0x1b4   : > { %2613 = vst.msk [vmem:[#allocation3 + $0x70] sm:$0xff] %vm801_vm2, %v2589_v41  ;;  %2614 = vst.msk [vmem:[#allocation3 + $0x78] sm:$0xff] %vm801_vm2, %v2590_v15  ;;  %v2686_v46 = vld [vmem:[#allocation3 + $0x18] sm:$0xf]  ;;  %v2876_v30 = vmax.f32 %v2844_v38, %v2748_v47  ;;  %v1029_v15 = vmax.f32 %v7066_v23, %v7175_v34  ;;  %v1476_v42 = vld [vmem:[#allocation3 + $0xd0] sm:$0x1]  ;;  %v3068_v52 = vmax.f32 %v3052_v12, %v3036_v40 }
 0x1b5   : > { %2615 = vst.msk [vmem:[#allocation3 + $0x80] sm:$0xff] %vm801_vm2, %v2591_v7  ;;  %2616 = vst.msk [vmem:[#allocation3 + $0x88] sm:$0xff] %vm801_vm2, %v2592_v10  ;;  %v2717_v4 = vld [vmem:[#allocation3 + $0x11] sm:$0xff]  ;;  %v2718_v51 = vld [vmem:[#allocation3 + $0x19] sm:$0xf]  ;;  %v8491_v7 = vmax.f32 %v7032_v24, %v7063_v8  ;;  %v1123_v23 = vmax.f32 %v1121_v58, %v7175_v34  ;;  %v1523_v40 = vmax.f32 %v7193_v60, %v7195_v63 }
 0x1b6   : > { %2617 = vst.msk [vmem:[#allocation3 + $0x90] sm:$0xff] %vm801_vm2, %v2593_v39  ;;  %2618 = vst.msk [vmem:[#allocation3 + $0x98] sm:$0xff] %vm801_vm2, %v2594_v17  ;;  %v2779_v6 = vld [vmem:[#allocation3 + $0x3] sm:$0xff]  ;;  %v2780_v61 = vld [vmem:[#allocation3 + $0xb] sm:$0xf]  ;;  %v2845_v54 = vmax.f32 %v2685_v56, %v2717_v4  ;;  %v2846_v36 = vmax.f32 %v2686_v46, %v2718_v51  ;;  %v1053_v17 = vmax.f32 %v1029_v15, %v957_v27 }
 0x1b7   : > { %v1051_v10 = vmax.f32 %v8491_v7, %v7175_v34  ;;  %v1478_v41 = vld [vmem:[#allocation3 + $0xf0] sm:$0x1]  ;;  %v2749_v29 = vld [vmem:[#allocation3 + $0x12] sm:$0xff]  ;;  %v2750_v11 = vld [vmem:[#allocation3 + $0x1a] sm:$0xf]  ;;  %v2907_v16 = vmax.f32 %v2875_v3, %v2779_v6  ;;  %v2908_v39 = vmax.f32 %v2876_v30, %v2780_v61  ;;  %v1136_v56 = vmax.f32 %v7063_v8, %v7175_v34 }
 0x1b8   : > { %v1492_v35 = vld [vmem:[#allocation3 + $0xd1] sm:$0x1]  ;;  %v2811_v24 = vld [vmem:[#allocation3 + $0x4] sm:$0xff]  ;;  %v2812_v38 = vld [vmem:[#allocation3 + $0xc] sm:$0xf]  ;;  %v2877_v20 = vmax.f32 %v2845_v54, %v2749_v29  ;;  %v2878_v47 = vmax.f32 %v2846_v36, %v2750_v11  ;;  %1078 = vst.msk [vmem:[#allocation3 + $0xd8] sm:$0xff] %vm801_vm2, %v1053_v17  ;;  %v1125_v4 = vmax.f32 %v1123_v23, %v957_v27 }
 0x1b9   : > { %1076 = vst.msk [vmem:[#allocation3 + $0xc8] sm:$0xff] %vm801_vm2, %v1051_v10  ;;  %v1494_v44 = vld [vmem:[#allocation3 + $0xf1] sm:$0x1]  ;;  %v2781_v31 = vld [vmem:[#allocation3 + $0x13] sm:$0xff]  ;;  %v2782_v12 = vld [vmem:[#allocation3 + $0x1b] sm:$0xf]  ;;  %v2939_v46 = vmax.f32 %v2907_v16, %v2811_v24  ;;  %v2940_v58 = vmax.f32 %v2908_v39, %v2812_v38  ;;  %v1138_v30 = vmax.f32 %v1136_v56, %v957_v27  ;;  %v1524_v7 = vmax.f32 %v1476_v42, %v1492_v35 }
 0x1ba   : > { %3083 = vst.msk [vmem:[#allocation2] sm:$0x1] %vm1543_vm3, %v3067_v48  ;;  %3084 = vst.msk [vmem:[#allocation2 + $0x10] sm:$0x1] %vm1543_vm3, %v3068_v52  ;;  %v2909_v51 = vmax.f32 %v2877_v20, %v2781_v31  ;;  %v2910_v3 = vmax.f32 %v2878_v47, %v2782_v12  ;;  %v1507_v15 = vld [vmem:[#allocation3 + $0xc2] sm:$0x1]  ;;  %v1526_v8 = vmax.f32 %v1478_v41, %v1494_v44 }
 0x1bb   : > { %v2813_v10 = vld [vmem:[#allocation3 + $0x14] sm:$0xff]  ;;  %v2814_v6 = vld [vmem:[#allocation3 + $0x1c] sm:$0xf]  ;;  %2971 = vst.msk [vmem:[#allocation2 + $0x2] sm:$0xff] %vm801_vm2, %v2939_v46  ;;  %1128 = vst.msk [vmem:[#allocation3 + $0xe8] sm:$0xff] %vm801_vm2, %v1125_v4  ;;  %v1539_v60 = vmax.f32 %v1523_v40, %v1507_v15 }
 0x1bc   : > { %2972 = vst.msk [vmem:[#allocation2 + $0xa] sm:$0xf] %vm1431_vm4, %v2940_v58  ;;  %v1508_v34 = vld [vmem:[#allocation3 + $0xd2] sm:$0x1]  ;;  %v2941_v63 = vmax.f32 %v2909_v51, %v2813_v10  ;;  %v2942_v61 = vmax.f32 %v2910_v3, %v2814_v6  ;;  %v7224_v27 = vld [vmem:[#allocation3 + $0x20] sm:$0xff] }
 0x1bd   : > { %1141 = vst.msk [vmem:[#allocation3 + $0xf8] sm:$0xff] %vm801_vm2, %v1138_v30  ;;  %v1510_v54 = vld [vmem:[#allocation3 + $0xf2] sm:$0x1]  ;;  %v1540_v36 = vmax.f32 %v1524_v7, %v1508_v34  ;;  %v7226_v42 = vld [vmem:[#allocation3 + $0x28] sm:$0xf]  ;;  %v7235_v41 = vld [vmem:[#allocation3 + $0x40] sm:$0xff] }
 0x1be   : > { %v7228_v48 = vld [vmem:[#allocation3 + $0x21] sm:$0xff]  ;;  %v1542_v52 = vmax.f32 %v1526_v8, %v1510_v54  ;;  %1556 = vst.msk [vmem:[#allocation2 + $0xc0] sm:$0x1] %vm1543_vm3, %v1539_v60  ;;  %v7231_v29 = vld [vmem:[#allocation3 + $0x30] sm:$0xff]  ;;  %v7233_v11 = vld [vmem:[#allocation3 + $0x38] sm:$0xf] }
 0x1bf   : > { %v2720_v16 = vld [vmem:[#allocation3 + $0x29] sm:$0xf]  ;;  %v7237_v39 = vld [vmem:[#allocation3 + $0x31] sm:$0xff]  ;;  %2973 = vst.msk [vmem:[#allocation2 + $0x12] sm:$0xff] %vm801_vm2, %v2941_v63  ;;  %v7248_v24 = vld [vmem:[#allocation3 + $0x60] sm:$0xff]  ;;  %v2847_v8 = vmax.f32 %v7224_v27, %v7228_v48 }
 0x1c0   : > { %2974 = vst.msk [vmem:[#allocation2 + $0x1a] sm:$0xf] %vm1431_vm4, %v2942_v61  ;;  %v7242_v17 = vld [vmem:[#allocation3 + $0x48] sm:$0xf]  ;;  %v7244_v23 = vld [vmem:[#allocation3 + $0x50] sm:$0xff]  ;;  %v7257_v31 = vld [vmem:[#allocation3 + $0x80] sm:$0xff]  ;;  %v2848_v60 = vmax.f32 %v7226_v42, %v2720_v16 }
 0x1c1   : > { %1557 = vst.msk [vmem:[#allocation2 + $0xd0] sm:$0x1] %vm1543_vm3, %v1540_v36  ;;  %v7246_v35 = vld [vmem:[#allocation3 + $0x58] sm:$0xf]  ;;  %v2723_v20 = vld [vmem:[#allocation3 + $0x41] sm:$0xff]  ;;  %v7253_v44 = vld [vmem:[#allocation3 + $0x70] sm:$0xff]  ;;  %v2849_v36 = vmax.f32 %v7231_v29, %v7237_v39 }
 0x1c2   : > { %v2722_v38 = vld [vmem:[#allocation3 + $0x39] sm:$0xf]  ;;  %v2724_v47 = vld [vmem:[#allocation3 + $0x49] sm:$0xf]  ;;  %1559 = vst.msk [vmem:[#allocation2 + $0xf0] sm:$0x1] %vm1543_vm3, %v1542_v52  ;;  %v2851_v18 = vmax.f32 %v7235_v41, %v2723_v20 }
 0x1c3   : > { %v7251_v56 = vld [vmem:[#allocation3 + $0x68] sm:$0xf]  ;;  %v7255_v40 = vld [vmem:[#allocation3 + $0x78] sm:$0xf]  ;;  %v7261_v51 = vld [vmem:[#allocation3 + $0x90] sm:$0xff]  ;;  %v2850_v52 = vmax.f32 %v7233_v11, %v2722_v38  ;;  %v2852_v14 = vmax.f32 %v7242_v17, %v2724_v47 }
 0x1c4   : > { %v2725_v12 = vld [vmem:[#allocation3 + $0x51] sm:$0xff]  ;;  %v2726_v46 = vld [vmem:[#allocation3 + $0x59] sm:$0xf]  ;;  %v2727_v58 = vld [vmem:[#allocation3 + $0x61] sm:$0xff] }
 0x1c5   : > { %v7259_v4 = vld [vmem:[#allocation3 + $0x88] sm:$0xf]  ;;  %v2729_v30 = vld [vmem:[#allocation3 + $0x71] sm:$0xff]  ;;  %v2730_v15 = vld [vmem:[#allocation3 + $0x79] sm:$0xf]  ;;  %v2853_v50 = vmax.f32 %v7244_v23, %v2725_v12  ;;  %v2854_v27 = vmax.f32 %v7246_v35, %v2726_v46  ;;  %v2855_v42 = vmax.f32 %v7248_v24, %v2727_v58 }
 0x1c6   : > { %v2728_v3 = vld [vmem:[#allocation3 + $0x69] sm:$0xf]  ;;  %v7263_v7 = vld [vmem:[#allocation3 + $0x98] sm:$0xf]  ;;  %v2731_v10 = vld [vmem:[#allocation3 + $0x81] sm:$0xff]  ;;  %v2857_v11 = vmax.f32 %v7253_v44, %v2729_v30  ;;  %v2858_v41 = vmax.f32 %v7255_v40, %v2730_v15 }
 0x1c7   : > { %v2732_v6 = vld [vmem:[#allocation3 + $0x89] sm:$0xf]  ;;  %v2733_v34 = vld [vmem:[#allocation3 + $0x91] sm:$0xff]  ;;  %v2734_v63 = vld [vmem:[#allocation3 + $0x99] sm:$0xf]  ;;  %v2856_v29 = vmax.f32 %v7251_v56, %v2728_v3  ;;  %v2859_v39 = vmax.f32 %v7257_v31, %v2731_v10 }
 0x1c8   : > { %v2751_v61 = vld [vmem:[#allocation3 + $0x22] sm:$0xff]  ;;  %v2752_v54 = vld [vmem:[#allocation3 + $0x2a] sm:$0xf]  ;;  %v2753_v5 = vld [vmem:[#allocation3 + $0x32] sm:$0xff]  ;;  %v2860_v23 = vmax.f32 %v7259_v4, %v2732_v6  ;;  %v2861_v35 = vmax.f32 %v7261_v51, %v2733_v34  ;;  %v2862_v56 = vmax.f32 %v7263_v7, %v2734_v63 }
 0x1c9   : > { %v2754_v19 = vld [vmem:[#allocation3 + $0x3a] sm:$0xf]  ;;  %v2755_v0 = vld [vmem:[#allocation3 + $0x42] sm:$0xff]  ;;  %v2756_v48 = vld [vmem:[#allocation3 + $0x4a] sm:$0xf]  ;;  %v2879_v24 = vmax.f32 %v2847_v8, %v2751_v61  ;;  %v2880_v47 = vmax.f32 %v2848_v60, %v2752_v54  ;;  %v2881_v3 = vmax.f32 %v2849_v36, %v2753_v5 }
 0x1ca   : > { %v2757_v16 = vld [vmem:[#allocation3 + $0x52] sm:$0xff]  ;;  %v2758_v33 = vld [vmem:[#allocation3 + $0x5a] sm:$0xf]  ;;  %v2759_v49 = vld [vmem:[#allocation3 + $0x62] sm:$0xff]  ;;  %v2882_v44 = vmax.f32 %v2850_v52, %v2754_v19  ;;  %v2883_v30 = vmax.f32 %v2851_v18, %v2755_v0  ;;  %v2884_v37 = vmax.f32 %v2852_v14, %v2756_v48 }
 0x1cb   : > { %v2760_v38 = vld [vmem:[#allocation3 + $0x6a] sm:$0xf]  ;;  %v2761_v17 = vld [vmem:[#allocation3 + $0x72] sm:$0xff]  ;;  %v2762_v20 = vld [vmem:[#allocation3 + $0x7a] sm:$0xf]  ;;  %v2885_v26 = vmax.f32 %v2853_v50, %v2757_v16  ;;  %v2886_v21 = vmax.f32 %v2854_v27, %v2758_v33  ;;  %v2887_v4 = vmax.f32 %v2855_v42, %v2759_v49 }
 0x1cc   : > { %v2763_v12 = vld [vmem:[#allocation3 + $0x82] sm:$0xff]  ;;  %v2764_v46 = vld [vmem:[#allocation3 + $0x8a] sm:$0xf]  ;;  %v2765_v58 = vld [vmem:[#allocation3 + $0x92] sm:$0xff]  ;;  %v2888_v8 = vmax.f32 %v2856_v29, %v2760_v38  ;;  %v2889_v60 = vmax.f32 %v2857_v11, %v2761_v17  ;;  %v7283_v61 = vmax.f32 %v2858_v41, %v2762_v20 }
 0x1cd   : > { %v2766_v40 = vld [vmem:[#allocation3 + $0x9a] sm:$0xf]  ;;  %v2783_v15 = vld [vmem:[#allocation3 + $0x23] sm:$0xff]  ;;  %v2784_v31 = vld [vmem:[#allocation3 + $0x2b] sm:$0xf]  ;;  %v7285_v54 = vmax.f32 %v2859_v39, %v2763_v12  ;;  %v2892_v18 = vmax.f32 %v2860_v23, %v2764_v46  ;;  %v7287_v7 = vmax.f32 %v2861_v35, %v2765_v58 }
 0x1ce   : > { %v2785_v10 = vld [vmem:[#allocation3 + $0x33] sm:$0xff]  ;;  %v2786_v6 = vld [vmem:[#allocation3 + $0x3b] sm:$0xf]  ;;  %v2787_v51 = vld [vmem:[#allocation3 + $0x43] sm:$0xff]  ;;  %v2911_v63 = vmax.f32 %v2879_v24, %v2783_v15  ;;  %v2912_v14 = vmax.f32 %v2880_v47, %v2784_v31  ;;  %v2894_v36 = vmax.f32 %v2862_v56, %v2766_v40 }
 0x1cf   : > { %v2788_v34 = vld [vmem:[#allocation3 + $0x4b] sm:$0xf]  ;;  %v2789_v5 = vld [vmem:[#allocation3 + $0x53] sm:$0xff]  ;;  %v2790_v19 = vld [vmem:[#allocation3 + $0x5b] sm:$0xf]  ;;  %v2913_v52 = vmax.f32 %v2881_v3, %v2785_v10  ;;  %v2914_v27 = vmax.f32 %v2882_v44, %v2786_v6  ;;  %v2915_v42 = vmax.f32 %v2883_v30, %v2787_v51 }
 0x1d0   : > { %v2791_v0 = vld [vmem:[#allocation3 + $0x63] sm:$0xff]  ;;  %v2792_v50 = vld [vmem:[#allocation3 + $0x6b] sm:$0xf]  ;;  %v2793_v33 = vld [vmem:[#allocation3 + $0x73] sm:$0xff]  ;;  %v2916_v11 = vmax.f32 %v2884_v37, %v2788_v34  ;;  %v2917_v41 = vmax.f32 %v2885_v26, %v2789_v5  ;;  %v2918_v39 = vmax.f32 %v2886_v21, %v2790_v19 }
 0x1d1   : > { %v2794_v49 = vld [vmem:[#allocation3 + $0x7b] sm:$0xf]  ;;  %v2795_v48 = vld [vmem:[#allocation3 + $0x83] sm:$0xff]  ;;  %v2796_v16 = vld [vmem:[#allocation3 + $0x8b] sm:$0xf]  ;;  %v2919_v38 = vmax.f32 %v2887_v4, %v2791_v0  ;;  %v2920_v35 = vmax.f32 %v2888_v8, %v2792_v50  ;;  %v2921_v24 = vmax.f32 %v2889_v60, %v2793_v33 }
 0x1d2   : > { %v2797_v29 = vld [vmem:[#allocation3 + $0x93] sm:$0xff]  ;;  %v2798_v17 = vld [vmem:[#allocation3 + $0x9b] sm:$0xf]  ;;  %v2815_v20 = vld [vmem:[#allocation3 + $0x24] sm:$0xff]  ;;  %v2922_v47 = vmax.f32 %v7283_v61, %v2794_v49  ;;  %v2923_v12 = vmax.f32 %v7285_v54, %v2795_v48  ;;  %v2924_v3 = vmax.f32 %v2892_v18, %v2796_v16 }
 0x1d3   : > { %v2816_v23 = vld [vmem:[#allocation3 + $0x2c] sm:$0xf]  ;;  %v2817_v46 = vld [vmem:[#allocation3 + $0x34] sm:$0xff]  ;;  %v2818_v58 = vld [vmem:[#allocation3 + $0x3c] sm:$0xf]  ;;  %v2925_v44 = vmax.f32 %v7287_v7, %v2797_v29  ;;  %v2943_v30 = vmax.f32 %v2911_v63, %v2815_v20  ;;  %v2926_v15 = vmax.f32 %v2894_v36, %v2798_v17 }
 0x1d4   : > { %v2819_v56 = vld [vmem:[#allocation3 + $0x44] sm:$0xff]  ;;  %v2944_v37 = vmax.f32 %v2912_v14, %v2816_v23  ;;  %v2820_v26 = vld [vmem:[#allocation3 + $0x4c] sm:$0xf]  ;;  %v2821_v21 = vld [vmem:[#allocation3 + $0x54] sm:$0xff]  ;;  %v2945_v31 = vmax.f32 %v2913_v52, %v2817_v46  ;;  %v2946_v10 = vmax.f32 %v2914_v27, %v2818_v58 }
 0x1d5   : > { %v2822_v40 = vld [vmem:[#allocation3 + $0x5c] sm:$0xf]  ;;  %v2947_v4 = vmax.f32 %v2915_v42, %v2819_v56  ;;  %v2823_v6 = vld [vmem:[#allocation3 + $0x64] sm:$0xff]  ;;  %v2824_v51 = vld [vmem:[#allocation3 + $0x6c] sm:$0xf]  ;;  %v2948_v8 = vmax.f32 %v2916_v11, %v2820_v26  ;;  %v2949_v60 = vmax.f32 %v2917_v41, %v2821_v21  ;;  %2975 = vst.msk [vmem:[#allocation2 + $0x22] sm:$0xff] %vm801_vm2, %v2943_v30 }
 0x1d6   : > { %v2825_v34 = vld [vmem:[#allocation3 + $0x74] sm:$0xff]  ;;  %v2950_v61 = vmax.f32 %v2918_v39, %v2822_v40  ;;  %2976 = vst.msk [vmem:[#allocation2 + $0x2a] sm:$0xf] %vm1431_vm4, %v2944_v37  ;;  %v2826_v54 = vld [vmem:[#allocation3 + $0x7c] sm:$0xf]  ;;  %v2827_v5 = vld [vmem:[#allocation3 + $0x84] sm:$0xff]  ;;  %v2951_v0 = vmax.f32 %v2919_v38, %v2823_v6  ;;  %v2952_v18 = vmax.f32 %v2920_v35, %v2824_v51 }
 0x1d7   : > { %v2828_v19 = vld [vmem:[#allocation3 + $0x8c] sm:$0xf]  ;;  %v2953_v7 = vmax.f32 %v2921_v24, %v2825_v34  ;;  %2977 = vst.msk [vmem:[#allocation2 + $0x32] sm:$0xff] %vm801_vm2, %v2945_v31  ;;  %2979 = vst.msk [vmem:[#allocation2 + $0x42] sm:$0xff] %vm801_vm2, %v2947_v4  ;;  %v2829_v63 = vld [vmem:[#allocation3 + $0x94] sm:$0xff]  ;;  %v2954_v50 = vmax.f32 %v2922_v47, %v2826_v54  ;;  %v2955_v33 = vmax.f32 %v2923_v12, %v2827_v5 }
 0x1d8   : > { %2978 = vst.msk [vmem:[#allocation2 + $0x3a] sm:$0xf] %vm1431_vm4, %v2946_v10  ;;  %v2830_v14 = vld [vmem:[#allocation3 + $0x9c] sm:$0xf]  ;;  %v2956_v49 = vmax.f32 %v2924_v3, %v2828_v19  ;;  %2980 = vst.msk [vmem:[#allocation2 + $0x4a] sm:$0xf] %vm1431_vm4, %v2948_v8  ;;  %v2957_v52 = vmax.f32 %v2925_v44, %v2829_v63  ;;  %v1944_v5 = vpack.c.bf16 %v7039_v57, %v7037_v22 }
 0x1d9   : > { %2981 = vst.msk [vmem:[#allocation2 + $0x52] sm:$0xff] %vm801_vm2, %v2949_v60  ;;  %v3005_v36 = vld [vmem:[#allocation3 + $0x20] sm:$0x1]  ;;  %v2958_v27 = vmax.f32 %v2926_v15, %v2830_v14  ;;  %2983 = vst.msk [vmem:[#allocation2 + $0x62] sm:$0xff] %vm801_vm2, %v2951_v0  ;;  %v3006_v42 = vld [vmem:[#allocation3 + $0x30] sm:$0x1] }
 0x1da   : > { %2982 = vst.msk [vmem:[#allocation2 + $0x5a] sm:$0xf] %vm1431_vm4, %v2950_v61  ;;  %2984 = vst.msk [vmem:[#allocation2 + $0x6a] sm:$0xf] %vm1431_vm4, %v2952_v18  ;;  %v3007_v48 = vld [vmem:[#allocation3 + $0x40] sm:$0x1]  ;;  %5753 = vmatprep.mubr.msk.bf16.mxu1 %vm801_vm2, %v1944_v5 }
 0x1db   : > { %2985 = vst.msk [vmem:[#allocation2 + $0x72] sm:$0xff] %vm801_vm2, %v2953_v7  ;;  %v3008_v16 = vld [vmem:[#allocation3 + $0x50] sm:$0x1]  ;;  %2987 = vst.msk [vmem:[#allocation2 + $0x82] sm:$0xff] %vm801_vm2, %v2955_v33  ;;  %v3009_v29 = vld [vmem:[#allocation3 + $0x60] sm:$0x1] }
 0x1dc   : > { %2986 = vst.msk [vmem:[#allocation2 + $0x7a] sm:$0xf] %vm1431_vm4, %v2954_v50  ;;  %2988 = vst.msk [vmem:[#allocation2 + $0x8a] sm:$0xf] %vm1431_vm4, %v2956_v49  ;;  %v3010_v11 = vld [vmem:[#allocation3 + $0x70] sm:$0x1] }
 0x1dd   : > { %v3011_v41 = vld [vmem:[#allocation3 + $0x80] sm:$0x1]  ;;  %2989 = vst.msk [vmem:[#allocation2 + $0x92] sm:$0xff] %vm801_vm2, %v2957_v52  ;;  %v3012_v39 = vld [vmem:[#allocation3 + $0x90] sm:$0x1] }
 0x1de   : > { %2990 = vst.msk [vmem:[#allocation2 + $0x9a] sm:$0xf] %vm1431_vm4, %v2958_v27  ;;  %v3021_v38 = vld [vmem:[#allocation3 + $0x21] sm:$0x1]  ;;  %v3022_v17 = vld [vmem:[#allocation3 + $0x31] sm:$0x1] }
 0x1df   : > { %v3023_v20 = vld [vmem:[#allocation3 + $0x41] sm:$0x1]  ;;  %v3024_v23 = vld [vmem:[#allocation3 + $0x51] sm:$0x1]  ;;  %v3053_v24 = vmax.f32 %v3005_v36, %v3021_v38  ;;  %v3054_v47 = vmax.f32 %v3006_v42, %v3022_v17  ;;  %v3037_v30 = vld [vmem:[#allocation3 + $0x22] sm:$0x1] }
 0x1e0   : > { %v3025_v35 = vld [vmem:[#allocation3 + $0x61] sm:$0x1]  ;;  %v3026_v12 = vld [vmem:[#allocation3 + $0x71] sm:$0x1]  ;;  %v3055_v56 = vmax.f32 %v3007_v48, %v3023_v20  ;;  %v3056_v3 = vmax.f32 %v3008_v16, %v3024_v23  ;;  %v3038_v37 = vld [vmem:[#allocation3 + $0x32] sm:$0x1] }
 0x1e1   : > { %v3027_v46 = vld [vmem:[#allocation3 + $0x81] sm:$0x1]  ;;  %v3028_v58 = vld [vmem:[#allocation3 + $0x91] sm:$0x1]  ;;  %v3057_v44 = vmax.f32 %v3009_v29, %v3025_v35  ;;  %v3039_v26 = vld [vmem:[#allocation3 + $0x42] sm:$0x1]  ;;  %v3058_v21 = vmax.f32 %v3010_v11, %v3026_v12  ;;  %v3069_v60 = vmax.f32 %v3053_v24, %v3037_v30  ;;  %v3070_v61 = vmax.f32 %v3054_v47, %v3038_v37 }
 0x1e2   : > { %v3059_v40 = vmax.f32 %v3011_v41, %v3027_v46  ;;  %v3060_v15 = vmax.f32 %v3012_v39, %v3028_v58  ;;  %v3099_v31 = vld [vmem:[#allocation3] sm:$0x1]  ;;  %v3100_v10 = vld [vmem:[#allocation3 + $0x10] sm:$0x1]  ;;  %v3115_v4 = vld [vmem:[#allocation3 + $0x1] sm:$0x1]  ;;  %v3071_v54 = vmax.f32 %v3055_v56, %v3039_v26 }
 0x1e3   : > { %v3116_v6 = vld [vmem:[#allocation3 + $0x11] sm:$0x1]  ;;  %v3040_v51 = vld [vmem:[#allocation3 + $0x52] sm:$0x1]  ;;  %v3041_v34 = vld [vmem:[#allocation3 + $0x62] sm:$0x1]  ;;  %v3163_v29 = vmax.f32 %v3099_v31, %v3115_v4 }
 0x1e4   : > { %v3042_v8 = vld [vmem:[#allocation3 + $0x72] sm:$0x1]  ;;  %v3043_v19 = vld [vmem:[#allocation3 + $0x82] sm:$0x1]  ;;  %v3072_v18 = vmax.f32 %v3056_v3, %v3040_v51  ;;  %v3073_v7 = vmax.f32 %v3057_v44, %v3041_v34  ;;  %v3101_v14 = vld [vmem:[#allocation3 + $0x20] sm:$0x1]  ;;  %v3164_v11 = vmax.f32 %v3100_v10, %v3116_v6 }
 0x1e5   : > { %v3044_v0 = vld [vmem:[#allocation3 + $0x92] sm:$0x1]  ;;  %v3074_v63 = vmax.f32 %v3058_v21, %v3042_v8  ;;  %v3075_v50 = vmax.f32 %v3059_v40, %v3043_v19  ;;  %3085 = vst.msk [vmem:[#allocation2 + $0x20] sm:$0x1] %vm1543_vm3, %v3069_v60  ;;  %3086 = vst.msk [vmem:[#allocation2 + $0x30] sm:$0x1] %vm1543_vm3, %v3070_v61 }
 0x1e6   : > { %v3076_v33 = vmax.f32 %v3060_v15, %v3044_v0  ;;  %3087 = vst.msk [vmem:[#allocation2 + $0x40] sm:$0x1] %vm1543_vm3, %v3071_v54  ;;  %v3102_v49 = vld [vmem:[#allocation3 + $0x30] sm:$0x1]  ;;  %v3103_v36 = vld [vmem:[#allocation3 + $0x40] sm:$0x1] }
 0x1e7   : > { %v3104_v52 = vld [vmem:[#allocation3 + $0x50] sm:$0x1]  ;;  %3088 = vst.msk [vmem:[#allocation2 + $0x50] sm:$0x1] %vm1543_vm3, %v3072_v18  ;;  %3089 = vst.msk [vmem:[#allocation2 + $0x60] sm:$0x1] %vm1543_vm3, %v3073_v7 }
 0x1e8   : > { %3090 = vst.msk [vmem:[#allocation2 + $0x70] sm:$0x1] %vm1543_vm3, %v3074_v63  ;;  %v3105_v22 = vld [vmem:[#allocation3 + $0x60] sm:$0x1]  ;;  %v3106_v57 = vld [vmem:[#allocation3 + $0x70] sm:$0x1] }
 0x1e9   : > { %v3107_v27 = vld [vmem:[#allocation3 + $0x80] sm:$0x1]  ;;  %3091 = vst.msk [vmem:[#allocation2 + $0x80] sm:$0x1] %vm1543_vm3, %v3075_v50  ;;  %3092 = vst.msk [vmem:[#allocation2 + $0x90] sm:$0x1] %vm1543_vm3, %v3076_v33 }
 0x1ea   : > { %v3108_v42 = vld [vmem:[#allocation3 + $0x90] sm:$0x1]  ;;  %v3117_v48 = vld [vmem:[#allocation3 + $0x21] sm:$0x1]  ;;  %v3118_v16 = vld [vmem:[#allocation3 + $0x31] sm:$0x1] }
 0x1eb   : > { %v3119_v41 = vld [vmem:[#allocation3 + $0x41] sm:$0x1]  ;;  %v3120_v39 = vld [vmem:[#allocation3 + $0x51] sm:$0x1]  ;;  %v3165_v17 = vmax.f32 %v3101_v14, %v3117_v48  ;;  %v3166_v20 = vmax.f32 %v3102_v49, %v3118_v16  ;;  %v3131_v58 = vld [vmem:[#allocation3 + $0x2] sm:$0x1] }
 0x1ec   : > { %v3121_v38 = vld [vmem:[#allocation3 + $0x61] sm:$0x1]  ;;  %v3122_v23 = vld [vmem:[#allocation3 + $0x71] sm:$0x1]  ;;  %v3167_v47 = vmax.f32 %v3103_v36, %v3119_v41  ;;  %v3168_v12 = vmax.f32 %v3104_v52, %v3120_v39  ;;  %v3132_v56 = vld [vmem:[#allocation3 + $0x12] sm:$0x1]  ;;  %v3179_v15 = vmax.f32 %v3163_v29, %v3131_v58 }
 0x1ed   : > { %v3123_v35 = vld [vmem:[#allocation3 + $0x81] sm:$0x1]  ;;  %v3124_v24 = vld [vmem:[#allocation3 + $0x91] sm:$0x1]  ;;  %v3169_v46 = vmax.f32 %v3105_v22, %v3121_v38  ;;  %v3133_v3 = vld [vmem:[#allocation3 + $0x22] sm:$0x1]  ;;  %v3170_v44 = vmax.f32 %v3106_v57, %v3122_v23  ;;  %v3180_v31 = vmax.f32 %v3164_v11, %v3132_v56 }
 0x1ee   : > { %v3171_v30 = vmax.f32 %v3107_v27, %v3123_v35  ;;  %v3172_v37 = vmax.f32 %v3108_v42, %v3124_v24  ;;  %v3134_v26 = vld [vmem:[#allocation3 + $0x32] sm:$0x1]  ;;  %v3135_v21 = vld [vmem:[#allocation3 + $0x42] sm:$0x1]  ;;  %v3181_v10 = vmax.f32 %v3165_v17, %v3133_v3  ;;  %v3147_v54 = vld [vmem:[#allocation3 + $0x3] sm:$0x1] }
 0x1ef   : > { %v3136_v40 = vld [vmem:[#allocation3 + $0x52] sm:$0x1]  ;;  %v3137_v4 = vld [vmem:[#allocation3 + $0x62] sm:$0x1]  ;;  %v3182_v34 = vmax.f32 %v3166_v20, %v3134_v26  ;;  %v3183_v8 = vmax.f32 %v3167_v47, %v3135_v21  ;;  %v3148_v5 = vld [vmem:[#allocation3 + $0x13] sm:$0x1]  ;;  %v3195_v33 = vmax.f32 %v3179_v15, %v3147_v54 }
 0x1f0   : > { %v3138_v6 = vld [vmem:[#allocation3 + $0x72] sm:$0x1]  ;;  %v3139_v51 = vld [vmem:[#allocation3 + $0x82] sm:$0x1]  ;;  %v3184_v60 = vmax.f32 %v3168_v12, %v3136_v40  ;;  %v3185_v19 = vmax.f32 %v3169_v46, %v3137_v4  ;;  %v3149_v7 = vld [vmem:[#allocation3 + $0x23] sm:$0x1]  ;;  %v3196_v49 = vmax.f32 %v3180_v31, %v3148_v5 }
 0x1f1   : > { %v3140_v61 = vld [vmem:[#allocation3 + $0x92] sm:$0x1]  ;;  %v3186_v0 = vmax.f32 %v3170_v44, %v3138_v6  ;;  %v3187_v18 = vmax.f32 %v3171_v30, %v3139_v51  ;;  %v3150_v63 = vld [vmem:[#allocation3 + $0x33] sm:$0x1]  ;;  %v3151_v14 = vld [vmem:[#allocation3 + $0x43] sm:$0x1]  ;;  %v3197_v57 = vmax.f32 %v3181_v10, %v3149_v7 }
 0x1f2   : > { %v3188_v50 = vmax.f32 %v3172_v37, %v3140_v61  ;;  %v3152_v36 = vld [vmem:[#allocation3 + $0x53] sm:$0x1]  ;;  %v3153_v52 = vld [vmem:[#allocation3 + $0x63] sm:$0x1]  ;;  %v3198_v27 = vmax.f32 %v3182_v34, %v3150_v63  ;;  %v3199_v42 = vmax.f32 %v3183_v8, %v3151_v14  ;;  %3211 = vst.msk [vmem:[#allocation2 + $0x1] sm:$0x1] %vm1543_vm3, %v3195_v33 }
 0x1f3   : > { %v3154_v22 = vld [vmem:[#allocation3 + $0x73] sm:$0x1]  ;;  %v3155_v48 = vld [vmem:[#allocation3 + $0x83] sm:$0x1]  ;;  %v3200_v29 = vmax.f32 %v3184_v60, %v3152_v36  ;;  %v3201_v11 = vmax.f32 %v3185_v19, %v3153_v52  ;;  %3212 = vst.msk [vmem:[#allocation2 + $0x11] sm:$0x1] %vm1543_vm3, %v3196_v49 }
 0x1f4   : > { %v3156_v16 = vld [vmem:[#allocation3 + $0x93] sm:$0x1]  ;;  %v3202_v41 = vmax.f32 %v3186_v0, %v3154_v22  ;;  %v3227_v39 = vld [vmem:[#allocation3 + $0xc] sm:$0x1]  ;;  %v3203_v38 = vmax.f32 %v3187_v18, %v3155_v48  ;;  %3213 = vst.msk [vmem:[#allocation2 + $0x21] sm:$0x1] %vm1543_vm3, %v3197_v57 }
 0x1f5   : > { %v3204_v17 = vmax.f32 %v3188_v50, %v3156_v16  ;;  %3214 = vst.msk [vmem:[#allocation2 + $0x31] sm:$0x1] %vm1543_vm3, %v3198_v27  ;;  %3215 = vst.msk [vmem:[#allocation2 + $0x41] sm:$0x1] %vm1543_vm3, %v3199_v42  ;;  %v3228_v20 = vld [vmem:[#allocation3 + $0x1c] sm:$0x1] }
 0x1f6   : > { %v3229_v23 = vld [vmem:[#allocation3 + $0x2c] sm:$0x1]  ;;  %v3230_v35 = vld [vmem:[#allocation3 + $0x3c] sm:$0x1]  ;;  %3216 = vst.msk [vmem:[#allocation2 + $0x51] sm:$0x1] %vm1543_vm3, %v3200_v29 }
 0x1f7   : > { %3217 = vst.msk [vmem:[#allocation2 + $0x61] sm:$0x1] %vm1543_vm3, %v3201_v11  ;;  %3218 = vst.msk [vmem:[#allocation2 + $0x71] sm:$0x1] %vm1543_vm3, %v3202_v41  ;;  %v3231_v24 = vld [vmem:[#allocation3 + $0x4c] sm:$0x1] }
 0x1f8   : > { %v3232_v47 = vld [vmem:[#allocation3 + $0x5c] sm:$0x1]  ;;  %v3233_v12 = vld [vmem:[#allocation3 + $0x6c] sm:$0x1]  ;;  %3219 = vst.msk [vmem:[#allocation2 + $0x81] sm:$0x1] %vm1543_vm3, %v3203_v38 }
 0x1f9   : > { %3220 = vst.msk [vmem:[#allocation2 + $0x91] sm:$0x1] %vm1543_vm3, %v3204_v17  ;;  %v3234_v46 = vld [vmem:[#allocation3 + $0x7c] sm:$0x1]  ;;  %v3235_v58 = vld [vmem:[#allocation3 + $0x8c] sm:$0x1] }
 0x1fa   : > { %v3236_v56 = vld [vmem:[#allocation3 + $0x9c] sm:$0x1]  ;;  %v3243_v3 = vld [vmem:[#allocation3 + $0xd] sm:$0x1]  ;;  %v3244_v44 = vld [vmem:[#allocation3 + $0x1d] sm:$0x1] }
 0x1fb   : > { %v3245_v30 = vld [vmem:[#allocation3 + $0x2d] sm:$0x1]  ;;  %v3246_v37 = vld [vmem:[#allocation3 + $0x3d] sm:$0x1]  ;;  %v3291_v40 = vmax.f32 %v3227_v39, %v3243_v3  ;;  %v3292_v15 = vmax.f32 %v3228_v20, %v3244_v44  ;;  %v3259_v61 = vld [vmem:[#allocation3 + $0xe] sm:$0x1] }
 0x1fc   : > { %v3247_v26 = vld [vmem:[#allocation3 + $0x4d] sm:$0x1]  ;;  %v3248_v21 = vld [vmem:[#allocation3 + $0x5d] sm:$0x1]  ;;  %v3293_v31 = vmax.f32 %v3229_v23, %v3245_v30  ;;  %v3294_v51 = vmax.f32 %v3230_v35, %v3246_v37  ;;  %v3260_v54 = vld [vmem:[#allocation3 + $0x1e] sm:$0x1] }
 0x1fd   : > { %v3249_v10 = vld [vmem:[#allocation3 + $0x6d] sm:$0x1]  ;;  %v3250_v4 = vld [vmem:[#allocation3 + $0x7d] sm:$0x1]  ;;  %v3295_v34 = vmax.f32 %v3231_v24, %v3247_v26  ;;  %v3296_v8 = vmax.f32 %v3232_v47, %v3248_v21  ;;  %v3261_v18 = vld [vmem:[#allocation3 + $0x2e] sm:$0x1]  ;;  %v3307_v50 = vmax.f32 %v3291_v40, %v3259_v61  ;;  %v3308_v33 = vmax.f32 %v3292_v15, %v3260_v54 }
 0x1fe   : > { %v3251_v6 = vld [vmem:[#allocation3 + $0x8d] sm:$0x1]  ;;  %v3252_v60 = vld [vmem:[#allocation3 + $0x9d] sm:$0x1]  ;;  %v3297_v5 = vmax.f32 %v3233_v12, %v3249_v10  ;;  %v3298_v19 = vmax.f32 %v3234_v46, %v3250_v4  ;;  %v3262_v7 = vld [vmem:[#allocation3 + $0x3e] sm:$0x1]  ;;  %v3309_v22 = vmax.f32 %v3293_v31, %v3261_v18 }
 0x1ff   : > { %v3299_v0 = vmax.f32 %v3235_v58, %v3251_v6  ;;  %v3263_v63 = vld [vmem:[#allocation3 + $0x4e] sm:$0x1]  ;;  %v3300_v14 = vmax.f32 %v3236_v56, %v3252_v60  ;;  %v3264_v49 = vld [vmem:[#allocation3 + $0x5e] sm:$0x1]  ;;  %v3310_v57 = vmax.f32 %v3294_v51, %v3262_v7  ;;  %v3275_v16 = vld [vmem:[#allocation3 + $0xf] sm:$0x1] }
 0x200   : > { %v3265_v36 = vld [vmem:[#allocation3 + $0x6e] sm:$0x1]  ;;  %v3266_v52 = vld [vmem:[#allocation3 + $0x7e] sm:$0x1]  ;;  %v3311_v27 = vmax.f32 %v3295_v34, %v3263_v63  ;;  %v3312_v29 = vmax.f32 %v3296_v8, %v3264_v49  ;;  %v3276_v39 = vld [vmem:[#allocation3 + $0x1f] sm:$0x1]  ;;  %v3323_v35 = vmax.f32 %v3307_v50, %v3275_v16 }
 0x201   : > { %v3267_v42 = vld [vmem:[#allocation3 + $0x8e] sm:$0x1]  ;;  %v3268_v48 = vld [vmem:[#allocation3 + $0x9e] sm:$0x1]  ;;  %v3313_v11 = vmax.f32 %v3297_v5, %v3265_v36  ;;  %v3314_v41 = vmax.f32 %v3298_v19, %v3266_v52  ;;  %v3277_v38 = vld [vmem:[#allocation3 + $0x2f] sm:$0x1]  ;;  %v3324_v46 = vmax.f32 %v3308_v33, %v3276_v39 }
 0x202   : > { %v3278_v17 = vld [vmem:[#allocation3 + $0x3f] sm:$0x1]  ;;  %v3315_v20 = vmax.f32 %v3299_v0, %v3267_v42  ;;  %v3316_v23 = vmax.f32 %v3300_v14, %v3268_v48  ;;  %v3279_v24 = vld [vmem:[#allocation3 + $0x4f] sm:$0x1]  ;;  %v3325_v58 = vmax.f32 %v3309_v22, %v3277_v38  ;;  %3339 = vst.msk [vmem:[#allocation2 + $0xe] sm:$0x1] %vm1543_vm3, %v3323_v35 }
 0x203   : > { %v3280_v47 = vld [vmem:[#allocation3 + $0x5f] sm:$0x1]  ;;  %v3281_v12 = vld [vmem:[#allocation3 + $0x6f] sm:$0x1]  ;;  %v3326_v56 = vmax.f32 %v3310_v57, %v3278_v17  ;;  %v3327_v37 = vmax.f32 %v3311_v27, %v3279_v24  ;;  %3340 = vst.msk [vmem:[#allocation2 + $0x1e] sm:$0x1] %vm1543_vm3, %v3324_v46 }
 0x204   : > { %v3282_v3 = vld [vmem:[#allocation3 + $0x7f] sm:$0x1]  ;;  %v3283_v44 = vld [vmem:[#allocation3 + $0x8f] sm:$0x1]  ;;  %v3328_v26 = vmax.f32 %v3312_v29, %v3280_v47  ;;  %v3329_v21 = vmax.f32 %v3313_v11, %v3281_v12  ;;  %3341 = vst.msk [vmem:[#allocation2 + $0x2e] sm:$0x1] %vm1543_vm3, %v3325_v58 }
 0x205   : > { %v3284_v30 = vld [vmem:[#allocation3 + $0x9f] sm:$0x1]  ;;  %v3330_v40 = vmax.f32 %v3314_v41, %v3282_v3  ;;  %v3331_v15 = vmax.f32 %v3315_v20, %v3283_v44  ;;  %3342 = vst.msk [vmem:[#allocation2 + $0x3e] sm:$0x1] %vm1543_vm3, %v3326_v56  ;;  %v3355_v10 = vld [vmem:[#allocation3 + $0xd] sm:$0x1] }
 0x206   : > { %v3332_v31 = vmax.f32 %v3316_v23, %v3284_v30  ;;  %v3356_v4 = vld [vmem:[#allocation3 + $0x1d] sm:$0x1]  ;;  %v3357_v6 = vld [vmem:[#allocation3 + $0x2d] sm:$0x1]  ;;  %3343 = vst.msk [vmem:[#allocation2 + $0x4e] sm:$0x1] %vm1543_vm3, %v3327_v37 }
 0x207   : > { %3344 = vst.msk [vmem:[#allocation2 + $0x5e] sm:$0x1] %vm1543_vm3, %v3328_v26  ;;  %3345 = vst.msk [vmem:[#allocation2 + $0x6e] sm:$0x1] %vm1543_vm3, %v3329_v21  ;;  %v3358_v51 = vld [vmem:[#allocation3 + $0x3d] sm:$0x1] }
 0x208   : > { %v3359_v34 = vld [vmem:[#allocation3 + $0x4d] sm:$0x1]  ;;  %v3360_v8 = vld [vmem:[#allocation3 + $0x5d] sm:$0x1]  ;;  %3346 = vst.msk [vmem:[#allocation2 + $0x7e] sm:$0x1] %vm1543_vm3, %v3330_v40 }
 0x209   : > { %3347 = vst.msk [vmem:[#allocation2 + $0x8e] sm:$0x1] %vm1543_vm3, %v3331_v15  ;;  %3348 = vst.msk [vmem:[#allocation2 + $0x9e] sm:$0x1] %vm1543_vm3, %v3332_v31  ;;  %v3361_v60 = vld [vmem:[#allocation3 + $0x6d] sm:$0x1] }
 0x20a   : > { %v3362_v61 = vld [vmem:[#allocation3 + $0x7d] sm:$0x1]  ;;  %v3363_v54 = vld [vmem:[#allocation3 + $0x8d] sm:$0x1]  ;;  %v3371_v19 = vld [vmem:[#allocation3 + $0xe] sm:$0x1] }
 0x20b   : > { %v3364_v5 = vld [vmem:[#allocation3 + $0x9d] sm:$0x1]  ;;  %v3372_v0 = vld [vmem:[#allocation3 + $0x1e] sm:$0x1]  ;;  %v3373_v18 = vld [vmem:[#allocation3 + $0x2e] sm:$0x1]  ;;  %v3403_v14 = vmax.f32 %v3355_v10, %v3371_v19 }
 0x20c   : > { %v3374_v7 = vld [vmem:[#allocation3 + $0x3e] sm:$0x1]  ;;  %v3375_v63 = vld [vmem:[#allocation3 + $0x4e] sm:$0x1]  ;;  %v3404_v50 = vmax.f32 %v3356_v4, %v3372_v0  ;;  %v3405_v52 = vmax.f32 %v3357_v6, %v3373_v18  ;;  %v3387_v48 = vld [vmem:[#allocation3 + $0xf] sm:$0x1] }
 0x20d   : > { %v3376_v33 = vld [vmem:[#allocation3 + $0x5e] sm:$0x1]  ;;  %v3377_v49 = vld [vmem:[#allocation3 + $0x6e] sm:$0x1]  ;;  %v3406_v22 = vmax.f32 %v3358_v51, %v3374_v7  ;;  %v3407_v57 = vmax.f32 %v3359_v34, %v3375_v63  ;;  %v3388_v41 = vld [vmem:[#allocation3 + $0x1f] sm:$0x1]  ;;  %v3419_v23 = vmax.f32 %v3403_v14, %v3387_v48 }
 0x20e   : > { %v3378_v36 = vld [vmem:[#allocation3 + $0x7e] sm:$0x1]  ;;  %v3379_v27 = vld [vmem:[#allocation3 + $0x8e] sm:$0x1]  ;;  %v3408_v16 = vmax.f32 %v3360_v8, %v3376_v33  ;;  %v3409_v29 = vmax.f32 %v3361_v60, %v3377_v49  ;;  %v3389_v39 = vld [vmem:[#allocation3 + $0x2f] sm:$0x1]  ;;  %v3420_v12 = vmax.f32 %v3404_v50, %v3388_v41 }
 0x20f   : > { %v3380_v42 = vld [vmem:[#allocation3 + $0x9e] sm:$0x1]  ;;  %v3410_v11 = vmax.f32 %v3362_v61, %v3378_v36  ;;  %v3390_v38 = vld [vmem:[#allocation3 + $0x3f] sm:$0x1]  ;;  %v3411_v17 = vmax.f32 %v3363_v54, %v3379_v27  ;;  %v3391_v35 = vld [vmem:[#allocation3 + $0x4f] sm:$0x1]  ;;  %v3421_v46 = vmax.f32 %v3405_v52, %v3389_v39 }
 0x210   : > { %v3412_v20 = vmax.f32 %v3364_v5, %v3380_v42  ;;  %v3392_v24 = vld [vmem:[#allocation3 + $0x5f] sm:$0x1]  ;;  %v3393_v47 = vld [vmem:[#allocation3 + $0x6f] sm:$0x1]  ;;  %v3422_v58 = vmax.f32 %v3406_v22, %v3390_v38  ;;  %v3423_v30 = vmax.f32 %v3407_v57, %v3391_v35  ;;  %3435 = vst.msk [vmem:[#allocation2 + $0xf] sm:$0x1] %vm1543_vm3, %v3419_v23 }
 0x211   : > { %v3394_v56 = vld [vmem:[#allocation3 + $0x7f] sm:$0x1]  ;;  %v3395_v3 = vld [vmem:[#allocation3 + $0x8f] sm:$0x1]  ;;  %v3424_v37 = vmax.f32 %v3408_v16, %v3392_v24  ;;  %v3425_v26 = vmax.f32 %v3409_v29, %v3393_v47  ;;  %v7340_v21 = vld [vmem:[#allocation3 + $0xc0] sm:$0x1] }
 0x212   : > { %v3396_v44 = vld [vmem:[#allocation3 + $0x9f] sm:$0x1]  ;;  %v7342_v40 = vld [vmem:[#allocation3 + $0xc1] sm:$0x1]  ;;  %v3426_v15 = vmax.f32 %v3410_v11, %v3394_v56  ;;  %v3427_v31 = vmax.f32 %v3411_v17, %v3395_v3  ;;  %3436 = vst.msk [vmem:[#allocation2 + $0x1f] sm:$0x1] %vm1543_vm3, %v3420_v12 }
 0x213   : > { %v3428_v10 = vmax.f32 %v3412_v20, %v3396_v44  ;;  %3437 = vst.msk [vmem:[#allocation2 + $0x2f] sm:$0x1] %vm1543_vm3, %v3421_v46  ;;  %3438 = vst.msk [vmem:[#allocation2 + $0x3f] sm:$0x1] %vm1543_vm3, %v3422_v58  ;;  %v3745_v4 = vld [vmem:[#allocation2] sm:$0xff]  ;;  %v3747_v6 = vld [vmem:[#allocation2 + $0x10] sm:$0xff] }
 0x214   : > { %v3749_v51 = vld [vmem:[#allocation2 + $0x20] sm:$0xff]  ;;  %3439 = vst.msk [vmem:[#allocation2 + $0x4f] sm:$0x1] %vm1543_vm3, %v3423_v30  ;;  %3440 = vst.msk [vmem:[#allocation2 + $0x5f] sm:$0x1] %vm1543_vm3, %v3424_v37  ;;  %v3751_v34 = vld [vmem:[#allocation2 + $0x30] sm:$0xff]  ;;  %v3865_v61 = vmax.f32 %v3745_v4, %v3747_v6 }
 0x215   : > { %3441 = vst.msk [vmem:[#allocation2 + $0x6f] sm:$0x1] %vm1543_vm3, %v3425_v26  ;;  %v3753_v8 = vld [vmem:[#allocation2 + $0x40] sm:$0xff]  ;;  %v3755_v60 = vld [vmem:[#allocation2 + $0x50] sm:$0xff]  ;;  %v3867_v54 = vmax.f32 %v3747_v6, %v3749_v51  ;;  %3442 = vst.msk [vmem:[#allocation2 + $0x7f] sm:$0x1] %vm1543_vm3, %v3426_v15  ;;  %v3869_v0 = vmax.f32 %v3749_v51, %v3751_v34 }
 0x216   : > { %3443 = vst.msk [vmem:[#allocation2 + $0x8f] sm:$0x1] %vm1543_vm3, %v3427_v31  ;;  %3444 = vst.msk [vmem:[#allocation2 + $0x9f] sm:$0x1] %vm1543_vm3, %v3428_v10  ;;  %v3779_v5 = vld [vmem:[#allocation2 + $0x60] sm:$0xff]  ;;  %v3803_v19 = vld [vmem:[#allocation2 + $0x70] sm:$0xff]  ;;  %v3871_v18 = vmax.f32 %v3751_v34, %v3753_v8  ;;  %v3873_v7 = vmax.f32 %v3753_v8, %v3755_v60  ;;  %v3889_v14 = vmax.f32 %v3865_v61, %v3749_v51 }
 0x217   : > { %v3875_v63 = vmax.f32 %v3755_v60, %v3779_v5  ;;  %v3891_v50 = vmax.f32 %v3867_v54, %v3751_v34  ;;  %v7353_v33 = vld [vmem:[#allocation3 + $0xc8] sm:$0xf]  ;;  %v7355_v49 = vld [vmem:[#allocation3 + $0xc0] sm:$0xff]  ;;  %v3893_v52 = vmax.f32 %v3869_v0, %v3753_v8  ;;  %v7363_v41 = vld [vmem:[#allocation3 + $0xd1] sm:$0xff] }
 0x218   : > { %v3827_v36 = vld [vmem:[#allocation2 + $0x80] sm:$0xff]  ;;  %v3895_v22 = vmax.f32 %v3871_v18, %v3755_v60  ;;  %v3897_v57 = vmax.f32 %v3873_v7, %v3779_v5  ;;  %v3913_v16 = vmax.f32 %v3889_v14, %v3751_v34  ;;  %v7361_v11 = vld [vmem:[#allocation3 + $0xc9] sm:$0xf]  ;;  %v7367_v38 = vld [vmem:[#allocation3 + $0xd0] sm:$0xff] }
 0x219   : > { %v7357_v27 = vld [vmem:[#allocation3 + $0xc1] sm:$0xff]  ;;  %v3899_v48 = vmax.f32 %v3875_v63, %v3803_v19  ;;  %v3915_v29 = vmax.f32 %v3891_v50, %v3753_v8  ;;  %v3917_v20 = vmax.f32 %v3893_v52, %v3755_v60  ;;  %v1327_v24 = vmax.f32 %v7353_v33, %v7361_v11  ;;  %v3748_v47 = vld [vmem:[#allocation2 + $0x18] sm:$0xff]  ;;  %v3851_v7 = vld [vmem:[#allocation2 + $0x90] sm:$0xff] }
 0x21a   : > { %v1326_v39 = vmax.f32 %v7355_v49, %v7357_v27  ;;  %v3746_v17 = vld [vmem:[#allocation2 + $0x8] sm:$0xff]  ;;  %v3919_v23 = vmax.f32 %v3895_v22, %v3779_v5  ;;  %v3921_v35 = vmax.f32 %v3897_v57, %v3803_v19  ;;  %v3752_v46 = vld [vmem:[#allocation2 + $0x38] sm:$0xff]  ;;  %v3937_v56 = vmax.f32 %v3913_v16, %v3753_v8  ;;  %v7379_v0 = vld [vmem:[#allocation3 + $0xe0] sm:$0xff] }
 0x21b   : > { %v3750_v12 = vld [vmem:[#allocation2 + $0x28] sm:$0xff]  ;;  %v3923_v58 = vmax.f32 %v3899_v48, %v3827_v36  ;;  %v3939_v3 = vmax.f32 %v3915_v29, %v3755_v60  ;;  %v1328_v44 = vmax.f32 %v7367_v38, %v7363_v41  ;;  %v3756_v37 = vld [vmem:[#allocation2 + $0x58] sm:$0xff]  ;;  %v3866_v15 = vmax.f32 %v3746_v17, %v3748_v47 }
 0x21c   : > { %v3754_v30 = vld [vmem:[#allocation2 + $0x48] sm:$0xff]  ;;  %v3868_v31 = vmax.f32 %v3748_v47, %v3750_v12  ;;  %v3870_v10 = vmax.f32 %v3750_v12, %v3752_v46  ;;  %v3941_v4 = vmax.f32 %v3917_v20, %v3779_v5  ;;  %v3804_v6 = vld [vmem:[#allocation2 + $0x78] sm:$0xff]  ;;  %v3943_v54 = vmax.f32 %v3919_v23, %v3803_v19  ;;  %3961 = vst.msk [vmem:[#allocation3 + $0x20] sm:$0xff] %vm801_vm2, %v3937_v56  ;;  %v1172_v20 = vld [vmem:[#allocation3 + $0xf0] sm:$0xff] }
 0x21d   : > { %v3780_v26 = vld [vmem:[#allocation2 + $0x68] sm:$0xff]  ;;  %v3872_v51 = vmax.f32 %v3752_v46, %v3754_v30  ;;  %v3874_v34 = vmax.f32 %v3754_v30, %v3756_v37  ;;  %3963 = vst.msk [vmem:[#allocation3 + $0x30] sm:$0xff] %vm801_vm2, %v3939_v3  ;;  %v7375_v8 = vld [vmem:[#allocation3 + $0xd8] sm:$0xf]  ;;  %v3890_v63 = vmax.f32 %v3866_v15, %v3750_v12  ;;  %v3945_v50 = vmax.f32 %v3921_v35, %v3827_v36 }
 0x21e   : > { %v3876_v61 = vmax.f32 %v3756_v37, %v3780_v26  ;;  %v7377_v60 = vld [vmem:[#allocation3 + $0xd9] sm:$0xf]  ;;  %v3828_v18 = vld [vmem:[#allocation2 + $0x88] sm:$0xff]  ;;  %v3892_v14 = vmax.f32 %v3868_v31, %v3752_v46  ;;  %v3894_v5 = vmax.f32 %v3870_v10, %v3754_v30  ;;  %3965 = vst.msk [vmem:[#allocation3 + $0x40] sm:$0xff] %vm801_vm2, %v3941_v4  ;;  %v3947_v48 = vmax.f32 %v3923_v58, %v3851_v7  ;;  %v1204_v36 = vld [vmem:[#allocation3 + $0xf1] sm:$0xff] }
 0x21f   : > { %v1202_v52 = vld [vmem:[#allocation3 + $0xe1] sm:$0xff]  ;;  %v3896_v19 = vmax.f32 %v3872_v51, %v3756_v37  ;;  %v3898_v22 = vmax.f32 %v3874_v34, %v3780_v26  ;;  %3967 = vst.msk [vmem:[#allocation3 + $0x50] sm:$0xff] %vm801_vm2, %v3943_v54  ;;  %v1173_v29 = vld [vmem:[#allocation3 + $0xf8] sm:$0xf]  ;;  %v1203_v17 = vld [vmem:[#allocation3 + $0xe9] sm:$0xf]  ;;  %v3914_v47 = vmax.f32 %v3890_v63, %v3752_v46  ;;  %v1329_v3 = vmax.f32 %v7375_v8, %v7377_v60 }
 0x220   : > { %v3900_v57 = vmax.f32 %v3876_v61, %v3804_v6  ;;  %v1171_v16 = vld [vmem:[#allocation3 + $0xe8] sm:$0xf]  ;;  %v3852_v23 = vld [vmem:[#allocation2 + $0x98] sm:$0xff]  ;;  %v3916_v56 = vmax.f32 %v3892_v14, %v3754_v30  ;;  %v3918_v12 = vmax.f32 %v3894_v5, %v3756_v37  ;;  %3969 = vst.msk [vmem:[#allocation3 + $0x60] sm:$0xff] %vm801_vm2, %v3945_v50  ;;  %3971 = vst.msk [vmem:[#allocation3 + $0x70] sm:$0xff] %vm801_vm2, %v3947_v48 }
 0x221   : > { %v1205_v35 = vld [vmem:[#allocation3 + $0xf9] sm:$0xf]  ;;  %v3920_v15 = vmax.f32 %v3896_v19, %v3780_v26  ;;  %v3922_v31 = vmax.f32 %v3898_v22, %v3804_v6  ;;  %v1230_v10 = vld [vmem:[#allocation3 + $0xc2] sm:$0xff]  ;;  %v1231_v4 = vld [vmem:[#allocation3 + $0xca] sm:$0xf]  ;;  %v1330_v34 = vmax.f32 %v7379_v0, %v1202_v52  ;;  %v3938_v46 = vmax.f32 %v3914_v47, %v3754_v30 }
 0x222   : > { %v3924_v58 = vmax.f32 %v3900_v57, %v3828_v18  ;;  %v1232_v51 = vld [vmem:[#allocation3 + $0xd2] sm:$0xff]  ;;  %v3940_v61 = vmax.f32 %v3916_v56, %v3756_v37  ;;  %v3942_v54 = vmax.f32 %v3918_v12, %v3780_v26  ;;  %v1233_v7 = vld [vmem:[#allocation3 + $0xda] sm:$0xf]  ;;  %v1234_v63 = vld [vmem:[#allocation3 + $0xe2] sm:$0xff]  ;;  %v1331_v5 = vmax.f32 %v1171_v16, %v1203_v17 }
 0x223   : > { %v1235_v14 = vld [vmem:[#allocation3 + $0xea] sm:$0xf]  ;;  %v3944_v50 = vmax.f32 %v3920_v15, %v3804_v6  ;;  %v3946_v42 = vmax.f32 %v3922_v31, %v3828_v18  ;;  %v1236_v60 = vld [vmem:[#allocation3 + $0xf2] sm:$0xff]  ;;  %v1237_v19 = vld [vmem:[#allocation3 + $0xfa] sm:$0xf]  ;;  %v1332_v57 = vmax.f32 %v1172_v20, %v1204_v36  ;;  %3962 = vst.msk [vmem:[#allocation3 + $0x28] sm:$0xff] %vm801_vm2, %v3938_v46  ;;  %v1333_v0 = vmax.f32 %v1173_v29, %v1205_v35 }
 0x224   : > { %v3948_v8 = vmax.f32 %v3924_v58, %v3852_v23  ;;  %v1262_v22 = vld [vmem:[#allocation3 + $0xc3] sm:$0xff]  ;;  %3964 = vst.msk [vmem:[#allocation3 + $0x38] sm:$0xff] %vm801_vm2, %v3940_v61  ;;  %3966 = vst.msk [vmem:[#allocation3 + $0x48] sm:$0xff] %vm801_vm2, %v3942_v54  ;;  %v1263_v30 = vld [vmem:[#allocation3 + $0xcb] sm:$0xf]  ;;  %v1358_v6 = vmax.f32 %v1326_v39, %v1230_v10  ;;  %v1359_v18 = vmax.f32 %v1327_v24, %v1231_v4 }
 0x225   : > { %v1264_v37 = vld [vmem:[#allocation3 + $0xd3] sm:$0xff]  ;;  %v1265_v26 = vld [vmem:[#allocation3 + $0xdb] sm:$0xf]  ;;  %v1360_v52 = vmax.f32 %v1328_v44, %v1232_v51  ;;  %3968 = vst.msk [vmem:[#allocation3 + $0x58] sm:$0xff] %vm801_vm2, %v3944_v50  ;;  %3970 = vst.msk [vmem:[#allocation3 + $0x68] sm:$0xff] %vm801_vm2, %v3946_v42  ;;  %v1361_v17 = vmax.f32 %v1329_v3, %v1233_v7  ;;  %v1362_v49 = vmax.f32 %v1330_v34, %v1234_v63 }
 0x226   : > { %3972 = vst.msk [vmem:[#allocation3 + $0x78] sm:$0xff] %vm801_vm2, %v3948_v8  ;;  %v1266_v48 = vld [vmem:[#allocation3 + $0xe3] sm:$0xff]  ;;  %v1267_v16 = vld [vmem:[#allocation3 + $0xeb] sm:$0xf]  ;;  %v1268_v29 = vld [vmem:[#allocation3 + $0xf3] sm:$0xff]  ;;  %v1363_v27 = vmax.f32 %v1331_v5, %v1235_v14  ;;  %v1364_v39 = vmax.f32 %v1332_v57, %v1236_v60  ;;  %v1365_v23 = vmax.f32 %v1333_v0, %v1237_v19  ;;  %v1390_v41 = vmax.f32 %v1358_v6, %v1262_v22 }
 0x227   : > { %v1573_v20 = vld [vmem:[#allocation3 + $0xd0] sm:$0x1]  ;;  %v1269_v33 = vld [vmem:[#allocation3 + $0xfb] sm:$0xf]  ;;  %v1294_v11 = vld [vmem:[#allocation3 + $0xc4] sm:$0xff]  ;;  %v1391_v38 = vmax.f32 %v1359_v18, %v1263_v30  ;;  %v1392_v44 = vmax.f32 %v1360_v52, %v1264_v37  ;;  %v1393_v12 = vmax.f32 %v1361_v17, %v1265_v26  ;;  %v1394_v36 = vmax.f32 %v1362_v49, %v1266_v48 }
 0x228   : > { %v1295_v24 = vld [vmem:[#allocation3 + $0xcc] sm:$0xf]  ;;  %v1296_v47 = vld [vmem:[#allocation3 + $0xd4] sm:$0xff]  ;;  %v1297_v56 = vld [vmem:[#allocation3 + $0xdc] sm:$0xf]  ;;  %v1395_v35 = vmax.f32 %v1363_v27, %v1267_v16  ;;  %v1396_v15 = vmax.f32 %v1364_v39, %v1268_v29  ;;  %v1397_v10 = vmax.f32 %v1365_v23, %v1269_v33  ;;  %v1422_v4 = vmax.f32 %v1390_v41, %v1294_v11 }
 0x229   : > { %v1298_v42 = vld [vmem:[#allocation3 + $0xe4] sm:$0xff]  ;;  %v1575_v31 = vld [vmem:[#allocation3 + $0xf0] sm:$0x1]  ;;  %v1299_v3 = vld [vmem:[#allocation3 + $0xec] sm:$0xf]  ;;  %v1423_v51 = vmax.f32 %v1391_v38, %v1295_v24  ;;  %v1424_v34 = vmax.f32 %v1392_v44, %v1296_v47  ;;  %v1425_v54 = vmax.f32 %v1393_v12, %v1297_v56  ;;  %v8492_v19 = vmax.f32 %v7340_v21, %v7342_v40 }
 0x22a   : > { %v1300_v58 = vld [vmem:[#allocation3 + $0xf4] sm:$0xff]  ;;  %v1589_v46 = vld [vmem:[#allocation3 + $0xd1] sm:$0x1]  ;;  %v1301_v61 = vld [vmem:[#allocation3 + $0xfc] sm:$0xf]  ;;  %v1426_v7 = vmax.f32 %v1394_v36, %v1298_v42  ;;  %v1427_v63 = vmax.f32 %v1395_v35, %v1299_v3  ;;  %1455 = vst.msk [vmem:[#allocation2 + $0xc2] sm:$0xff] %vm801_vm2, %v1422_v4 }
 0x22b   : > { %v1428_v14 = vmax.f32 %v1396_v15, %v1300_v58  ;;  %v1591_v5 = vld [vmem:[#allocation3 + $0xf1] sm:$0x1]  ;;  %v1604_v50 = vld [vmem:[#allocation3 + $0xc2] sm:$0x1]  ;;  %v1429_v8 = vmax.f32 %v1397_v10, %v1301_v61  ;;  %1456 = vst.msk [vmem:[#allocation2 + $0xca] sm:$0xf] %vm1431_vm4, %v1423_v51  ;;  %v1637_v60 = vmax.f32 %v1573_v20, %v1589_v46 }
 0x22c   : > { %1457 = vst.msk [vmem:[#allocation2 + $0xd2] sm:$0xff] %vm801_vm2, %v1424_v34  ;;  %v1652_v22 = vmax.f32 %v8492_v19, %v1604_v50  ;;  %1459 = vst.msk [vmem:[#allocation2 + $0xe2] sm:$0xff] %vm801_vm2, %v1426_v7  ;;  %v1605_v57 = vld [vmem:[#allocation3 + $0xd2] sm:$0x1]  ;;  %v1639_v30 = vmax.f32 %v1575_v31, %v1591_v5  ;;  %v1620_v26 = vld [vmem:[#allocation3 + $0xc3] sm:$0x1] }
 0x22d   : > { %1458 = vst.msk [vmem:[#allocation2 + $0xda] sm:$0xf] %vm1431_vm4, %v1425_v54  ;;  %1460 = vst.msk [vmem:[#allocation2 + $0xea] sm:$0xf] %vm1431_vm4, %v1427_v63  ;;  %v1653_v37 = vmax.f32 %v1637_v60, %v1605_v57  ;;  %v1621_v0 = vld [vmem:[#allocation3 + $0xd3] sm:$0x1] }
 0x22e   : > { %1461 = vst.msk [vmem:[#allocation2 + $0xf2] sm:$0xff] %vm801_vm2, %v1428_v14  ;;  %v1668_v6 = vmax.f32 %v1652_v22, %v1620_v26  ;;  %v1607_v18 = vld [vmem:[#allocation3 + $0xf2] sm:$0x1]  ;;  %v4045_v21 = vld [vmem:[#allocation3 + $0x20] sm:$0xff]  ;;  %v1623_v49 = vld [vmem:[#allocation3 + $0xf3] sm:$0x1] }
 0x22f   : > { %1462 = vst.msk [vmem:[#allocation2 + $0xfa] sm:$0xf] %vm1431_vm4, %v1429_v8  ;;  %v1669_v52 = vmax.f32 %v1653_v37, %v1621_v0  ;;  %v4077_v40 = vld [vmem:[#allocation3 + $0x21] sm:$0xff]  ;;  %v1655_v48 = vmax.f32 %v1639_v30, %v1607_v18  ;;  %v4047_v16 = vld [vmem:[#allocation3 + $0x30] sm:$0xff]  ;;  %v1700_v27 = vld [vmem:[#allocation3 + $0xcc] sm:$0x1]  ;;  %v2523_v18 = vmax.f32 %v7075_v62, %v7092_v28 }
 0x230   : > { %1684 = vst.msk [vmem:[#allocation2 + $0xc1] sm:$0x1] %vm1543_vm3, %v1668_v6  ;;  %v4079_v29 = vld [vmem:[#allocation3 + $0x31] sm:$0xff]  ;;  %v4205_v17 = vmax.f32 %v4045_v21, %v4077_v40  ;;  %v1701_v39 = vld [vmem:[#allocation3 + $0xdc] sm:$0x1]  ;;  %v4109_v20 = vld [vmem:[#allocation3 + $0x22] sm:$0xff] }
 0x231   : > { %1685 = vst.msk [vmem:[#allocation2 + $0xd1] sm:$0x1] %vm1543_vm3, %v1669_v52  ;;  %v4207_v33 = vmax.f32 %v4047_v16, %v4079_v29  ;;  %v1671_v11 = vmax.f32 %v1655_v48, %v1623_v49  ;;  %v1702_v24 = vld [vmem:[#allocation3 + $0xec] sm:$0x1]  ;;  %v1703_v23 = vld [vmem:[#allocation3 + $0xfc] sm:$0x1] }
 0x232   : > { %v1716_v41 = vld [vmem:[#allocation3 + $0xcd] sm:$0x1]  ;;  %v4111_v38 = vld [vmem:[#allocation3 + $0x32] sm:$0xff]  ;;  %v1717_v44 = vld [vmem:[#allocation3 + $0xdd] sm:$0x1]  ;;  %v7417_v58 = vmax.f32 %v4205_v17, %v4109_v20  ;;  %v2524_v17 = vmax.f32 %v7136_v32, %v7152_v53 }
 0x233   : > { %v1718_v47 = vld [vmem:[#allocation3 + $0xed] sm:$0x1]  ;;  %v1719_v56 = vld [vmem:[#allocation3 + $0xfd] sm:$0x1]  ;;  %v1764_v42 = vmax.f32 %v1700_v27, %v1716_v41  ;;  %1687 = vst.msk [vmem:[#allocation2 + $0xf1] sm:$0x1] %vm1543_vm3, %v1671_v11  ;;  %v1765_v15 = vmax.f32 %v1701_v39, %v1717_v44  ;;  %v7419_v46 = vmax.f32 %v4207_v33, %v4111_v38 }
 0x234   : > { %v1732_v12 = vld [vmem:[#allocation3 + $0xce] sm:$0x1]  ;;  %v1733_v36 = vld [vmem:[#allocation3 + $0xde] sm:$0x1]  ;;  %v1766_v31 = vmax.f32 %v1702_v24, %v1718_v47  ;;  %v1767_v3 = vmax.f32 %v1703_v23, %v1719_v56  ;;  %v1748_v4 = vld [vmem:[#allocation3 + $0xcf] sm:$0x1] }
 0x235   : > { %v1734_v35 = vld [vmem:[#allocation3 + $0xee] sm:$0x1]  ;;  %v1735_v10 = vld [vmem:[#allocation3 + $0xfe] sm:$0x1]  ;;  %v1749_v51 = vld [vmem:[#allocation3 + $0xdf] sm:$0x1]  ;;  %v1780_v34 = vmax.f32 %v1764_v42, %v1732_v12  ;;  %v1781_v7 = vmax.f32 %v1765_v15, %v1733_v36 }
 0x236   : > { %v1750_v61 = vld [vmem:[#allocation3 + $0xef] sm:$0x1]  ;;  %v1751_v54 = vld [vmem:[#allocation3 + $0xff] sm:$0x1]  ;;  %v1782_v63 = vmax.f32 %v1766_v31, %v1734_v35  ;;  %v1783_v14 = vmax.f32 %v1767_v3, %v1735_v10  ;;  %v1828_v5 = vld [vmem:[#allocation3 + $0xcd] sm:$0x1]  ;;  %v1945_v3 = vpack.c.bf16 %v7046_v59, %v7044_v45 }
 0x237   : > { %v4141_v50 = vld [vmem:[#allocation3 + $0x23] sm:$0xff]  ;;  %v1796_v8 = vmax.f32 %v1780_v34, %v1748_v4  ;;  %v1829_v60 = vld [vmem:[#allocation3 + $0xdd] sm:$0x1]  ;;  %v1830_v19 = vld [vmem:[#allocation3 + $0xed] sm:$0x1]  ;;  %v1797_v57 = vmax.f32 %v1781_v7, %v1749_v51 }
 0x238   : > { %v1831_v22 = vld [vmem:[#allocation3 + $0xfd] sm:$0x1]  ;;  %v1798_v30 = vmax.f32 %v1782_v63, %v1750_v61  ;;  %v1799_v37 = vmax.f32 %v1783_v14, %v1751_v54  ;;  %v1844_v26 = vld [vmem:[#allocation3 + $0xce] sm:$0x1]  ;;  %v1845_v0 = vld [vmem:[#allocation3 + $0xde] sm:$0x1]  ;;  %v4269_v49 = vmax.f32 %v7417_v58, %v4141_v50 }
 0x239   : > { %v1846_v6 = vld [vmem:[#allocation3 + $0xee] sm:$0x1]  ;;  %v4143_v52 = vld [vmem:[#allocation3 + $0x33] sm:$0xff]  ;;  %1812 = vst.msk [vmem:[#allocation2 + $0xce] sm:$0x1] %vm1543_vm3, %v1796_v8  ;;  %v1876_v48 = vmax.f32 %v1828_v5, %v1844_v26  ;;  %v1877_v16 = vmax.f32 %v1829_v60, %v1845_v0  ;;  %v7431_v11 = vld [vmem:[#allocation2 + $0xa0] sm:$0xff] }
 0x23a   : > { %v1847_v21 = vld [vmem:[#allocation3 + $0xfe] sm:$0x1]  ;;  %v1860_v40 = vld [vmem:[#allocation3 + $0xcf] sm:$0x1]  ;;  %v1878_v29 = vmax.f32 %v1830_v19, %v1846_v6  ;;  %v4271_v27 = vmax.f32 %v7419_v46, %v4143_v52  ;;  %1813 = vst.msk [vmem:[#allocation2 + $0xde] sm:$0x1] %vm1543_vm3, %v1797_v57  ;;  %v2525_v56 = vmax.f32 %v7092_v28, %v7431_v11  ;;  %v2547_v4 = vmax.f32 %v2523_v18, %v7431_v11 }
 0x23b   : > { %1814 = vst.msk [vmem:[#allocation2 + $0xee] sm:$0x1] %vm1543_vm3, %v1798_v30  ;;  %1815 = vst.msk [vmem:[#allocation2 + $0xfe] sm:$0x1] %vm1543_vm3, %v1799_v37  ;;  %v1861_v39 = vld [vmem:[#allocation3 + $0xdf] sm:$0x1]  ;;  %v1879_v33 = vmax.f32 %v1831_v22, %v1847_v21  ;;  %v1892_v23 = vmax.f32 %v1876_v48, %v1860_v40 }
 0x23c   : > { %v1862_v20 = vld [vmem:[#allocation3 + $0xef] sm:$0x1]  ;;  %v1863_v24 = vld [vmem:[#allocation3 + $0xff] sm:$0x1]  ;;  %v1893_v41 = vmax.f32 %v1877_v16, %v1861_v39  ;;  %v7435_v47 = vld [vmem:[#allocation2 + $0xb0] sm:$0xff] }
 0x23d   : > { %v1894_v38 = vmax.f32 %v1878_v29, %v1862_v20  ;;  %v7433_v44 = vld [vmem:[#allocation2 + $0xa8] sm:$0xff]  ;;  %v1895_v42 = vmax.f32 %v1879_v33, %v1863_v24  ;;  %v7439_v12 = vld [vmem:[#allocation2 + $0xc0] sm:$0xff]  ;;  %v7441_v36 = vld [vmem:[#allocation2 + $0xd0] sm:$0xff]  ;;  %v2527_v31 = vmax.f32 %v7431_v11, %v7435_v47  ;;  %1908 = vst.msk [vmem:[#allocation2 + $0xcf] sm:$0x1] %vm1543_vm3, %v1892_v23  ;;  %v2549_v34 = vmax.f32 %v2525_v56, %v7435_v47 }
 0x23e   : > { %v7443_v35 = vld [vmem:[#allocation2 + $0xe0] sm:$0xff]  ;;  %v2526_v15 = vmax.f32 %v7152_v53, %v7433_v44  ;;  %1909 = vst.msk [vmem:[#allocation2 + $0xdf] sm:$0x1] %vm1543_vm3, %v1893_v41  ;;  %v2529_v10 = vmax.f32 %v7435_v47, %v7439_v12  ;;  %v2548_v51 = vmax.f32 %v2524_v17, %v7433_v44  ;;  %v4175_v46 = vld [vmem:[#allocation3 + $0x34] sm:$0xff]  ;;  %v2663_v7 = vmax.f32 %v7439_v12, %v7441_v36  ;;  %v7501_v39 = vld [vmem:[#allocation2 + $0x28] sm:$0xff] }
 0x23f   : > { %v4173_v58 = vld [vmem:[#allocation3 + $0x24] sm:$0xff]  ;;  %1910 = vst.msk [vmem:[#allocation2 + $0xef] sm:$0x1] %vm1543_vm3, %v1894_v38  ;;  %1911 = vst.msk [vmem:[#allocation2 + $0xff] sm:$0x1] %vm1543_vm3, %v1895_v42  ;;  %v2551_v54 = vmax.f32 %v2527_v31, %v7439_v12  ;;  %v2677_v63 = vmax.f32 %v7441_v36, %v7443_v35  ;;  %v4303_v5 = vmax.f32 %v4271_v27, %v4175_v46  ;;  %v7468_v50 = vld [vmem:[#allocation2 + $0xb8] sm:$0xff] }
 0x240   : > { %v4301_v61 = vmax.f32 %v4269_v49, %v4173_v58  ;;  %v800_v14 = vld [vmem:[%s8406_s3] sm:$0x1]  ;;  %v7470_v8 = vld [vmem:[#allocation2 + $0xf0] sm:$0xff]  ;;  %v2553_v60 = vmax.f32 %v2529_v10, %v7441_v36  ;;  %v2571_v19 = vmax.f32 %v2547_v4, %v7435_v47  ;;  %v2573_v22 = vmax.f32 %v2549_v34, %v7439_v12  ;;  %v5528_v57 = vld [vmem:[%s8406_s3 + $0x1] sm:$0x1] }
 0x241   : > { %5892 = vmatprep.subr.msk.bf16.mxu0 %vm2010_vm5, %v800_v14  ;;  %v2550_v30 = vmax.f32 %v2526_v15, %v7468_v50  ;;  %v2575_v37 = vmax.f32 %v2551_v54, %v7441_v36  ;;  %v2665_v26 = vmax.f32 %v2663_v7, %v7443_v35  ;;  %v2679_v0 = vmax.f32 %v2677_v63, %v7470_v8  ;;  %v5561_v40 = vld [vmem:[%s8406_s3 + $0x2] sm:$0x1]  ;;  %v5578_v48 = vld [vmem:[%s8406_s3 + $0x3] sm:$0x1]  ;;  %v7508_v24 = vld [vmem:[#allocation2 + $0x30] sm:$0xff] }
 0x242   : > { %5891 = vmatprep.subr.msk.bf16.mxu1 %vm2010_vm5, %v5528_v57  ;;  %v2572_v6 = vmax.f32 %v2548_v51, %v7468_v50  ;;  %v2577_v18 = vmax.f32 %v2553_v60, %v7443_v35  ;;  %v2595_v52 = vmax.f32 %v2571_v19, %v7439_v12  ;;  %v2597_v21 = vmax.f32 %v2573_v22, %v7441_v36  ;;  %v7499_v27 = vld [vmem:[#allocation2 + $0x20] sm:$0xff]  ;;  %v7510_v23 = vld [vmem:[#allocation2 + $0x38] sm:$0xff]  ;;  %v7559_v59 = vld [vmem:[#allocation2 + $0x10] sm:$0xff] }
 0x243   : > { %v2599_v16 = vmax.f32 %v2575_v37, %v7443_v35  ;;  %v2667_v29 = vmax.f32 %v2665_v26, %v7470_v8  ;;  %2681 = vst.msk [vmem:[#allocation3 + $0xf0] sm:$0xff] %vm801_vm2, %v2679_v0  ;;  %v2224_v17 = vsel %vm2010_vm5, %v800_v14, 0  ;;  %v2012_v49 = vsel %vm2010_vm5, %v5528_v57, 0  ;;  %8493 = vst [vmem:[#allocation39_spill] sm:$0xff] %v7508_v24  ;;  %v8496_v19 = vld [vmem:[#allocation34_spill] sm:$0xff] }
 0x244   : > { %v2528_v20 = vmax.f32 %v7433_v44, %v7468_v50  ;;  %v2601_v33 = vmax.f32 %v2577_v18, %v7470_v8  ;;  %2619 = vst.msk [vmem:[#allocation3 + $0xa0] sm:$0xff] %vm801_vm2, %v2595_v52  ;;  %2621 = vst.msk [vmem:[#allocation3 + $0xb0] sm:$0xff] %vm801_vm2, %v2597_v21  ;;  %5786 = vmatpush3.bf16.msra.mxu0 %v2224_v17  ;;  %5752 = vmatpush3.bf16.msra.mxu1 %v2012_v49  ;;  %v7513_v41 = vld [vmem:[#allocation2 + $0xc8] sm:$0xff]  ;;  %v3550_v42 = vsel %vm2010_vm5, %v5561_v40, 0  ;;  %v4379_v57 = vld [vmem:[#allocation3 + $0x21] sm:$0x1] }
 0x245   : > { %4333 = vst.msk [vmem:[#allocation2 + $0x22] sm:$0xff] %vm801_vm2, %v4301_v61  ;;  %v7515_v38 = vld [vmem:[#allocation2 + $0xd8] sm:$0xff]  ;;  %2623 = vst.msk [vmem:[#allocation3 + $0xc0] sm:$0xff] %vm801_vm2, %v2599_v16  ;;  %5893 = vmatprep.subr.msk.bf16.mxu1 %vm2010_vm5, %v5561_v40  ;;  %5894 = vmatprep.subr.msk.bf16.mxu0 %vm2010_vm5, %v5578_v48  ;;  %v4908_v15 = vsel %vm2010_vm5, %v5578_v48, 0  ;;  %v1946_v31 = vpack.c.bf16 %v7111_v9, %v7048_v2  ;;  %v2530_v58 = vmax.f32 %v7468_v50, %v7513_v41  ;;  %v4475_v37 = vld [vmem:[#allocation3 + $0x21] sm:$0x1] }
 0x246   : > { %v7517_v56 = vld [vmem:[#allocation2 + $0xe8] sm:$0xff]  ;;  %2669 = vst.msk [vmem:[#allocation3 + $0xe0] sm:$0xff] %vm801_vm2, %v2667_v29  ;;  %4335 = vst.msk [vmem:[#allocation2 + $0x32] sm:$0xff] %vm801_vm2, %v4303_v5  ;;  %v2552_v10 = vmax.f32 %v2528_v20, %v7513_v41  ;;  %v2574_v4 = vmax.f32 %v2550_v30, %v7513_v41  ;;  %v2596_v51 = vmax.f32 %v2572_v6, %v7513_v41  ;;  %v7546_v9 = vld [vmem:[#allocation2 + $0xf8] sm:$0xff] }
 0x247   : > { %2625 = vst.msk [vmem:[#allocation3 + $0xd0] sm:$0xff] %vm801_vm2, %v2601_v33  ;;  %v2664_v34 = vmax.f32 %v7513_v41, %v7515_v38  ;;  %v2678_v46 = vmax.f32 %v7515_v38, %v7517_v56  ;;  %v8494_v2 = vpack.c.bf16 %v6395_v25, %v6366_v13  ;;  %5754 = vmatmul.mubr.msk.bf16.vlgmr.msra.gmra.mxu1 %vm801_vm2, %v1945_v3  ;;  %v7561_v3 = vld [vmem:[#allocation2 + $0x18] sm:$0xff]  ;;  %v4363_v5 = vld [vmem:[#allocation3 + $0x20] sm:$0x1]  ;;  %v8497_v0 = vld [vmem:[#allocation30_spill] sm:$0xff] }
 0x248   : > { %v2554_v61 = vmax.f32 %v2530_v58, %v7515_v38  ;;  %v2576_v54 = vmax.f32 %v2552_v10, %v7515_v38  ;;  %v2598_v7 = vmax.f32 %v2574_v4, %v7515_v38  ;;  %2620 = vst.msk [vmem:[#allocation3 + $0xa8] sm:$0xff] %vm801_vm2, %v2596_v51  ;;  %v8495_v13 = vpack.c.bf16 %v6470_v55, %v6444_v43  ;;  %v4046_v43 = vld [vmem:[#allocation3 + $0x28] sm:$0xf]  ;;  %v4459_v30 = vld [vmem:[#allocation3 + $0x20] sm:$0x1]  ;;  %v8498_v6 = vld [vmem:[#allocation35_spill] sm:$0xff] }
 0x249   : > { %5788 = vmatmul.mubr.msk.bf16.vlgmr.msra.gmra.mxu0 %vm801_vm2, %v8494_v2  ;;  %5820 = vmatpush3.bf16.msra.mxu1 %v3550_v42  ;;  %v2666_v25 = vmax.f32 %v2664_v34, %v7517_v56  ;;  %v2680_v45 = vmax.f32 %v2678_v46, %v7546_v9  ;;  %v4078_v55 = vld [vmem:[#allocation3 + $0x29] sm:$0xf]  ;;  %v1947_v22 = vpack.c.bf16 %v8496_v19, %v7053_v1  ;;  %v7574_v52 = vld [vmem:[#allocation2] sm:$0xff]  ;;  %v8499_v58 = vld [vmem:[#allocation11_spill] sm:$0xff] }
 0x24a   : > { %5791 = vmatprep.mubr.msk.bf16.mxu0 %vm801_vm2, %v8495_v13  ;;  %5854 = vmatpush3.bf16.msra.mxu0 %v4908_v15  ;;  %v2578_v63 = vmax.f32 %v2554_v61, %v7517_v56  ;;  %v2600_v14 = vmax.f32 %v2576_v54, %v7517_v56  ;;  %2622 = vst.msk [vmem:[#allocation3 + $0xb8] sm:$0xff] %vm801_vm2, %v2598_v7  ;;  %v7577_v40 = vld [vmem:[#allocation2 + $0x8] sm:$0xff]  ;;  %v4395_v17 = vld [vmem:[#allocation3 + $0x22] sm:$0x1]  ;;  %v7600_v61 = vld [vmem:[#allocation3 + $0xf0] sm:$0xff] }
 0x24b   : > { %5757 = vmatprep.mubr.msk.bf16.mxu1 %vm801_vm2, %v1946_v31  ;;  %v2668_v60 = vmax.f32 %v2666_v25, %v7546_v9  ;;  %2682 = vst.msk [vmem:[#allocation3 + $0xf8] sm:$0xff] %vm801_vm2, %v2680_v45  ;;  %v1948_v18 = vpack.c.bf16 %v8498_v6, %v8497_v0  ;;  %v2703_v21 = vld [vmem:[#allocation3 + $0xa0] sm:$0xff]  ;;  %v3991_v1 = vmax.f32 %v7574_v52, %v7559_v59  ;;  %v4110_v29 = vld [vmem:[#allocation3 + $0x2a] sm:$0xf]  ;;  %v7594_v34 = vld [vmem:[#allocation3 + $0xb0] sm:$0xff] }
 0x24c   : > { %v2602_v26 = vmax.f32 %v2578_v63, %v7546_v9  ;;  %2624 = vst.msk [vmem:[#allocation3 + $0xc8] sm:$0xff] %vm801_vm2, %v2600_v14  ;;  %v4206_v48 = vmax.f32 %v4046_v43, %v4078_v55  ;;  %v3992_v16 = vmax.f32 %v7577_v40, %v7561_v3  ;;  %v4411_v49 = vmax.f32 %v4363_v5, %v4379_v57  ;;  %v4491_v20 = vld [vmem:[#allocation3 + $0x22] sm:$0x1]  ;;  %v4142_v63 = vld [vmem:[#allocation3 + $0x2b] sm:$0xf] }
 0x24d   : > { %2670 = vst.msk [vmem:[#allocation3 + $0xe8] sm:$0xff] %vm801_vm2, %v2668_v60  ;;  %v4523_v33 = vmax.f32 %v4459_v30, %v4475_v37  ;;  %v8500_v10 = vld [vmem:[#allocation8_spill] sm:$0xff]  ;;  %v3993_v51 = vmax.f32 %v3991_v1, %v7499_v27 }
 0x24e   : > { %2626 = vst.msk [vmem:[#allocation3 + $0xd8] sm:$0xff] %vm801_vm2, %v2602_v26  ;;  %v8501_v4 = vpack.c.bf16 %v8499_v58, %v8500_v10  ;;  %v7596_v46 = vld [vmem:[#allocation3 + $0xc0] sm:$0xff]  ;;  %v3994_v45 = vmax.f32 %v3992_v16, %v7501_v39  ;;  %v7608_v43 = vld [vmem:[#allocation3 + $0xd0] sm:$0xff]  ;;  %v4427_v57 = vmax.f32 %v4411_v49, %v4395_v17  ;;  %v8508_v58 = vld [vmem:[#allocation37_spill] sm:$0xff] }
 0x24f   : > { %v7584_v42 = vld [vmem:[#allocation3 + $0xa8] sm:$0xf]  ;;  %5758 = vmatmul.mubr.msk.bf16.gmra.mxu1 %vm801_vm2, %v1947_v22  ;;  %v7598_v2 = vld [vmem:[#allocation3 + $0xe0] sm:$0xff]  ;;  %v4009_v19 = vmax.f32 %v3993_v51, %v7508_v24  ;;  %3995 = vst.msk [vmem:[#allocation3] sm:$0xff] %vm801_vm2, %v3993_v51  ;;  %v4238_v22 = vmax.f32 %v4206_v48, %v4110_v29  ;;  %v4539_v37 = vmax.f32 %v4523_v33, %v4491_v20  ;;  %v4174_v48 = vld [vmem:[#allocation3 + $0x2c] sm:$0xf] }
 0x250   : > { %v2735_v15 = vld [vmem:[#allocation3 + $0xa1] sm:$0xff]  ;;  %v7586_v31 = vld [vmem:[#allocation3 + $0xa9] sm:$0xf]  ;;  %5761 = vmatprep.mubr.msk.bf16.mxu1 %vm801_vm2, %v1948_v18  ;;  %3996 = vst.msk [vmem:[#allocation3 + $0x8] sm:$0xff] %vm801_vm2, %v3994_v45  ;;  %v4010_v51 = vmax.f32 %v3994_v45, %v7510_v23 }
 0x251   : > { %5792 = vmatmul.mubr.msk.bf16.gmra.mxu0 %vm801_vm2, %v8501_v4  ;;  %v2863_v54 = vmax.f32 %v2703_v21, %v2735_v15  ;;  %v8502_v7 = vld [vmem:[#allocation20_spill] sm:$0xff]  ;;  %v2706_v14 = vld [vmem:[#allocation3 + $0xb8] sm:$0xf]  ;;  %v2864_v18 = vmax.f32 %v7584_v42, %v7586_v31  ;;  %v2768_v20 = vld [vmem:[#allocation3 + $0xaa] sm:$0xf]  ;;  %4011 = vst.msk [vmem:[#allocation3 + $0x10] sm:$0xff] %vm801_vm2, %v4009_v19  ;;  %v4270_v42 = vmax.f32 %v4238_v22, %v4142_v63 }
 0x252   : > { %v8503_v13 = vld [vmem:[#allocation16_spill] sm:$0xff]  ;;  %v2737_v55 = vld [vmem:[#allocation3 + $0xb1] sm:$0xff]  ;;  %v2738_v5 = vld [vmem:[#allocation3 + $0xb9] sm:$0xf]  ;;  %4443 = vst.msk [vmem:[#allocation2 + $0x20] sm:$0x1] %vm1543_vm3, %v4427_v57 }
 0x253   : > { %v8504_v25 = vpack.c.bf16 %v8502_v7, %v8503_v13  ;;  %v2767_v60 = vld [vmem:[#allocation3 + $0xa2] sm:$0xff]  ;;  %v7612_v26 = vld [vmem:[#allocation3 + $0xf8] sm:$0xf]  ;;  %v2865_v33 = vmax.f32 %v7594_v34, %v2737_v55  ;;  %v2866_v4 = vmax.f32 %v2706_v14, %v2738_v5  ;;  %4012 = vst.msk [vmem:[#allocation3 + $0x18] sm:$0xff] %vm801_vm2, %v4010_v51  ;;  %v4302_v55 = vmax.f32 %v4270_v42, %v4174_v48  ;;  %v7664_v42 = vld [vmem:[#allocation3 + $0xa0] sm:$0x1] }
 0x254   : > { %v4507_v30 = vld [vmem:[#allocation3 + $0x23] sm:$0x1]  ;;  %v7614_v0 = vld [vmem:[#allocation3 + $0xf1] sm:$0xff]  ;;  %v7616_v6 = vld [vmem:[#allocation3 + $0xf9] sm:$0xf]  ;;  %v7639_v57 = vmax.f32 %v2864_v18, %v2768_v20 }
 0x255   : > { %5795 = vmatprep.mubr.msk.bf16.mxu0 %vm801_vm2, %v8504_v25  ;;  %v8505_v21 = vld [vmem:[#allocation31_spill] sm:$0xff]  ;;  %v8506_v1 = vld [vmem:[#allocation36_spill] sm:$0xff]  ;;  %v2708_v29 = vld [vmem:[#allocation3 + $0xc8] sm:$0xf]  ;;  %v2873_v63 = vmax.f32 %v7600_v61, %v7614_v0  ;;  %4334 = vst.msk [vmem:[#allocation2 + $0x2a] sm:$0xf] %vm1431_vm4, %v4302_v55 }
 0x256   : > { %v1949_v16 = vpack.c.bf16 %v8506_v1, %v8505_v21  ;;  %v8507_v15 = vld [vmem:[#allocation32_spill] sm:$0xff]  ;;  %v2740_v49 = vld [vmem:[#allocation3 + $0xc9] sm:$0xf]  ;;  %v7630_v1 = vmax.f32 %v2863_v54, %v2767_v60  ;;  %v2741_v24 = vld [vmem:[#allocation3 + $0xd1] sm:$0xff]  ;;  %v2874_v60 = vmax.f32 %v7612_v26, %v7616_v6 }
 0x257   : > { %v1950_v10 = vpack.c.bf16 %v8508_v58, %v8507_v15  ;;  %v2739_v17 = vld [vmem:[#allocation3 + $0xc1] sm:$0xff]  ;;  %v2744_v13 = vld [vmem:[#allocation3 + $0xe9] sm:$0xf]  ;;  %v2868_v21 = vmax.f32 %v2708_v29, %v2740_v49  ;;  %v4555_v15 = vmax.f32 %v4539_v37, %v4507_v30  ;;  %v2710_v58 = vld [vmem:[#allocation3 + $0xd8] sm:$0xf] }
 0x258   : > { %v2712_v31 = vld [vmem:[#allocation3 + $0xe8] sm:$0xf]  ;;  %v2867_v25 = vmax.f32 %v7596_v46, %v2739_v17  ;;  %v2742_v34 = vld [vmem:[#allocation3 + $0xd9] sm:$0xf]  ;;  %v2869_v46 = vmax.f32 %v7608_v43, %v2741_v24  ;;  %v7650_v24 = vld [vmem:[#allocation3 + $0xf0] sm:$0x1]  ;;  %5762 = vmatmul.mubr.msk.bf16.gmra.mxu1 %vm801_vm2, %v1949_v16 }
 0x259   : > { %v2743_v7 = vld [vmem:[#allocation3 + $0xe1] sm:$0xff]  ;;  %v2872_v45 = vmax.f32 %v2712_v31, %v2744_v13  ;;  %v2769_v5 = vld [vmem:[#allocation3 + $0xb2] sm:$0xff]  ;;  %v2770_v19 = vld [vmem:[#allocation3 + $0xba] sm:$0xf]  ;;  %v2870_v54 = vmax.f32 %v2710_v58, %v2742_v34  ;;  %4571 = vst.msk [vmem:[#allocation2 + $0x21] sm:$0x1] %vm1543_vm3, %v4555_v15  ;;  %5765 = vmatprep.mubr.msk.bf16.mxu1 %vm801_vm2, %v1950_v10 }
 0x25a   : > { %v2871_v14 = vmax.f32 %v7598_v2, %v2743_v7  ;;  %v2771_v22 = vld [vmem:[#allocation3 + $0xc2] sm:$0xff]  ;;  %v2772_v2 = vld [vmem:[#allocation3 + $0xca] sm:$0xf]  ;;  %v2773_v30 = vld [vmem:[#allocation3 + $0xd2] sm:$0xff]  ;;  %v7644_v0 = vmax.f32 %v2865_v33, %v2769_v5  ;;  %v7646_v48 = vmax.f32 %v2866_v4, %v2770_v19 }
 0x25b   : > { %v2774_v37 = vld [vmem:[#allocation3 + $0xda] sm:$0xf]  ;;  %v7642_v61 = vld [vmem:[#allocation3 + $0xa3] sm:$0xff]  ;;  %v7648_v29 = vmax.f32 %v2867_v25, %v2771_v22  ;;  %v7652_v43 = vld [vmem:[#allocation3 + $0xf1] sm:$0x1]  ;;  %v2900_v33 = vmax.f32 %v2868_v21, %v2772_v2  ;;  %v7660_v4 = vmax.f32 %v2869_v46, %v2773_v30 }
 0x25c   : > { %v8509_v26 = vld [vmem:[#allocation18_spill] sm:$0xff]  ;;  %v2775_v17 = vld [vmem:[#allocation3 + $0xe2] sm:$0xff]  ;;  %v2776_v49 = vld [vmem:[#allocation3 + $0xea] sm:$0xf]  ;;  %v7662_v51 = vmax.f32 %v2870_v54, %v2774_v37  ;;  %v2927_v10 = vmax.f32 %v7630_v1, %v7642_v61 }
 0x25d   : > { %v8510_v6 = vld [vmem:[#allocation14_spill] sm:$0xff]  ;;  %v7666_v31 = vld [vmem:[#allocation3 + $0xa1] sm:$0x1]  ;;  %v2778_v16 = vld [vmem:[#allocation3 + $0xfa] sm:$0xf]  ;;  %v2903_v34 = vmax.f32 %v2871_v14, %v2775_v17  ;;  %v7673_v21 = vmax.f32 %v2872_v45, %v2776_v49 }
 0x25e   : > { %v8511_v18 = vpack.c.bf16 %v8509_v26, %v8510_v6  ;;  %v2777_v20 = vld [vmem:[#allocation3 + $0xf2] sm:$0xff]  ;;  %v8512_v7 = vld [vmem:[#allocation28_spill] sm:$0xff]  ;;  %v2800_v15 = vld [vmem:[#allocation3 + $0xab] sm:$0xf]  ;;  %v2906_v26 = vmax.f32 %v2874_v60, %v2778_v16 }
 0x25f   : > { %v8513_v13 = vld [vmem:[#allocation24_spill] sm:$0xff]  ;;  %v2801_v58 = vld [vmem:[#allocation3 + $0xb3] sm:$0xff]  ;;  %v7675_v55 = vmax.f32 %v2873_v63, %v2777_v20  ;;  %v7677_v5 = vld [vmem:[#allocation3 + $0xb0] sm:$0x1]  ;;  %v2928_v14 = vmax.f32 %v7639_v57, %v2800_v15 }
 0x260   : > { %5796 = vmatmul.mubr.msk.bf16.gmra.mxu0 %vm801_vm2, %v8511_v18  ;;  %v8514_v25 = vpack.c.bf16 %v8512_v7, %v8513_v13  ;;  %v7679_v19 = vld [vmem:[#allocation3 + $0xb1] sm:$0x1]  ;;  %v8515_v22 = vld [vmem:[#allocation33_spill] sm:$0xff]  ;;  %v2802_v2 = vld [vmem:[#allocation3 + $0xbb] sm:$0xf]  ;;  %v2929_v45 = vmax.f32 %v7644_v0, %v2801_v58  ;;  %v1952_v7 = vpack.c.bf16 %v7136_v32, %v7075_v62 }
 0x261   : > { %v8516_v46 = vld [vmem:[#allocation38_spill] sm:$0xff]  ;;  %v2803_v30 = vld [vmem:[#allocation3 + $0xc3] sm:$0xff]  ;;  %v2804_v37 = vld [vmem:[#allocation3 + $0xcb] sm:$0xf]  ;;  %v2930_v17 = vmax.f32 %v7646_v48, %v2802_v2 }
 0x262   : > { %5799 = vmatprep.mubr.msk.bf16.mxu0 %vm801_vm2, %v8514_v25  ;;  %v1951_v54 = vpack.c.bf16 %v8516_v46, %v8515_v22  ;;  %v2805_v63 = vld [vmem:[#allocation3 + $0xd3] sm:$0xff]  ;;  %v2806_v6 = vld [vmem:[#allocation3 + $0xdb] sm:$0xf]  ;;  %v2807_v18 = vld [vmem:[#allocation3 + $0xe3] sm:$0xff]  ;;  %v2931_v49 = vmax.f32 %v7648_v29, %v2803_v30  ;;  %v2932_v20 = vmax.f32 %v2900_v33, %v2804_v37 }
 0x263   : > { %v2808_v13 = vld [vmem:[#allocation3 + $0xeb] sm:$0xf]  ;;  %v2809_v60 = vld [vmem:[#allocation3 + $0xf3] sm:$0xff]  ;;  %v2810_v25 = vld [vmem:[#allocation3 + $0xfb] sm:$0xf]  ;;  %v2933_v1 = vmax.f32 %v7660_v4, %v2805_v63  ;;  %v2934_v57 = vmax.f32 %v7662_v51, %v2806_v6  ;;  %v2935_v61 = vmax.f32 %v2903_v34, %v2807_v18  ;;  %v3061_v4 = vmax.f32 %v7664_v42, %v7666_v31 }
 0x264   : > { %v2831_v16 = vld [vmem:[#allocation3 + $0xa4] sm:$0xff]  ;;  %v2832_v15 = vld [vmem:[#allocation3 + $0xac] sm:$0xf]  ;;  %v2833_v48 = vld [vmem:[#allocation3 + $0xb4] sm:$0xff]  ;;  %v2936_v29 = vmax.f32 %v7673_v21, %v2808_v13  ;;  %v2937_v33 = vmax.f32 %v7675_v55, %v2809_v60  ;;  %v2938_v58 = vmax.f32 %v2906_v26, %v2810_v25  ;;  %v3062_v63 = vmax.f32 %v7677_v5, %v7679_v19  ;;  %5766 = vmatmul.mubr.msk.bf16.gmra.mxu1 %vm801_vm2, %v1951_v54 }
 0x265   : > { %v3015_v62 = vld [vmem:[#allocation3 + $0xc0] sm:$0x1]  ;;  %v3016_v32 = vld [vmem:[#allocation3 + $0xd0] sm:$0x1]  ;;  %v2834_v46 = vld [vmem:[#allocation3 + $0xbc] sm:$0xf]  ;;  %v2959_v2 = vmax.f32 %v2927_v10, %v2831_v16  ;;  %v2960_v30 = vmax.f32 %v2928_v14, %v2832_v15  ;;  %v2961_v37 = vmax.f32 %v2929_v45, %v2833_v48  ;;  %5769 = vmatprep.mubr.msk.bf16.mxu1 %vm801_vm2, %v1952_v7 }
 0x266   : > { %v3017_v22 = vld [vmem:[#allocation3 + $0xe0] sm:$0x1]  ;;  %v2835_v51 = vld [vmem:[#allocation3 + $0xc4] sm:$0xff]  ;;  %v2836_v34 = vld [vmem:[#allocation3 + $0xcc] sm:$0xf]  ;;  %v2962_v55 = vmax.f32 %v2930_v17, %v2834_v46 }
 0x267   : > { %v2837_v6 = vld [vmem:[#allocation3 + $0xd4] sm:$0xff]  ;;  %v2838_v21 = vld [vmem:[#allocation3 + $0xdc] sm:$0xf]  ;;  %v2839_v18 = vld [vmem:[#allocation3 + $0xe4] sm:$0xff]  ;;  %v2963_v26 = vmax.f32 %v2931_v49, %v2835_v51  ;;  %v2964_v13 = vmax.f32 %v2932_v20, %v2836_v34  ;;  %2991 = vst.msk [vmem:[#allocation2 + $0xa2] sm:$0xff] %vm801_vm2, %v2959_v2 }
 0x268   : > { %v8517_v60 = vld [vmem:[#allocation26_spill] sm:$0xff]  ;;  %v2840_v42 = vld [vmem:[#allocation3 + $0xec] sm:$0xf]  ;;  %v2842_v10 = vld [vmem:[#allocation3 + $0xfc] sm:$0xf]  ;;  %v2965_v14 = vmax.f32 %v2933_v1, %v2837_v6  ;;  %v2966_v45 = vmax.f32 %v2934_v57, %v2838_v21  ;;  %v2967_v16 = vmax.f32 %v2935_v61, %v2839_v18  ;;  %2993 = vst.msk [vmem:[#allocation2 + $0xb2] sm:$0xff] %vm801_vm2, %v2961_v37  ;;  %v8523_v21 = vmax.f32 %v7650_v24, %v7652_v43 }
 0x269   : > { %v8518_v25 = vld [vmem:[#allocation22_spill] sm:$0xff]  ;;  %2992 = vst.msk [vmem:[#allocation2 + $0xaa] sm:$0xf] %vm1431_vm4, %v2960_v30  ;;  %v8520_v5 = vld [vmem:[#allocation7_spill] sm:$0xff]  ;;  %v8521_v19 = vld [vmem:[#allocation5_spill] sm:$0xff]  ;;  %v2968_v54 = vmax.f32 %v2936_v29, %v2840_v42  ;;  %v2970_v20 = vmax.f32 %v2938_v58, %v2842_v10 }
 0x26a   : > { %v8519_v0 = vpack.c.bf16 %v8517_v60, %v8518_v25  ;;  %v2841_v31 = vld [vmem:[#allocation3 + $0xf4] sm:$0xff]  ;;  %v8522_v17 = vpack.c.bf16 %v8520_v5, %v8521_v19  ;;  %2994 = vst.msk [vmem:[#allocation2 + $0xba] sm:$0xf] %vm1431_vm4, %v2962_v55  ;;  %2996 = vst.msk [vmem:[#allocation2 + $0xca] sm:$0xf] %vm1431_vm4, %v2964_v13  ;;  %v1954_v60 = vpack.c.bf16 %v7433_v44, %v7431_v11  ;;  %v8527_v11 = vld [vmem:[#allocation13_spill] sm:$0xff] }
 0x26b   : > { %v2969_v49 = vmax.f32 %v2937_v33, %v2841_v31  ;;  %2995 = vst.msk [vmem:[#allocation2 + $0xc2] sm:$0xff] %vm801_vm2, %v2963_v26  ;;  %v3031_v1 = vld [vmem:[#allocation3 + $0xc1] sm:$0x1]  ;;  %v3032_v57 = vld [vmem:[#allocation3 + $0xd1] sm:$0x1]  ;;  %2997 = vst.msk [vmem:[#allocation2 + $0xd2] sm:$0xff] %vm801_vm2, %v2965_v14 }
 0x26c   : > { %5800 = vmatmul.mubr.msk.bf16.gmra.mxu0 %vm801_vm2, %v8519_v0  ;;  %v3033_v61 = vld [vmem:[#allocation3 + $0xe1] sm:$0x1]  ;;  %2998 = vst.msk [vmem:[#allocation2 + $0xda] sm:$0xf] %vm1431_vm4, %v2966_v45  ;;  %v3045_v0 = vld [vmem:[#allocation3 + $0xa2] sm:$0x1]  ;;  %v3063_v48 = vmax.f32 %v3015_v62, %v3031_v1  ;;  %v3064_v29 = vmax.f32 %v3016_v32, %v3032_v57 }
 0x26d   : > { %5803 = vmatprep.mubr.msk.bf16.mxu0 %vm801_vm2, %v8522_v17  ;;  %2999 = vst.msk [vmem:[#allocation2 + $0xe2] sm:$0xff] %vm801_vm2, %v2967_v16  ;;  %v3046_v7 = vld [vmem:[#allocation3 + $0xb2] sm:$0x1]  ;;  %v3047_v15 = vld [vmem:[#allocation3 + $0xc2] sm:$0x1]  ;;  %v3065_v33 = vmax.f32 %v3017_v22, %v3033_v61  ;;  %3001 = vst.msk [vmem:[#allocation2 + $0xf2] sm:$0xff] %vm801_vm2, %v2969_v49  ;;  %v3077_v34 = vmax.f32 %v3061_v4, %v3045_v0  ;;  %v1953_v4 = vpack.c.bf16 %v7152_v53, %v7092_v28 }
 0x26e   : > { %3000 = vst.msk [vmem:[#allocation2 + $0xea] sm:$0xf] %vm1431_vm4, %v2968_v54  ;;  %3002 = vst.msk [vmem:[#allocation2 + $0xfa] sm:$0xf] %vm1431_vm4, %v2970_v20  ;;  %v3048_v58 = vld [vmem:[#allocation3 + $0xd2] sm:$0x1]  ;;  %v3078_v2 = vmax.f32 %v3062_v63, %v3046_v7  ;;  %v3079_v30 = vmax.f32 %v3063_v48, %v3047_v15 }
 0x26f   : > { %v3049_v46 = vld [vmem:[#allocation3 + $0xe2] sm:$0x1]  ;;  %v3050_v51 = vld [vmem:[#allocation3 + $0xf2] sm:$0x1]  ;;  %v3080_v37 = vmax.f32 %v3064_v29, %v3048_v58  ;;  %v3109_v32 = vld [vmem:[#allocation3 + $0xa0] sm:$0x1]  ;;  %5770 = vmatmul.mubr.msk.bf16.gmra.mxu1 %vm801_vm2, %v1953_v4 }
 0x270   : > { %v3081_v6 = vmax.f32 %v3065_v33, %v3049_v46  ;;  %v3082_v62 = vmax.f32 %v8523_v21, %v3050_v51  ;;  %v3110_v22 = vld [vmem:[#allocation3 + $0xb0] sm:$0x1]  ;;  %v3111_v18 = vld [vmem:[#allocation3 + $0xc0] sm:$0x1]  ;;  %3093 = vst.msk [vmem:[#allocation2 + $0xa0] sm:$0x1] %vm1543_vm3, %v3077_v34  ;;  %5773 = vmatprep.mubr.msk.bf16.mxu1 %vm801_vm2, %v1954_v60 }
 0x271   : > { %3094 = vst.msk [vmem:[#allocation2 + $0xb0] sm:$0x1] %vm1543_vm3, %v3078_v2  ;;  %v3112_v55 = vld [vmem:[#allocation3 + $0xd0] sm:$0x1]  ;;  %v3113_v26 = vld [vmem:[#allocation3 + $0xe0] sm:$0x1] }
 0x272   : > { %v3114_v13 = vld [vmem:[#allocation3 + $0xf0] sm:$0x1]  ;;  %3095 = vst.msk [vmem:[#allocation2 + $0xc0] sm:$0x1] %vm1543_vm3, %v3079_v30  ;;  %3096 = vst.msk [vmem:[#allocation2 + $0xd0] sm:$0x1] %vm1543_vm3, %v3080_v37 }
 0x273   : > { %3097 = vst.msk [vmem:[#allocation2 + $0xe0] sm:$0x1] %vm1543_vm3, %v3081_v6  ;;  %3098 = vst.msk [vmem:[#allocation2 + $0xf0] sm:$0x1] %vm1543_vm3, %v3082_v62  ;;  %v3125_v24 = vld [vmem:[#allocation3 + $0xa1] sm:$0x1] }
 0x274   : > { %v3126_v43 = vld [vmem:[#allocation3 + $0xb1] sm:$0x1]  ;;  %v3127_v63 = vld [vmem:[#allocation3 + $0xc1] sm:$0x1]  ;;  %v3173_v10 = vmax.f32 %v3109_v32, %v3125_v24  ;;  %v3141_v5 = vld [vmem:[#allocation3 + $0xa2] sm:$0x1] }
 0x275   : > { %v3128_v25 = vld [vmem:[#allocation3 + $0xd1] sm:$0x1]  ;;  %v3129_v42 = vld [vmem:[#allocation3 + $0xe1] sm:$0x1]  ;;  %v3174_v14 = vmax.f32 %v3110_v22, %v3126_v43  ;;  %v3175_v28 = vmax.f32 %v3111_v18, %v3127_v63  ;;  %v3142_v19 = vld [vmem:[#allocation3 + $0xb2] sm:$0x1] }
 0x276   : > { %v3130_v31 = vld [vmem:[#allocation3 + $0xf1] sm:$0x1]  ;;  %v8525_v45 = vld [vmem:[#allocation4_spill] sm:$0xff]  ;;  %v3176_v54 = vmax.f32 %v3112_v55, %v3128_v25  ;;  %v3177_v49 = vmax.f32 %v3113_v26, %v3129_v42  ;;  %v3144_v57 = vld [vmem:[#allocation3 + $0xd2] sm:$0x1]  ;;  %v3189_v7 = vmax.f32 %v3173_v10, %v3141_v5  ;;  %v1955_v25 = vpack.c.bf16 %v7468_v50, %v7435_v47 }
 0x277   : > { %v8524_v53 = vld [vmem:[#allocation6_spill] sm:$0xff]  ;;  %v3143_v17 = vld [vmem:[#allocation3 + $0xc2] sm:$0x1]  ;;  %v3178_v20 = vmax.f32 %v3114_v13, %v3130_v31  ;;  %v3190_v15 = vmax.f32 %v3174_v14, %v3142_v19  ;;  %v3157_v29 = vld [vmem:[#allocation3 + $0xa3] sm:$0x1] }
 0x278   : > { %v8526_v16 = vpack.c.bf16 %v8524_v53, %v8525_v45  ;;  %v8528_v44 = vld [vmem:[#allocation10_spill] sm:$0xff]  ;;  %v3145_v61 = vld [vmem:[#allocation3 + $0xe2] sm:$0x1]  ;;  %v3191_v48 = vmax.f32 %v3175_v28, %v3143_v17  ;;  %v3159_v58 = vld [vmem:[#allocation3 + $0xc3] sm:$0x1]  ;;  %v3192_v46 = vmax.f32 %v3176_v54, %v3144_v57  ;;  %v3205_v6 = vmax.f32 %v3189_v7, %v3157_v29  ;;  %5774 = vmatmul.mubr.msk.bf16.gmra.mxu1 %vm801_vm2, %v1955_v25 }
 0x279   : > { %v8529_v1 = vpack.c.bf16 %v8527_v11, %v8528_v44  ;;  %v3146_v0 = vld [vmem:[#allocation3 + $0xf2] sm:$0x1]  ;;  %v3158_v33 = vld [vmem:[#allocation3 + $0xb3] sm:$0x1]  ;;  %v3193_v51 = vmax.f32 %v3177_v49, %v3145_v61  ;;  %v3161_v30 = vld [vmem:[#allocation3 + $0xe3] sm:$0x1]  ;;  %v1956_v28 = vpack.c.bf16 %v7513_v41, %v7439_v12 }
 0x27a   : > { %5804 = vmatmul.mubr.msk.bf16.gmra.mxu0 %vm801_vm2, %v8526_v16  ;;  %v3194_v34 = vmax.f32 %v3178_v20, %v3146_v0  ;;  %v3160_v2 = vld [vmem:[#allocation3 + $0xd3] sm:$0x1]  ;;  %v3206_v21 = vmax.f32 %v3190_v15, %v3158_v33  ;;  %v3207_v62 = vmax.f32 %v3191_v48, %v3159_v58  ;;  %v3237_v55 = vld [vmem:[#allocation3 + $0xac] sm:$0x1]  ;;  %v3238_v26 = vld [vmem:[#allocation3 + $0xbc] sm:$0x1] }
 0x27b   : > { %5807 = vmatprep.mubr.msk.bf16.mxu0 %vm801_vm2, %v8529_v1  ;;  %v3162_v37 = vld [vmem:[#allocation3 + $0xf3] sm:$0x1]  ;;  %v3208_v32 = vmax.f32 %v3192_v46, %v3160_v2  ;;  %v3209_v22 = vmax.f32 %v3193_v51, %v3161_v30  ;;  %v3239_v13 = vld [vmem:[#allocation3 + $0xcc] sm:$0x1]  ;;  %v7746_v4 = vld [vmem:[#allocation2 + $0x78] sm:$0xff]  ;;  %5777 = vmatprep.mubr.msk.bf16.mxu1 %vm801_vm2, %v1956_v28 }
 0x27c   : > { %v3210_v18 = vmax.f32 %v3194_v34, %v3162_v37  ;;  %3221 = vst.msk [vmem:[#allocation2 + $0xa1] sm:$0x1] %vm1543_vm3, %v3205_v6  ;;  %3222 = vst.msk [vmem:[#allocation2 + $0xb1] sm:$0x1] %vm1543_vm3, %v3206_v21  ;;  %v3240_v24 = vld [vmem:[#allocation3 + $0xdc] sm:$0x1] }
 0x27d   : > { %3223 = vst.msk [vmem:[#allocation2 + $0xc1] sm:$0x1] %vm1543_vm3, %v3207_v62  ;;  %v3241_v43 = vld [vmem:[#allocation3 + $0xec] sm:$0x1]  ;;  %v3242_v63 = vld [vmem:[#allocation3 + $0xfc] sm:$0x1] }
 0x27e   : > { %v7751_v60 = vld [vmem:[#allocation2 + $0x88] sm:$0xff]  ;;  %3224 = vst.msk [vmem:[#allocation2 + $0xd1] sm:$0x1] %vm1543_vm3, %v3208_v32  ;;  %3225 = vst.msk [vmem:[#allocation2 + $0xe1] sm:$0x1] %vm1543_vm3, %v3209_v22  ;;  %v8530_v50 = vld [vmem:[#allocation12_spill] sm:$0xff] }
 0x27f   : > { %3226 = vst.msk [vmem:[#allocation2 + $0xf1] sm:$0x1] %vm1543_vm3, %v3210_v18  ;;  %v3253_v42 = vld [vmem:[#allocation3 + $0xad] sm:$0x1]  ;;  %v3254_v31 = vld [vmem:[#allocation3 + $0xbd] sm:$0x1]  ;;  %v3880_v32 = vmax.f32 %v7746_v4, %v7751_v60 }
 0x280   : > { %v3255_v10 = vld [vmem:[#allocation3 + $0xcd] sm:$0x1]  ;;  %v3256_v53 = vld [vmem:[#allocation3 + $0xdd] sm:$0x1]  ;;  %v3301_v5 = vmax.f32 %v3237_v55, %v3253_v42  ;;  %v3302_v19 = vmax.f32 %v3238_v26, %v3254_v31  ;;  %v3269_v49 = vld [vmem:[#allocation3 + $0xae] sm:$0x1] }
 0x281   : > { %v7758_v14 = vld [vmem:[#allocation2 + $0x68] sm:$0xff]  ;;  %v3258_v16 = vld [vmem:[#allocation3 + $0xfd] sm:$0x1]  ;;  %v3303_v47 = vmax.f32 %v3239_v13, %v3255_v10  ;;  %v3270_v20 = vld [vmem:[#allocation3 + $0xbe] sm:$0x1]  ;;  %v3304_v44 = vmax.f32 %v3240_v24, %v3256_v53 }
 0x282   : > { %v3257_v45 = vld [vmem:[#allocation3 + $0xed] sm:$0x1]  ;;  %v3271_v11 = vld [vmem:[#allocation3 + $0xce] sm:$0x1]  ;;  %v3306_v57 = vmax.f32 %v3242_v63, %v3258_v16  ;;  %v3272_v0 = vld [vmem:[#allocation3 + $0xde] sm:$0x1]  ;;  %v3317_v48 = vmax.f32 %v3301_v5, %v3269_v49  ;;  %v3318_v29 = vmax.f32 %v3302_v19, %v3270_v20  ;;  %v3878_v34 = vmax.f32 %v7758_v14, %v7746_v4 }
 0x283   : > { %v8531_v17 = vld [vmem:[#allocation9_spill] sm:$0xff]  ;;  %v3305_v1 = vmax.f32 %v3241_v43, %v3257_v45  ;;  %v3274_v15 = vld [vmem:[#allocation3 + $0xfe] sm:$0x1]  ;;  %v3319_v33 = vmax.f32 %v3303_v47, %v3271_v11  ;;  %v7772_v58 = vld [vmem:[#allocation2 + $0x80] sm:$0xff]  ;;  %v3320_v6 = vmax.f32 %v3304_v44, %v3272_v0  ;;  %v1957_v16 = vpack.c.bf16 %v7515_v38, %v7441_v36 }
 0x284   : > { %v8532_v54 = vpack.c.bf16 %v8530_v50, %v8531_v17  ;;  %v8533_v12 = vld [vmem:[#allocation21_spill] sm:$0xff]  ;;  %v7774_v46 = vld [vmem:[#allocation2 + $0x90] sm:$0xff]  ;;  %v7776_v51 = vld [vmem:[#allocation2 + $0x98] sm:$0xff]  ;;  %v3322_v62 = vmax.f32 %v3306_v57, %v3274_v15  ;;  %v7786_v45 = vmax.f32 %v3878_v34, %v7751_v60  ;;  %v1958_v36 = vpack.c.bf16 %v7517_v56, %v7443_v35 }
 0x285   : > { %v8534_v41 = vld [vmem:[#allocation17_spill] sm:$0xff]  ;;  %v3286_v30 = vld [vmem:[#allocation3 + $0xbf] sm:$0x1]  ;;  %v3366_v31 = vld [vmem:[#allocation3 + $0xbd] sm:$0x1]  ;;  %v3881_v50 = vmax.f32 %v7772_v58, %v7774_v46  ;;  %v3882_v17 = vmax.f32 %v7751_v60, %v7776_v51  ;;  %5778 = vmatmul.mubr.msk.bf16.gmra.mxu1 %vm801_vm2, %v1957_v16 }
 0x286   : > { %5808 = vmatmul.mubr.msk.bf16.gmra.mxu0 %vm801_vm2, %v8532_v54  ;;  %v8535_v61 = vpack.c.bf16 %v8533_v12, %v8534_v41  ;;  %v3273_v7 = vld [vmem:[#allocation3 + $0xee] sm:$0x1]  ;;  %v3285_v2 = vld [vmem:[#allocation3 + $0xaf] sm:$0x1]  ;;  %v3288_v22 = vld [vmem:[#allocation3 + $0xdf] sm:$0x1]  ;;  %v3334_v13 = vmax.f32 %v3318_v29, %v3286_v30  ;;  %v7798_v54 = vmax.f32 %v3880_v32, %v7776_v51  ;;  %5781 = vmatprep.mubr.msk.bf16.mxu1 %vm801_vm2, %v1958_v36 }
 0x287   : > { %v3287_v37 = vld [vmem:[#allocation3 + $0xcf] sm:$0x1]  ;;  %v3321_v21 = vmax.f32 %v3305_v1, %v3273_v7  ;;  %v3290_v55 = vld [vmem:[#allocation3 + $0xff] sm:$0x1]  ;;  %v3333_v26 = vmax.f32 %v3317_v48, %v3285_v2  ;;  %v3336_v43 = vmax.f32 %v3320_v6, %v3288_v22  ;;  %v3365_v42 = vld [vmem:[#allocation3 + $0xad] sm:$0x1] }
 0x288   : > { %5811 = vmatprep.mubr.msk.bf16.mxu0 %vm801_vm2, %v8535_v61  ;;  %v3289_v18 = vld [vmem:[#allocation3 + $0xef] sm:$0x1]  ;;  %v3335_v24 = vmax.f32 %v3319_v33, %v3287_v37  ;;  %v3338_v25 = vmax.f32 %v3322_v62, %v3290_v55  ;;  %v3367_v10 = vld [vmem:[#allocation3 + $0xcd] sm:$0x1]  ;;  %3350 = vst.msk [vmem:[#allocation2 + $0xbe] sm:$0x1] %vm1543_vm3, %v3334_v13  ;;  %v1959_v13 = vpack.c.bf16 %v7546_v9, %v7470_v8 }
 0x289   : > { %v3337_v63 = vmax.f32 %v3321_v21, %v3289_v18  ;;  %3349 = vst.msk [vmem:[#allocation2 + $0xae] sm:$0x1] %vm1543_vm3, %v3333_v26  ;;  %v3368_v28 = vld [vmem:[#allocation3 + $0xdd] sm:$0x1]  ;;  %v3369_v4 = vld [vmem:[#allocation3 + $0xed] sm:$0x1]  ;;  %v3926_v21 = vmax.f32 %v7786_v45, %v7776_v51 }
 0x28a   : > { %3351 = vst.msk [vmem:[#allocation2 + $0xce] sm:$0x1] %vm1543_vm3, %v3335_v24  ;;  %v3370_v53 = vld [vmem:[#allocation3 + $0xfd] sm:$0x1]  ;;  %3352 = vst.msk [vmem:[#allocation2 + $0xde] sm:$0x1] %vm1543_vm3, %v3336_v43 }
 0x28b   : > { %3353 = vst.msk [vmem:[#allocation2 + $0xee] sm:$0x1] %vm1543_vm3, %v3337_v63  ;;  %3354 = vst.msk [vmem:[#allocation2 + $0xfe] sm:$0x1] %vm1543_vm3, %v3338_v25  ;;  %v3381_v5 = vld [vmem:[#allocation3 + $0xae] sm:$0x1] }
 0x28c   : > { %v3382_v19 = vld [vmem:[#allocation3 + $0xbe] sm:$0x1]  ;;  %v3383_v47 = vld [vmem:[#allocation3 + $0xce] sm:$0x1]  ;;  %v3413_v11 = vmax.f32 %v3365_v42, %v3381_v5  ;;  %v3397_v61 = vld [vmem:[#allocation3 + $0xaf] sm:$0x1] }
 0x28d   : > { %v3384_v38 = vld [vmem:[#allocation3 + $0xde] sm:$0x1]  ;;  %v3385_v49 = vld [vmem:[#allocation3 + $0xee] sm:$0x1]  ;;  %v3414_v44 = vmax.f32 %v3366_v31, %v3382_v19  ;;  %v3415_v1 = vmax.f32 %v3367_v10, %v3383_v47  ;;  %v3398_v0 = vld [vmem:[#allocation3 + $0xbf] sm:$0x1]  ;;  %v3483_v10 = vpack.c.bf16 %v7577_v40, %v7574_v52  ;;  %5782 = vmatmul.mubr.msk.bf16.gmra.mxu1 %vm801_vm2, %v1959_v13 }
 0x28e   : > { %v3386_v20 = vld [vmem:[#allocation3 + $0xfe] sm:$0x1]  ;;  %v3399_v7 = vld [vmem:[#allocation3 + $0xcf] sm:$0x1]  ;;  %v3416_v15 = vmax.f32 %v3368_v28, %v3384_v38  ;;  %v3417_v48 = vmax.f32 %v3369_v4, %v3385_v49  ;;  %v3400_v58 = vld [vmem:[#allocation3 + $0xdf] sm:$0x1]  ;;  %v3429_v30 = vmax.f32 %v3413_v11, %v3397_v61  ;;  %v3484_v28 = vpack.c.bf16 %v7561_v3, %v7559_v59 }
 0x28f   : > { %v8536_v57 = vld [vmem:[#allocation19_spill] sm:$0xff]  ;;  %v3418_v29 = vmax.f32 %v3370_v53, %v3386_v20  ;;  %v8539_v35 = vld [vmem:[#allocation29_spill] sm:$0xff]  ;;  %v3430_v37 = vmax.f32 %v3414_v44, %v3398_v0  ;;  %v3431_v6 = vmax.f32 %v3415_v1, %v3399_v7  ;;  %v7814_v18 = vld [vmem:[#allocation2 + $0xa0] sm:$0xff]  ;;  %5821 = vmatprep.mubr.msk.bf16.mxu1 %vm801_vm2, %v3483_v10 }
 0x290   : > { %v8537_v12 = vld [vmem:[#allocation15_spill] sm:$0xff]  ;;  %v8540_v56 = vld [vmem:[#allocation25_spill] sm:$0xff]  ;;  %v3432_v62 = vmax.f32 %v3416_v15, %v3400_v58  ;;  %v3767_v55 = vld [vmem:[#allocation2 + $0xb0] sm:$0xff]  ;;  %3445 = vst.msk [vmem:[#allocation2 + $0xaf] sm:$0x1] %vm1543_vm3, %v3429_v30  ;;  %v3883_v63 = vmax.f32 %v7774_v46, %v7814_v18  ;;  %v3905_v31 = vmax.f32 %v3881_v50, %v7814_v18 }
 0x291   : > { %v8538_v41 = vpack.c.bf16 %v8536_v57, %v8537_v12  ;;  %v8541_v33 = vpack.c.bf16 %v8539_v35, %v8540_v56  ;;  %v3401_v34 = vld [vmem:[#allocation3 + $0xef] sm:$0x1]  ;;  %v3402_v2 = vld [vmem:[#allocation3 + $0xff] sm:$0x1]  ;;  %v3791_v26 = vld [vmem:[#allocation2 + $0xc0] sm:$0xff]  ;;  %v3885_v25 = vmax.f32 %v7814_v18, %v3767_v55 }
 0x292   : > { %v3433_v32 = vmax.f32 %v3417_v48, %v3401_v34  ;;  %v3434_v22 = vmax.f32 %v3418_v29, %v3402_v2  ;;  %3446 = vst.msk [vmem:[#allocation2 + $0xbf] sm:$0x1] %vm1543_vm3, %v3430_v37  ;;  %3447 = vst.msk [vmem:[#allocation2 + $0xcf] sm:$0x1] %vm1543_vm3, %v3431_v6  ;;  %v3815_v24 = vld [vmem:[#allocation2 + $0xd0] sm:$0xff]  ;;  %v3839_v43 = vld [vmem:[#allocation2 + $0xe0] sm:$0xff]  ;;  %v3887_v42 = vmax.f32 %v3767_v55, %v3791_v26 }
 0x293   : > { %5812 = vmatmul.mubr.msk.bf16.gmra.mxu0 %vm801_vm2, %v8538_v41  ;;  %3448 = vst.msk [vmem:[#allocation2 + $0xdf] sm:$0x1] %vm1543_vm3, %v3432_v62  ;;  %v4021_v8 = vmax.f32 %v3791_v26, %v3815_v24  ;;  %v4035_v9 = vmax.f32 %v3815_v24, %v3839_v43  ;;  %v4041_v46 = vld [vmem:[#allocation3] sm:$0xff]  ;;  %v4042_v4 = vld [vmem:[#allocation3 + $0x8] sm:$0xf]  ;;  %v3863_v16 = vld [vmem:[#allocation2 + $0xf0] sm:$0xff]  ;;  %v3907_v5 = vmax.f32 %v3883_v63, %v3767_v55 }
 0x294   : > { %5815 = vmatprep.mubr.msk.bf16.mxu0 %vm801_vm2, %v8541_v33  ;;  %3449 = vst.msk [vmem:[#allocation2 + $0xef] sm:$0x1] %vm1543_vm3, %v3433_v32  ;;  %3450 = vst.msk [vmem:[#allocation2 + $0xff] sm:$0x1] %vm1543_vm3, %v3434_v22  ;;  %v4073_v53 = vld [vmem:[#allocation3 + $0x1] sm:$0xff]  ;;  %v3909_v19 = vmax.f32 %v3885_v25, %v3791_v26  ;;  %v3911_v47 = vmax.f32 %v3887_v42, %v3815_v24  ;;  %v3929_v50 = vmax.f32 %v3905_v31, %v3767_v55  ;;  %v8542_v12 = vld [vmem:[#allocation27_spill] sm:$0xff] }
 0x295   : > { %v4074_v36 = vld [vmem:[#allocation3 + $0x9] sm:$0xf]  ;;  %v4023_v38 = vmax.f32 %v4021_v8, %v3839_v43  ;;  %v4037_v49 = vmax.f32 %v4035_v9, %v3863_v16  ;;  %v4201_v11 = vmax.f32 %v4041_v46, %v4073_v53  ;;  %v3931_v1 = vmax.f32 %v3907_v5, %v3791_v26  ;;  %v8543_v41 = vld [vmem:[#allocation23_spill] sm:$0xff]  ;;  %v4361_v7 = vld [vmem:[#allocation3] sm:$0x1]  ;;  %5822 = vmatmul.mubr.msk.bf16.vlgmr.msra.gmra.mxu1 %vm801_vm2, %v3484_v28 }
 0x296   : > { %v4105_v20 = vld [vmem:[#allocation3 + $0x2] sm:$0xff]  ;;  %v4202_v44 = vmax.f32 %v4042_v4, %v4074_v36  ;;  %v3933_v57 = vmax.f32 %v3909_v19, %v3815_v24  ;;  %v3935_v52 = vmax.f32 %v3911_v47, %v3839_v43  ;;  %v3953_v40 = vmax.f32 %v3929_v50, %v3791_v26  ;;  %v4106_v0 = vld [vmem:[#allocation3 + $0xa] sm:$0xf]  ;;  %v4377_v15 = vld [vmem:[#allocation3 + $0x1] sm:$0x1] }
 0x297   : > { %v8544_v61 = vpack.c.bf16 %v8542_v12, %v8543_v41  ;;  %v4025_v48 = vmax.f32 %v4023_v38, %v3863_v16  ;;  %4039 = vst.msk [vmem:[#allocation3 + $0xf0] sm:$0xff] %vm801_vm2, %v4037_v49  ;;  %v4233_v29 = vmax.f32 %v4201_v11, %v4105_v20  ;;  %v4409_v56 = vmax.f32 %v4361_v7, %v4377_v15  ;;  %v7840_v33 = vld [vmem:[#allocation3] sm:$0x1]  ;;  %v7842_v58 = vld [vmem:[#allocation3 + $0x1] sm:$0x1]  ;;  %v4137_v6 = vld [vmem:[#allocation3 + $0x3] sm:$0xff] }
 0x298   : > { %v7838_v35 = vmax.f32 %v4202_v44, %v4106_v0  ;;  %v3955_v34 = vmax.f32 %v3931_v1, %v3815_v24  ;;  %v3957_v2 = vmax.f32 %v3933_v57, %v3839_v43  ;;  %v3959_v30 = vmax.f32 %v3935_v52, %v3863_v16  ;;  %3977 = vst.msk [vmem:[#allocation3 + $0xa0] sm:$0xff] %vm801_vm2, %v3953_v40  ;;  %v4138_v62 = vld [vmem:[#allocation3 + $0xb] sm:$0xf]  ;;  %v4393_v32 = vld [vmem:[#allocation3 + $0x2] sm:$0x1] }
 0x299   : > { %v3485_v37 = vpack.c.bf16 %v7501_v39, %v7499_v27  ;;  %v3766_v22 = vld [vmem:[#allocation2 + $0xa8] sm:$0xff]  ;;  %v3768_v55 = vld [vmem:[#allocation2 + $0xb8] sm:$0xff]  ;;  %4027 = vst.msk [vmem:[#allocation3 + $0xe0] sm:$0xff] %vm801_vm2, %v4025_v48  ;;  %v4265_v13 = vmax.f32 %v4233_v29, %v4137_v6  ;;  %v4425_v43 = vmax.f32 %v4409_v56, %v4393_v32  ;;  %v4521_v63 = vmax.f32 %v7840_v33, %v7842_v58  ;;  %v4489_v38 = vld [vmem:[#allocation3 + $0x2] sm:$0x1] }
 0x29a   : > { %v3792_v26 = vld [vmem:[#allocation2 + $0xc8] sm:$0xff]  ;;  %v4266_v24 = vmax.f32 %v7838_v35, %v4138_v62  ;;  %v3816_v25 = vld [vmem:[#allocation2 + $0xd8] sm:$0xff]  ;;  %v3884_v31 = vmax.f32 %v7776_v51, %v3766_v22  ;;  %v3886_v8 = vmax.f32 %v3766_v22, %v3768_v55  ;;  %v3906_v10 = vmax.f32 %v3882_v17, %v3766_v22  ;;  %3979 = vst.msk [vmem:[#allocation3 + $0xb0] sm:$0xff] %vm801_vm2, %v3955_v34  ;;  %v4049_v7 = vld [vmem:[#allocation3 + $0x40] sm:$0xff] }
 0x29b   : > { %5816 = vmatmul.mubr.msk.bf16.gmra.mxu0 %vm801_vm2, %v8544_v61  ;;  %v3840_v42 = vld [vmem:[#allocation2 + $0xe8] sm:$0xff]  ;;  %v3888_v9 = vmax.f32 %v3768_v55, %v3792_v26  ;;  %3981 = vst.msk [vmem:[#allocation3 + $0xc0] sm:$0xff] %vm801_vm2, %v3957_v2  ;;  %3983 = vst.msk [vmem:[#allocation3 + $0xd0] sm:$0xff] %vm801_vm2, %v3959_v30  ;;  %v4022_v46 = vmax.f32 %v3792_v26, %v3816_v25  ;;  %v3928_v53 = vmax.f32 %v7798_v54, %v3766_v22  ;;  %v3864_v19 = vld [vmem:[#allocation2 + $0xf8] sm:$0xff] }
 0x29c   : > { %v4036_v4 = vmax.f32 %v3816_v25, %v3840_v42  ;;  %v3950_v16 = vmax.f32 %v3926_v21, %v3766_v22  ;;  %v4169_v5 = vld [vmem:[#allocation3 + $0x4] sm:$0xff]  ;;  %4441 = vst.msk [vmem:[#allocation2] sm:$0x1] %vm1543_vm3, %v4425_v43  ;;  %v3908_v60 = vmax.f32 %v3884_v31, %v3768_v55  ;;  %v3910_v17 = vmax.f32 %v3886_v8, %v3792_v26  ;;  %v4170_v36 = vld [vmem:[#allocation3 + $0xc] sm:$0xf]  ;;  %v4043_v21 = vld [vmem:[#allocation3 + $0x10] sm:$0xff] }
 0x29d   : > { %v3912_v47 = vmax.f32 %v3888_v9, %v3816_v25  ;;  %v3930_v50 = vmax.f32 %v3906_v10, %v3768_v55  ;;  %v4585_v49 = vld [vmem:[#allocation3 + $0xc] sm:$0x1]  ;;  %v4601_v20 = vld [vmem:[#allocation3 + $0xd] sm:$0x1]  ;;  %v4024_v11 = vmax.f32 %v4022_v46, %v3840_v42  ;;  %v3952_v54 = vmax.f32 %v3928_v53, %v3768_v55  ;;  %v4729_v45 = vld [vmem:[#allocation3 + $0xe] sm:$0x1]  ;;  %5825 = vmatprep.mubr.msk.bf16.mxu1 %vm801_vm2, %v3485_v37 }
 0x29e   : > { %v4038_v44 = vmax.f32 %v4036_v4, %v3864_v19  ;;  %3974 = vst.msk [vmem:[#allocation3 + $0x88] sm:$0xff] %vm801_vm2, %v3950_v16  ;;  %v4297_v1 = vmax.f32 %v4265_v13, %v4169_v5  ;;  %v4713_v51 = vld [vmem:[#allocation3 + $0xd] sm:$0x1]  ;;  %v3932_v57 = vmax.f32 %v3908_v60, %v3792_v26  ;;  %v3934_v52 = vmax.f32 %v3910_v17, %v3816_v25  ;;  %v4044_v41 = vld [vmem:[#allocation3 + $0x18] sm:$0xf]  ;;  %v4081_v15 = vld [vmem:[#allocation3 + $0x41] sm:$0xff] }
 0x29f   : > { %v3936_v40 = vmax.f32 %v3912_v47, %v3840_v42  ;;  %v3954_v12 = vmax.f32 %v3930_v50, %v3792_v26  ;;  %v4075_v61 = vld [vmem:[#allocation3 + $0x11] sm:$0xff]  ;;  %v4076_v0 = vld [vmem:[#allocation3 + $0x19] sm:$0xf]  ;;  %v4026_v48 = vmax.f32 %v4024_v11, %v3864_v19  ;;  %3976 = vst.msk [vmem:[#allocation3 + $0x98] sm:$0xff] %vm801_vm2, %v3952_v54  ;;  %v4298_v29 = vmax.f32 %v4266_v24, %v4170_v36  ;;  %v4505_v2 = vld [vmem:[#allocation3 + $0x3] sm:$0x1] }
 0x2a0   : > { %4040 = vst.msk [vmem:[#allocation3 + $0xf8] sm:$0xff] %vm801_vm2, %v4038_v44  ;;  %4329 = vst.msk [vmem:[#allocation2 + $0x2] sm:$0xff] %vm801_vm2, %v4297_v1  ;;  %v4537_v35 = vmax.f32 %v4521_v63, %v4489_v38  ;;  %v4649_v56 = vmax.f32 %v4585_v49, %v4601_v20  ;;  %v3956_v33 = vmax.f32 %v3932_v57, %v3816_v25  ;;  %v4617_v30 = vld [vmem:[#allocation3 + $0xe] sm:$0x1]  ;;  %v4633_v28 = vld [vmem:[#allocation3 + $0xf] sm:$0x1] }
 0x2a1   : > { %v3958_v58 = vmax.f32 %v3934_v52, %v3840_v42  ;;  %v3960_v34 = vmax.f32 %v3936_v40, %v3864_v19  ;;  %3978 = vst.msk [vmem:[#allocation3 + $0xa8] sm:$0xff] %vm801_vm2, %v3954_v12  ;;  %v4761_v59 = vmax.f32 %v4713_v51, %v4729_v45  ;;  %4028 = vst.msk [vmem:[#allocation3 + $0xe8] sm:$0xff] %vm801_vm2, %v4026_v48  ;;  %v4745_v62 = vld [vmem:[#allocation3 + $0xf] sm:$0x1]  ;;  %v4107_v32 = vld [vmem:[#allocation3 + $0x12] sm:$0xff] }
 0x2a2   : > { %4330 = vst.msk [vmem:[#allocation2 + $0xa] sm:$0xf] %vm1431_vm4, %v4298_v29  ;;  %v4553_v3 = vmax.f32 %v4537_v35, %v4505_v2  ;;  %v4665_v6 = vmax.f32 %v4649_v56, %v4617_v30  ;;  %v4203_v22 = vmax.f32 %v4043_v21, %v4075_v61  ;;  %v4204_v55 = vmax.f32 %v4044_v41, %v4076_v0  ;;  %v4108_v39 = vld [vmem:[#allocation3 + $0x1a] sm:$0xf]  ;;  %v4362_v37 = vld [vmem:[#allocation3 + $0x10] sm:$0x1] }
 0x2a3   : > { %v4209_v26 = vmax.f32 %v4049_v7, %v4081_v15  ;;  %3980 = vst.msk [vmem:[#allocation3 + $0xb8] sm:$0xff] %vm801_vm2, %v3956_v33  ;;  %3982 = vst.msk [vmem:[#allocation3 + $0xc8] sm:$0xff] %vm801_vm2, %v3958_v58  ;;  %v4777_v27 = vmax.f32 %v4761_v59, %v4745_v62  ;;  %v4378_v13 = vld [vmem:[#allocation3 + $0x11] sm:$0x1]  ;;  %v4139_v43 = vld [vmem:[#allocation3 + $0x13] sm:$0xff] }
 0x2a4   : > { %3984 = vst.msk [vmem:[#allocation3 + $0xd8] sm:$0xff] %vm801_vm2, %v3960_v34  ;;  %v4681_v24 = vmax.f32 %v4665_v6, %v4633_v28  ;;  %v4235_v63 = vmax.f32 %v4203_v22, %v4107_v32  ;;  %v4236_v25 = vmax.f32 %v4204_v55, %v4108_v39  ;;  %v4410_v42 = vmax.f32 %v4362_v37, %v4378_v13  ;;  %v4458_v31 = vld [vmem:[#allocation3 + $0x10] sm:$0x1]  ;;  %v4474_v8 = vld [vmem:[#allocation3 + $0x11] sm:$0x1]  ;;  %v8545_v17 = vld [vmem:[#allocation39_spill] sm:$0xff] }
 0x2a5   : > { %4569 = vst.msk [vmem:[#allocation2 + $0x1] sm:$0x1] %vm1543_vm3, %v4553_v3  ;;  %4793 = vst.msk [vmem:[#allocation2 + $0xf] sm:$0x1] %vm1543_vm3, %v4777_v27  ;;  %v4140_v9 = vld [vmem:[#allocation3 + $0x1b] sm:$0xf]  ;;  %v4522_v46 = vmax.f32 %v4458_v31, %v4474_v8  ;;  %v3486_v47 = vpack.c.bf16 %v7510_v23, %v8545_v17 }
 0x2a6   : > { %v4394_v10 = vld [vmem:[#allocation3 + $0x12] sm:$0x1]  ;;  %v4586_v4 = vld [vmem:[#allocation3 + $0x1c] sm:$0x1]  ;;  %4697 = vst.msk [vmem:[#allocation2 + $0xe] sm:$0x1] %vm1543_vm3, %v4681_v24  ;;  %v4267_v53 = vmax.f32 %v4235_v63, %v4139_v43  ;;  %v4268_v16 = vmax.f32 %v4236_v25, %v4140_v9 }
 0x2a7   : > { %v4426_v5 = vmax.f32 %v4410_v42, %v4394_v10  ;;  %v4490_v19 = vld [vmem:[#allocation3 + $0x12] sm:$0x1]  ;;  %v4602_v60 = vld [vmem:[#allocation3 + $0x1d] sm:$0x1]  ;;  %v4113_v50 = vld [vmem:[#allocation3 + $0x42] sm:$0xff]  ;;  %5826 = vmatmul.mubr.msk.bf16.gmra.mxu1 %vm801_vm2, %v3486_v47 }
 0x2a8   : > { %v4171_v36 = vld [vmem:[#allocation3 + $0x14] sm:$0xff]  ;;  %v4172_v38 = vld [vmem:[#allocation3 + $0x1c] sm:$0xf]  ;;  %v4538_v49 = vmax.f32 %v4522_v46, %v4490_v19  ;;  %v4650_v20 = vmax.f32 %v4586_v4, %v4602_v60  ;;  %v4241_v11 = vmax.f32 %v4209_v26, %v4113_v50  ;;  %v4506_v1 = vld [vmem:[#allocation3 + $0x13] sm:$0x1] }
 0x2a9   : > { %v4299_v44 = vmax.f32 %v4267_v53, %v4171_v36  ;;  %v4300_v54 = vmax.f32 %v4268_v16, %v4172_v38  ;;  %4442 = vst.msk [vmem:[#allocation2 + $0x10] sm:$0x1] %vm1543_vm3, %v4426_v5  ;;  %v4618_v51 = vld [vmem:[#allocation3 + $0x1e] sm:$0x1]  ;;  %v4145_v23 = vld [vmem:[#allocation3 + $0x43] sm:$0xff]  ;;  %v4051_v12 = vld [vmem:[#allocation3 + $0x50] sm:$0xff] }
 0x2aa   : > { %v4554_v45 = vmax.f32 %v4538_v49, %v4506_v1  ;;  %v4666_v21 = vmax.f32 %v4650_v20, %v4618_v51  ;;  %v4634_v57 = vld [vmem:[#allocation3 + $0x1f] sm:$0x1]  ;;  %v4273_v52 = vmax.f32 %v4241_v11, %v4145_v23  ;;  %v4053_v41 = vld [vmem:[#allocation3 + $0x60] sm:$0xff]  ;;  %v4083_v61 = vld [vmem:[#allocation3 + $0x51] sm:$0xff] }
 0x2ab   : > { %4331 = vst.msk [vmem:[#allocation2 + $0x12] sm:$0xff] %vm801_vm2, %v4299_v44  ;;  %v4177_v0 = vld [vmem:[#allocation3 + $0x44] sm:$0xff]  ;;  %v4714_v48 = vld [vmem:[#allocation3 + $0x1d] sm:$0x1]  ;;  %v4730_v33 = vld [vmem:[#allocation3 + $0x1e] sm:$0x1]  ;;  %v4211_v59 = vmax.f32 %v4051_v12, %v4083_v61 }
 0x2ac   : > { %4332 = vst.msk [vmem:[#allocation2 + $0x1a] sm:$0xf] %vm1431_vm4, %v4300_v54  ;;  %v4682_v40 = vmax.f32 %v4666_v21, %v4634_v57  ;;  %v4809_v7 = vld [vmem:[#allocation2] sm:$0xff]  ;;  %v4305_v35 = vmax.f32 %v4273_v52, %v4177_v0  ;;  %v4587_v58 = vld [vmem:[#allocation3 + $0x2c] sm:$0x1]  ;;  %v4762_v34 = vmax.f32 %v4714_v48, %v4730_v33  ;;  %v4115_v32 = vld [vmem:[#allocation3 + $0x52] sm:$0xff] }
 0x2ad   : > { %4570 = vst.msk [vmem:[#allocation2 + $0x11] sm:$0x1] %vm1543_vm3, %v4554_v45  ;;  %v4810_v15 = vld [vmem:[#allocation2 + $0x8] sm:$0xff]  ;;  %v3459_v30 = vld [vmem:[#allocation2 + $0x40] sm:$0xff]  ;;  %v4746_v3 = vld [vmem:[#allocation3 + $0x1f] sm:$0x1]  ;;  %v4243_v10 = vmax.f32 %v4211_v59, %v4115_v32 }
 0x2ae   : > { %4698 = vst.msk [vmem:[#allocation2 + $0x1e] sm:$0x1] %vm1543_vm3, %v4682_v40  ;;  %v4085_v29 = vld [vmem:[#allocation3 + $0x61] sm:$0xff]  ;;  %v4841_v56 = vpack.c.bf16 %v4810_v15, %v4809_v7  ;;  %v4603_v2 = vld [vmem:[#allocation3 + $0x2d] sm:$0x1]  ;;  %v4778_v55 = vmax.f32 %v4762_v34, %v4746_v3  ;;  %v4147_v5 = vld [vmem:[#allocation3 + $0x53] sm:$0xff] }
 0x2af   : > { %v4651_v28 = vmax.f32 %v4587_v58, %v4603_v2  ;;  %v4715_v6 = vld [vmem:[#allocation3 + $0x2d] sm:$0x1]  ;;  %v4731_v62 = vld [vmem:[#allocation3 + $0x2e] sm:$0x1]  ;;  %v4213_v22 = vmax.f32 %v4053_v41, %v4085_v29  ;;  %v4747_v13 = vld [vmem:[#allocation3 + $0x2f] sm:$0x1]  ;;  %v4275_v40 = vmax.f32 %v4243_v10, %v4147_v5 }
 0x2b0   : > { %5855 = vmatprep.mubr.msk.bf16.mxu0 %vm801_vm2, %v4841_v56  ;;  %v4619_v26 = vld [vmem:[#allocation3 + $0x2e] sm:$0x1]  ;;  %v4763_v27 = vmax.f32 %v4715_v6, %v4731_v62  ;;  %v4048_v43 = vld [vmem:[#allocation3 + $0x38] sm:$0xf]  ;;  %v4117_v25 = vld [vmem:[#allocation3 + $0x62] sm:$0xff] }
 0x2b1   : > { %v3460_v39 = vld [vmem:[#allocation2 + $0x48] sm:$0xff]  ;;  %v4667_v37 = vmax.f32 %v4651_v28, %v4619_v26  ;;  %v4080_v63 = vld [vmem:[#allocation3 + $0x39] sm:$0xf]  ;;  %4794 = vst.msk [vmem:[#allocation2 + $0x1f] sm:$0x1] %vm1543_vm3, %v4778_v55  ;;  %v4245_v19 = vmax.f32 %v4213_v22, %v4117_v25  ;;  %v4813_v29 = vld [vmem:[#allocation2 + $0x20] sm:$0xff] }
 0x2b2   : > { %v3487_v24 = vpack.c.bf16 %v3460_v39, %v3459_v30  ;;  %4337 = vst.msk [vmem:[#allocation2 + $0x42] sm:$0xff] %vm801_vm2, %v4305_v35  ;;  %v4635_v42 = vld [vmem:[#allocation3 + $0x2f] sm:$0x1]  ;;  %v4779_v31 = vmax.f32 %v4763_v27, %v4747_v13  ;;  %v4208_v8 = vmax.f32 %v4048_v43, %v4080_v63  ;;  %v4364_v9 = vld [vmem:[#allocation3 + $0x30] sm:$0x1]  ;;  %v4149_v38 = vld [vmem:[#allocation3 + $0x63] sm:$0xff] }
 0x2b3   : > { %v4683_v46 = vmax.f32 %v4667_v37, %v4635_v42  ;;  %v4112_v4 = vld [vmem:[#allocation3 + $0x3a] sm:$0xf]  ;;  %v4380_v53 = vld [vmem:[#allocation3 + $0x31] sm:$0x1]  ;;  %v4460_v16 = vld [vmem:[#allocation3 + $0x30] sm:$0x1]  ;;  %v4277_v48 = vmax.f32 %v4245_v19, %v4149_v38 }
 0x2b4   : > { %5829 = vmatprep.mubr.msk.bf16.mxu1 %vm801_vm2, %v3487_v24  ;;  %4795 = vst.msk [vmem:[#allocation2 + $0x2f] sm:$0x1] %vm1543_vm3, %v4779_v31  ;;  %v4144_v60 = vld [vmem:[#allocation3 + $0x3b] sm:$0xf]  ;;  %v4240_v17 = vmax.f32 %v4208_v8, %v4112_v4  ;;  %v4396_v47 = vld [vmem:[#allocation3 + $0x32] sm:$0x1]  ;;  %v4412_v50 = vmax.f32 %v4364_v9, %v4380_v53 }
 0x2b5   : > { %v4476_v36 = vld [vmem:[#allocation3 + $0x31] sm:$0x1]  ;;  %4699 = vst.msk [vmem:[#allocation2 + $0x2e] sm:$0x1] %vm1543_vm3, %v4683_v46  ;;  %v4176_v20 = vld [vmem:[#allocation3 + $0x3c] sm:$0xf] }
 0x2b6   : > { %v4811_v49 = vld [vmem:[#allocation2 + $0x10] sm:$0xff]  ;;  %v4524_v44 = vmax.f32 %v4460_v16, %v4476_v36  ;;  %v4588_v54 = vld [vmem:[#allocation3 + $0x3c] sm:$0x1]  ;;  %v4604_v1 = vld [vmem:[#allocation3 + $0x3d] sm:$0x1]  ;;  %v4272_v51 = vmax.f32 %v4240_v17, %v4144_v60  ;;  %v4428_v45 = vmax.f32 %v4412_v50, %v4396_v47 }
 0x2b7   : > { %v4492_v11 = vld [vmem:[#allocation3 + $0x32] sm:$0x1]  ;;  %v4508_v21 = vld [vmem:[#allocation3 + $0x33] sm:$0x1]  ;;  %v4652_v23 = vmax.f32 %v4588_v54, %v4604_v1  ;;  %v4716_v57 = vld [vmem:[#allocation3 + $0x3d] sm:$0x1] }
 0x2b8   : > { %v4732_v52 = vld [vmem:[#allocation3 + $0x3e] sm:$0x1]  ;;  %v4540_v12 = vmax.f32 %v4524_v44, %v4492_v11  ;;  %v4050_v0 = vld [vmem:[#allocation3 + $0x48] sm:$0xf]  ;;  %v4179_v15 = vld [vmem:[#allocation3 + $0x54] sm:$0xff]  ;;  %v4304_v35 = vmax.f32 %v4272_v51, %v4176_v20 }
 0x2b9   : > { %v4620_v41 = vld [vmem:[#allocation3 + $0x3e] sm:$0x1]  ;;  %v4764_v61 = vmax.f32 %v4716_v57, %v4732_v52  ;;  %v4082_v7 = vld [vmem:[#allocation3 + $0x49] sm:$0xf]  ;;  %4444 = vst.msk [vmem:[#allocation2 + $0x30] sm:$0x1] %vm1543_vm3, %v4428_v45  ;;  %v4307_v43 = vmax.f32 %v4275_v40, %v4179_v15 }
 0x2ba   : > { %v4636_v56 = vld [vmem:[#allocation3 + $0x3f] sm:$0x1]  ;;  %v4668_v33 = vmax.f32 %v4652_v23, %v4620_v41  ;;  %v4114_v34 = vld [vmem:[#allocation3 + $0x4a] sm:$0xf]  ;;  %v4210_v2 = vmax.f32 %v4050_v0, %v4082_v7  ;;  %v7900_v30 = vld [vmem:[#allocation3 + $0x70] sm:$0xff]  ;;  %v4556_v6 = vmax.f32 %v4540_v12, %v4508_v21 }
 0x2bb   : > { %v4748_v58 = vld [vmem:[#allocation3 + $0x3f] sm:$0x1]  ;;  %v7902_v59 = vld [vmem:[#allocation3 + $0x71] sm:$0xff]  ;;  %v4181_v3 = vld [vmem:[#allocation3 + $0x64] sm:$0xff]  ;;  %4336 = vst.msk [vmem:[#allocation2 + $0x3a] sm:$0xf] %vm1431_vm4, %v4304_v35 }
 0x2bc   : > { %v4812_v28 = vld [vmem:[#allocation2 + $0x18] sm:$0xff]  ;;  %v4780_v62 = vmax.f32 %v4764_v61, %v4748_v58  ;;  %v4365_v32 = vld [vmem:[#allocation3 + $0x40] sm:$0x1]  ;;  %v4381_v22 = vld [vmem:[#allocation3 + $0x41] sm:$0x1]  ;;  %v4684_v26 = vmax.f32 %v4668_v33, %v4636_v56  ;;  %v4242_v39 = vmax.f32 %v4210_v2, %v4114_v34  ;;  %v4309_v9 = vmax.f32 %v4277_v48, %v4181_v3 }
 0x2bd   : > { %v4842_v55 = vpack.c.bf16 %v4812_v28, %v4811_v49  ;;  %v4146_v27 = vld [vmem:[#allocation3 + $0x4b] sm:$0xf]  ;;  %v4413_v37 = vmax.f32 %v4365_v32, %v4381_v22  ;;  %v4461_v13 = vld [vmem:[#allocation3 + $0x40] sm:$0x1]  ;;  %v4477_v24 = vld [vmem:[#allocation3 + $0x41] sm:$0x1]  ;;  %v4215_v36 = vmax.f32 %v7900_v30, %v7902_v59 }
 0x2be   : > { %4572 = vst.msk [vmem:[#allocation2 + $0x31] sm:$0x1] %vm1543_vm3, %v4556_v6  ;;  %4796 = vst.msk [vmem:[#allocation2 + $0x3f] sm:$0x1] %vm1543_vm3, %v4780_v62  ;;  %v4178_v63 = vld [vmem:[#allocation3 + $0x4c] sm:$0xf]  ;;  %v4525_v31 = vmax.f32 %v4461_v13, %v4477_v24  ;;  %v4274_v46 = vmax.f32 %v4242_v39, %v4146_v27 }
 0x2bf   : > { %v4397_v25 = vld [vmem:[#allocation3 + $0x42] sm:$0x1]  ;;  %v4589_v8 = vld [vmem:[#allocation3 + $0x4c] sm:$0x1]  ;;  %5856 = vmatmul.mubr.msk.bf16.vlgmr.msra.gmra.mxu0 %vm801_vm2, %v4842_v55  ;;  %4700 = vst.msk [vmem:[#allocation2 + $0x3e] sm:$0x1] %vm1543_vm3, %v4684_v26 }
 0x2c0   : > { %v4493_v42 = vld [vmem:[#allocation3 + $0x42] sm:$0x1]  ;;  %v4814_v10 = vld [vmem:[#allocation2 + $0x28] sm:$0xff]  ;;  %v4429_v4 = vmax.f32 %v4413_v37, %v4397_v25  ;;  %v4509_v53 = vld [vmem:[#allocation3 + $0x43] sm:$0x1]  ;;  %v4306_v38 = vmax.f32 %v4274_v46, %v4178_v63 }
 0x2c1   : > { %v4605_v16 = vld [vmem:[#allocation3 + $0x4d] sm:$0x1]  ;;  %v4843_v5 = vpack.c.bf16 %v4814_v10, %v4813_v29  ;;  %v4541_v19 = vmax.f32 %v4525_v31, %v4493_v42  ;;  %v4621_v60 = vld [vmem:[#allocation3 + $0x4e] sm:$0x1]  ;;  %v4749_v49 = vld [vmem:[#allocation3 + $0x4f] sm:$0x1] }
 0x2c2   : > { %v4653_v17 = vmax.f32 %v4589_v8, %v4605_v16  ;;  %v4717_v47 = vld [vmem:[#allocation3 + $0x4d] sm:$0x1]  ;;  %v4733_v50 = vld [vmem:[#allocation3 + $0x4e] sm:$0x1]  ;;  %4445 = vst.msk [vmem:[#allocation2 + $0x40] sm:$0x1] %vm1543_vm3, %v4429_v4 }
 0x2c3   : > { %v4765_v20 = vmax.f32 %v4717_v47, %v4733_v50  ;;  %v3461_v11 = vld [vmem:[#allocation2 + $0x50] sm:$0xff]  ;;  %v3462_v44 = vld [vmem:[#allocation2 + $0x58] sm:$0xff]  ;;  %5859 = vmatprep.mubr.msk.bf16.mxu0 %vm801_vm2, %v4843_v5  ;;  %v4557_v54 = vmax.f32 %v4541_v19, %v4509_v53  ;;  %v7914_v45 = vld [vmem:[#allocation2 + $0x60] sm:$0xff]  ;;  %4338 = vst.msk [vmem:[#allocation2 + $0x4a] sm:$0xf] %vm1431_vm4, %v4306_v38 }
 0x2c4   : > { %v4669_v1 = vmax.f32 %v4653_v17, %v4621_v60  ;;  %v3488_v51 = vpack.c.bf16 %v3462_v44, %v3461_v11  ;;  %4339 = vst.msk [vmem:[#allocation2 + $0x52] sm:$0xff] %vm801_vm2, %v4307_v43  ;;  %v4052_v21 = vld [vmem:[#allocation3 + $0x58] sm:$0xf]  ;;  %v4637_v52 = vld [vmem:[#allocation3 + $0x4f] sm:$0x1]  ;;  %v3489_v12 = vpack.c.bf16 %v7758_v14, %v7914_v45  ;;  %4341 = vst.msk [vmem:[#allocation2 + $0x62] sm:$0xff] %vm801_vm2, %v4309_v9 }
 0x2c5   : > { %v4084_v23 = vld [vmem:[#allocation3 + $0x59] sm:$0xf]  ;;  %v4781_v40 = vmax.f32 %v4765_v20, %v4749_v49  ;;  %4573 = vst.msk [vmem:[#allocation2 + $0x41] sm:$0x1] %vm1543_vm3, %v4557_v54  ;;  %v4366_v15 = vld [vmem:[#allocation3 + $0x50] sm:$0x1] }
 0x2c6   : > { %v4119_v57 = vld [vmem:[#allocation3 + $0x72] sm:$0xff]  ;;  %v4116_v41 = vld [vmem:[#allocation3 + $0x5a] sm:$0xf]  ;;  %v4212_v61 = vmax.f32 %v4052_v21, %v4084_v23  ;;  %v4685_v0 = vmax.f32 %v4669_v1, %v4637_v52  ;;  %5830 = vmatmul.mubr.msk.bf16.gmra.mxu1 %vm801_vm2, %v3488_v51  ;;  %v4382_v48 = vld [vmem:[#allocation3 + $0x51] sm:$0x1] }
 0x2c7   : > { %v4148_v7 = vld [vmem:[#allocation3 + $0x5b] sm:$0xf]  ;;  %v4247_v29 = vmax.f32 %v4215_v36, %v4119_v57  ;;  %v4815_v35 = vld [vmem:[#allocation2 + $0x30] sm:$0xff]  ;;  %4797 = vst.msk [vmem:[#allocation2 + $0x4f] sm:$0x1] %vm1543_vm3, %v4781_v40  ;;  %5833 = vmatprep.mubr.msk.bf16.mxu1 %vm801_vm2, %v3489_v12  ;;  %v4414_v14 = vmax.f32 %v4366_v15, %v4382_v48  ;;  %v7927_v9 = vld [vmem:[#allocation3 + $0xa0] sm:$0xff] }
 0x2c8   : > { %v4244_v56 = vmax.f32 %v4212_v61, %v4116_v41  ;;  %v4462_v33 = vld [vmem:[#allocation3 + $0x50] sm:$0x1]  ;;  %v4478_v58 = vld [vmem:[#allocation3 + $0x51] sm:$0x1]  ;;  %v4151_v34 = vld [vmem:[#allocation3 + $0x73] sm:$0xff] }
 0x2c9   : > { %v4816_v2 = vld [vmem:[#allocation2 + $0x38] sm:$0xff]  ;;  %4701 = vst.msk [vmem:[#allocation2 + $0x4e] sm:$0x1] %vm1543_vm3, %v4685_v0  ;;  %v4398_v59 = vld [vmem:[#allocation3 + $0x52] sm:$0x1]  ;;  %v4526_v3 = vmax.f32 %v4462_v33, %v4478_v58  ;;  %v4279_v24 = vmax.f32 %v4247_v29, %v4151_v34  ;;  %v7929_v10 = vld [vmem:[#allocation3 + $0xa1] sm:$0xff] }
 0x2ca   : > { %v4180_v30 = vld [vmem:[#allocation3 + $0x5c] sm:$0xf]  ;;  %v4844_v28 = vpack.c.bf16 %v4816_v2, %v4815_v35  ;;  %v4276_v6 = vmax.f32 %v4244_v56, %v4148_v7  ;;  %v4430_v62 = vmax.f32 %v4414_v14, %v4398_v59  ;;  %v4494_v32 = vld [vmem:[#allocation3 + $0x52] sm:$0x1]  ;;  %v4510_v26 = vld [vmem:[#allocation3 + $0x53] sm:$0x1]  ;;  %v4221_v7 = vmax.f32 %v7927_v9, %v7929_v10 }
 0x2cb   : > { %v4590_v22 = vld [vmem:[#allocation3 + $0x5c] sm:$0x1]  ;;  %v4606_v55 = vld [vmem:[#allocation3 + $0x5d] sm:$0x1]  ;;  %v4542_v27 = vmax.f32 %v4526_v3, %v4494_v32  ;;  %v4734_v13 = vld [vmem:[#allocation3 + $0x5e] sm:$0x1] }
 0x2cc   : > { %v4654_v39 = vmax.f32 %v4590_v22, %v4606_v55  ;;  %v4718_v37 = vld [vmem:[#allocation3 + $0x5d] sm:$0x1]  ;;  %5860 = vmatmul.mubr.msk.bf16.gmra.mxu0 %vm801_vm2, %v4844_v28  ;;  %v4308_v43 = vmax.f32 %v4276_v6, %v4180_v30  ;;  %4446 = vst.msk [vmem:[#allocation2 + $0x50] sm:$0x1] %vm1543_vm3, %v4430_v62  ;;  %v4622_v63 = vld [vmem:[#allocation3 + $0x5e] sm:$0x1] }
 0x2cd   : > { %v4766_v25 = vmax.f32 %v4718_v37, %v4734_v13  ;;  %v4054_v42 = vld [vmem:[#allocation3 + $0x68] sm:$0xf]  ;;  %v4183_v8 = vld [vmem:[#allocation3 + $0x74] sm:$0xff]  ;;  %v4558_v46 = vmax.f32 %v4542_v27, %v4510_v26  ;;  %v4638_v4 = vld [vmem:[#allocation3 + $0x5f] sm:$0x1] }
 0x2ce   : > { %v4086_v31 = vld [vmem:[#allocation3 + $0x69] sm:$0xf]  ;;  %v4670_v53 = vmax.f32 %v4654_v39, %v4622_v63  ;;  %v4750_v16 = vld [vmem:[#allocation3 + $0x5f] sm:$0x1]  ;;  %v4817_v60 = vld [vmem:[#allocation2 + $0x40] sm:$0xff]  ;;  %v4311_v54 = vmax.f32 %v4279_v24, %v4183_v8 }
 0x2cf   : > { %v4118_v5 = vld [vmem:[#allocation3 + $0x6a] sm:$0xf]  ;;  %v4214_v19 = vmax.f32 %v4054_v42, %v4086_v31  ;;  %4340 = vst.msk [vmem:[#allocation2 + $0x5a] sm:$0xf] %vm1431_vm4, %v4308_v43  ;;  %v4782_v17 = vmax.f32 %v4766_v25, %v4750_v16  ;;  %v4367_v47 = vld [vmem:[#allocation3 + $0x60] sm:$0x1] }
 0x2d0   : > { %v4383_v50 = vld [vmem:[#allocation3 + $0x61] sm:$0x1]  ;;  %4574 = vst.msk [vmem:[#allocation2 + $0x51] sm:$0x1] %vm1543_vm3, %v4558_v46  ;;  %v4686_v36 = vmax.f32 %v4670_v53, %v4638_v4  ;;  %v4150_v38 = vld [vmem:[#allocation3 + $0x6b] sm:$0xf] }
 0x2d1   : > { %v4246_v49 = vmax.f32 %v4214_v19, %v4118_v5  ;;  %v4415_v20 = vmax.f32 %v4367_v47, %v4383_v50  ;;  %v4463_v11 = vld [vmem:[#allocation3 + $0x60] sm:$0x1]  ;;  %v4479_v44 = vld [vmem:[#allocation3 + $0x61] sm:$0x1]  ;;  %v4818_v1 = vld [vmem:[#allocation2 + $0x48] sm:$0xff] }
 0x2d2   : > { %4798 = vst.msk [vmem:[#allocation2 + $0x5f] sm:$0x1] %vm1543_vm3, %v4782_v17  ;;  %v4182_v51 = vld [vmem:[#allocation3 + $0x6c] sm:$0xf]  ;;  %v4399_v21 = vld [vmem:[#allocation3 + $0x62] sm:$0x1]  ;;  %v4527_v57 = vmax.f32 %v4463_v11, %v4479_v44  ;;  %v4845_v52 = vpack.c.bf16 %v4818_v1, %v4817_v60 }
 0x2d3   : > { %v4495_v23 = vld [vmem:[#allocation3 + $0x62] sm:$0x1]  ;;  %4702 = vst.msk [vmem:[#allocation2 + $0x5e] sm:$0x1] %vm1543_vm3, %v4686_v36  ;;  %v4278_v40 = vmax.f32 %v4246_v49, %v4150_v38  ;;  %v4431_v12 = vmax.f32 %v4415_v20, %v4399_v21  ;;  %v4511_v41 = vld [vmem:[#allocation3 + $0x63] sm:$0x1] }
 0x2d4   : > { %v4591_v61 = vld [vmem:[#allocation3 + $0x6c] sm:$0x1]  ;;  %v4607_v0 = vld [vmem:[#allocation3 + $0x6d] sm:$0x1]  ;;  %v4543_v15 = vmax.f32 %v4527_v57, %v4495_v23  ;;  %v4623_v48 = vld [vmem:[#allocation3 + $0x6e] sm:$0x1]  ;;  %5863 = vmatprep.mubr.msk.bf16.mxu0 %vm801_vm2, %v4845_v52 }
 0x2d5   : > { %v4655_v29 = vmax.f32 %v4591_v61, %v4607_v0  ;;  %v4719_v35 = vld [vmem:[#allocation3 + $0x6d] sm:$0x1]  ;;  %v4735_v56 = vld [vmem:[#allocation3 + $0x6e] sm:$0x1]  ;;  %v4310_v14 = vmax.f32 %v4278_v40, %v4182_v51  ;;  %4447 = vst.msk [vmem:[#allocation2 + $0x60] sm:$0x1] %vm1543_vm3, %v4431_v12 }
 0x2d6   : > { %v4751_v33 = vld [vmem:[#allocation3 + $0x6f] sm:$0x1]  ;;  %v4767_v58 = vmax.f32 %v4719_v35, %v4735_v56  ;;  %v7939_v34 = vld [vmem:[#allocation2 + $0x70] sm:$0xff]  ;;  %v7941_v2 = vld [vmem:[#allocation2 + $0x80] sm:$0xff]  ;;  %v4559_v30 = vmax.f32 %v4543_v15, %v4511_v41 }
 0x2d7   : > { %v4671_v59 = vmax.f32 %v4655_v29, %v4623_v48  ;;  %v6177_v3 = vld [vmem:[#allocation2 + $0x78] sm:$0xff]  ;;  %v3468_v6 = vld [vmem:[#allocation2 + $0x88] sm:$0xff]  ;;  %v3877_v62 = vmax.f32 %v7914_v45, %v7939_v34  ;;  %4342 = vst.msk [vmem:[#allocation2 + $0x6a] sm:$0xf] %vm1431_vm4, %v4310_v14  ;;  %v4819_v43 = vld [vmem:[#allocation2 + $0x50] sm:$0xff] }
 0x2d8   : > { %v3490_v28 = vpack.c.bf16 %v6177_v3, %v7939_v34  ;;  %v4056_v32 = vld [vmem:[#allocation3 + $0x78] sm:$0xf]  ;;  %4343 = vst.msk [vmem:[#allocation2 + $0x72] sm:$0xff] %vm801_vm2, %v4311_v54  ;;  %v4125_v55 = vld [vmem:[#allocation3 + $0xa2] sm:$0xff]  ;;  %v4639_v26 = vld [vmem:[#allocation3 + $0x6f] sm:$0x1]  ;;  %v4783_v27 = vmax.f32 %v4767_v58, %v4751_v33  ;;  %v3491_v39 = vpack.c.bf16 %v3468_v6, %v7941_v2  ;;  %v3879_v33 = vmax.f32 %v7939_v34, %v7941_v2 }
 0x2d9   : > { %v4088_v22 = vld [vmem:[#allocation3 + $0x79] sm:$0xf]  ;;  %v4253_v24 = vmax.f32 %v4221_v7, %v4125_v55  ;;  %4575 = vst.msk [vmem:[#allocation2 + $0x61] sm:$0x1] %vm1543_vm3, %v4559_v30  ;;  %v4687_v63 = vmax.f32 %v4671_v59, %v4639_v26  ;;  %v4368_v45 = vld [vmem:[#allocation3 + $0x70] sm:$0x1]  ;;  %v3901_v42 = vmax.f32 %v3877_v62, %v7941_v2 }
 0x2da   : > { %v4120_v37 = vld [vmem:[#allocation3 + $0x7a] sm:$0xf]  ;;  %v4216_v13 = vmax.f32 %v4056_v32, %v4088_v22  ;;  %5834 = vmatmul.mubr.msk.bf16.gmra.mxu1 %vm801_vm2, %v3490_v28  ;;  %v4384_v25 = vld [vmem:[#allocation3 + $0x71] sm:$0x1]  ;;  %v4157_v31 = vld [vmem:[#allocation3 + $0xa3] sm:$0xff] }
 0x2db   : > { %4799 = vst.msk [vmem:[#allocation2 + $0x6f] sm:$0x1] %vm1543_vm3, %v4783_v27  ;;  %5837 = vmatprep.mubr.msk.bf16.mxu1 %vm801_vm2, %v3491_v39  ;;  %v4152_v8 = vld [vmem:[#allocation3 + $0x7b] sm:$0xf]  ;;  %v4416_v10 = vmax.f32 %v4368_v45, %v4384_v25  ;;  %v4464_v46 = vld [vmem:[#allocation3 + $0x70] sm:$0x1]  ;;  %v4285_v11 = vmax.f32 %v4253_v24, %v4157_v31 }
 0x2dc   : > { %v4248_v9 = vmax.f32 %v4216_v13, %v4120_v37  ;;  %v4480_v4 = vld [vmem:[#allocation3 + $0x71] sm:$0x1]  ;;  %v4820_v53 = vld [vmem:[#allocation2 + $0x58] sm:$0xff]  ;;  %4703 = vst.msk [vmem:[#allocation2 + $0x6e] sm:$0x1] %vm1543_vm3, %v4687_v63  ;;  %v4189_v57 = vld [vmem:[#allocation3 + $0xa4] sm:$0xff] }
 0x2dd   : > { %v4184_v16 = vld [vmem:[#allocation3 + $0x7c] sm:$0xf]  ;;  %v4400_v5 = vld [vmem:[#allocation3 + $0x72] sm:$0x1]  ;;  %v4528_v19 = vmax.f32 %v4464_v46, %v4480_v4  ;;  %v4846_v47 = vpack.c.bf16 %v4820_v53, %v4819_v43  ;;  %v4512_v44 = vld [vmem:[#allocation3 + $0x73] sm:$0x1]  ;;  %v4317_v59 = vmax.f32 %v4285_v11, %v4189_v57 }
 0x2de   : > { %v6178_v60 = vld [vmem:[#allocation2 + $0x90] sm:$0xff]  ;;  %v4280_v50 = vmax.f32 %v4248_v9, %v4152_v8  ;;  %v4432_v36 = vmax.f32 %v4416_v10, %v4400_v5  ;;  %v4592_v49 = vld [vmem:[#allocation3 + $0x7c] sm:$0x1]  ;;  %v4608_v20 = vld [vmem:[#allocation3 + $0x7d] sm:$0x1] }
 0x2df   : > { %v3925_v17 = vmax.f32 %v3901_v42, %v6178_v60  ;;  %v4496_v38 = vld [vmem:[#allocation3 + $0x72] sm:$0x1]  ;;  %v4656_v1 = vmax.f32 %v4592_v49, %v4608_v20  ;;  %v4720_v51 = vld [vmem:[#allocation3 + $0x7d] sm:$0x1]  ;;  %v4736_v21 = vld [vmem:[#allocation3 + $0x7e] sm:$0x1]  ;;  %5864 = vmatmul.mubr.msk.bf16.gmra.mxu0 %vm801_vm2, %v4846_v47 }
 0x2e0   : > { %v4544_v54 = vmax.f32 %v4528_v19, %v4496_v38  ;;  %v4312_v52 = vmax.f32 %v4280_v50, %v4184_v16  ;;  %4448 = vst.msk [vmem:[#allocation2 + $0x70] sm:$0x1] %vm1543_vm3, %v4432_v36  ;;  %v4624_v40 = vld [vmem:[#allocation3 + $0x7e] sm:$0x1]  ;;  %v4768_v12 = vmax.f32 %v4720_v51, %v4736_v21  ;;  %v4058_v41 = vld [vmem:[#allocation3 + $0x88] sm:$0xf] }
 0x2e1   : > { %v3949_v23 = vmax.f32 %v3925_v17, %v7814_v18  ;;  %v4090_v61 = vld [vmem:[#allocation3 + $0x89] sm:$0xf]  ;;  %v4640_v7 = vld [vmem:[#allocation3 + $0x7f] sm:$0x1]  ;;  %v4672_v15 = vmax.f32 %v4656_v1, %v4624_v40  ;;  %v4821_v56 = vld [vmem:[#allocation2 + $0x60] sm:$0xff] }
 0x2e2   : > { %v4560_v0 = vmax.f32 %v4544_v54, %v4512_v44  ;;  %v4752_v48 = vld [vmem:[#allocation3 + $0x7f] sm:$0x1]  ;;  %v4122_v29 = vld [vmem:[#allocation3 + $0x8a] sm:$0xf]  ;;  %v4218_v35 = vmax.f32 %v4058_v41, %v4090_v61  ;;  %4344 = vst.msk [vmem:[#allocation2 + $0x7a] sm:$0xf] %vm1431_vm4, %v4312_v52 }
 0x2e3   : > { %3973 = vst.msk [vmem:[#allocation3 + $0x80] sm:$0xff] %vm801_vm2, %v3949_v23  ;;  %v4784_v14 = vmax.f32 %v4768_v12, %v4752_v48  ;;  %v4593_v58 = vld [vmem:[#allocation3 + $0x8c] sm:$0x1]  ;;  %v4609_v30 = vld [vmem:[#allocation3 + $0x8d] sm:$0x1]  ;;  %v4688_v3 = vmax.f32 %v4672_v15, %v4640_v7  ;;  %v3469_v43 = vld [vmem:[#allocation2 + $0x90] sm:$0xff] }
 0x2e4   : > { %4576 = vst.msk [vmem:[#allocation2 + $0x71] sm:$0x1] %vm1543_vm3, %v4560_v0  ;;  %v4154_v28 = vld [vmem:[#allocation3 + $0x8b] sm:$0xf]  ;;  %v4250_v6 = vmax.f32 %v4218_v35, %v4122_v29  ;;  %v4657_v32 = vmax.f32 %v4593_v58, %v4609_v30  ;;  %v4641_v27 = vld [vmem:[#allocation3 + $0x8f] sm:$0x1]  ;;  %v3903_v31 = vmax.f32 %v3879_v33, %v3469_v43 }
 0x2e5   : > { %v4625_v62 = vld [vmem:[#allocation3 + $0x8e] sm:$0x1]  ;;  %v4721_v22 = vld [vmem:[#allocation3 + $0x8d] sm:$0x1]  ;;  %4800 = vst.msk [vmem:[#allocation2 + $0x7f] sm:$0x1] %vm1543_vm3, %v4784_v14 }
 0x2e6   : > { %v4822_v55 = vld [vmem:[#allocation2 + $0x68] sm:$0xff]  ;;  %4704 = vst.msk [vmem:[#allocation2 + $0x7e] sm:$0x1] %vm1543_vm3, %v4688_v3  ;;  %v4282_v34 = vmax.f32 %v4250_v6, %v4154_v28  ;;  %v4673_v2 = vmax.f32 %v4657_v32, %v4625_v62  ;;  %v3470_v63 = vld [vmem:[#allocation2 + $0x98] sm:$0xff]  ;;  %v3471_v45 = vld [vmem:[#allocation2 + $0xa0] sm:$0xff]  ;;  %v3927_v50 = vmax.f32 %v3903_v31, %v7814_v18 }
 0x2e7   : > { %v4186_v26 = vld [vmem:[#allocation3 + $0x8c] sm:$0xf]  ;;  %v4847_v13 = vpack.c.bf16 %v4822_v55, %v4821_v56  ;;  %v3492_v25 = vpack.c.bf16 %v3470_v63, %v3469_v43  ;;  %v4060_v8 = vld [vmem:[#allocation3 + $0x98] sm:$0xf]  ;;  %v4063_v10 = vld [vmem:[#allocation3 + $0xb0] sm:$0xff] }
 0x2e8   : > { %v4737_v39 = vld [vmem:[#allocation3 + $0x8e] sm:$0x1]  ;;  %v4753_v37 = vld [vmem:[#allocation3 + $0x8f] sm:$0x1]  ;;  %v4092_v9 = vld [vmem:[#allocation3 + $0x99] sm:$0xf]  ;;  %v4314_v53 = vmax.f32 %v4282_v34, %v4186_v26  ;;  %v4689_v16 = vmax.f32 %v4673_v2, %v4641_v27 }
 0x2e9   : > { %v4769_v24 = vmax.f32 %v4721_v22, %v4737_v39  ;;  %v3472_v42 = vld [vmem:[#allocation2 + $0xa8] sm:$0xff]  ;;  %v7965_v46 = vld [vmem:[#allocation3 + $0xc0] sm:$0xff]  ;;  %v4095_v4 = vld [vmem:[#allocation3 + $0xb1] sm:$0xff]  ;;  %5867 = vmatprep.mubr.msk.bf16.mxu0 %vm801_vm2, %v4847_v13  ;;  %5838 = vmatmul.mubr.msk.bf16.gmra.mxu1 %vm801_vm2, %v3492_v25  ;;  %v4220_v36 = vmax.f32 %v4060_v8, %v4092_v9 }
 0x2ea   : > { %v3493_v19 = vpack.c.bf16 %v3472_v42, %v3471_v45  ;;  %4349 = vst.msk [vmem:[#allocation2 + $0xa2] sm:$0xff] %vm801_vm2, %v4317_v59  ;;  %v4097_v60 = vld [vmem:[#allocation3 + $0xc1] sm:$0xff]  ;;  %v4369_v49 = vld [vmem:[#allocation3 + $0x80] sm:$0x1]  ;;  %v4124_v20 = vld [vmem:[#allocation3 + $0x9a] sm:$0xf]  ;;  %v4223_v18 = vmax.f32 %v4063_v10, %v4095_v4 }
 0x2eb   : > { %v4785_v5 = vmax.f32 %v4769_v24, %v4753_v37  ;;  %v4057_v17 = vld [vmem:[#allocation3 + $0x80] sm:$0xff]  ;;  %4346 = vst.msk [vmem:[#allocation2 + $0x8a] sm:$0xf] %vm1431_vm4, %v4314_v53  ;;  %v4156_v11 = vld [vmem:[#allocation3 + $0x9b] sm:$0xf]  ;;  %v4823_v44 = vld [vmem:[#allocation2 + $0x70] sm:$0xff]  ;;  %v4252_v23 = vmax.f32 %v4220_v36, %v4124_v20  ;;  %v4225_v7 = vmax.f32 %v7965_v46, %v4097_v60 }
 0x2ec   : > { %v4089_v47 = vld [vmem:[#allocation3 + $0x81] sm:$0xff]  ;;  %4705 = vst.msk [vmem:[#allocation2 + $0x8e] sm:$0x1] %vm1543_vm3, %v4689_v16  ;;  %5841 = vmatprep.mubr.msk.bf16.mxu1 %vm801_vm2, %v3493_v19  ;;  %v6179_v51 = vld [vmem:[#allocation2 + $0xb0] sm:$0xff]  ;;  %v4465_v12 = vld [vmem:[#allocation3 + $0x80] sm:$0x1] }
 0x2ed   : > { %v4217_v38 = vmax.f32 %v4057_v17, %v4089_v47  ;;  %4801 = vst.msk [vmem:[#allocation2 + $0x8f] sm:$0x1] %vm1543_vm3, %v4785_v5  ;;  %v4121_v54 = vld [vmem:[#allocation3 + $0x82] sm:$0xff]  ;;  %v4385_v1 = vld [vmem:[#allocation3 + $0x81] sm:$0x1]  ;;  %v3951_v21 = vmax.f32 %v3927_v50, %v6179_v51  ;;  %v4127_v0 = vld [vmem:[#allocation3 + $0xb2] sm:$0xff]  ;;  %v4284_v35 = vmax.f32 %v4252_v23, %v4156_v11 }
 0x2ee   : > { %v4153_v57 = vld [vmem:[#allocation3 + $0x83] sm:$0xff]  ;;  %v4417_v40 = vmax.f32 %v4369_v49, %v4385_v1  ;;  %v4481_v41 = vld [vmem:[#allocation3 + $0x81] sm:$0x1]  ;;  %v4188_v61 = vld [vmem:[#allocation3 + $0x9c] sm:$0xf]  ;;  %v4255_v27 = vmax.f32 %v4223_v18, %v4127_v0 }
 0x2ef   : > { %v4249_v52 = vmax.f32 %v4217_v38, %v4121_v54  ;;  %v4824_v15 = vld [vmem:[#allocation2 + $0x78] sm:$0xff]  ;;  %v4401_v48 = vld [vmem:[#allocation3 + $0x82] sm:$0x1]  ;;  %v4529_v29 = vmax.f32 %v4465_v12, %v4481_v41  ;;  %3975 = vst.msk [vmem:[#allocation3 + $0x90] sm:$0xff] %vm801_vm2, %v3951_v21  ;;  %v4185_v58 = vld [vmem:[#allocation3 + $0x84] sm:$0xff]  ;;  %v4316_v32 = vmax.f32 %v4284_v35, %v4188_v61 }
 0x2f0   : > { %v4594_v56 = vld [vmem:[#allocation3 + $0x9c] sm:$0x1]  ;;  %v4129_v14 = vld [vmem:[#allocation3 + $0xc2] sm:$0xff]  ;;  %v4848_v33 = vpack.c.bf16 %v4824_v15, %v4823_v44  ;;  %v4433_v59 = vmax.f32 %v4417_v40, %v4401_v48  ;;  %v4610_v28 = vld [vmem:[#allocation3 + $0x9d] sm:$0x1] }
 0x2f1   : > { %v4281_v30 = vmax.f32 %v4249_v52, %v4153_v57  ;;  %v4497_v3 = vld [vmem:[#allocation3 + $0x82] sm:$0x1]  ;;  %v4513_v6 = vld [vmem:[#allocation3 + $0x83] sm:$0x1]  ;;  %v4658_v22 = vmax.f32 %v4594_v56, %v4610_v28  ;;  %v4722_v55 = vld [vmem:[#allocation3 + $0x9d] sm:$0x1]  ;;  %v4257_v43 = vmax.f32 %v4225_v7, %v4129_v14 }
 0x2f2   : > { %v4545_v62 = vmax.f32 %v4529_v29, %v4497_v3  ;;  %v4738_v26 = vld [vmem:[#allocation3 + $0x9e] sm:$0x1]  ;;  %5868 = vmatmul.mubr.msk.bf16.gmra.mxu0 %vm801_vm2, %v4848_v33  ;;  %4449 = vst.msk [vmem:[#allocation2 + $0x80] sm:$0x1] %vm1543_vm3, %v4433_v59  ;;  %v4062_v34 = vld [vmem:[#allocation3 + $0xa8] sm:$0xf] }
 0x2f3   : > { %v4313_v39 = vmax.f32 %v4281_v30, %v4185_v58  ;;  %v4626_v37 = vld [vmem:[#allocation3 + $0x9e] sm:$0x1]  ;;  %v4770_v13 = vmax.f32 %v4722_v55, %v4738_v26  ;;  %v4094_v2 = vld [vmem:[#allocation3 + $0xa9] sm:$0xf]  ;;  %v4159_v24 = vld [vmem:[#allocation3 + $0xb3] sm:$0xff] }
 0x2f4   : > { %v4561_v63 = vmax.f32 %v4545_v62, %v4513_v6  ;;  %4348 = vst.msk [vmem:[#allocation2 + $0x9a] sm:$0xf] %vm1431_vm4, %v4316_v32  ;;  %v4642_v45 = vld [vmem:[#allocation3 + $0x9f] sm:$0x1]  ;;  %v4674_v25 = vmax.f32 %v4658_v22, %v4626_v37  ;;  %v4222_v31 = vmax.f32 %v4062_v34, %v4094_v2  ;;  %v4371_v8 = vld [vmem:[#allocation3 + $0xa0] sm:$0x1]  ;;  %v4287_v47 = vmax.f32 %v4255_v27, %v4159_v24 }
 0x2f5   : > { %v4754_v42 = vld [vmem:[#allocation3 + $0x9f] sm:$0x1]  ;;  %4345 = vst.msk [vmem:[#allocation2 + $0x82] sm:$0xff] %vm801_vm2, %v4313_v39  ;;  %v4126_v10 = vld [vmem:[#allocation3 + $0xaa] sm:$0xf]  ;;  %v7983_v11 = vld [vmem:[#allocation3 + $0xd0] sm:$0xff] }
 0x2f6   : > { %v4786_v9 = vmax.f32 %v4770_v13, %v4754_v42  ;;  %v4387_v46 = vld [vmem:[#allocation3 + $0xa1] sm:$0x1]  ;;  %v4467_v4 = vld [vmem:[#allocation3 + $0xa0] sm:$0x1]  ;;  %v4161_v53 = vld [vmem:[#allocation3 + $0xc3] sm:$0xff]  ;;  %v4690_v16 = vmax.f32 %v4674_v25, %v4642_v45  ;;  %v4254_v19 = vmax.f32 %v4222_v31, %v4126_v10 }
 0x2f7   : > { %4577 = vst.msk [vmem:[#allocation2 + $0x81] sm:$0x1] %vm1543_vm3, %v4561_v63  ;;  %v4158_v5 = vld [vmem:[#allocation3 + $0xab] sm:$0xf]  ;;  %v4419_v60 = vmax.f32 %v4371_v8, %v4387_v46  ;;  %v4483_v17 = vld [vmem:[#allocation3 + $0xa1] sm:$0x1]  ;;  %v4289_v1 = vmax.f32 %v4257_v43, %v4161_v53 }
 0x2f8   : > { %v4059_v50 = vld [vmem:[#allocation3 + $0x90] sm:$0xff]  ;;  %4802 = vst.msk [vmem:[#allocation2 + $0x9f] sm:$0x1] %vm1543_vm3, %v4786_v9  ;;  %v4190_v38 = vld [vmem:[#allocation3 + $0xac] sm:$0xf]  ;;  %v4531_v20 = vmax.f32 %v4467_v4, %v4483_v17  ;;  %v4286_v23 = vmax.f32 %v4254_v19, %v4158_v5  ;;  %v4193_v40 = vld [vmem:[#allocation3 + $0xc4] sm:$0xff] }
 0x2f9   : > { %v4091_v36 = vld [vmem:[#allocation3 + $0x91] sm:$0xff]  ;;  %v4403_v49 = vld [vmem:[#allocation3 + $0xa2] sm:$0x1]  ;;  %v4370_v21 = vld [vmem:[#allocation3 + $0x90] sm:$0x1]  ;;  %v4321_v32 = vmax.f32 %v4289_v1, %v4193_v40 }
 0x2fa   : > { %v7985_v44 = vld [vmem:[#allocation3 + $0xd1] sm:$0xff]  ;;  %v4219_v51 = vmax.f32 %v4059_v50, %v4091_v36  ;;  %4706 = vst.msk [vmem:[#allocation2 + $0x9e] sm:$0x1] %vm1543_vm3, %v4690_v16  ;;  %v4435_v18 = vmax.f32 %v4419_v60, %v4403_v49  ;;  %v4499_v57 = vld [vmem:[#allocation3 + $0xa2] sm:$0x1]  ;;  %v4318_v33 = vmax.f32 %v4286_v23, %v4190_v38  ;;  %v3476_v5 = vld [vmem:[#allocation2 + $0xc8] sm:$0xff] }
 0x2fb   : > { %v4191_v54 = vld [vmem:[#allocation3 + $0xb4] sm:$0xff]  ;;  %v4515_v52 = vld [vmem:[#allocation3 + $0xa3] sm:$0x1]  ;;  %v4386_v41 = vld [vmem:[#allocation3 + $0x91] sm:$0x1]  ;;  %v4547_v0 = vmax.f32 %v4531_v20, %v4499_v57  ;;  %v4227_v34 = vmax.f32 %v7983_v11, %v7985_v44 }
 0x2fc   : > { %v4123_v12 = vld [vmem:[#allocation3 + $0x92] sm:$0xff]  ;;  %v4466_v61 = vld [vmem:[#allocation3 + $0x90] sm:$0x1]  ;;  %v7988_v7 = vld [vmem:[#allocation3 + $0xe0] sm:$0xff]  ;;  %v4418_v56 = vmax.f32 %v4370_v21, %v4386_v41  ;;  %4451 = vst.msk [vmem:[#allocation2 + $0xa0] sm:$0x1] %vm1543_vm3, %v4435_v18  ;;  %v4319_v58 = vmax.f32 %v4287_v47, %v4191_v54 }
 0x2fd   : > { %v7990_v15 = vld [vmem:[#allocation3 + $0xe1] sm:$0xff]  ;;  %v4155_v48 = vld [vmem:[#allocation3 + $0x93] sm:$0xff]  ;;  %v4251_v29 = vmax.f32 %v4219_v51, %v4123_v12  ;;  %v4402_v35 = vld [vmem:[#allocation3 + $0x92] sm:$0x1]  ;;  %v4563_v28 = vmax.f32 %v4547_v0, %v4515_v52  ;;  %4350 = vst.msk [vmem:[#allocation2 + $0xaa] sm:$0xf] %vm1431_vm4, %v4318_v33 }
 0x2fe   : > { %v4482_v14 = vld [vmem:[#allocation3 + $0x91] sm:$0x1]  ;;  %v4187_v30 = vld [vmem:[#allocation3 + $0x94] sm:$0xff]  ;;  %v4498_v59 = vld [vmem:[#allocation3 + $0x92] sm:$0x1]  ;;  %v4434_v26 = vmax.f32 %v4418_v56, %v4402_v35  ;;  %v4229_v4 = vmax.f32 %v7988_v7, %v7990_v15 }
 0x2ff   : > { %v4530_v3 = vmax.f32 %v4466_v61, %v4482_v14  ;;  %v4595_v6 = vld [vmem:[#allocation3 + $0xac] sm:$0x1]  ;;  %v4611_v62 = vld [vmem:[#allocation3 + $0xad] sm:$0x1]  ;;  %v4283_v55 = vmax.f32 %v4251_v29, %v4155_v48  ;;  %v4514_v27 = vld [vmem:[#allocation3 + $0x93] sm:$0x1] }
 0x300   : > { %v4826_v22 = vld [vmem:[#allocation2 + $0x88] sm:$0xff]  ;;  %v4659_v37 = vmax.f32 %v4595_v6, %v4611_v62  ;;  %v4825_v2 = vld [vmem:[#allocation2 + $0x80] sm:$0xff]  ;;  %4579 = vst.msk [vmem:[#allocation2 + $0xa1] sm:$0x1] %vm1543_vm3, %v4563_v28  ;;  %4450 = vst.msk [vmem:[#allocation2 + $0x90] sm:$0x1] %vm1543_vm3, %v4434_v26 }
 0x301   : > { %v4627_v39 = vld [vmem:[#allocation3 + $0xae] sm:$0x1]  ;;  %v4723_v13 = vld [vmem:[#allocation3 + $0xad] sm:$0x1]  ;;  %v4546_v24 = vmax.f32 %v4530_v3, %v4498_v59  ;;  %v4643_v43 = vld [vmem:[#allocation3 + $0xaf] sm:$0x1]  ;;  %v4849_v25 = vpack.c.bf16 %v4826_v22, %v4825_v2  ;;  %v4315_v42 = vmax.f32 %v4283_v55, %v4187_v30 }
 0x302   : > { %v4739_v63 = vld [vmem:[#allocation3 + $0xae] sm:$0x1]  ;;  %v4755_v45 = vld [vmem:[#allocation3 + $0xaf] sm:$0x1]  ;;  %v4675_v31 = vmax.f32 %v4659_v37, %v4627_v39  ;;  %v3473_v9 = vld [vmem:[#allocation2 + $0xb0] sm:$0xff] }
 0x303   : > { %v4771_v8 = vmax.f32 %v4723_v13, %v4739_v63  ;;  %v3474_v10 = vld [vmem:[#allocation2 + $0xb8] sm:$0xff]  ;;  %v3475_v46 = vld [vmem:[#allocation2 + $0xc0] sm:$0xff]  ;;  %v4562_v53 = vmax.f32 %v4546_v24, %v4514_v27  ;;  %5871 = vmatprep.mubr.msk.bf16.mxu0 %vm801_vm2, %v4849_v25  ;;  %4347 = vst.msk [vmem:[#allocation2 + $0x92] sm:$0xff] %vm801_vm2, %v4315_v42  ;;  %v4372_v11 = vld [vmem:[#allocation3 + $0xb0] sm:$0x1] }
 0x304   : > { %v3494_v16 = vpack.c.bf16 %v3474_v10, %v3473_v9  ;;  %4351 = vst.msk [vmem:[#allocation2 + $0xb2] sm:$0xff] %vm801_vm2, %v4319_v58  ;;  %v4064_v19 = vld [vmem:[#allocation3 + $0xb8] sm:$0xf]  ;;  %v4133_v47 = vld [vmem:[#allocation3 + $0xe2] sm:$0xff]  ;;  %v4691_v50 = vmax.f32 %v4675_v31, %v4643_v43  ;;  %v3495_v38 = vpack.c.bf16 %v3476_v5, %v3475_v46  ;;  %4353 = vst.msk [vmem:[#allocation2 + $0xc2] sm:$0xff] %vm801_vm2, %v4321_v32 }
 0x305   : > { %v4096_v60 = vld [vmem:[#allocation3 + $0xb9] sm:$0xf]  ;;  %v4787_v36 = vmax.f32 %v4771_v8, %v4755_v45  ;;  %4578 = vst.msk [vmem:[#allocation2 + $0x91] sm:$0x1] %vm1543_vm3, %v4562_v53  ;;  %v4388_v44 = vld [vmem:[#allocation3 + $0xb1] sm:$0x1]  ;;  %v4261_v52 = vmax.f32 %v4229_v4, %v4133_v47 }
 0x306   : > { %v4131_v17 = vld [vmem:[#allocation3 + $0xd2] sm:$0xff]  ;;  %v4224_v49 = vmax.f32 %v4064_v19, %v4096_v60  ;;  %5842 = vmatmul.mubr.msk.bf16.gmra.mxu1 %vm801_vm2, %v3494_v16  ;;  %v4128_v20 = vld [vmem:[#allocation3 + $0xba] sm:$0xf]  ;;  %4707 = vst.msk [vmem:[#allocation2 + $0xae] sm:$0x1] %vm1543_vm3, %v4691_v50  ;;  %v4420_v21 = vmax.f32 %v4372_v11, %v4388_v44  ;;  %v4165_v0 = vld [vmem:[#allocation3 + $0xe3] sm:$0xff] }
 0x307   : > { %v4259_v54 = vmax.f32 %v4227_v34, %v4131_v17  ;;  %4803 = vst.msk [vmem:[#allocation2 + $0xaf] sm:$0x1] %vm1543_vm3, %v4787_v36  ;;  %5845 = vmatprep.mubr.msk.bf16.mxu1 %vm801_vm2, %v3495_v38  ;;  %v4160_v1 = vld [vmem:[#allocation3 + $0xbb] sm:$0xf]  ;;  %v4468_v23 = vld [vmem:[#allocation3 + $0xb0] sm:$0x1]  ;;  %v4293_v27 = vmax.f32 %v4261_v52, %v4165_v0 }
 0x308   : > { %v4256_v51 = vmax.f32 %v4224_v49, %v4128_v20  ;;  %v4484_v18 = vld [vmem:[#allocation3 + $0xb1] sm:$0x1]  ;;  %v4163_v57 = vld [vmem:[#allocation3 + $0xd3] sm:$0xff]  ;;  %v4404_v40 = vld [vmem:[#allocation3 + $0xb2] sm:$0x1] }
 0x309   : > { %v4532_v12 = vmax.f32 %v4468_v23, %v4484_v18  ;;  %v4596_v41 = vld [vmem:[#allocation3 + $0xbc] sm:$0x1]  ;;  %v4612_v61 = vld [vmem:[#allocation3 + $0xbd] sm:$0x1]  ;;  %v4436_v48 = vmax.f32 %v4420_v21, %v4404_v40  ;;  %v4500_v29 = vld [vmem:[#allocation3 + $0xb2] sm:$0x1]  ;;  %v4291_v3 = vmax.f32 %v4259_v54, %v4163_v57 }
 0x30a   : > { %v4192_v7 = vld [vmem:[#allocation3 + $0xbc] sm:$0xf]  ;;  %v4288_v15 = vmax.f32 %v4256_v51, %v4160_v1  ;;  %v4516_v35 = vld [vmem:[#allocation3 + $0xb3] sm:$0x1]  ;;  %v4660_v56 = vmax.f32 %v4596_v41, %v4612_v61  ;;  %v4829_v14 = vld [vmem:[#allocation2 + $0xa0] sm:$0xff] }
 0x30b   : > { %v4548_v33 = vmax.f32 %v4532_v12, %v4500_v29  ;;  %v4628_v58 = vld [vmem:[#allocation3 + $0xbe] sm:$0x1]  ;;  %v4724_v30 = vld [vmem:[#allocation3 + $0xbd] sm:$0x1]  ;;  %4452 = vst.msk [vmem:[#allocation2 + $0xb0] sm:$0x1] %vm1543_vm3, %v4436_v48 }
 0x30c   : > { %v4740_v59 = vld [vmem:[#allocation3 + $0xbe] sm:$0x1]  ;;  %v4320_v28 = vmax.f32 %v4288_v15, %v4192_v7  ;;  %v4644_v6 = vld [vmem:[#allocation3 + $0xbf] sm:$0x1]  ;;  %v4676_v62 = vmax.f32 %v4660_v56, %v4628_v58  ;;  %v4066_v22 = vld [vmem:[#allocation3 + $0xc8] sm:$0xf] }
 0x30d   : > { %v4772_v32 = vmax.f32 %v4724_v30, %v4740_v59  ;;  %v4098_v55 = vld [vmem:[#allocation3 + $0xc9] sm:$0xf]  ;;  %v4195_v26 = vld [vmem:[#allocation3 + $0xd4] sm:$0xff]  ;;  %v4564_v37 = vmax.f32 %v4548_v33, %v4516_v35  ;;  %v4756_v13 = vld [vmem:[#allocation3 + $0xbf] sm:$0x1] }
 0x30e   : > { %v4828_v39 = vld [vmem:[#allocation2 + $0x98] sm:$0xff]  ;;  %v4130_v34 = vld [vmem:[#allocation3 + $0xca] sm:$0xf]  ;;  %v4226_v2 = vmax.f32 %v4066_v22, %v4098_v55  ;;  %v4827_v43 = vld [vmem:[#allocation2 + $0x90] sm:$0xff]  ;;  %4352 = vst.msk [vmem:[#allocation2 + $0xba] sm:$0xf] %vm1431_vm4, %v4320_v28  ;;  %v4692_v63 = vmax.f32 %v4676_v62, %v4644_v6  ;;  %v4323_v5 = vmax.f32 %v4291_v3, %v4195_v26 }
 0x30f   : > { %v4197_v24 = vld [vmem:[#allocation3 + $0xe4] sm:$0xff]  ;;  %v4788_v45 = vmax.f32 %v4772_v32, %v4756_v13  ;;  %v4373_v25 = vld [vmem:[#allocation3 + $0xc0] sm:$0x1]  ;;  %v4389_v42 = vld [vmem:[#allocation3 + $0xc1] sm:$0x1]  ;;  %v4850_v9 = vpack.c.bf16 %v4828_v39, %v4827_v43 }
 0x310   : > { %v8011_v31 = vld [vmem:[#allocation3 + $0xf0] sm:$0xff]  ;;  %v4830_v10 = vld [vmem:[#allocation2 + $0xa8] sm:$0xff]  ;;  %4580 = vst.msk [vmem:[#allocation2 + $0xb1] sm:$0x1] %vm1543_vm3, %v4564_v37  ;;  %v4258_v4 = vmax.f32 %v4226_v2, %v4130_v34  ;;  %v4421_v53 = vmax.f32 %v4373_v25, %v4389_v42  ;;  %v4469_v16 = vld [vmem:[#allocation3 + $0xc0] sm:$0x1]  ;;  %v4325_v50 = vmax.f32 %v4293_v27, %v4197_v24 }
 0x311   : > { %v8013_v8 = vld [vmem:[#allocation3 + $0xf1] sm:$0xff]  ;;  %v4162_v46 = vld [vmem:[#allocation3 + $0xcb] sm:$0xf]  ;;  %v4851_v19 = vpack.c.bf16 %v4830_v10, %v4829_v14  ;;  %4708 = vst.msk [vmem:[#allocation2 + $0xbe] sm:$0x1] %vm1543_vm3, %v4692_v63  ;;  %5872 = vmatmul.mubr.msk.bf16.gmra.mxu0 %vm801_vm2, %v4850_v9  ;;  %v3479_v15 = vld [vmem:[#allocation2 + $0xe0] sm:$0xff] }
 0x312   : > { %4804 = vst.msk [vmem:[#allocation2 + $0xbf] sm:$0x1] %vm1543_vm3, %v4788_v45  ;;  %v4194_v60 = vld [vmem:[#allocation3 + $0xcc] sm:$0xf]  ;;  %v4405_v17 = vld [vmem:[#allocation3 + $0xc2] sm:$0x1]  ;;  %v4290_v36 = vmax.f32 %v4258_v4, %v4162_v46  ;;  %v4231_v61 = vmax.f32 %v8011_v31, %v8013_v8 }
 0x313   : > { %v4485_v47 = vld [vmem:[#allocation3 + $0xc1] sm:$0x1]  ;;  %v4437_v38 = vmax.f32 %v4421_v53, %v4405_v17  ;;  %v4501_v49 = vld [vmem:[#allocation3 + $0xc2] sm:$0x1]  ;;  %v4597_v11 = vld [vmem:[#allocation3 + $0xcc] sm:$0x1]  ;;  %5875 = vmatprep.mubr.msk.bf16.mxu0 %vm801_vm2, %v4851_v19 }
 0x314   : > { %v4533_v20 = vmax.f32 %v4469_v16, %v4485_v47  ;;  %v4613_v44 = vld [vmem:[#allocation3 + $0xcd] sm:$0x1]  ;;  %v4517_v54 = vld [vmem:[#allocation3 + $0xc3] sm:$0x1]  ;;  %v4629_v1 = vld [vmem:[#allocation3 + $0xce] sm:$0x1]  ;;  %v4322_v18 = vmax.f32 %v4290_v36, %v4194_v60 }
 0x315   : > { %v4661_v51 = vmax.f32 %v4597_v11, %v4613_v44  ;;  %v4725_v21 = vld [vmem:[#allocation3 + $0xcd] sm:$0x1]  ;;  %v4741_v23 = vld [vmem:[#allocation3 + $0xce] sm:$0x1]  ;;  %4453 = vst.msk [vmem:[#allocation2 + $0xc0] sm:$0x1] %vm1543_vm3, %v4437_v38 }
 0x316   : > { %v4549_v57 = vmax.f32 %v4533_v20, %v4501_v49  ;;  %v4757_v52 = vld [vmem:[#allocation3 + $0xcf] sm:$0x1]  ;;  %v4773_v40 = vmax.f32 %v4725_v21, %v4741_v23  ;;  %v3477_v12 = vld [vmem:[#allocation2 + $0xd0] sm:$0xff]  ;;  %v3478_v41 = vld [vmem:[#allocation2 + $0xd8] sm:$0xff]  ;;  %4354 = vst.msk [vmem:[#allocation2 + $0xca] sm:$0xf] %vm1431_vm4, %v4322_v18 }
 0x317   : > { %v4677_v0 = vmax.f32 %v4661_v51, %v4629_v1  ;;  %v3496_v7 = vpack.c.bf16 %v3478_v41, %v3477_v12  ;;  %4355 = vst.msk [vmem:[#allocation2 + $0xd2] sm:$0xff] %vm801_vm2, %v4323_v5  ;;  %v3480_v48 = vld [vmem:[#allocation2 + $0xe8] sm:$0xff]  ;;  %v4068_v29 = vld [vmem:[#allocation3 + $0xd8] sm:$0xf]  ;;  %v4831_v59 = vld [vmem:[#allocation2 + $0xb0] sm:$0xff] }
 0x318   : > { %v4565_v35 = vmax.f32 %v4549_v57, %v4517_v54  ;;  %v4645_v56 = vld [vmem:[#allocation3 + $0xcf] sm:$0x1]  ;;  %v4789_v14 = vmax.f32 %v4773_v40, %v4757_v52  ;;  %v3497_v33 = vpack.c.bf16 %v3480_v48, %v3479_v15  ;;  %4357 = vst.msk [vmem:[#allocation2 + $0xe2] sm:$0xff] %vm801_vm2, %v4325_v50  ;;  %v4100_v58 = vld [vmem:[#allocation3 + $0xd9] sm:$0xf] }
 0x319   : > { %v4135_v30 = vld [vmem:[#allocation3 + $0xf2] sm:$0xff]  ;;  %v4693_v3 = vmax.f32 %v4677_v0, %v4645_v56  ;;  %5846 = vmatmul.mubr.msk.bf16.gmra.mxu1 %vm801_vm2, %v3496_v7  ;;  %v4228_v28 = vmax.f32 %v4068_v29, %v4100_v58  ;;  %v4374_v6 = vld [vmem:[#allocation3 + $0xd0] sm:$0x1]  ;;  %v4132_v32 = vld [vmem:[#allocation3 + $0xda] sm:$0xf] }
 0x31a   : > { %v4832_v62 = vld [vmem:[#allocation2 + $0xb8] sm:$0xff]  ;;  %4581 = vst.msk [vmem:[#allocation2 + $0xc1] sm:$0x1] %vm1543_vm3, %v4565_v35  ;;  %4805 = vst.msk [vmem:[#allocation2 + $0xcf] sm:$0x1] %vm1543_vm3, %v4789_v14  ;;  %5849 = vmatprep.mubr.msk.bf16.mxu1 %vm801_vm2, %v3497_v33  ;;  %v4263_v55 = vmax.f32 %v4231_v61, %v4135_v30 }
 0x31b   : > { %v4390_v22 = vld [vmem:[#allocation3 + $0xd1] sm:$0x1]  ;;  %v4852_v26 = vpack.c.bf16 %v4832_v62, %v4831_v59  ;;  %4709 = vst.msk [vmem:[#allocation2 + $0xce] sm:$0x1] %vm1543_vm3, %v4693_v3  ;;  %v4164_v27 = vld [vmem:[#allocation3 + $0xdb] sm:$0xf]  ;;  %v4260_v39 = vmax.f32 %v4228_v28, %v4132_v32 }
 0x31c   : > { %v4422_v37 = vmax.f32 %v4374_v6, %v4390_v22  ;;  %v4470_v13 = vld [vmem:[#allocation3 + $0xd0] sm:$0x1]  ;;  %v4486_v34 = vld [vmem:[#allocation3 + $0xd1] sm:$0x1]  ;;  %v4167_v2 = vld [vmem:[#allocation3 + $0xf3] sm:$0xff] }
 0x31d   : > { %v4196_v24 = vld [vmem:[#allocation3 + $0xdc] sm:$0xf]  ;;  %v4406_v43 = vld [vmem:[#allocation3 + $0xd2] sm:$0x1]  ;;  %v4534_v63 = vmax.f32 %v4470_v13, %v4486_v34  ;;  %5876 = vmatmul.mubr.msk.bf16.gmra.mxu0 %vm801_vm2, %v4852_v26  ;;  %v4292_v42 = vmax.f32 %v4260_v39, %v4164_v27  ;;  %v4518_v9 = vld [vmem:[#allocation3 + $0xd3] sm:$0x1]  ;;  %v4295_v19 = vmax.f32 %v4263_v55, %v4167_v2 }
 0x31e   : > { %v4598_v45 = vld [vmem:[#allocation3 + $0xdc] sm:$0x1]  ;;  %v4614_v25 = vld [vmem:[#allocation3 + $0xdd] sm:$0x1]  ;;  %v4438_v31 = vmax.f32 %v4422_v37, %v4406_v43  ;;  %v4502_v8 = vld [vmem:[#allocation3 + $0xd2] sm:$0x1] }
 0x31f   : > { %v4662_v10 = vmax.f32 %v4598_v45, %v4614_v25  ;;  %v4726_v46 = vld [vmem:[#allocation3 + $0xdd] sm:$0x1]  ;;  %v4550_v4 = vmax.f32 %v4534_v63, %v4502_v8  ;;  %v4630_v53 = vld [vmem:[#allocation3 + $0xde] sm:$0x1]  ;;  %v4070_v5 = vld [vmem:[#allocation3 + $0xe8] sm:$0xf]  ;;  %v4324_v60 = vmax.f32 %v4292_v42, %v4196_v24 }
 0x320   : > { %v4742_v16 = vld [vmem:[#allocation3 + $0xde] sm:$0x1]  ;;  %4454 = vst.msk [vmem:[#allocation2 + $0xd0] sm:$0x1] %vm1543_vm3, %v4438_v31  ;;  %v4646_v17 = vld [vmem:[#allocation3 + $0xdf] sm:$0x1] }
 0x321   : > { %v4678_v47 = vmax.f32 %v4662_v10, %v4630_v53  ;;  %v4758_v50 = vld [vmem:[#allocation3 + $0xdf] sm:$0x1]  ;;  %v4774_v36 = vmax.f32 %v4726_v46, %v4742_v16  ;;  %v4102_v38 = vld [vmem:[#allocation3 + $0xe9] sm:$0xf]  ;;  %v4199_v49 = vld [vmem:[#allocation3 + $0xf4] sm:$0xff]  ;;  %v4566_v20 = vmax.f32 %v4550_v4, %v4518_v9 }
 0x322   : > { %v4134_v11 = vld [vmem:[#allocation3 + $0xea] sm:$0xf]  ;;  %v4230_v44 = vmax.f32 %v4070_v5, %v4102_v38  ;;  %v4375_v54 = vld [vmem:[#allocation3 + $0xe0] sm:$0x1]  ;;  %v4391_v1 = vld [vmem:[#allocation3 + $0xe1] sm:$0x1]  ;;  %v4327_v0 = vmax.f32 %v4295_v19, %v4199_v49 }
 0x323   : > { %v4833_v51 = vld [vmem:[#allocation2 + $0xc0] sm:$0xff]  ;;  %4356 = vst.msk [vmem:[#allocation2 + $0xda] sm:$0xf] %vm1431_vm4, %v4324_v60  ;;  %v4694_v21 = vmax.f32 %v4678_v47, %v4646_v17  ;;  %v4790_v23 = vmax.f32 %v4774_v36, %v4758_v50  ;;  %v4166_v18 = vld [vmem:[#allocation3 + $0xeb] sm:$0xf]  ;;  %v4423_v57 = vmax.f32 %v4375_v54, %v4391_v1  ;;  %v3481_v62 = vld [vmem:[#allocation2 + $0xf0] sm:$0xff] }
 0x324   : > { %v4471_v52 = vld [vmem:[#allocation3 + $0xe0] sm:$0x1]  ;;  %v4834_v40 = vld [vmem:[#allocation2 + $0xc8] sm:$0xff]  ;;  %4582 = vst.msk [vmem:[#allocation2 + $0xd1] sm:$0x1] %vm1543_vm3, %v4566_v20  ;;  %v4262_v12 = vmax.f32 %v4230_v44, %v4134_v11  ;;  %v3482_v26 = vld [vmem:[#allocation2 + $0xf8] sm:$0xff] }
 0x325   : > { %v4407_v41 = vld [vmem:[#allocation3 + $0xe2] sm:$0x1]  ;;  %v4487_v61 = vld [vmem:[#allocation3 + $0xe1] sm:$0x1]  ;;  %v4853_v7 = vpack.c.bf16 %v4834_v40, %v4833_v51  ;;  %4710 = vst.msk [vmem:[#allocation2 + $0xde] sm:$0x1] %vm1543_vm3, %v4694_v21  ;;  %v3498_v2 = vpack.c.bf16 %v3482_v26, %v3481_v62 }
 0x326   : > { %4806 = vst.msk [vmem:[#allocation2 + $0xdf] sm:$0x1] %vm1543_vm3, %v4790_v23  ;;  %v4198_v15 = vld [vmem:[#allocation3 + $0xec] sm:$0xf]  ;;  %v4439_v48 = vmax.f32 %v4423_v57, %v4407_v41  ;;  %v4535_v29 = vmax.f32 %v4471_v52, %v4487_v61  ;;  %v4294_v14 = vmax.f32 %v4262_v12, %v4166_v18  ;;  %v4503_v33 = vld [vmem:[#allocation3 + $0xe2] sm:$0x1] }
 0x327   : > { %v4599_v35 = vld [vmem:[#allocation3 + $0xec] sm:$0x1]  ;;  %v4615_v56 = vld [vmem:[#allocation3 + $0xed] sm:$0x1]  ;;  %v4519_v58 = vld [vmem:[#allocation3 + $0xe3] sm:$0x1]  ;;  %5879 = vmatprep.mubr.msk.bf16.mxu0 %vm801_vm2, %v4853_v7  ;;  %5850 = vmatmul.mubr.msk.bf16.gmra.mxu1 %vm801_vm2, %v3498_v2  ;;  %v8052_v7 = vpop.f32.mrf.mxu0 }
 0x328   : > { %v4663_v30 = vmax.f32 %v4599_v35, %v4615_v56  ;;  %v4727_v59 = vld [vmem:[#allocation3 + $0xed] sm:$0x1]  ;;  %4455 = vst.msk [vmem:[#allocation2 + $0xe0] sm:$0x1] %vm1543_vm3, %v4439_v48  ;;  %v4551_v3 = vmax.f32 %v4535_v29, %v4503_v33  ;;  %v4631_v28 = vld [vmem:[#allocation3 + $0xee] sm:$0x1]  ;;  %v4326_v32 = vmax.f32 %v4294_v14, %v4198_v15  ;;  %v8054_v15 = vpop.f32.mrf.mxu1 }
 0x329   : > { %v4743_v6 = vld [vmem:[#allocation3 + $0xee] sm:$0x1]  ;;  %v4072_v27 = vld [vmem:[#allocation3 + $0xf8] sm:$0xf]  ;;  %v4647_v13 = vld [vmem:[#allocation3 + $0xef] sm:$0x1]  ;;  %v8056_v48 = vpop.f32.mrf.mxu0 }
 0x32a   : > { %v4679_v22 = vmax.f32 %v4663_v30, %v4631_v28  ;;  %v4775_v55 = vmax.f32 %v4727_v59, %v4743_v6  ;;  %v4104_v39 = vld [vmem:[#allocation3 + $0xf9] sm:$0xf]  ;;  %v4567_v37 = vmax.f32 %v4551_v3, %v4519_v58  ;;  %v4759_v34 = vld [vmem:[#allocation3 + $0xef] sm:$0x1]  ;;  %4359 = vst.msk [vmem:[#allocation2 + $0xf2] sm:$0xff] %vm801_vm2, %v4327_v0  ;;  %v8058_v29 = vpop.f32.mrf.mxu1 }
 0x32b   : > { %v4232_v24 = vmax.f32 %v4072_v27, %v4104_v39  ;;  %4358 = vst.msk [vmem:[#allocation2 + $0xea] sm:$0xf] %vm1431_vm4, %v4326_v32  ;;  %v4136_v45 = vld [vmem:[#allocation3 + $0xfa] sm:$0xf]  ;;  %v4376_v25 = vld [vmem:[#allocation3 + $0xf0] sm:$0x1]  ;;  %v8060_v56 = vpop.f32.mrf.mxu0 }
 0x32c   : > { %v4695_v43 = vmax.f32 %v4679_v22, %v4647_v13  ;;  %v4791_v63 = vmax.f32 %v4775_v55, %v4759_v34  ;;  %v4392_v42 = vld [vmem:[#allocation3 + $0xf1] sm:$0x1]  ;;  %4583 = vst.msk [vmem:[#allocation2 + $0xe1] sm:$0x1] %vm1543_vm3, %v4567_v37  ;;  %v4472_v10 = vld [vmem:[#allocation3 + $0xf0] sm:$0x1]  ;;  %v8062_v14 = vpop.f32.mrf.mxu1 }
 0x32d   : > { %v4835_v31 = vld [vmem:[#allocation2 + $0xd0] sm:$0xff]  ;;  %v4264_v8 = vmax.f32 %v4232_v24, %v4136_v45  ;;  %v4424_v9 = vmax.f32 %v4376_v25, %v4392_v42  ;;  %v4836_v4 = vld [vmem:[#allocation2 + $0xd8] sm:$0xff]  ;;  %v8064_v30 = vpop.f32.mrf.mxu0 }
 0x32e   : > { %v4488_v46 = vld [vmem:[#allocation3 + $0xf1] sm:$0x1]  ;;  %4711 = vst.msk [vmem:[#allocation2 + $0xee] sm:$0x1] %vm1543_vm3, %v4695_v43  ;;  %4807 = vst.msk [vmem:[#allocation2 + $0xef] sm:$0x1] %vm1543_vm3, %v4791_v63  ;;  %v4854_v19 = vpack.c.bf16 %v4836_v4, %v4835_v31  ;;  %v8066_v59 = vpop.f32.mrf.mxu1 }
 0x32f   : > { %v4168_v53 = vld [vmem:[#allocation3 + $0xfb] sm:$0xf]  ;;  %v4408_v16 = vld [vmem:[#allocation3 + $0xf2] sm:$0x1]  ;;  %v4536_v5 = vmax.f32 %v4472_v10, %v4488_v46  ;;  %v4520_v1 = vld [vmem:[#allocation3 + $0xf3] sm:$0x1]  ;;  %v8069_v3 = vpop.f32.mrf.mxu0 }
 0x330   : > { %v4296_v60 = vmax.f32 %v4264_v8, %v4168_v53  ;;  %v4440_v17 = vmax.f32 %v4424_v9, %v4408_v16  ;;  %v4504_v47 = vld [vmem:[#allocation3 + $0xf2] sm:$0x1]  ;;  %v4600_v50 = vld [vmem:[#allocation3 + $0xfc] sm:$0x1]  ;;  %v4616_v36 = vld [vmem:[#allocation3 + $0xfd] sm:$0x1]  ;;  %5880 = vmatmul.mubr.msk.bf16.gmra.mxu0 %vm801_vm2, %v4854_v19  ;;  %v8071_v28 = vpop.f32.mrf.mxu1 }
 0x331   : > { %v4200_v38 = vld [vmem:[#allocation3 + $0xfc] sm:$0xf]  ;;  %v4552_v49 = vmax.f32 %v4536_v5, %v4504_v47  ;;  %v4664_v20 = vmax.f32 %v4600_v50, %v4616_v36  ;;  %v8073_v6 = vpop.f32.mrf.mxu0 }
 0x332   : > { %v4728_v11 = vld [vmem:[#allocation3 + $0xfd] sm:$0x1]  ;;  %v4744_v44 = vld [vmem:[#allocation3 + $0xfe] sm:$0x1]  ;;  %v4328_v54 = vmax.f32 %v4296_v60, %v4200_v38  ;;  %4456 = vst.msk [vmem:[#allocation2 + $0xf0] sm:$0x1] %vm1543_vm3, %v4440_v17  ;;  %v8075_v62 = vpop.f32.mrf.mxu1 }
 0x333   : > { %v4632_v51 = vld [vmem:[#allocation3 + $0xfe] sm:$0x1]  ;;  %v4776_v21 = vmax.f32 %v4728_v11, %v4744_v44  ;;  %v4568_v23 = vmax.f32 %v4552_v49, %v4520_v1  ;;  %v4760_v57 = vld [vmem:[#allocation3 + $0xff] sm:$0x1]  ;;  %v4837_v12 = vld [vmem:[#allocation2 + $0xe0] sm:$0xff]  ;;  %v8077_v32 = vpop.f32.mrf.mxu0 }
 0x334   : > { %v4680_v18 = vmax.f32 %v4664_v20, %v4632_v51  ;;  %4360 = vst.msk [vmem:[#allocation2 + $0xfa] sm:$0xf] %vm1431_vm4, %v4328_v54  ;;  %v4648_v52 = vld [vmem:[#allocation3 + $0xff] sm:$0x1]  ;;  %v8079_v22 = vpop.f32.mrf.mxu1 }
 0x335   : > { %v4792_v40 = vmax.f32 %v4776_v21, %v4760_v57  ;;  %4584 = vst.msk [vmem:[#allocation2 + $0xf1] sm:$0x1] %vm1543_vm3, %v4568_v23  ;;  %v4838_v61 = vld [vmem:[#allocation2 + $0xe8] sm:$0xff]  ;;  %v8081_v55 = vpop.f32.mrf.mxu0 }
 0x336   : > { %v4696_v41 = vmax.f32 %v4680_v18, %v4648_v52  ;;  %v4855_v0 = vpack.c.bf16 %v4838_v61, %v4837_v12  ;;  %v8083_v26 = vpop.f32.mrf.mxu1 }
 0x337   : > { %4808 = vst.msk [vmem:[#allocation2 + $0xff] sm:$0x1] %vm1543_vm3, %v4792_v40  ;;  %v5797_v27 = vpop.f32.mrf.mxu0 }
 0x338   : > { %4712 = vst.msk [vmem:[#allocation2 + $0xfe] sm:$0x1] %vm1543_vm3, %v4696_v41  ;;  %5883 = vmatprep.mubr.msk.bf16.mxu0 %vm801_vm2, %v4855_v0  ;;  %v5763_v39 = vpop.f32.mrf.mxu1 }
 0x339   : > { %v8085_v37 = vadd.f32 %v5797_v27, %v5763_v39  ;;  %v2292_v13 = vpop.f32.mrf.mxu0 }
 0x33a   : > { %v2080_v34 = vpop.f32.mrf.mxu1 }
 0x33b   : > { %v8087_v2 = vadd.f32 %v2292_v13, %v2080_v34  ;;  %v5798_v24 = vpop.f32.mrf.mxu0 }
 0x33c   : > { %v4839_v35 = vld [vmem:[#allocation2 + $0xf0] sm:$0xff]  ;;  %v5764_v43 = vpop.f32.mrf.mxu1 }
 0x33d   : > { %v8089_v63 = vadd.f32 %v5798_v24, %v5764_v43  ;;  %v2295_v45 = vpop.f32.mrf.mxu0 }
 0x33e   : > { %v2083_v25 = vpop.f32.mrf.mxu1 }
 0x33f   : > { %v4840_v33 = vld [vmem:[#allocation2 + $0xf8] sm:$0xff]  ;;  %v8091_v42 = vadd.f32 %v2295_v45, %v2083_v25  ;;  %v5801_v31 = vpop.f32.mrf.mxu0 }
 0x340   : > { %v4856_v58 = vpack.c.bf16 %v4840_v33, %v4839_v35  ;;  %v5767_v8 = vpop.f32.mrf.mxu1 }
 0x341   : > { %v8093_v9 = vadd.f32 %v5801_v31, %v5767_v8  ;;  %v2308_v10 = vpop.f32.mrf.mxu0 }
 0x342   : > { %5884 = vmatmul.mubr.msk.bf16.gmra.mxu0 %vm801_vm2, %v4856_v58  ;;  %v2096_v46 = vpop.f32.mrf.mxu1 }
 0x343   : > { %v8095_v4 = vadd.f32 %v2308_v10, %v2096_v46  ;;  %v5802_v53 = vpop.f32.mrf.mxu0 }
 0x344   : > { %v5768_v16 = vpop.f32.mrf.mxu1 }
 0x345   : > { %v8097_v5 = vadd.f32 %v5802_v53, %v5768_v16  ;;  %v2311_v19 = vpop.f32.mrf.mxu0 }
 0x346   : > { %v2099_v60 = vpop.f32.mrf.mxu1 }
 0x347   : > { %v8099_v17 = vadd.f32 %v2311_v19, %v2099_v60  ;;  %v5805_v47 = vpop.f32.mrf.mxu0 }
 0x348   : > { %v5771_v50 = vpop.f32.mrf.mxu1 }
 0x349   : > { %v8101_v36 = vadd.f32 %v5805_v47, %v5771_v50  ;;  %v2324_v38 = vpop.f32.mrf.mxu0 }
 0x34a   : > { %v2112_v49 = vpop.f32.mrf.mxu1 }
 0x34b   : > { %v8103_v20 = vadd.f32 %v2324_v38, %v2112_v49  ;;  %v5806_v11 = vpop.f32.mrf.mxu0 }
 0x34c   : > { %v5772_v44 = vpop.f32.mrf.mxu1 }
 0x34d   : > { %v8105_v54 = vadd.f32 %v5806_v11, %v5772_v44  ;;  %v2327_v1 = vpop.f32.mrf.mxu0 }
 0x34e   : > { %v2115_v51 = vpop.f32.mrf.mxu1 }
 0x34f   : > { %v8107_v21 = vadd.f32 %v2327_v1, %v2115_v51  ;;  %v5809_v23 = vpop.f32.mrf.mxu0 }
 0x350   : > { %v5775_v18 = vpop.f32.mrf.mxu1 }
 0x351   : > { %v8109_v57 = vadd.f32 %v5809_v23, %v5775_v18  ;;  %v2340_v52 = vpop.f32.mrf.mxu0 }
 0x352   : > { %v2128_v40 = vpop.f32.mrf.mxu1 }
 0x353   : > { %v8111_v12 = vadd.f32 %v2340_v52, %v2128_v40  ;;  %v5810_v41 = vpop.f32.mrf.mxu0 }
 0x354   : > { %v5776_v61 = vpop.f32.mrf.mxu1 }
 0x355   : > { %v8113_v0 = vadd.f32 %v5810_v41, %v5776_v61  ;;  %v2343_v35 = vpop.f32.mrf.mxu0  ;;  %v2269_v41 = vadd.f32 %v8052_v7, %v8054_v15  ;;  %v2261_v61 = vadd.f32 %v8056_v48, %v8058_v29  ;;  %v2264_v7 = vadd.f32 %v8064_v30, %v8066_v59 }
 0x356   : > { %v2131_v33 = vpop.f32.mrf.mxu1 }
 0x357   : > { %v8115_v58 = vadd.f32 %v2343_v35, %v2131_v33  ;;  %v5813_v27 = vpop.f32.mrf.mxu0 }
 0x358   : > { %v5779_v39 = vpop.f32.mrf.mxu1 }
 0x359   : > { %v8117_v13 = vadd.f32 %v5813_v27, %v5779_v39  ;;  %v2356_v34 = vpop.f32.mrf.mxu0  ;;  %v8140_v39 = vld [vmem:[%s8407_s4] ss:$0 sm:$0xff] }
 0x35a   : > { %v2144_v24 = vpop.f32.mrf.mxu1 }
 0x35b   : > { %v8119_v43 = vadd.f32 %v2356_v34, %v2144_v24  ;;  %v5814_v45 = vpop.f32.mrf.mxu0  ;;  %v2272_v34 = vadd.f32 %v8060_v56, %v8062_v14  ;;  %v2285_v14 = vadd.f32 %v8069_v3, %v8071_v28  ;;  %v2288_v3 = vadd.f32 %v8077_v32, %v8079_v22 }
 0x35c   : > { %v5780_v25 = vpop.f32.mrf.mxu1 }
 0x35d   : > { %v8121_v31 = vadd.f32 %v5814_v45, %v5780_v25  ;;  %v2359_v8 = vpop.f32.mrf.mxu0 }
 0x35e   : > { %v2147_v10 = vpop.f32.mrf.mxu1 }
 0x35f   : > { %v8123_v46 = vadd.f32 %v2359_v8, %v2147_v10  ;;  %v5817_v53 = vpop.f32.mrf.mxu0 }
 0x360   : > { %v5783_v16 = vpop.f32.mrf.mxu1 }
 0x361   : > { %v2372_v19 = vpop.f32.mrf.mxu0  ;;  %v8125_v60 = vadd.f32 %v5817_v53, %v5783_v16 }
 0x362   : > { %v2160_v47 = vpop.f32.mrf.mxu1 }
 0x363   : > { %v5818_v50 = vpop.f32.mrf.mxu0  ;;  %v8127_v38 = vadd.f32 %v2372_v19, %v2160_v47 }
 0x364   : > { %v5784_v49 = vpop.f32.mrf.mxu1 }
 0x365   : > { %v8129_v11 = vadd.f32 %v5818_v50, %v5784_v49  ;;  %v2375_v44 = vpop.f32.mrf.mxu0 }
 0x366   : > { %v2163_v1 = vpop.f32.mrf.mxu1 }
 0x367   : > { %v8131_v51 = vadd.f32 %v2375_v44, %v2163_v1  ;;  %v2277_v44 = vadd.f32 %v8073_v6, %v8075_v62  ;;  %v2280_v6 = vadd.f32 %v8081_v55, %v8083_v26 }
 0x368   : > { %v5823_v23 = vpop.f32.mrf.mxu1 }
 0x369   : > { %v3715_v35 = vadd.f32 %v5823_v23, %v2269_v41 }
 0x36a   : > { %v3586_v18 = vpop.f32.mrf.mxu1 }
 0x36b   : > { %v3713_v24 = vadd.f32 %v3586_v18, %v2261_v61 }
 0x36c   : > { %v5824_v52 = vpop.f32.mrf.mxu1 }
 0x36d   : > { %v3716_v15 = vadd.f32 %v5824_v52, %v2272_v34 }
 0x36e   : > { %v3589_v40 = vpop.f32.mrf.mxu1 }
 0x36f   : > { %v3714_v16 = vadd.f32 %v3589_v40, %v2264_v7 }
 0x370   : > { %v5827_v33 = vpop.f32.mrf.mxu1 }
 0x371   : > { %v3719_v1 = vadd.f32 %v5827_v33, %v2285_v14 }
 0x372   : > { %v3602_v8 = vpop.f32.mrf.mxu1 }
 0x373   : > { %v3717_v52 = vadd.f32 %v3602_v8, %v2277_v44 }
 0x374   : > { %v5828_v49 = vpop.f32.mrf.mxu1 }
 0x376   : > { %v3605_v61 = vpop.f32.mrf.mxu1 }
 0x377   : > { %v3718_v22 = vadd.f32 %v3605_v61, %v2280_v6 }
 0x37f   : > { %v5857_v27 = vpop.f32.mrf.mxu0 }
 0x380   : > { %v5073_v45 = vadd.f32 %v5857_v27, %v3715_v35  ;;  %v3720_v35 = vadd.f32 %v5828_v49, %v2288_v3 }
 0x381   : > { %v4944_v25 = vpop.f32.mrf.mxu0 }
 0x382   : > { %v8147_v48 = vadd.f32 %v8140_v39, %v5073_v45  ;;  %v5071_v29 = vadd.f32 %v4944_v25, %v3713_v24 }
 0x383   : > { %v5858_v10 = vpop.f32.mrf.mxu0 }
 0x384   : > { %v5598_v53 = vmul.f32 -1.442695, %v8147_v48  ;;  %v8151_v19 = vadd.f32 %v8140_v39, %v5071_v29  ;;  %v5074_v56 = vadd.f32 %v5858_v10, %v3716_v15 }
 0x385   : > { %v4947_v47 = vpop.f32.mrf.mxu0 }
 0x386   : > { %6047 = vpow2.f32 %v5598_v53  ;;  %v5596_v30 = vmul.f32 -1.442695, %v8151_v19  ;;  %v8157_v59 = vadd.f32 %v8140_v39, %v5074_v56  ;;  %v5072_v50 = vadd.f32 %v4947_v47, %v3714_v16  ;;  %v5831_v45 = vpop.f32.mrf.mxu1 }
 0x387   : > { %v3723_v49 = vadd.f32 %v5831_v45, %v8085_v37 }
 0x388   : > { %6049 = vpow2.f32 %v5596_v30  ;;  %v5599_v23 = vmul.f32 -1.442695, %v8157_v59  ;;  %v8163_v18 = vadd.f32 %v8140_v39, %v5072_v50  ;;  %v3618_v8 = vpop.f32.mrf.mxu1 }
 0x389   : > { %v3721_v3 = vadd.f32 %v3618_v8, %v8087_v2 }
 0x38a   : > { %6051 = vpow2.f32 %v5599_v23  ;;  %v5597_v40 = vmul.f32 -1.442695, %v8163_v18  ;;  %v5832_v30 = vpop.f32.mrf.mxu1 }
 0x38b   : > { %v3724_v61 = vadd.f32 %v5832_v30, %v8089_v63 }
 0x38c   : > { %v5861_v28 = vpop.f32.mrf.mxu0  ;;  %6053 = vpow2.f32 %v5597_v40  ;;  %v3621_v40 = vpop.f32.mrf.mxu1 }
 0x38d   : > { %v5077_v41 = vadd.f32 %v5861_v28, %v3719_v1 }
 0x38e   : > { %v4960_v62 = vpop.f32.mrf.mxu0 }
 0x38f   : > { %v8171_v33 = vadd.f32 %v8140_v39, %v5077_v41  ;;  %v5075_v27 = vadd.f32 %v4960_v62, %v3717_v52 }
 0x390   : > { %v5862_v34 = vpop.f32.mrf.mxu0 }
 0x391   : > { %v5602_v32 = vmul.f32 -1.442695, %v8171_v33  ;;  %v8175_v24 = vadd.f32 %v8140_v39, %v5075_v27  ;;  %v5078_v25 = vadd.f32 %v5862_v34, %v3720_v35  ;;  %v3722_v34 = vadd.f32 %v3621_v40, %v8091_v42 }
 0x392   : > { %v4963_v7 = vpop.f32.mrf.mxu0 }
 0x393   : > { %6055 = vpow2.f32 %v5602_v32  ;;  %v5600_v55 = vmul.f32 -1.442695, %v8175_v24  ;;  %v8179_v26 = vadd.f32 %v8140_v39, %v5078_v25  ;;  %v5076_v15 = vadd.f32 %v4963_v7, %v3718_v22  ;;  %v6048_v53 = vpop.eup %6047 }
 0x394   : > { %v5240_v16 = vadd.f32 1.0, %v6048_v53 }
 0x395   : > { %6057 = vpow2.f32 %v5600_v55  ;;  %v5603_v29 = vmul.f32 -1.442695, %v8179_v26  ;;  %v8183_v10 = vadd.f32 %v8140_v39, %v5076_v15  ;;  %v6050_v14 = vpop.eup %6049 }
 0x396   : > { %v5238_v47 = vadd.f32 1.0, %v6050_v14 }
 0x397   : > { %6059 = vpow2.f32 %v5603_v29  ;;  %v5601_v56 = vmul.f32 -1.442695, %v8183_v10  ;;  %v6052_v50 = vpop.eup %6051 }
 0x398   : > { %6061 = vrcp.f32 %v5240_v16  ;;  %v5241_v44 = vadd.f32 1.0, %v6052_v50 }
 0x399   : > { %6063 = vpow2.f32 %v5601_v56  ;;  %v6054_v23 = vpop.eup %6053 }
 0x39a   : > { %6065 = vrcp.f32 %v5238_v47  ;;  %v5239_v52 = vadd.f32 1.0, %v6054_v23  ;;  %v5835_v45 = vpop.f32.mrf.mxu1 }
 0x39b   : > { %6067 = vrcp.f32 %v5241_v44  ;;  %v3727_v23 = vadd.f32 %v5835_v45, %v8093_v9 }
 0x39c   : > { %6069 = vrcp.f32 %v5239_v52  ;;  %v3634_v56 = vpop.f32.mrf.mxu1 }
 0x39d   : > { %v3725_v40 = vadd.f32 %v3634_v56, %v8095_v4 }
 0x39f   : > { %v5865_v1 = vpop.f32.mrf.mxu0 }
 0x3a0   : > { %v5081_v28 = vadd.f32 %v5865_v1, %v3723_v49  ;;  %v6056_v35 = vpop.eup %6055 }
 0x3a1   : > { %v4976_v41 = vpop.f32.mrf.mxu0  ;;  %v5244_v22 = vadd.f32 1.0, %v6056_v35 }
 0x3a2   : > { %v8190_v6 = vadd.f32 %v8140_v39, %v5081_v28  ;;  %v5079_v62 = vadd.f32 %v4976_v41, %v3721_v3  ;;  %v6058_v63 = vpop.eup %6057  ;;  %v5836_v3 = vpop.f32.mrf.mxu1 }
 0x3a3   : > { %v5866_v37 = vpop.f32.mrf.mxu0  ;;  %v5242_v29 = vadd.f32 1.0, %v6058_v63  ;;  %v3728_v9 = vadd.f32 %v5836_v3, %v8097_v5 }
 0x3a4   : > { %v5606_v27 = vmul.f32 -1.442695, %v8190_v6  ;;  %v8195_v2 = vadd.f32 %v8140_v39, %v5079_v62  ;;  %v5082_v32 = vadd.f32 %v5866_v37, %v3724_v61  ;;  %v6060_v8 = vpop.eup %6059  ;;  %v3637_v35 = vpop.f32.mrf.mxu1 }
 0x3a5   : > { %v4979_v25 = vpop.f32.mrf.mxu0  ;;  %v5245_v16 = vadd.f32 1.0, %v6060_v8  ;;  %v6062_v14 = vpop.eup %6061  ;;  %v3726_v5 = vadd.f32 %v3637_v35, %v8099_v17 }
 0x3a6   : > { %6071 = vpow2.f32 %v5606_v27  ;;  %v5604_v7 = vmul.f32 -1.442695, %v8195_v2  ;;  %v8199_v55 = vadd.f32 %v8140_v39, %v5082_v32  ;;  %v5080_v15 = vadd.f32 %v4979_v25, %v3722_v34  ;;  %v6064_v30 = vpop.eup %6063 }
 0x3a7   : > { %6073 = vrcp.f32 %v5244_v22  ;;  %v5336_v50 = vmul.f32 %v6062_v14, %v8147_v48  ;;  %v6066_v49 = vpop.eup %6065  ;;  %v5243_v44 = vadd.f32 1.0, %v6064_v30 }
 0x3a8   : > { %6075 = vpow2.f32 %v5604_v7  ;;  %v5607_v42 = vmul.f32 -1.442695, %v8199_v55  ;;  %v8204_v53 = vadd.f32 %v8140_v39, %v5080_v15  ;;  %v5334_v1 = vmul.f32 %v6066_v49, %v8151_v19  ;;  %v6068_v28 = vpop.eup %6067 }
 0x3a9   : > { %6077 = vrcp.f32 %v5242_v29  ;;  %5369 = vst.msk [vmem:[%s8209_s16 + $0x10] sm:$0xff] %vm5366_vm6, %v5336_v50  ;;  %v5337_v48 = vmul.f32 %v6068_v28, %v8157_v59  ;;  %v6070_v61 = vpop.eup %6069  ;;  %v5839_v29 = vpop.f32.mrf.mxu1 }
 0x3aa   : > { %6079 = vpow2.f32 %v5607_v42  ;;  %v5605_v47 = vmul.f32 -1.442695, %v8204_v53  ;;  %5367 = vst.msk [vmem:[%s8209_s16] sm:$0xff] %vm5366_vm6, %v5334_v1  ;;  %v5335_v19 = vmul.f32 %v6070_v61, %v8163_v18  ;;  %v3731_v35 = vadd.f32 %v5839_v29, %v8101_v36 }
 0x3ab   : > { %6081 = vrcp.f32 %v5245_v16  ;;  %5370 = vst.msk [vmem:[%s8209_s16 + $0x18] sm:$0xff] %vm5366_vm6, %v5337_v48  ;;  %v3650_v1 = vpop.f32.mrf.mxu1 }
 0x3ac   : > { %6083 = vpow2.f32 %v5605_v47  ;;  %5368 = vst.msk [vmem:[%s8209_s16 + $0x8] sm:$0xff] %vm5366_vm6, %v5335_v19 }
 0x3ad   : > { %6085 = vrcp.f32 %v5243_v44 }
 0x3b2   : > { %v5869_v52 = vpop.f32.mrf.mxu0 }
 0x3b3   : > { %v5085_v41 = vadd.f32 %v5869_v52, %v3727_v23  ;;  %v6072_v32 = vpop.eup %6071  ;;  %v5840_v52 = vpop.f32.mrf.mxu1 }
 0x3b4   : > { %v4992_v62 = vpop.f32.mrf.mxu0  ;;  %v6074_v45 = vpop.eup %6073  ;;  %v5248_v18 = vadd.f32 1.0, %v6072_v32 }
 0x3b5   : > { %v8226_v37 = vadd.f32 %v8140_v39, %v5085_v41  ;;  %v5083_v27 = vadd.f32 %v4992_v62, %v3725_v40  ;;  %v6076_v63 = vpop.eup %6075  ;;  %v5340_v7 = vmul.f32 %v6074_v45, %v8171_v33  ;;  %v3653_v48 = vpop.f32.mrf.mxu1  ;;  %v3729_v45 = vadd.f32 %v3650_v1, %v8103_v20 }
 0x3b6   : > { %v5870_v34 = vpop.f32.mrf.mxu0  ;;  %v6078_v42 = vpop.eup %6077  ;;  %v5246_v16 = vadd.f32 1.0, %v6076_v63  ;;  %v3730_v29 = vadd.f32 %v3653_v48, %v8107_v21 }
 0x3b7   : > { %v5610_v4 = vmul.f32 -1.442695, %v8226_v37  ;;  %v8232_v59 = vadd.f32 %v8140_v39, %v5083_v27  ;;  %v5086_v22 = vadd.f32 %v5870_v34, %v3728_v9  ;;  %v6080_v14 = vpop.eup %6079  ;;  %5373 = vst.msk [vmem:[%s8209_s16 + $0x30] sm:$0xff] %vm5366_vm6, %v5340_v7  ;;  %v5338_v17 = vmul.f32 %v6078_v42, %v8175_v24 }
 0x3b8   : > { %v4995_v25 = vpop.f32.mrf.mxu0  ;;  %v6082_v47 = vpop.eup %6081  ;;  %v5249_v30 = vadd.f32 1.0, %v6080_v14 }
 0x3b9   : > { %6087 = vpow2.f32 %v5610_v4  ;;  %v5608_v15 = vmul.f32 -1.442695, %v8232_v59  ;;  %v8238_v8 = vadd.f32 %v8140_v39, %v5086_v22  ;;  %v5084_v56 = vadd.f32 %v4995_v25, %v3726_v5  ;;  %v6084_v49 = vpop.eup %6083  ;;  %5371 = vst.msk [vmem:[%s8209_s16 + $0x20] sm:$0xff] %vm5366_vm6, %v5338_v17 }
 0x3ba   : > { %6089 = vrcp.f32 %v5248_v18  ;;  %v5341_v44 = vmul.f32 %v6082_v47, %v8179_v26  ;;  %v5247_v24 = vadd.f32 1.0, %v6084_v49  ;;  %v6086_v3 = vpop.eup %6085  ;;  %v3732_v25 = vadd.f32 %v5840_v52, %v8105_v54 }
 0x3bb   : > { %6091 = vpow2.f32 %v5608_v15  ;;  %v5611_v33 = vmul.f32 -1.442695, %v8238_v8  ;;  %v8245_v50 = vadd.f32 %v8140_v39, %v5084_v56  ;;  %v5339_v28 = vmul.f32 %v6086_v3, %v8183_v10 }
 0x3bc   : > { %6093 = vrcp.f32 %v5246_v16  ;;  %5374 = vst.msk [vmem:[%s8209_s16 + $0x38] sm:$0xff] %vm5366_vm6, %v5341_v44 }
 0x3bd   : > { %6095 = vpow2.f32 %v5611_v33  ;;  %v5609_v23 = vmul.f32 -1.442695, %v8245_v50  ;;  %5372 = vst.msk [vmem:[%s8209_s16 + $0x28] sm:$0xff] %vm5366_vm6, %v5339_v28 }
 0x3be   : > { %6097 = vrcp.f32 %v5249_v30 }
 0x3bf   : > { %6099 = vrcp.f32 %v5247_v24 }
 0x3c0   : > { %6101 = vpow2.f32 %v5609_v23 }
 0x3c6   : > { %v6088_v40 = vpop.eup %6087  ;;  %v5843_v10 = vpop.f32.mrf.mxu1 }
 0x3c7   : > { %v6090_v26 = vpop.eup %6089  ;;  %v5252_v41 = vadd.f32 1.0, %v6088_v40  ;;  %v3735_v21 = vadd.f32 %v5843_v10, %v8109_v57 }
 0x3c8   : > { %v6092_v61 = vpop.eup %6091  ;;  %v5344_v62 = vmul.f32 %v6090_v26, %v8190_v6  ;;  %v3666_v7 = vpop.f32.mrf.mxu1 }
 0x3c9   : > { %v6094_v19 = vpop.eup %6093  ;;  %6103 = vrcp.f32 %v5252_v41  ;;  %v5250_v9 = vadd.f32 1.0, %v6092_v61  ;;  %v3733_v1 = vadd.f32 %v3666_v7, %v8111_v12 }
 0x3ca   : > { %v6096_v27 = vpop.eup %6095  ;;  %5377 = vst.msk [vmem:[%s8209_s16 + $0x50] sm:$0xff] %vm5366_vm6, %v5344_v62  ;;  %v5342_v34 = vmul.f32 %v6094_v19, %v8195_v2  ;;  %v5844_v47 = vpop.f32.mrf.mxu1 }
 0x3cb   : > { %v6098_v4 = vpop.eup %6097  ;;  %6105 = vrcp.f32 %v5250_v9  ;;  %v5253_v22 = vadd.f32 1.0, %v6096_v27  ;;  %v3736_v48 = vadd.f32 %v5844_v47, %v8113_v0 }
 0x3cc   : > { %5375 = vst.msk [vmem:[%s8209_s16 + $0x40] sm:$0xff] %vm5366_vm6, %v5342_v34  ;;  %v5345_v6 = vmul.f32 %v6098_v4, %v8199_v55  ;;  %v6100_v36 = vpop.eup %6099  ;;  %v3669_v3 = vpop.f32.mrf.mxu1 }
 0x3cd   : > { %6107 = vrcp.f32 %v5253_v22  ;;  %v6102_v15 = vpop.eup %6101  ;;  %v5343_v20 = vmul.f32 %v6100_v36, %v8204_v53  ;;  %v3734_v62 = vadd.f32 %v3669_v3, %v8115_v58 }
 0x3ce   : > { %5378 = vst.msk [vmem:[%s8209_s16 + $0x58] sm:$0xff] %vm5366_vm6, %v5345_v6  ;;  %v5251_v55 = vadd.f32 1.0, %v6102_v15 }
 0x3cf   : > { %5376 = vst.msk [vmem:[%s8209_s16 + $0x48] sm:$0xff] %vm5366_vm6, %v5343_v20 }
 0x3d0   : > { %6109 = vrcp.f32 %v5251_v55 }
 0x3d1   : > { %v5873_v32 = vpop.f32.mrf.mxu0 }
 0x3d2   : > { %v5089_v18 = vadd.f32 %v5873_v32, %v3731_v35 }
 0x3d3   : > { %v5008_v5 = vpop.f32.mrf.mxu0 }
 0x3d4   : > { %v8267_v2 = vadd.f32 %v8140_v39, %v5089_v18  ;;  %v5087_v63 = vadd.f32 %v5008_v5, %v3729_v45 }
 0x3d5   : > { %v5874_v42 = vpop.f32.mrf.mxu0 }
 0x3d6   : > { %v5614_v16 = vmul.f32 -1.442695, %v8267_v2  ;;  %v8275_v56 = vadd.f32 %v8140_v39, %v5087_v63  ;;  %v5090_v54 = vadd.f32 %v5874_v42, %v3732_v25  ;;  %v6104_v52 = vpop.eup %6103 }
 0x3d7   : > { %v5011_v14 = vpop.f32.mrf.mxu0  ;;  %v5348_v26 = vmul.f32 %v6104_v52, %v8226_v37 }
 0x3d8   : > { %v5612_v17 = vmul.f32 -1.442695, %v8275_v56  ;;  %v8281_v33 = vadd.f32 %v8140_v39, %v5090_v54  ;;  %v5088_v53 = vadd.f32 %v5011_v14, %v3730_v29  ;;  %6111 = vpow2.f32 %v5614_v16  ;;  %v6106_v12 = vpop.eup %6105 }
 0x3d9   : > { %5381 = vst.msk [vmem:[%s8209_s16 + $0x70] sm:$0xff] %vm5366_vm6, %v5348_v26  ;;  %v5346_v0 = vmul.f32 %v6106_v12, %v8232_v59  ;;  %v5847_v35 = vpop.f32.mrf.mxu1 }
 0x3da   : > { %6113 = vpow2.f32 %v5612_v17  ;;  %v5615_v30 = vmul.f32 -1.442695, %v8281_v33  ;;  %v8286_v49 = vadd.f32 %v8140_v39, %v5088_v53  ;;  %v6108_v37 = vpop.eup %6107  ;;  %v3739_v15 = vadd.f32 %v5847_v35, %v8117_v13 }
 0x3db   : > { %5379 = vst.msk [vmem:[%s8209_s16 + $0x60] sm:$0xff] %vm5366_vm6, %v5346_v0  ;;  %v5349_v58 = vmul.f32 %v6108_v37, %v8238_v8  ;;  %v3682_v22 = vpop.f32.mrf.mxu1 }
 0x3dc   : > { %6115 = vpow2.f32 %v5615_v30  ;;  %v5613_v23 = vmul.f32 -1.442695, %v8286_v49  ;;  %v3737_v55 = vadd.f32 %v3682_v22, %v8119_v43 }
 0x3dd   : > { %v5877_v44 = vpop.f32.mrf.mxu0  ;;  %5382 = vst.msk [vmem:[%s8209_s16 + $0x78] sm:$0xff] %vm5366_vm6, %v5349_v58  ;;  %v6110_v45 = vpop.eup %6109 }
 0x3de   : > { %v5093_v24 = vadd.f32 %v5877_v44, %v3735_v21  ;;  %6117 = vpow2.f32 %v5613_v23  ;;  %v5347_v5 = vmul.f32 %v6110_v45, %v8245_v50  ;;  %v5848_v63 = vpop.f32.mrf.mxu1 }
 0x3df   : > { %v5024_v28 = vpop.f32.mrf.mxu0  ;;  %v3740_v17 = vadd.f32 %v5848_v63, %v8121_v31 }
 0x3e0   : > { %v8292_v57 = vadd.f32 %v8140_v39, %v5093_v24  ;;  %v5091_v40 = vadd.f32 %v5024_v28, %v3733_v1  ;;  %5380 = vst.msk [vmem:[%s8209_s16 + $0x68] sm:$0xff] %vm5366_vm6, %v5347_v5  ;;  %v3685_v54 = vpop.f32.mrf.mxu1 }
 0x3e1   : > { %v5878_v41 = vpop.f32.mrf.mxu0  ;;  %v3738_v23 = vadd.f32 %v3685_v54, %v8123_v46 }
 0x3e2   : > { %v5618_v61 = vmul.f32 -1.442695, %v8292_v57  ;;  %v8298_v19 = vadd.f32 %v8140_v39, %v5091_v40  ;;  %v5094_v9 = vadd.f32 %v5878_v41, %v3736_v48 }
 0x3e3   : > { %v5027_v10 = vpop.f32.mrf.mxu0 }
 0x3e4   : > { %6119 = vpow2.f32 %v5618_v61  ;;  %v5616_v27 = vmul.f32 -1.442695, %v8298_v19  ;;  %v8305_v34 = vadd.f32 %v8140_v39, %v5094_v9  ;;  %v5092_v32 = vadd.f32 %v5027_v10, %v3734_v62 }
 0x3e5   : > { %v6112_v6 = vpop.eup %6111 }
 0x3e6   : > { %6121 = vpow2.f32 %v5616_v27  ;;  %v5619_v4 = vmul.f32 -1.442695, %v8305_v34  ;;  %v8312_v59 = vadd.f32 %v8140_v39, %v5092_v32  ;;  %v5256_v25 = vadd.f32 1.0, %v6112_v6 }
 0x3e7   : > { %v6114_v36 = vpop.eup %6113  ;;  %v5851_v3 = vpop.f32.mrf.mxu1 }
 0x3e8   : > { %6123 = vpow2.f32 %v5619_v4  ;;  %v5617_v18 = vmul.f32 -1.442695, %v8312_v59  ;;  %v5254_v8 = vadd.f32 1.0, %v6114_v36  ;;  %v3743_v32 = vadd.f32 %v5851_v3, %v8125_v60 }
 0x3e9   : > { %v6116_v7 = vpop.eup %6115  ;;  %v3698_v46 = vpop.f32.mrf.mxu1 }
 0x3ea   : > { %6125 = vpow2.f32 %v5617_v18  ;;  %v5257_v20 = vadd.f32 1.0, %v6116_v7  ;;  %v3741_v18 = vadd.f32 %v3698_v46, %v8127_v38 }
 0x3eb   : > { %6127 = vrcp.f32 %v5256_v25  ;;  %v6118_v42 = vpop.eup %6117  ;;  %v5852_v58 = vpop.f32.mrf.mxu1 }
 0x3ec   : > { %6129 = vrcp.f32 %v5254_v8  ;;  %v5255_v50 = vadd.f32 1.0, %v6118_v42 }
 0x3ed   : > { %6131 = vrcp.f32 %v5257_v20  ;;  %v3701_v25 = vpop.f32.mrf.mxu1 }
 0x3ee   : > { %6133 = vrcp.f32 %v5255_v50 }
 0x3f0   : > { %v5881_v29 = vpop.f32.mrf.mxu0 }
 0x3f1   : > { %v5097_v16 = vadd.f32 %v5881_v29, %v3739_v15  ;;  %v6120_v21 = vpop.eup %6119 }
 0x3f2   : > { %v5040_v14 = vpop.f32.mrf.mxu0  ;;  %v5260_v30 = vadd.f32 1.0, %v6120_v21 }
 0x3f3   : > { %v8324_v53 = vadd.f32 %v8140_v39, %v5097_v16  ;;  %v5095_v47 = vadd.f32 %v5040_v14, %v3737_v55  ;;  %v6122_v24 = vpop.eup %6121 }
 0x3f4   : > { %v5882_v13 = vpop.f32.mrf.mxu0  ;;  %6135 = vrcp.f32 %v5260_v30  ;;  %v5258_v31 = vadd.f32 1.0, %v6122_v24 }
 0x3f5   : > { %v5622_v44 = vmul.f32 -1.442695, %v8324_v53  ;;  %v8328_v1 = vadd.f32 %v8140_v39, %v5095_v47  ;;  %v5098_v43 = vadd.f32 %v5882_v13, %v3740_v17  ;;  %v6124_v40 = vpop.eup %6123 }
 0x3f6   : > { %v5043_v28 = vpop.f32.mrf.mxu0  ;;  %v5261_v41 = vadd.f32 1.0, %v6124_v40 }
 0x3f7   : > { %v5620_v52 = vmul.f32 -1.442695, %v8328_v1  ;;  %v8333_v48 = vadd.f32 %v8140_v39, %v5098_v43  ;;  %6137 = vpow2.f32 %v5622_v44  ;;  %v5096_v26 = vadd.f32 %v5043_v28, %v3738_v23  ;;  %v6126_v61 = vpop.eup %6125 }
 0x3f8   : > { %6139 = vrcp.f32 %v5258_v31  ;;  %v5259_v9 = vadd.f32 1.0, %v6126_v61  ;;  %v6128_v0 = vpop.eup %6127 }
 0x3f9   : > { %v5623_v12 = vmul.f32 -1.442695, %v8333_v48  ;;  %6141 = vpow2.f32 %v5620_v52  ;;  %v8337_v62 = vadd.f32 %v8140_v39, %v5096_v26  ;;  %v6130_v10 = vpop.eup %6129  ;;  %v5352_v37 = vmul.f32 %v6128_v0, %v8267_v2 }
 0x3fa   : > { %6143 = vrcp.f32 %v5261_v41  ;;  %v5350_v27 = vmul.f32 %v6130_v10, %v8275_v56  ;;  %v6132_v4 = vpop.eup %6131  ;;  %v3744_v56 = vadd.f32 %v5852_v58, %v8129_v11  ;;  %v3742_v11 = vadd.f32 %v3701_v25, %v8131_v51 }
 0x3fb   : > { %6145 = vpow2.f32 %v5623_v12  ;;  %v5621_v35 = vmul.f32 -1.442695, %v8337_v62  ;;  %5385 = vst.msk [vmem:[%s8209_s16 + $0x90] sm:$0xff] %vm5366_vm6, %v5352_v37  ;;  %v5353_v45 = vmul.f32 %v6132_v4, %v8281_v33  ;;  %v6134_v2 = vpop.eup %6133 }
 0x3fc   : > { %6147 = vrcp.f32 %v5259_v9  ;;  %5383 = vst.msk [vmem:[%s8209_s16 + $0x80] sm:$0xff] %vm5366_vm6, %v5350_v27  ;;  %v5351_v60 = vmul.f32 %v6134_v2, %v8286_v49 }
 0x3fd   : > { %6149 = vpow2.f32 %v5621_v35  ;;  %5386 = vst.msk [vmem:[%s8209_s16 + $0x98] sm:$0xff] %vm5366_vm6, %v5353_v45 }
 0x3fe   : > { %5384 = vst.msk [vmem:[%s8209_s16 + $0x88] sm:$0xff] %vm5366_vm6, %v5351_v60 }
 0x401   : > { %v6136_v7 = vpop.eup %6135 }
 0x402   : > { %v5885_v22 = vpop.f32.mrf.mxu0  ;;  %v5356_v49 = vmul.f32 %v6136_v7, %v8292_v57 }
 0x403   : > { %v5101_v6 = vadd.f32 %v5885_v22, %v3743_v32 }
 0x404   : > { %v5056_v5 = vpop.f32.mrf.mxu0  ;;  %v6138_v20 = vpop.eup %6137  ;;  %5389 = vst.msk [vmem:[%s8209_s16 + $0xb0] sm:$0xff] %vm5366_vm6, %v5356_v49 }
 0x405   : > { %v8354_v36 = vadd.f32 %v8140_v39, %v5101_v6  ;;  %v5099_v8 = vadd.f32 %v5056_v5, %v3741_v18  ;;  %v6140_v42 = vpop.eup %6139  ;;  %v5264_v55 = vadd.f32 1.0, %v6138_v20 }
 0x406   : > { %v5886_v63 = vpop.f32.mrf.mxu0  ;;  %v6142_v54 = vpop.eup %6141  ;;  %v5354_v14 = vmul.f32 %v6140_v42, %v8298_v19 }
 0x407   : > { %v5626_v38 = vmul.f32 -1.442695, %v8354_v36  ;;  %v8360_v33 = vadd.f32 %v8140_v39, %v5099_v8  ;;  %v5102_v15 = vadd.f32 %v5886_v63, %v3744_v56  ;;  %v6144_v47 = vpop.eup %6143  ;;  %v5262_v57 = vadd.f32 1.0, %v6142_v54 }
 0x408   : > { %v5059_v29 = vpop.f32.mrf.mxu0  ;;  %v6146_v21 = vpop.eup %6145  ;;  %5387 = vst.msk [vmem:[%s8209_s16 + $0xa0] sm:$0xff] %vm5366_vm6, %v5354_v14  ;;  %v5357_v13 = vmul.f32 %v6144_v47, %v8305_v34 }
 0x409   : > { %6151 = vpow2.f32 %v5626_v38  ;;  %v5624_v16 = vmul.f32 -1.442695, %v8360_v33  ;;  %v5141_v50 = vadd.f32 %v8140_v39, %v5102_v15  ;;  %v5100_v17 = vadd.f32 %v5059_v29, %v3742_v11  ;;  %v6148_v44 = vpop.eup %6147 }
 0x40a   : > { %6153 = vrcp.f32 %v5264_v55  ;;  %v5265_v43 = vadd.f32 1.0, %v6146_v21  ;;  %v6150_v24 = vpop.eup %6149  ;;  %5390 = vst.msk [vmem:[%s8209_s16 + $0xb8] sm:$0xff] %vm5366_vm6, %v5357_v13  ;;  %v5355_v19 = vmul.f32 %v6148_v44, %v8312_v59 }
 0x40b   : > { %v5627_v51 = vmul.f32 -1.442695, %v5141_v50  ;;  %6155 = vpow2.f32 %v5624_v16  ;;  %v5139_v30 = vadd.f32 %v8140_v39, %v5100_v17  ;;  %v5263_v3 = vadd.f32 1.0, %v6150_v24 }
 0x40c   : > { %6157 = vrcp.f32 %v5262_v57  ;;  %5388 = vst.msk [vmem:[%s8209_s16 + $0xa8] sm:$0xff] %vm5366_vm6, %v5355_v19 }
 0x40d   : > { %6159 = vpow2.f32 %v5627_v51  ;;  %v5625_v23 = vmul.f32 -1.442695, %v5139_v30 }
 0x40e   : > { %6161 = vrcp.f32 %v5265_v43 }
 0x40f   : > { %6163 = vpow2.f32 %v5625_v23 }
 0x410   : > { %6165 = vrcp.f32 %v5263_v3 }
 0x416   : > { %v6152_v34 = vpop.eup %6151 }
 0x417   : > { %v5268_v39 = vadd.f32 1.0, %v6152_v34  ;;  %v6154_v28 = vpop.eup %6153 }
 0x418   : > { %v6156_v31 = vpop.eup %6155  ;;  %v5360_v52 = vmul.f32 %v6154_v28, %v8324_v53 }
 0x419   : > { %6167 = vrcp.f32 %v5268_v39  ;;  %v6158_v40 = vpop.eup %6157  ;;  %v5266_v59 = vadd.f32 1.0, %v6156_v31 }
 0x41a   : > { %v6160_v26 = vpop.eup %6159  ;;  %5393 = vst.msk [vmem:[%s8209_s16 + $0xd0] sm:$0xff] %vm5366_vm6, %v5360_v52  ;;  %v5358_v41 = vmul.f32 %v6158_v40, %v8328_v1 }
 0x41b   : > { %v6162_v12 = vpop.eup %6161  ;;  %6169 = vrcp.f32 %v5266_v59  ;;  %v5269_v61 = vadd.f32 1.0, %v6160_v26 }
 0x41c   : > { %v6164_v46 = vpop.eup %6163  ;;  %5391 = vst.msk [vmem:[%s8209_s16 + $0xc0] sm:$0xff] %vm5366_vm6, %v5358_v41  ;;  %v5361_v53 = vmul.f32 %v6162_v12, %v8333_v48 }
 0x41d   : > { %v6166_v9 = vpop.eup %6165  ;;  %6171 = vrcp.f32 %v5269_v61  ;;  %v5267_v0 = vadd.f32 1.0, %v6164_v46 }
 0x41e   : > { %5394 = vst.msk [vmem:[%s8209_s16 + $0xd8] sm:$0xff] %vm5366_vm6, %v5361_v53  ;;  %v5359_v35 = vmul.f32 %v6166_v9, %v8337_v62 }
 0x41f   : > { %6173 = vrcp.f32 %v5267_v0 }
 0x420   : > { %5392 = vst.msk [vmem:[%s8209_s16 + $0xc8] sm:$0xff] %vm5366_vm6, %v5359_v35 }
 0x426   : > { %v6168_v1 = vpop.eup %6167 }
 0x427   : > { %v5364_v10 = vmul.f32 %v6168_v1, %v8354_v36 }
 0x428   : > { %v6170_v37 = vpop.eup %6169 }
 0x429   : > { %5397 = vst.msk [vmem:[%s8209_s16 + $0xf0] sm:$0xff] %vm5366_vm6, %v5364_v10  ;;  %v5362_v48 = vmul.f32 %v6170_v37, %v8360_v33 }
 0x42a   : > { %v6172_v27 = vpop.eup %6171 }
 0x42b   : > { %5395 = vst.msk [vmem:[%s8209_s16 + $0xe0] sm:$0xff] %vm5366_vm6, %v5362_v48  ;;  %v5365_v32 = vmul.f32 %v6172_v27, %v5141_v50 }
 0x42c   : > { %v6174_v58 = vpop.eup %6173 }
 0x42d   : > { %5398 = vst.msk [vmem:[%s8209_s16 + $0xf8] sm:$0xff] %vm5366_vm6, %v5365_v32  ;;  %v5363_v4 = vmul.f32 %v6174_v58, %v5139_v30 }
 0x42f   : > { %5396 = vst.msk [vmem:[%s8209_s16 + $0xe8] sm:$0xff] %vm5366_vm6, %v5363_v4 }
 0x430 PF: > { %s15_s18 = sadd.s32 1, %s6186_s18  }
 0x431   : > { %p12_p4 = scmp.ge.s32.totalorder %s15_s18, 4  }
 0x433   :  { %14 = sbr.rel (!%p12_p4) target bundleno = 1 (0x1), region = 85 }

</bundles_post_ra>
